<compile_context>
chip_gen: v7x
topology: tpu7x:2x2x1
jax: 0.10.0
libtpu: 0.0.40
codegen_flags: <defaults>
</compile_context>

<pallas_src>
import functools

import jax
import jax.numpy as jnp
import numpy as np
from jax.experimental import pallas as pl
from jax.experimental.pallas import tpu as pltpu


# ----------------------------------------------------------------------------
# Fused decoder kernel
# ----------------------------------------------------------------------------
def _decoder_kernel(x_ref, wsq_ref, bsq_ref, w0_ref, b0_ref, w1_ref, b1_ref,
                    w2_ref, b2_ref, o_ref, pad0_ref, pad1_ref,
                    *, nif, B, H, W):
    HW = H * W
    BHW = B * HW

    # ---- squeeze (1x1 conv) + ReLU for all input features in one matmul ----
    x = x_ref[...].astype(jnp.bfloat16)                       # (nif*BHW, Cenc)
    y = jnp.dot(x, wsq_ref[...], preferred_element_type=jnp.float32)
    y = jnp.maximum(y + bsq_ref[...], 0.0)                    # (nif*BHW, 256)

    # channel concat of the per-feature squeeze outputs -> (BHW, nif*256)
    cat = jnp.concatenate(
        [y[f * BHW:(f + 1) * BHW] for f in range(nif)], axis=-1
    ).astype(jnp.bfloat16)

    def conv3x3_relu(act_rows, pad_ref, w_ref, b_ref):
        """3x3 conv (pad=1, stride=1) + ReLU on (BHW, Cin) rows via im2col."""
        cin = act_rows.shape[-1]
        # in-kernel zero padding: zero the scratch, copy rows into the interior
        pad_ref[...] = jnp.zeros(pad_ref.shape, pad_ref.dtype)
        for b in range(B):
            for h in range(H):
                r = b * HW + h * W
                pad_ref[b, h + 1, pl.ds(1, W), :] = act_rows[r:r + W, :]
        # im2col: 9 shifted taps concatenated along channels -> one matmul
        taps = []
        for dy in range(3):
            for dx in range(3):
                taps.append(
                    pad_ref[:, dy:dy + H, dx:dx + W, :].reshape(BHW, cin))
        col = jnp.concatenate(taps, axis=-1)                  # (BHW, 9*cin)
        out = jnp.dot(col, w_ref[...], preferred_element_type=jnp.float32)
        return jnp.maximum(out + b_ref[...], 0.0)             # (BHW, Cout) f32

    h0 = conv3x3_relu(cat, pad0_ref, w0_ref, b0_ref).astype(jnp.bfloat16)
    h1 = conv3x3_relu(h0, pad1_ref, w1_ref, b1_ref)           # (BHW, 256) f32

    # spatial mean BEFORE the final 1x1 conv (linear ops commute with the mean)
    pooled = jnp.mean(h1.reshape(B, HW, h1.shape[-1]), axis=1)      # (B, 256)
    out = jnp.dot(pooled.astype(jnp.bfloat16), w2_ref[...],
                  preferred_element_type=jnp.float32) + b2_ref[...]  # (B, 6F)
    o_ref[...] = (0.01 * out).astype(o_ref.dtype)


def _full_spec(a):
    n = a.ndim
    return pl.BlockSpec(a.shape, lambda i, n=n: (0,) * n)


def fused_decoder_call(x_rows, weights, *, nif, B, H, W, cout):
    c_enc = x_rows.shape[-1]
    c1 = nif * 256
    kernel = functools.partial(_decoder_kernel, nif=nif, B=B, H=H, W=W)

    flops = 2 * (nif * B * H * W * c_enc * 256
                 + B * H * W * 9 * c1 * 256
                 + B * H * W * 9 * 256 * 256
                 + B * 256 * cout)
    bytes_accessed = int(
        sum(int(np.prod(weights[k].shape)) * weights[k].dtype.itemsize
            for k in ("squeeze_w", "pose0_w", "pose1_w", "pose2_w"))
        + x_rows.size * x_rows.dtype.itemsize + B * cout * 4)

    args = (x_rows,
            weights["squeeze_w"], weights["squeeze_b"],
            weights["pose0_w"], weights["pose0_b"],
            weights["pose1_w"], weights["pose1_b"],
            weights["pose2_w"], weights["pose2_b"])

    # TODO(synk): optional v7x 2-TensorCore split of the pose0/pose1 Cout dim;
    # at this toy size the single launch is launch/DMA-bound, so not done here.
    return pl.pallas_call(
        kernel,
        out_shape=jax.ShapeDtypeStruct((B, cout), jnp.float32),
        grid=(1,),
        in_specs=[_full_spec(a) for a in args],
        out_specs=pl.BlockSpec((B, cout), lambda i: (0, 0)),
        scratch_shapes=[
            pltpu.VMEM((B, H + 2, W + 2, c1), jnp.bfloat16),   # pad buf conv0
            pltpu.VMEM((B, H + 2, W + 2, 256), jnp.bfloat16),  # pad buf conv1
        ],
        compiler_params=pltpu.CompilerParams(
            dimension_semantics=("arbitrary",),
            vmem_limit_bytes=32 * 1024 * 1024),
        cost_estimate=pl.CostEstimate(
            flops=flops, transcendentals=0, bytes_accessed=bytes_accessed),
    )(*args)


# ----------------------------------------------------------------------------
# Decoder forward (single fused Pallas kernel + trivial JAX glue)
# ----------------------------------------------------------------------------
def decoder_forward(weights, input_features, num_frames_to_predict_for):
    last_features = [f[-1] for f in input_features]           # NCHW
    nif = len(last_features)
    B, c_enc, H, W = last_features[0].shape

    # NCHW -> (B*H*W, C) rows, stacked along rows for all input features.
    # (tiny ~8 KB layout op kept outside the kernel; all compute is fused)
    x_rows = jnp.concatenate(
        [jnp.transpose(f, (0, 2, 3, 1)).reshape(B * H * W, c_enc)
         for f in last_features], axis=0)

    cout = 6 * num_frames_to_predict_for
    out = fused_decoder_call(x_rows, weights, nif=nif, B=B, H=H, W=W,
                             cout=cout)                        # (B, 6F), x0.01
    out = out.reshape(-1, num_frames_to_predict_for, 1, 6)
    axisangle = out[..., :3]
    translation = out[..., 3:]
    return axisangle, translation


# ----------------------------------------------------------------------------
# Pure-JAX reference (mirrors PyTorch NCHW semantics) for sanity checking
# ----------------------------------------------------------------------------
def decoder_reference(weights, input_features, num_frames_to_predict_for):
    def conv(x, w_oihw, b, pad):
        y = jax.lax.conv_general_dilated(
            x, w_oihw, (1, 1), [(pad, pad), (pad, pad)],
            dimension_numbers=("NCHW", "OIHW", "NCHW"))
        return y + b[None, :, None, None]

    last = [f[-1] for f in input_features]
    cat = jnp.concatenate(
        [jax.nn.relu(conv(f, weights["squeeze_w_oihw"],
                          weights["squeeze_b"][0], 0)) for f in last], axis=1)
    out = jax.nn.relu(conv(cat, weights["pose0_w_oihw"],
                           weights["pose0_b"][0], 1))
    out = jax.nn.relu(conv(out, weights["pose1_w_oihw"],
                           weights["pose1_b"][0], 1))
    out = conv(out, weights["pose2_w_oihw"], weights["pose2_b"][0], 0)
    out = out.mean(3).mean(2)
    out = 0.01 * out.reshape(-1, num_frames_to_predict_for, 1, 6)
    return out[..., :3], out[..., 3:]


# ----------------------------------------------------------------------------
# Deterministic parameter init + driver
# ----------------------------------------------------------------------------
def make_weights(c_enc, num_input_features, num_frames):
    k = jax.random.split(jax.random.PRNGKey(42), 8)
    c_pose_in = num_input_features * 256
    c_out = 6 * num_frames

    # Weights stored in bf16 for the MXU; reference uses the SAME bf16 values
    # upcast to f32, so the check isolates activation-precision differences.
    sq_w = (0.05 * jax.random.normal(k[0], (256, c_enc, 1, 1))).astype(jnp.bfloat16)
    sq_b = 0.05 * jax.random.normal(k[1], (256,), jnp.float32)
    p0_w = (0.03 * jax.random.normal(k[2], (256, c_pose_in, 3, 3))).astype(jnp.bfloat16)
    p0_b = 0.05 * jax.random.normal(k[3], (256,), jnp.float32)
    p1_w = (0.03 * jax.random.normal(k[4], (256, 256, 3, 3))).astype(jnp.bfloat16)
    p1_b = 0.05 * jax.random.normal(k[5], (256,), jnp.float32)
    p2_w = (0.05 * jax.random.normal(k[6], (c_out, 256, 1, 1))).astype(jnp.bfloat16)
    p2_b = 0.05 * jax.random.normal(k[7], (c_out,), jnp.float32)

    def im2col_weight(w_oihw):   # (O, I, 3, 3) -> (9*I, O), tap-major rows
        o = w_oihw.shape[0]
        return jnp.transpose(w_oihw, (2, 3, 1, 0)).reshape(-1, o)

    return {
        # kernel-layout weights (bf16), biases in f32
        "squeeze_w": sq_w[:, :, 0, 0].T,                    # (Cenc, 256)
        "squeeze_b": sq_b.reshape(1, -1),
        "pose0_w": im2col_weight(p0_w),                     # (9*Cin, 256)
        "pose0_b": p0_b.reshape(1, -1),
        "pose1_w": im2col_weight(p1_w),                     # (9*256, 256)
        "pose1_b": p1_b.reshape(1, -1),
        "pose2_w": p2_w[:, :, 0, 0].T,                      # (256, 6F)
        "pose2_b": p2_b.reshape(1, -1),
        # reference-layout (PyTorch OIHW) f32 copies of the same bf16 values
        "squeeze_w_oihw": sq_w.astype(jnp.float32),
        "pose0_w_oihw": p0_w.astype(jnp.float32),
        "pose1_w_oihw": p1_w.astype(jnp.float32),
        "pose2_w_oihw": p2_w.astype(jnp.float32),
    }


if __name__ == "__main__":
    # Module hyperparameters (small, consistent with the PyTorch forward)
    num_ch_enc = [16, 32]               # num_ch_enc[-1] = 32
    num_input_features = 2
    num_frames_to_predict_for = 2
    B, H, W = 2, 4, 4

    weights = make_weights(num_ch_enc[-1], num_input_features,
                           num_frames_to_predict_for)

    # input_features: list of feature pyramids; only the last level is used.
    keys = jax.random.split(jax.random.PRNGKey(0), num_input_features)
    input_features = []
    for i in range(num_input_features):
        dummy_lvl = jnp.zeros((B, num_ch_enc[0], H * 2, W * 2), jnp.float32)
        last_lvl = jax.random.normal(keys[i], (B, num_ch_enc[-1], H, W),
                                     jnp.float32)
        input_features.append([dummy_lvl, last_lvl])

    axisangle, translation = decoder_forward(weights, input_features,
                                             num_frames_to_predict_for)
    jax.block_until_ready((axisangle, translation))

    # sanity check against a plain-JAX NCHW reference (same bf16 weights)
    aa_ref, tr_ref = decoder_reference(weights, input_features,
                                       num_frames_to_predict_for)
    aa_ref, tr_ref = np.asarray(aa_ref), np.asarray(tr_ref)
    aa, tr = np.asarray(axisangle), np.asarray(translation)

    assert aa.shape == (B, num_frames_to_predict_for, 1, 3)
    assert tr.shape == (B, num_frames_to_predict_for, 1, 3)
    # tolerance covers bf16 activation rounding (weights are bit-identical)
    tol = 1e-2 * max(np.abs(aa_ref).max(), np.abs(tr_ref).max()) + 1e-5
    assert np.abs(aa - aa_ref).max() <= tol, np.abs(aa - aa_ref).max()
    assert np.abs(tr - tr_ref).max() <= tol, np.abs(tr - tr_ref).max()

    print("KERNEL_OK")
</pallas_src>

<mosaic_0001>
module attributes {stable_mosaic.version = 11 : i64} {
  func.func @_decoder_kernel(%arg0: i32, %arg1: memref<64x32xf32, #tpu.memory_space<vmem>>, %arg2: memref<32x256xbf16, #tpu.memory_space<vmem>>, %arg3: memref<1x256xf32, #tpu.memory_space<vmem>>, %arg4: memref<4608x256xbf16, #tpu.memory_space<vmem>>, %arg5: memref<1x256xf32, #tpu.memory_space<vmem>>, %arg6: memref<2304x256xbf16, #tpu.memory_space<vmem>>, %arg7: memref<1x256xf32, #tpu.memory_space<vmem>>, %arg8: memref<256x12xbf16, #tpu.memory_space<vmem>>, %arg9: memref<1x12xf32, #tpu.memory_space<vmem>>, %arg10: memref<2x12xf32, #tpu.memory_space<vmem>>, %arg11: memref<2x6x6x512xbf16, #tpu.memory_space<vmem>>, %arg12: memref<2x6x6x256xbf16, #tpu.memory_space<vmem>>) attributes {dimension_semantics = [#tpu.dimension_semantics<arbitrary>], iteration_bounds = array<i64: 1>, scalar_prefetch = 0 : i64, scratch_operands = 2 : i64, tpu.core_type = #tpu.core_type<tc>, window_params = [{pipeline_mode = #tpu.pipeline_mode<synchronous>, transform_indices = @transform_0, window_bounds = array<i64: 64, 32>}, {pipeline_mode = #tpu.pipeline_mode<synchronous>, transform_indices = @transform_1, window_bounds = array<i64: 32, 256>}, {pipeline_mode = #tpu.pipeline_mode<synchronous>, transform_indices = @transform_2, window_bounds = array<i64: 1, 256>}, {pipeline_mode = #tpu.pipeline_mode<synchronous>, transform_indices = @transform_3, window_bounds = array<i64: 4608, 256>}, {pipeline_mode = #tpu.pipeline_mode<synchronous>, transform_indices = @transform_4, window_bounds = array<i64: 1, 256>}, {pipeline_mode = #tpu.pipeline_mode<synchronous>, transform_indices = @transform_5, window_bounds = array<i64: 2304, 256>}, {pipeline_mode = #tpu.pipeline_mode<synchronous>, transform_indices = @transform_6, window_bounds = array<i64: 1, 256>}, {pipeline_mode = #tpu.pipeline_mode<synchronous>, transform_indices = @transform_7, window_bounds = array<i64: 256, 12>}, {pipeline_mode = #tpu.pipeline_mode<synchronous>, transform_indices = @transform_8, window_bounds = array<i64: 1, 12>}, {pipeline_mode = #tpu.pipeline_mode<synchronous>, transform_indices = @transform_9, window_bounds = array<i64: 2, 12>}]} {
    %c0 = arith.constant 0 : index
    %c0_0 = arith.constant 0 : index
    %0 = vector.load %arg1[%c0, %c0_0] : memref<64x32xf32, #tpu.memory_space<vmem>>, vector<64x32xf32>
    %1 = arith.truncf %0 : vector<64x32xf32> to vector<64x32xbf16>
    %c0_1 = arith.constant 0 : index
    %c0_2 = arith.constant 0 : index
    %2 = vector.load %arg2[%c0_1, %c0_2] : memref<32x256xbf16, #tpu.memory_space<vmem>>, vector<32x256xbf16>
    %cst = arith.constant dense<0.000000e+00> : vector<64x256xf32>
    %3 = tpu.matmul %1, %2, %cst {dimension_numbers = #tpu.dot_dimension_numbers<[1], [0], [0], [1], [0, 0, 1, 1], [], []>} : vector<64x32xbf16>, vector<32x256xbf16>, vector<64x256xf32> -> vector<64x256xf32>
    %c0_3 = arith.constant 0 : index
    %c0_4 = arith.constant 0 : index
    %4 = vector.load %arg3[%c0_3, %c0_4] : memref<1x256xf32, #tpu.memory_space<vmem>>, vector<1x256xf32>
    %5 = vector.broadcast %4 : vector<1x256xf32> to vector<64x256xf32>
    %6 = arith.addf %3, %5 : vector<64x256xf32>
    %cst_5 = arith.constant 0.000000e+00 : f32
    %7 = vector.broadcast %cst_5 : f32 to vector<64x256xf32>
    %8 = arith.maximumf %6, %7 : vector<64x256xf32>
    %9 = vector.extract_strided_slice %8 {offsets = [0, 0], sizes = [32, 256], strides = [1, 1]} : vector<64x256xf32> to vector<32x256xf32>
    %10 = vector.extract_strided_slice %8 {offsets = [32, 0], sizes = [32, 256], strides = [1, 1]} : vector<64x256xf32> to vector<32x256xf32>
    %11 = tpu.concatenate %9, %10 in 1 : vector<32x256xf32>, vector<32x256xf32> -> vector<32x512xf32>
    %12 = arith.truncf %11 : vector<32x512xf32> to vector<32x512xbf16>
    %cst_6 = arith.constant 0.000000e+00 : bf16
    %13 = vector.broadcast %cst_6 : bf16 to vector<2x6x6x512xbf16>
    %c0_7 = arith.constant 0 : index
    %c0_8 = arith.constant 0 : index
    %c0_9 = arith.constant 0 : index
    %c0_10 = arith.constant 0 : index
    %14 = vector.load %arg11[%c0_7, %c0_8, %c0_9, %c0_10] : memref<2x6x6x512xbf16, #tpu.memory_space<vmem>>, vector<2x6x6x512xbf16>
    tpu.vector_store %arg11[%c0_7, %c0_8, %c0_9, %c0_10], %13 {strides = array<i32>} : memref<2x6x6x512xbf16, #tpu.memory_space<vmem>>, vector<2x6x6x512xbf16>,
    %15 = vector.extract_strided_slice %12 {offsets = [0, 0], sizes = [4, 512], strides = [1, 1]} : vector<32x512xbf16> to vector<4x512xbf16>
    %c0_11 = arith.constant 0 : index
    %c1 = arith.constant 1 : index
    %c1_12 = arith.constant 1 : index
    %c0_13 = arith.constant 0 : index
    %16 = vector.load %arg11[%c0_11, %c1, %c1_12, %c0_13] : memref<2x6x6x512xbf16, #tpu.memory_space<vmem>>, vector<1x1x4x512xbf16>
    %17 = vector.shape_cast %16 : vector<1x1x4x512xbf16> to vector<4x512xbf16>
    %18 = vector.shape_cast %15 : vector<4x512xbf16> to vector<1x1x4x512xbf16>
    tpu.vector_store %arg11[%c0_11, %c1, %c1_12, %c0_13], %18 {strides = array<i32>} : memref<2x6x6x512xbf16, #tpu.memory_space<vmem>>, vector<1x1x4x512xbf16>,
    %19 = vector.extract_strided_slice %12 {offsets = [4, 0], sizes = [4, 512], strides = [1, 1]} : vector<32x512xbf16> to vector<4x512xbf16>
    %c0_14 = arith.constant 0 : index
    %c2 = arith.constant 2 : index
    %c1_15 = arith.constant 1 : index
    %c0_16 = arith.constant 0 : index
    %20 = vector.load %arg11[%c0_14, %c2, %c1_15, %c0_16] : memref<2x6x6x512xbf16, #tpu.memory_space<vmem>>, vector<1x1x4x512xbf16>
    %21 = vector.shape_cast %20 : vector<1x1x4x512xbf16> to vector<4x512xbf16>
    %22 = vector.shape_cast %19 : vector<4x512xbf16> to vector<1x1x4x512xbf16>
    tpu.vector_store %arg11[%c0_14, %c2, %c1_15, %c0_16], %22 {strides = array<i32>} : memref<2x6x6x512xbf16, #tpu.memory_space<vmem>>, vector<1x1x4x512xbf16>,
    %23 = vector.extract_strided_slice %12 {offsets = [8, 0], sizes = [4, 512], strides = [1, 1]} : vector<32x512xbf16> to vector<4x512xbf16>
    %c0_17 = arith.constant 0 : index
    %c3 = arith.constant 3 : index
    %c1_18 = arith.constant 1 : index
    %c0_19 = arith.constant 0 : index
    %24 = vector.load %arg11[%c0_17, %c3, %c1_18, %c0_19] : memref<2x6x6x512xbf16, #tpu.memory_space<vmem>>, vector<1x1x4x512xbf16>
    %25 = vector.shape_cast %24 : vector<1x1x4x512xbf16> to vector<4x512xbf16>
    %26 = vector.shape_cast %23 : vector<4x512xbf16> to vector<1x1x4x512xbf16>
    tpu.vector_store %arg11[%c0_17, %c3, %c1_18, %c0_19], %26 {strides = array<i32>} : memref<2x6x6x512xbf16, #tpu.memory_space<vmem>>, vector<1x1x4x512xbf16>,
    %27 = vector.extract_strided_slice %12 {offsets = [12, 0], sizes = [4, 512], strides = [1, 1]} : vector<32x512xbf16> to vector<4x512xbf16>
    %c0_20 = arith.constant 0 : index
    %c4 = arith.constant 4 : index
    %c1_21 = arith.constant 1 : index
    %c0_22 = arith.constant 0 : index
    %28 = vector.load %arg11[%c0_20, %c4, %c1_21, %c0_22] : memref<2x6x6x512xbf16, #tpu.memory_space<vmem>>, vector<1x1x4x512xbf16>
    %29 = vector.shape_cast %28 : vector<1x1x4x512xbf16> to vector<4x512xbf16>
    %30 = vector.shape_cast %27 : vector<4x512xbf16> to vector<1x1x4x512xbf16>
    tpu.vector_store %arg11[%c0_20, %c4, %c1_21, %c0_22], %30 {strides = array<i32>} : memref<2x6x6x512xbf16, #tpu.memory_space<vmem>>, vector<1x1x4x512xbf16>,
    %31 = vector.extract_strided_slice %12 {offsets = [16, 0], sizes = [4, 512], strides = [1, 1]} : vector<32x512xbf16> to vector<4x512xbf16>
    %c1_23 = arith.constant 1 : index
    %c1_24 = arith.constant 1 : index
    %c1_25 = arith.constant 1 : index
    %c0_26 = arith.constant 0 : index
    %32 = vector.load %arg11[%c1_23, %c1_24, %c1_25, %c0_26] : memref<2x6x6x512xbf16, #tpu.memory_space<vmem>>, vector<1x1x4x512xbf16>
    %33 = vector.shape_cast %32 : vector<1x1x4x512xbf16> to vector<4x512xbf16>
    %34 = vector.shape_cast %31 : vector<4x512xbf16> to vector<1x1x4x512xbf16>
    tpu.vector_store %arg11[%c1_23, %c1_24, %c1_25, %c0_26], %34 {strides = array<i32>} : memref<2x6x6x512xbf16, #tpu.memory_space<vmem>>, vector<1x1x4x512xbf16>,
    %35 = vector.extract_strided_slice %12 {offsets = [20, 0], sizes = [4, 512], strides = [1, 1]} : vector<32x512xbf16> to vector<4x512xbf16>
    %c1_27 = arith.constant 1 : index
    %c2_28 = arith.constant 2 : index
    %c1_29 = arith.constant 1 : index
    %c0_30 = arith.constant 0 : index
    %36 = vector.load %arg11[%c1_27, %c2_28, %c1_29, %c0_30] : memref<2x6x6x512xbf16, #tpu.memory_space<vmem>>, vector<1x1x4x512xbf16>
    %37 = vector.shape_cast %36 : vector<1x1x4x512xbf16> to vector<4x512xbf16>
    %38 = vector.shape_cast %35 : vector<4x512xbf16> to vector<1x1x4x512xbf16>
    tpu.vector_store %arg11[%c1_27, %c2_28, %c1_29, %c0_30], %38 {strides = array<i32>} : memref<2x6x6x512xbf16, #tpu.memory_space<vmem>>, vector<1x1x4x512xbf16>,
    %39 = vector.extract_strided_slice %12 {offsets = [24, 0], sizes = [4, 512], strides = [1, 1]} : vector<32x512xbf16> to vector<4x512xbf16>
    %c1_31 = arith.constant 1 : index
    %c3_32 = arith.constant 3 : index
    %c1_33 = arith.constant 1 : index
    %c0_34 = arith.constant 0 : index
    %40 = vector.load %arg11[%c1_31, %c3_32, %c1_33, %c0_34] : memref<2x6x6x512xbf16, #tpu.memory_space<vmem>>, vector<1x1x4x512xbf16>
    %41 = vector.shape_cast %40 : vector<1x1x4x512xbf16> to vector<4x512xbf16>
    %42 = vector.shape_cast %39 : vector<4x512xbf16> to vector<1x1x4x512xbf16>
    tpu.vector_store %arg11[%c1_31, %c3_32, %c1_33, %c0_34], %42 {strides = array<i32>} : memref<2x6x6x512xbf16, #tpu.memory_space<vmem>>, vector<1x1x4x512xbf16>,
    %43 = vector.extract_strided_slice %12 {offsets = [28, 0], sizes = [4, 512], strides = [1, 1]} : vector<32x512xbf16> to vector<4x512xbf16>
    %c1_35 = arith.constant 1 : index
    %c4_36 = arith.constant 4 : index
    %c1_37 = arith.constant 1 : index
    %c0_38 = arith.constant 0 : index
    %44 = vector.load %arg11[%c1_35, %c4_36, %c1_37, %c0_38] : memref<2x6x6x512xbf16, #tpu.memory_space<vmem>>, vector<1x1x4x512xbf16>
    %45 = vector.shape_cast %44 : vector<1x1x4x512xbf16> to vector<4x512xbf16>
    %46 = vector.shape_cast %43 : vector<4x512xbf16> to vector<1x1x4x512xbf16>
    tpu.vector_store %arg11[%c1_35, %c4_36, %c1_37, %c0_38], %46 {strides = array<i32>} : memref<2x6x6x512xbf16, #tpu.memory_space<vmem>>, vector<1x1x4x512xbf16>,
    %c0_39 = arith.constant 0 : index
    %c0_40 = arith.constant 0 : index
    %c0_41 = arith.constant 0 : index
    %c0_42 = arith.constant 0 : index
    %47 = vector.load %arg11[%c0_39, %c0_40, %c0_41, %c0_42] : memref<2x6x6x512xbf16, #tpu.memory_space<vmem>>, vector<2x4x4x512xbf16>
    %48 = vector.shape_cast %47 : vector<2x4x4x512xbf16> to vector<32x512xbf16>
    %c0_43 = arith.constant 0 : index
    %c0_44 = arith.constant 0 : index
    %c1_45 = arith.constant 1 : index
    %c0_46 = arith.constant 0 : index
    %49 = vector.load %arg11[%c0_43, %c0_44, %c1_45, %c0_46] : memref<2x6x6x512xbf16, #tpu.memory_space<vmem>>, vector<2x4x4x512xbf16>
    %50 = vector.shape_cast %49 : vector<2x4x4x512xbf16> to vector<32x512xbf16>
    %c0_47 = arith.constant 0 : index
    %c0_48 = arith.constant 0 : index
    %c2_49 = arith.constant 2 : index
    %c0_50 = arith.constant 0 : index
    %51 = vector.load %arg11[%c0_47, %c0_48, %c2_49, %c0_50] : memref<2x6x6x512xbf16, #tpu.memory_space<vmem>>, vector<2x4x4x512xbf16>
    %52 = vector.shape_cast %51 : vector<2x4x4x512xbf16> to vector<32x512xbf16>
    %c0_51 = arith.constant 0 : index
    %c1_52 = arith.constant 1 : index
    %c0_53 = arith.constant 0 : index
    %c0_54 = arith.constant 0 : index
    %53 = vector.load %arg11[%c0_51, %c1_52, %c0_53, %c0_54] : memref<2x6x6x512xbf16, #tpu.memory_space<vmem>>, vector<2x4x4x512xbf16>
    %54 = vector.shape_cast %53 : vector<2x4x4x512xbf16> to vector<32x512xbf16>
    %c0_55 = arith.constant 0 : index
    %c1_56 = arith.constant 1 : index
    %c1_57 = arith.constant 1 : index
    %c0_58 = arith.constant 0 : index
    %55 = vector.load %arg11[%c0_55, %c1_56, %c1_57, %c0_58] : memref<2x6x6x512xbf16, #tpu.memory_space<vmem>>, vector<2x4x4x512xbf16>
    %56 = vector.shape_cast %55 : vector<2x4x4x512xbf16> to vector<32x512xbf16>
    %c0_59 = arith.constant 0 : index
    %c1_60 = arith.constant 1 : index
    %c2_61 = arith.constant 2 : index
    %c0_62 = arith.constant 0 : index
    %57 = vector.load %arg11[%c0_59, %c1_60, %c2_61, %c0_62] : memref<2x6x6x512xbf16, #tpu.memory_space<vmem>>, vector<2x4x4x512xbf16>
    %58 = vector.shape_cast %57 : vector<2x4x4x512xbf16> to vector<32x512xbf16>
    %c0_63 = arith.constant 0 : index
    %c2_64 = arith.constant 2 : index
    %c0_65 = arith.constant 0 : index
    %c0_66 = arith.constant 0 : index
    %59 = vector.load %arg11[%c0_63, %c2_64, %c0_65, %c0_66] : memref<2x6x6x512xbf16, #tpu.memory_space<vmem>>, vector<2x4x4x512xbf16>
    %60 = vector.shape_cast %59 : vector<2x4x4x512xbf16> to vector<32x512xbf16>
    %c0_67 = arith.constant 0 : index
    %c2_68 = arith.constant 2 : index
    %c1_69 = arith.constant 1 : index
    %c0_70 = arith.constant 0 : index
    %61 = vector.load %arg11[%c0_67, %c2_68, %c1_69, %c0_70] : memref<2x6x6x512xbf16, #tpu.memory_space<vmem>>, vector<2x4x4x512xbf16>
    %62 = vector.shape_cast %61 : vector<2x4x4x512xbf16> to vector<32x512xbf16>
    %c0_71 = arith.constant 0 : index
    %c2_72 = arith.constant 2 : index
    %c2_73 = arith.constant 2 : index
    %c0_74 = arith.constant 0 : index
    %63 = vector.load %arg11[%c0_71, %c2_72, %c2_73, %c0_74] : memref<2x6x6x512xbf16, #tpu.memory_space<vmem>>, vector<2x4x4x512xbf16>
    %64 = vector.shape_cast %63 : vector<2x4x4x512xbf16> to vector<32x512xbf16>
    %65 = tpu.concatenate %48, %50, %52, %54, %56, %58, %60, %62, %64 in 1 : vector<32x512xbf16>, vector<32x512xbf16>, vector<32x512xbf16>, vector<32x512xbf16>, vector<32x512xbf16>, vector<32x512xbf16>, vector<32x512xbf16>, vector<32x512xbf16>, vector<32x512xbf16> -> vector<32x4608xbf16>
    %c0_75 = arith.constant 0 : index
    %c0_76 = arith.constant 0 : index
    %66 = vector.load %arg4[%c0_75, %c0_76] : memref<4608x256xbf16, #tpu.memory_space<vmem>>, vector<4608x256xbf16>
    %cst_77 = arith.constant dense<0.000000e+00> : vector<32x256xf32>
    %67 = tpu.matmul %65, %66, %cst_77 {dimension_numbers = #tpu.dot_dimension_numbers<[1], [0], [0], [1], [0, 0, 1, 1], [], []>} : vector<32x4608xbf16>, vector<4608x256xbf16>, vector<32x256xf32> -> vector<32x256xf32>
    %c0_78 = arith.constant 0 : index
    %c0_79 = arith.constant 0 : index
    %68 = vector.load %arg5[%c0_78, %c0_79] : memref<1x256xf32, #tpu.memory_space<vmem>>, vector<1x256xf32>
    %69 = vector.broadcast %68 : vector<1x256xf32> to vector<32x256xf32>
    %70 = arith.addf %67, %69 : vector<32x256xf32>
    %cst_80 = arith.constant 0.000000e+00 : f32
    %71 = vector.broadcast %cst_80 : f32 to vector<32x256xf32>
    %72 = arith.maximumf %70, %71 : vector<32x256xf32>
    %73 = arith.truncf %72 : vector<32x256xf32> to vector<32x256xbf16>
    %cst_81 = arith.constant 0.000000e+00 : bf16
    %74 = vector.broadcast %cst_81 : bf16 to vector<2x6x6x256xbf16>
    %c0_82 = arith.constant 0 : index
    %c0_83 = arith.constant 0 : index
    %c0_84 = arith.constant 0 : index
    %c0_85 = arith.constant 0 : index
    %75 = vector.load %arg12[%c0_82, %c0_83, %c0_84, %c0_85] : memref<2x6x6x256xbf16, #tpu.memory_space<vmem>>, vector<2x6x6x256xbf16>
    tpu.vector_store %arg12[%c0_82, %c0_83, %c0_84, %c0_85], %74 {strides = array<i32>} : memref<2x6x6x256xbf16, #tpu.memory_space<vmem>>, vector<2x6x6x256xbf16>,
    %76 = vector.extract_strided_slice %73 {offsets = [0, 0], sizes = [4, 256], strides = [1, 1]} : vector<32x256xbf16> to vector<4x256xbf16>
    %c0_86 = arith.constant 0 : index
    %c1_87 = arith.constant 1 : index
    %c1_88 = arith.constant 1 : index
    %c0_89 = arith.constant 0 : index
    %77 = vector.load %arg12[%c0_86, %c1_87, %c1_88, %c0_89] : memref<2x6x6x256xbf16, #tpu.memory_space<vmem>>, vector<1x1x4x256xbf16>
    %78 = vector.shape_cast %77 : vector<1x1x4x256xbf16> to vector<4x256xbf16>
    %79 = vector.shape_cast %76 : vector<4x256xbf16> to vector<1x1x4x256xbf16>
    tpu.vector_store %arg12[%c0_86, %c1_87, %c1_88, %c0_89], %79 {strides = array<i32>} : memref<2x6x6x256xbf16, #tpu.memory_space<vmem>>, vector<1x1x4x256xbf16>,
    %80 = vector.extract_strided_slice %73 {offsets = [4, 0], sizes = [4, 256], strides = [1, 1]} : vector<32x256xbf16> to vector<4x256xbf16>
    %c0_90 = arith.constant 0 : index
    %c2_91 = arith.constant 2 : index
    %c1_92 = arith.constant 1 : index
    %c0_93 = arith.constant 0 : index
    %81 = vector.load %arg12[%c0_90, %c2_91, %c1_92, %c0_93] : memref<2x6x6x256xbf16, #tpu.memory_space<vmem>>, vector<1x1x4x256xbf16>
    %82 = vector.shape_cast %81 : vector<1x1x4x256xbf16> to vector<4x256xbf16>
    %83 = vector.shape_cast %80 : vector<4x256xbf16> to vector<1x1x4x256xbf16>
    tpu.vector_store %arg12[%c0_90, %c2_91, %c1_92, %c0_93], %83 {strides = array<i32>} : memref<2x6x6x256xbf16, #tpu.memory_space<vmem>>, vector<1x1x4x256xbf16>,
    %84 = vector.extract_strided_slice %73 {offsets = [8, 0], sizes = [4, 256], strides = [1, 1]} : vector<32x256xbf16> to vector<4x256xbf16>
    %c0_94 = arith.constant 0 : index
    %c3_95 = arith.constant 3 : index
    %c1_96 = arith.constant 1 : index
    %c0_97 = arith.constant 0 : index
    %85 = vector.load %arg12[%c0_94, %c3_95, %c1_96, %c0_97] : memref<2x6x6x256xbf16, #tpu.memory_space<vmem>>, vector<1x1x4x256xbf16>
    %86 = vector.shape_cast %85 : vector<1x1x4x256xbf16> to vector<4x256xbf16>
    %87 = vector.shape_cast %84 : vector<4x256xbf16> to vector<1x1x4x256xbf16>
    tpu.vector_store %arg12[%c0_94, %c3_95, %c1_96, %c0_97], %87 {strides = array<i32>} : memref<2x6x6x256xbf16, #tpu.memory_space<vmem>>, vector<1x1x4x256xbf16>,
    %88 = vector.extract_strided_slice %73 {offsets = [12, 0], sizes = [4, 256], strides = [1, 1]} : vector<32x256xbf16> to vector<4x256xbf16>
    %c0_98 = arith.constant 0 : index
    %c4_99 = arith.constant 4 : index
    %c1_100 = arith.constant 1 : index
    %c0_101 = arith.constant 0 : index
    %89 = vector.load %arg12[%c0_98, %c4_99, %c1_100, %c0_101] : memref<2x6x6x256xbf16, #tpu.memory_space<vmem>>, vector<1x1x4x256xbf16>
    %90 = vector.shape_cast %89 : vector<1x1x4x256xbf16> to vector<4x256xbf16>
    %91 = vector.shape_cast %88 : vector<4x256xbf16> to vector<1x1x4x256xbf16>
    tpu.vector_store %arg12[%c0_98, %c4_99, %c1_100, %c0_101], %91 {strides = array<i32>} : memref<2x6x6x256xbf16, #tpu.memory_space<vmem>>, vector<1x1x4x256xbf16>,
    %92 = vector.extract_strided_slice %73 {offsets = [16, 0], sizes = [4, 256], strides = [1, 1]} : vector<32x256xbf16> to vector<4x256xbf16>
    %c1_102 = arith.constant 1 : index
    %c1_103 = arith.constant 1 : index
    %c1_104 = arith.constant 1 : index
    %c0_105 = arith.constant 0 : index
    %93 = vector.load %arg12[%c1_102, %c1_103, %c1_104, %c0_105] : memref<2x6x6x256xbf16, #tpu.memory_space<vmem>>, vector<1x1x4x256xbf16>
    %94 = vector.shape_cast %93 : vector<1x1x4x256xbf16> to vector<4x256xbf16>
    %95 = vector.shape_cast %92 : vector<4x256xbf16> to vector<1x1x4x256xbf16>
    tpu.vector_store %arg12[%c1_102, %c1_103, %c1_104, %c0_105], %95 {strides = array<i32>} : memref<2x6x6x256xbf16, #tpu.memory_space<vmem>>, vector<1x1x4x256xbf16>,
    %96 = vector.extract_strided_slice %73 {offsets = [20, 0], sizes = [4, 256], strides = [1, 1]} : vector<32x256xbf16> to vector<4x256xbf16>
    %c1_106 = arith.constant 1 : index
    %c2_107 = arith.constant 2 : index
    %c1_108 = arith.constant 1 : index
    %c0_109 = arith.constant 0 : index
    %97 = vector.load %arg12[%c1_106, %c2_107, %c1_108, %c0_109] : memref<2x6x6x256xbf16, #tpu.memory_space<vmem>>, vector<1x1x4x256xbf16>
    %98 = vector.shape_cast %97 : vector<1x1x4x256xbf16> to vector<4x256xbf16>
    %99 = vector.shape_cast %96 : vector<4x256xbf16> to vector<1x1x4x256xbf16>
    tpu.vector_store %arg12[%c1_106, %c2_107, %c1_108, %c0_109], %99 {strides = array<i32>} : memref<2x6x6x256xbf16, #tpu.memory_space<vmem>>, vector<1x1x4x256xbf16>,
    %100 = vector.extract_strided_slice %73 {offsets = [24, 0], sizes = [4, 256], strides = [1, 1]} : vector<32x256xbf16> to vector<4x256xbf16>
    %c1_110 = arith.constant 1 : index
    %c3_111 = arith.constant 3 : index
    %c1_112 = arith.constant 1 : index
    %c0_113 = arith.constant 0 : index
    %101 = vector.load %arg12[%c1_110, %c3_111, %c1_112, %c0_113] : memref<2x6x6x256xbf16, #tpu.memory_space<vmem>>, vector<1x1x4x256xbf16>
    %102 = vector.shape_cast %101 : vector<1x1x4x256xbf16> to vector<4x256xbf16>
    %103 = vector.shape_cast %100 : vector<4x256xbf16> to vector<1x1x4x256xbf16>
    tpu.vector_store %arg12[%c1_110, %c3_111, %c1_112, %c0_113], %103 {strides = array<i32>} : memref<2x6x6x256xbf16, #tpu.memory_space<vmem>>, vector<1x1x4x256xbf16>,
    %104 = vector.extract_strided_slice %73 {offsets = [28, 0], sizes = [4, 256], strides = [1, 1]} : vector<32x256xbf16> to vector<4x256xbf16>
    %c1_114 = arith.constant 1 : index
    %c4_115 = arith.constant 4 : index
    %c1_116 = arith.constant 1 : index
    %c0_117 = arith.constant 0 : index
    %105 = vector.load %arg12[%c1_114, %c4_115, %c1_116, %c0_117] : memref<2x6x6x256xbf16, #tpu.memory_space<vmem>>, vector<1x1x4x256xbf16>
    %106 = vector.shape_cast %105 : vector<1x1x4x256xbf16> to vector<4x256xbf16>
    %107 = vector.shape_cast %104 : vector<4x256xbf16> to vector<1x1x4x256xbf16>
    tpu.vector_store %arg12[%c1_114, %c4_115, %c1_116, %c0_117], %107 {strides = array<i32>} : memref<2x6x6x256xbf16, #tpu.memory_space<vmem>>, vector<1x1x4x256xbf16>,
    %c0_118 = arith.constant 0 : index
    %c0_119 = arith.constant 0 : index
    %c0_120 = arith.constant 0 : index
    %c0_121 = arith.constant 0 : index
    %108 = vector.load %arg12[%c0_118, %c0_119, %c0_120, %c0_121] : memref<2x6x6x256xbf16, #tpu.memory_space<vmem>>, vector<2x4x4x256xbf16>
    %109 = vector.shape_cast %108 : vector<2x4x4x256xbf16> to vector<32x256xbf16>
    %c0_122 = arith.constant 0 : index
    %c0_123 = arith.constant 0 : index
    %c1_124 = arith.constant 1 : index
    %c0_125 = arith.constant 0 : index
    %110 = vector.load %arg12[%c0_122, %c0_123, %c1_124, %c0_125] : memref<2x6x6x256xbf16, #tpu.memory_space<vmem>>, vector<2x4x4x256xbf16>
    %111 = vector.shape_cast %110 : vector<2x4x4x256xbf16> to vector<32x256xbf16>
    %c0_126 = arith.constant 0 : index
    %c0_127 = arith.constant 0 : index
    %c2_128 = arith.constant 2 : index
    %c0_129 = arith.constant 0 : index
    %112 = vector.load %arg12[%c0_126, %c0_127, %c2_128, %c0_129] : memref<2x6x6x256xbf16, #tpu.memory_space<vmem>>, vector<2x4x4x256xbf16>
    %113 = vector.shape_cast %112 : vector<2x4x4x256xbf16> to vector<32x256xbf16>
    %c0_130 = arith.constant 0 : index
    %c1_131 = arith.constant 1 : index
    %c0_132 = arith.constant 0 : index
    %c0_133 = arith.constant 0 : index
    %114 = vector.load %arg12[%c0_130, %c1_131, %c0_132, %c0_133] : memref<2x6x6x256xbf16, #tpu.memory_space<vmem>>, vector<2x4x4x256xbf16>
    %115 = vector.shape_cast %114 : vector<2x4x4x256xbf16> to vector<32x256xbf16>
    %c0_134 = arith.constant 0 : index
    %c1_135 = arith.constant 1 : index
    %c1_136 = arith.constant 1 : index
    %c0_137 = arith.constant 0 : index
    %116 = vector.load %arg12[%c0_134, %c1_135, %c1_136, %c0_137] : memref<2x6x6x256xbf16, #tpu.memory_space<vmem>>, vector<2x4x4x256xbf16>
    %117 = vector.shape_cast %116 : vector<2x4x4x256xbf16> to vector<32x256xbf16>
    %c0_138 = arith.constant 0 : index
    %c1_139 = arith.constant 1 : index
    %c2_140 = arith.constant 2 : index
    %c0_141 = arith.constant 0 : index
    %118 = vector.load %arg12[%c0_138, %c1_139, %c2_140, %c0_141] : memref<2x6x6x256xbf16, #tpu.memory_space<vmem>>, vector<2x4x4x256xbf16>
    %119 = vector.shape_cast %118 : vector<2x4x4x256xbf16> to vector<32x256xbf16>
    %c0_142 = arith.constant 0 : index
    %c2_143 = arith.constant 2 : index
    %c0_144 = arith.constant 0 : index
    %c0_145 = arith.constant 0 : index
    %120 = vector.load %arg12[%c0_142, %c2_143, %c0_144, %c0_145] : memref<2x6x6x256xbf16, #tpu.memory_space<vmem>>, vector<2x4x4x256xbf16>
    %121 = vector.shape_cast %120 : vector<2x4x4x256xbf16> to vector<32x256xbf16>
    %c0_146 = arith.constant 0 : index
    %c2_147 = arith.constant 2 : index
    %c1_148 = arith.constant 1 : index
    %c0_149 = arith.constant 0 : index
    %122 = vector.load %arg12[%c0_146, %c2_147, %c1_148, %c0_149] : memref<2x6x6x256xbf16, #tpu.memory_space<vmem>>, vector<2x4x4x256xbf16>
    %123 = vector.shape_cast %122 : vector<2x4x4x256xbf16> to vector<32x256xbf16>
    %c0_150 = arith.constant 0 : index
    %c2_151 = arith.constant 2 : index
    %c2_152 = arith.constant 2 : index
    %c0_153 = arith.constant 0 : index
    %124 = vector.load %arg12[%c0_150, %c2_151, %c2_152, %c0_153] : memref<2x6x6x256xbf16, #tpu.memory_space<vmem>>, vector<2x4x4x256xbf16>
    %125 = vector.shape_cast %124 : vector<2x4x4x256xbf16> to vector<32x256xbf16>
    %126 = tpu.concatenate %109, %111, %113, %115, %117, %119, %121, %123, %125 in 1 : vector<32x256xbf16>, vector<32x256xbf16>, vector<32x256xbf16>, vector<32x256xbf16>, vector<32x256xbf16>, vector<32x256xbf16>, vector<32x256xbf16>, vector<32x256xbf16>, vector<32x256xbf16> -> vector<32x2304xbf16>
    %c0_154 = arith.constant 0 : index
    %c0_155 = arith.constant 0 : index
    %127 = vector.load %arg6[%c0_154, %c0_155] : memref<2304x256xbf16, #tpu.memory_space<vmem>>, vector<2304x256xbf16>
    %cst_156 = arith.constant dense<0.000000e+00> : vector<32x256xf32>
    %128 = tpu.matmul %126, %127, %cst_156 {dimension_numbers = #tpu.dot_dimension_numbers<[1], [0], [0], [1], [0, 0, 1, 1], [], []>} : vector<32x2304xbf16>, vector<2304x256xbf16>, vector<32x256xf32> -> vector<32x256xf32>
    %c0_157 = arith.constant 0 : index
    %c0_158 = arith.constant 0 : index
    %129 = vector.load %arg7[%c0_157, %c0_158] : memref<1x256xf32, #tpu.memory_space<vmem>>, vector<1x256xf32>
    %130 = vector.broadcast %129 : vector<1x256xf32> to vector<32x256xf32>
    %131 = arith.addf %128, %130 : vector<32x256xf32>
    %cst_159 = arith.constant 0.000000e+00 : f32
    %132 = vector.broadcast %cst_159 : f32 to vector<32x256xf32>
    %133 = arith.maximumf %131, %132 : vector<32x256xf32>
    %134 = vector.shape_cast %133 : vector<32x256xf32> to vector<2x16x256xf32>
    %cst_160 = arith.constant dense<0.000000e+00> : vector<2x256xf32>
    %135 = vector.multi_reduction <add>, %134, %cst_160 [1] : vector<2x16x256xf32> to vector<2x256xf32>
    %cst_161 = arith.constant 1.600000e+01 : f32
    %136 = vector.broadcast %cst_161 : f32 to vector<2x256xf32>
    %137 = arith.divf %135, %136 : vector<2x256xf32>
    %138 = arith.truncf %137 : vector<2x256xf32> to vector<2x256xbf16>
    %c0_162 = arith.constant 0 : index
    %c0_163 = arith.constant 0 : index
    %139 = vector.load %arg8[%c0_162, %c0_163] : memref<256x12xbf16, #tpu.memory_space<vmem>>, vector<256x12xbf16>
    %cst_164 = arith.constant dense<0.000000e+00> : vector<2x12xf32>
    %140 = tpu.matmul %138, %139, %cst_164 {dimension_numbers = #tpu.dot_dimension_numbers<[1], [0], [0], [1], [0, 0, 1, 1], [], []>} : vector<2x256xbf16>, vector<256x12xbf16>, vector<2x12xf32> -> vector<2x12xf32>
    %c0_165 = arith.constant 0 : index
    %c0_166 = arith.constant 0 : index
    %141 = vector.load %arg9[%c0_165, %c0_166] : memref<1x12xf32, #tpu.memory_space<vmem>>, vector<1x12xf32>
    %142 = vector.broadcast %141 : vector<1x12xf32> to vector<2x12xf32>
    %143 = arith.addf %140, %142 : vector<2x12xf32>
    %cst_167 = arith.constant 0.00999999977 : f32
    %144 = vector.broadcast %cst_167 : f32 to vector<2x12xf32>
    %145 = arith.mulf %144, %143 : vector<2x12xf32>
    %c0_168 = arith.constant 0 : index
    %c0_169 = arith.constant 0 : index
    %146 = vector.load %arg10[%c0_168, %c0_169] : memref<2x12xf32, #tpu.memory_space<vmem>>, vector<2x12xf32>
    tpu.vector_store %arg10[%c0_168, %c0_169], %145 {strides = array<i32>} : memref<2x12xf32, #tpu.memory_space<vmem>>, vector<2x12xf32>,
    return
  }
  func.func @transform_0(%arg0: i32) -> (i32, i32) {
    %c0_i32 = arith.constant 0 : i32
    %c0_i32_0 = arith.constant 0 : i32
    %c0_i32_1 = arith.constant 0 : i32
    return %c0_i32, %c0_i32_0 : i32, i32
  }
  func.func @transform_1(%arg0: i32) -> (i32, i32) {
    %c0_i32 = arith.constant 0 : i32
    %c0_i32_0 = arith.constant 0 : i32
    %c0_i32_1 = arith.constant 0 : i32
    return %c0_i32, %c0_i32_0 : i32, i32
  }
  func.func @transform_2(%arg0: i32) -> (i32, i32) {
    %c0_i32 = arith.constant 0 : i32
    %c0_i32_0 = arith.constant 0 : i32
    %c0_i32_1 = arith.constant 0 : i32
    return %c0_i32, %c0_i32_0 : i32, i32
  }
  func.func @transform_3(%arg0: i32) -> (i32, i32) {
    %c0_i32 = arith.constant 0 : i32
    %c0_i32_0 = arith.constant 0 : i32
    %c0_i32_1 = arith.constant 0 : i32
    return %c0_i32, %c0_i32_0 : i32, i32
  }
  func.func @transform_4(%arg0: i32) -> (i32, i32) {
    %c0_i32 = arith.constant 0 : i32
    %c0_i32_0 = arith.constant 0 : i32
    %c0_i32_1 = arith.constant 0 : i32
    return %c0_i32, %c0_i32_0 : i32, i32
  }
  func.func @transform_5(%arg0: i32) -> (i32, i32) {
    %c0_i32 = arith.constant 0 : i32
    %c0_i32_0 = arith.constant 0 : i32
    %c0_i32_1 = arith.constant 0 : i32
    return %c0_i32, %c0_i32_0 : i32, i32
  }
  func.func @transform_6(%arg0: i32) -> (i32, i32) {
    %c0_i32 = arith.constant 0 : i32
    %c0_i32_0 = arith.constant 0 : i32
    %c0_i32_1 = arith.constant 0 : i32
    return %c0_i32, %c0_i32_0 : i32, i32
  }
  func.func @transform_7(%arg0: i32) -> (i32, i32) {
    %c0_i32 = arith.constant 0 : i32
    %c0_i32_0 = arith.constant 0 : i32
    %c0_i32_1 = arith.constant 0 : i32
    return %c0_i32, %c0_i32_0 : i32, i32
  }
  func.func @transform_8(%arg0: i32) -> (i32, i32) {
    %c0_i32 = arith.constant 0 : i32
    %c0_i32_0 = arith.constant 0 : i32
    %c0_i32_1 = arith.constant 0 : i32
    return %c0_i32, %c0_i32_0 : i32, i32
  }
  func.func @transform_9(%arg0: i32) -> (i32, i32) {
    %c0_i32 = arith.constant 0 : i32
    %c0_i32_0 = arith.constant 0 : i32
    %c0_i32_1 = arith.constant 0 : i32
    return %c0_i32, %c0_i32_0 : i32, i32
  }
}

</mosaic_0001>

<bundles_post_ra>
// kernel: tpu_custom_call.1
= control target key start
LH: loop header
LB: loop body
LE: loop exit
PB: predicated region body
PF: predicated region fallthrough
CT: control target
= control target key end

     0   :  { %14 = vsyncpa [#allocation5], 0  ;;  %s16085_s0 = inlined_call_operand.vmem [shape: f32[64,32], index: 0, kind: input, shape index: {}]   ;;  %s16086_s1 = inlined_call_operand.hbm [shape: bf16[32,256], index: 1, kind: input, shape index: {}]   ;;  %s16087_s2 = inlined_call_operand.hbm [shape: f32[1,256], index: 2, kind: input, shape index: {}]   ;;  %s16088_s3 = inlined_call_operand.hbm [shape: bf16[4608,256], index: 3, kind: input, shape index: {}]   ;;  %s16089_s4 = inlined_call_operand.hbm [shape: f32[1,256], index: 4, kind: input, shape index: {}]   ;;  %s16090_s5 = inlined_call_operand.hbm [shape: bf16[2304,256], index: 5, kind: input, shape index: {}]   ;;  %s16091_s6 = inlined_call_operand.hbm [shape: f32[1,256], index: 6, kind: input, shape index: {}]   ;;  %s16092_s7 = inlined_call_operand.vmem [shape: bf16[256,12], index: 7, kind: input, shape index: {}]   ;;  %s16093_s8 = inlined_call_operand.hbm [shape: f32[1,12], index: 8, kind: input, shape index: {}]   ;;  %s16094_s9 = inlined_call_operand.hbm [shape: f32[2,12], index: 9, kind: output, shape index: {}]  }
   0x1   :  { %15 = vsyncpa [#allocation8], 0 }
   0x2   :  { %16 = vsyncpa [#allocation11], 0 }
   0x3   :  { %17 = vsyncpa [#allocation14], 0 }
   0x4   :  { %18 = vsyncpa [#allocation6], 0  ;;  %s14546_s30 = smov [#allocation7]   ;;  %s14547_s11 = smov [#allocation10]  }
   0x5   :  { %s39_s10 = sshll.u32 %s14546_s30, 4  ;;  %s61_s12 = sshll.u32 %s14547_s11, 4  ;;  %s40_s10 = int_to_ptr.vmem [resolvable:$true] %s39_s10  ;;  %s62_s12 = int_to_ptr.vmem [resolvable:$true] %s61_s12 }
   0x6   :  { %s14360_s15 = scalar_lea.hbm %s16087_s2, 32 }
   0x7   :  { %p14361_p0 = scmp.ne.s32.totalorder %s16087_s2, %s14360_s15  ;;  %p14364_p1 = scmp.lt.u32.totalorder %s14360_s15, %s16087_s2 }
   0x9   :  { %p14366_p2 = pnand %p14364_p1, %p14361_p0 }
   0xb   :  { %14369 = shalt.err (!%p14366_p2)
}
   0xc   :  { %s14370_s20 = scalar_lea.vmem %s40_s10, 32  ;;  %p14375_p4 = scmp.lt.s32.totalorder %s40_s10, %s40_s10 }
   0xd   :  { %p14371_p3 = scmp.ne.s32.totalorder %s40_s10, %s14370_s20  ;;  %p14376_p5 = scmp.lt.s32.totalorder %s14370_s20, %s14370_s20 }
   0xf   :  { %p14377_p6 = por %p14376_p5, %p14375_p4 }
  0x11   :  { %p14378_p7 = pnand %p14377_p6, %p14371_p3 }
  0x13   :  { %14381 = shalt.err (!%p14378_p7)
}
  0x14   :  { %42 = dma.hbm_to_vmem [thread:$0]  %s16087_s2, 32, %s40_s10, [#allocation8]  }
  0x15   :  { %s14382_s25 = scalar_lea.hbm %s16089_s4, 32 }
  0x16   :  { %p14383_p8 = scmp.ne.s32.totalorder %s16089_s4, %s14382_s25  ;;  %p14386_p9 = scmp.lt.u32.totalorder %s14382_s25, %s16089_s4 }
  0x18   :  { %p14388_p10 = pnand %p14386_p9, %p14383_p8 }
  0x1a   :  { %14391 = shalt.err (!%p14388_p10)
}
  0x1b   :  { %s14392_s30 = scalar_lea.vmem %s62_s12, 32  ;;  %p14397_p12 = scmp.lt.s32.totalorder %s62_s12, %s62_s12 }
  0x1c   :  { %p14393_p11 = scmp.ne.s32.totalorder %s62_s12, %s14392_s30  ;;  %p14398_p13 = scmp.lt.s32.totalorder %s14392_s30, %s14392_s30 }
  0x1e   :  { %p14399_p0 = por %p14398_p13, %p14397_p12 }
  0x20   :  { %p14400_p1 = pnand %p14399_p0, %p14393_p11 }
  0x22   :  { %14403 = shalt.err (!%p14400_p1)
}
  0x23   :  { %64 = dma.hbm_to_vmem [thread:$0]  %s16089_s4, 32, %s62_s12, [#allocation11]  }
  0x24   :  { %s14548_s11 = smov [#allocation13]   ;;  %s14549_s14 = smov [#allocation4]  }
  0x25   :  { %s83_s13 = sshll.u32 %s14548_s11, 4  ;;  %s26_s15 = sshll.u32 %s14549_s14, 4  ;;  %s84_s13 = int_to_ptr.vmem [resolvable:$true] %s83_s13  ;;  %s14632_s15 = int_to_ptr.vmem [resolvable:$true] %s26_s15 }
  0x26   :  { %s14404_s18 = scalar_lea.hbm %s16091_s6, 32 }
  0x27   :  { %p14405_p2 = scmp.ne.s32.totalorder %s16091_s6, %s14404_s18  ;;  %p14408_p3 = scmp.lt.u32.totalorder %s14404_s18, %s16091_s6 }
  0x29   :  { %p14410_p4 = pnand %p14408_p3, %p14405_p2 }
  0x2b   :  { %14413 = shalt.err (!%p14410_p4)
}
  0x2c   :  { %s14414_s4 = scalar_lea.vmem %s84_s13, 32  ;;  %p14419_p6 = scmp.lt.s32.totalorder %s84_s13, %s84_s13 }
  0x2d   :  { %p14415_p5 = scmp.ne.s32.totalorder %s84_s13, %s14414_s4  ;;  %p14420_p7 = scmp.lt.s32.totalorder %s14414_s4, %s14414_s4 }
  0x2f   :  { %p14421_p8 = por %p14420_p7, %p14419_p6 }
  0x31   :  { %p14422_p9 = pnand %p14421_p8, %p14415_p5 }
  0x33   :  { %14425 = shalt.err (!%p14422_p9)
}
  0x34   :  { %86 = dma.hbm_to_vmem [thread:$0]  %s16091_s6, 32, %s84_s13, [#allocation14]  }
  0x35   :  { %s14426_s26 = scalar_lea.hbm %s16086_s1, 512 }
  0x36   :  { %p14427_p10 = scmp.ne.s32.totalorder %s16086_s1, %s14426_s26  ;;  %p14430_p11 = scmp.lt.u32.totalorder %s14426_s26, %s16086_s1 }
  0x38   :  { %p14432_p12 = pnand %p14430_p11, %p14427_p10 }
  0x3a   :  { %14435 = shalt.err (!%p14432_p12)
}
  0x3b   :  { %s14436_s2 = scalar_lea.vmem %s14632_s15, 512  ;;  %p14441_p0 = scmp.lt.s32.totalorder %s14632_s15, %s14632_s15 }
  0x3c   :  { %p14437_p13 = scmp.ne.s32.totalorder %s14632_s15, %s14436_s2  ;;  %p14442_p1 = scmp.lt.s32.totalorder %s14436_s2, %s14436_s2 }
  0x3e   :  { %p14443_p2 = por %p14442_p1, %p14441_p0 }
  0x40   :  { %p14444_p3 = pnand %p14443_p2, %p14437_p13 }
  0x42   :  { %14447 = shalt.err (!%p14444_p3)
}
  0x43   :  { %s14550_s6 = smov 128   ;;  %s14551_s10 = smov 8  }
  0x44   :  { %32 = dma.hbm_to_vmem [thread:$0]  %s16086_s1, 512, %s14632_s15, [#allocation5], %s14550_s6, %s14550_s6, %s14551_s10  }
  0x45   :  { %s14552_s14 = smov [#allocation9]   ;;  %s14553_s17 = smov [#allocation12]  }
  0x46   :  { %s48_s16 = sshll.u32 %s14552_s14, 4  ;;  %s70_s18 = sshll.u32 %s14553_s17, 4  ;;  %s49_s16 = int_to_ptr.vmem [resolvable:$true] %s48_s16  ;;  %s14666_s18 = int_to_ptr.vmem [resolvable:$true] %s70_s18 }
  0x47   :  { %s14448_s21 = scalar_lea.hbm %s16088_s3, 73728 }
  0x48   :  { %p14449_p4 = scmp.ne.s32.totalorder %s16088_s3, %s14448_s21  ;;  %p14452_p5 = scmp.lt.u32.totalorder %s14448_s21, %s16088_s3 }
  0x4a   :  { %p14454_p6 = pnand %p14452_p5, %p14449_p4 }
  0x4c   :  { %14457 = shalt.err (!%p14454_p6)
}
  0x4d   :  { %s14458_s1 = scalar_lea.vmem %s49_s16, 73728  ;;  %p14463_p8 = scmp.lt.s32.totalorder %s49_s16, %s49_s16 }
  0x4e   :  { %p14459_p7 = scmp.ne.s32.totalorder %s49_s16, %s14458_s1  ;;  %p14464_p9 = scmp.lt.s32.totalorder %s14458_s1, %s14458_s1 }
  0x50   :  { %p14465_p10 = por %p14464_p9, %p14463_p8 }
  0x52   :  { %p14466_p11 = pnand %p14465_p10, %p14459_p7 }
  0x54   :  { %14469 = shalt.err (!%p14466_p11)
}
  0x55   :  { %54 = dma.hbm_to_vmem [thread:$0]  %s16088_s3, 73728, %s49_s16, [#allocation8], %s14550_s6, %s14550_s6, %s14551_s10  }
  0x56   :  { %s14470_s27 = scalar_lea.hbm %s16090_s5, 36864 }
  0x57   :  { %p14471_p12 = scmp.ne.s32.totalorder %s16090_s5, %s14470_s27  ;;  %p14474_p13 = scmp.lt.u32.totalorder %s14470_s27, %s16090_s5 }
  0x59   :  { %p14476_p0 = pnand %p14474_p13, %p14471_p12 }
  0x5b   :  { %14479 = shalt.err (!%p14476_p0)
}
  0x5c   :  { %s14480_s11 = scalar_lea.vmem %s14666_s18, 36864  ;;  %p14485_p2 = scmp.lt.s32.totalorder %s14666_s18, %s14666_s18 }
  0x5d   :  { %p14481_p1 = scmp.ne.s32.totalorder %s14666_s18, %s14480_s11  ;;  %p14486_p3 = scmp.lt.s32.totalorder %s14480_s11, %s14480_s11 }
  0x5f   :  { %p14487_p4 = por %p14486_p3, %p14485_p2 }
  0x61   :  { %p14488_p5 = pnand %p14487_p4, %p14481_p1 }
  0x63   :  { %14491 = shalt.err (!%p14488_p5)
}
  0x64   :  { %76 = dma.hbm_to_vmem [thread:$0]  %s16090_s5, 36864, %s14666_s18, [#allocation11], %s14550_s6, %s14550_s6, %s14551_s10  }
  0x65   :  { %s14554_s14 = smov [#allocation15]   ;;  %s14492_s20 = scalar_lea.hbm %s16093_s8, 16 }
  0x66   :  { %s95_s16 = sshll.u32 %s14554_s14, 4  ;;  %p14493_p6 = scmp.ne.s32.totalorder %s16093_s8, %s14492_s20  ;;  %s96_s16 = int_to_ptr.vmem [resolvable:$true] %s95_s16 }
  0x67   :  { %p14496_p7 = scmp.lt.u32.totalorder %s14492_s20, %s16093_s8 }
  0x69   :  { %p14498_p8 = pnand %p14496_p7, %p14493_p6 }
  0x6b   :  { %14501 = shalt.err (!%p14498_p8)
}
  0x6c   :  { %s14502_s23 = scalar_lea.vmem %s96_s16, 16  ;;  %s14506_s5 = scalar_lea.vmem %s96_s16, 32 }
  0x6d   :  { %p14503_p9 = scmp.ne.s32.totalorder %s96_s16, %s14502_s23  ;;  %p14507_p10 = scmp.lt.s32.totalorder %s96_s16, %s96_s16 }
  0x6e   :  { %p14508_p11 = scmp.lt.s32.totalorder %s14506_s5, %s14502_s23 }
  0x70   :  { %p14509_p12 = por %p14508_p11, %p14507_p10 }
  0x72   :  { %p14510_p13 = pnand %p14509_p12, %p14503_p9 }
  0x74   :  { %14513 = shalt.err (!%p14510_p13)
}
  0x75   :  { %98 = dma.hbm_to_vmem [thread:$0]  %s16093_s8, 16, %s96_s16, [#allocation14]  }
  0x76   :  { %14536 = dma.done.wait [#allocation5], 512  }
  0x77   :  { %14537 = vsyncadd [#allocation5], 4294966784 }
  0x78   :  { %14538 = dma.done.wait [#allocation8], 73760  }
  0x79   :  { %14539 = vsyncadd [#allocation8], 4294893536 }
  0x7a   :  { %14540 = dma.done.wait [#allocation11], 36896  }
  0x7b   :  { %14541 = vsyncadd [#allocation11], 4294930400 }
  0x7c   :  { %14542 = dma.done.wait [#allocation14], 48  }
  0x7d   :  { %14543 = vsyncadd [#allocation14], 4294967248  ;;  %v14555_v0 = vmov 0   ;;  %v13042_v1 = vld [vmem:[#allocation4 + $0x4] ss:$8 sps:$4 sm:$0xff]   ;;  %vm169_vm0 = vcmask 261120  }
  0x7e   :  { %214 = vmatprep.mubr.bf16.mxu0 %v14555_v0  ;;  %279 = vst [vmem:[#allocation2] sm:$0x77] %v14555_v0  ;;  %280 = vst [vmem:[#allocation2 + $0x8] sm:$0x77] %v14555_v0  ;;  %v13044_v2 = vld [vmem:[#allocation4] ss:$8 sps:$4 sm:$0xff]   ;;  %182 = vmatprep.subr.bf16.mxu0 %v13042_v1 }
  0x7f   :  { %281 = vst [vmem:[#allocation2 + $0x10] sm:$0x77] %v14555_v0  ;;  %282 = vst [vmem:[#allocation2 + $0x18] sm:$0x77] %v14555_v0  ;;  %v13045_v3 = vld [vmem:[#allocation4 + $0x14] ss:$8 sps:$4 sm:$0xff]   ;;  %183 = vmatpush1.bf16.msra.mxu0 %v13044_v2 }
  0x80   :  { %283 = vst [vmem:[#allocation2 + $0x20] sm:$0x77] %v14555_v0  ;;  %284 = vst [vmem:[#allocation2 + $0x28] sm:$0x77] %v14555_v0  ;;  %v13047_v4 = vld [vmem:[#allocation4 + $0x10] ss:$8 sps:$4 sm:$0xff]   ;;  %184 = vmatprep.subr.bf16.mxu0 %v13045_v3 }
  0x81   :  { %285 = vst [vmem:[#allocation2 + $0x30] sm:$0x77] %v14555_v0  ;;  %286 = vst [vmem:[#allocation2 + $0x38] sm:$0x77] %v14555_v0  ;;  %v121_v5 = vld [vmem:[%s16085_s0] sm:$0xff]  ;;  %v122_v6 = vld [vmem:[%s16085_s0 + $0x8] sm:$0xff] }
  0x82   :  { %287 = vst [vmem:[#allocation2 + $0x40] sm:$0x77] %v14555_v0  ;;  %288 = vst [vmem:[#allocation2 + $0x48] sm:$0x77] %v14555_v0  ;;  %v129_v7 = vpack.c.bf16 %v122_v6, %v121_v5  ;;  %v13050_v8 = vld [vmem:[#allocation9 + $0x4] ss:$8 sps:$4 sm:$0xff]  }
  0x83   :  { %289 = vst [vmem:[#allocation2 + $0x50] sm:$0x77] %v14555_v0  ;;  %290 = vst [vmem:[#allocation2 + $0x58] sm:$0x77] %v14555_v0  ;;  %185 = vmatpush1.bf16.msra.mxu0 %v13047_v4  ;;  %v13048_v9 = vld [vmem:[#allocation9] ss:$8 sps:$4 sm:$0xff]  }
  0x84   :  { %291 = vst [vmem:[#allocation2 + $0x60] sm:$0x77] %v14555_v0  ;;  %292 = vst [vmem:[#allocation2 + $0x68] sm:$0x77] %v14555_v0  ;;  %6552 = vmatprep.subr.bf16.mxu0 %v13050_v8  ;;  %v13053_v10 = vld [vmem:[#allocation9 + $0x14] ss:$8 sps:$4 sm:$0xff]  }
  0x85   :  { %293 = vst [vmem:[#allocation2 + $0x70] sm:$0x77] %v14555_v0  ;;  %294 = vst [vmem:[#allocation2 + $0x78] sm:$0x77] %v14555_v0  ;;  %v123_v11 = vld [vmem:[%s16085_s0 + $0x10] sm:$0xff]  ;;  %v124_v12 = vld [vmem:[%s16085_s0 + $0x18] sm:$0xff] }
  0x86   :  { %295 = vst [vmem:[#allocation2 + $0x80] sm:$0x77] %v14555_v0  ;;  %296 = vst [vmem:[#allocation2 + $0x88] sm:$0x77] %v14555_v0  ;;  %11595 = vmatmul.mubr.msk.bf16.vlgmr.msra.gmra.mrb[0].mxu0 %vm169_vm0, %v129_v7  ;;  %v13051_v13 = vld [vmem:[#allocation9 + $0x10] ss:$8 sps:$4 sm:$0xff]   ;;  %v130_v15 = vpack.c.bf16 %v124_v12, %v123_v11 }
  0x87   :  { %297 = vst [vmem:[#allocation2 + $0x90] sm:$0x77] %v14555_v0  ;;  %298 = vst [vmem:[#allocation2 + $0x98] sm:$0x77] %v14555_v0  ;;  %224 = vmatprep.mubr.bf16.mxu0 %v14555_v0  ;;  %6553 = vmatpush1.bf16.msra.mxu0 %v13048_v9  ;;  %v13056_v14 = vld [vmem:[#allocation9 + $0x24] ss:$8 sps:$4 sm:$0xff]  }
  0x88   :  { %299 = vst [vmem:[#allocation2 + $0xa0] sm:$0x77] %v14555_v0  ;;  %300 = vst [vmem:[#allocation2 + $0xa8] sm:$0x77] %v14555_v0  ;;  %6554 = vmatprep.subr.bf16.mxu0 %v13053_v10  ;;  %v13066_v16 = vld [vmem:[#allocation9 + $0x404] ss:$8 sps:$4 sm:$0xff]  }
  0x89   :  { %301 = vst [vmem:[#allocation2 + $0xb0] sm:$0x77] %v14555_v0  ;;  %302 = vst [vmem:[#allocation2 + $0xb8] sm:$0x77] %v14555_v0  ;;  %v13068_v17 = vld [vmem:[#allocation9 + $0x400] ss:$8 sps:$4 sm:$0xff]   ;;  %6764 = vmatprep.subr.bf16.mxu1 %v13066_v16 }
  0x8a   :  { %7518 = vst [vmem:[#allocation3] sm:$0x77] %v14555_v0  ;;  %7519 = vst [vmem:[#allocation3 + $0x8] sm:$0x77] %v14555_v0  ;;  %v13054_v18 = vld [vmem:[#allocation9 + $0x20] ss:$8 sps:$4 sm:$0xff]   ;;  %6765 = vmatpush1.bf16.msra.mxu1 %v13068_v17 }
  0x8b   :  { %7520 = vst [vmem:[#allocation3 + $0x10] sm:$0x77] %v14555_v0  ;;  %7521 = vst [vmem:[#allocation3 + $0x18] sm:$0x77] %v14555_v0  ;;  %6555 = vmatpush1.bf16.msra.mxu0 %v13051_v13  ;;  %v13059_v19 = vld [vmem:[#allocation9 + $0x34] ss:$8 sps:$4 sm:$0xff]  }
  0x8c   :  { %7522 = vst [vmem:[#allocation3 + $0x20] sm:$0x77] %v14555_v0  ;;  %7523 = vst [vmem:[#allocation3 + $0x28] sm:$0x77] %v14555_v0  ;;  %6556 = vmatprep.subr.bf16.mxu0 %v13056_v14  ;;  %v13072_v20 = vld [vmem:[#allocation9 + $0x414] ss:$8 sps:$4 sm:$0xff]  }
  0x8d   :  { %7524 = vst [vmem:[#allocation3 + $0x30] sm:$0x77] %v14555_v0  ;;  %7525 = vst [vmem:[#allocation3 + $0x38] sm:$0x77] %v14555_v0  ;;  %v13074_v21 = vld [vmem:[#allocation9 + $0x410] ss:$8 sps:$4 sm:$0xff]   ;;  %6766 = vmatprep.subr.bf16.mxu1 %v13072_v20 }
  0x8e   :  { %7526 = vst [vmem:[#allocation3 + $0x40] sm:$0x77] %v14555_v0  ;;  %7527 = vst [vmem:[#allocation3 + $0x48] sm:$0x77] %v14555_v0  ;;  %11596 = vmatmul.mubr.msk.bf16.gmra.mrb[4].mxu0 %vm169_vm0, %v130_v15  ;;  %v125_v22 = vld [vmem:[%s16085_s0 + $0x20] sm:$0xff]  ;;  %v126_v23 = vld [vmem:[%s16085_s0 + $0x28] sm:$0xff]  ;;  %6767 = vmatpush1.bf16.msra.mxu1 %v13074_v21 }
  0x8f   :  { %7528 = vst [vmem:[#allocation3 + $0x50] sm:$0x77] %v14555_v0  ;;  %7529 = vst [vmem:[#allocation3 + $0x58] sm:$0x77] %v14555_v0  ;;  %234 = vmatprep.mubr.bf16.mxu0 %v14555_v0  ;;  %6557 = vmatpush1.bf16.msra.mxu0 %v13054_v18  ;;  %v13057_v24 = vld [vmem:[#allocation9 + $0x30] ss:$8 sps:$4 sm:$0xff]   ;;  %v131_v29 = vpack.c.bf16 %v126_v23, %v125_v22 }
  0x90   :  { %v13078_v25 = vld [vmem:[#allocation9 + $0x424] ss:$8 sps:$4 sm:$0xff]   ;;  %6558 = vmatprep.subr.bf16.mxu0 %v13059_v19  ;;  %v13060_v27 = vld [vmem:[#allocation9 + $0x40] ss:$8 sps:$4 sm:$0xff]   ;;  %v13065_v30 = vld [vmem:[#allocation9 + $0x54] ss:$8 sps:$4 sm:$0xff]   ;;  %v139_v19 = vlaneseq }
  0x91   :  { %v13062_v26 = vld [vmem:[#allocation9 + $0x44] ss:$8 sps:$4 sm:$0xff]   ;;  %v13080_v28 = vld [vmem:[#allocation9 + $0x420] ss:$8 sps:$4 sm:$0xff]   ;;  %6768 = vmatprep.subr.bf16.mxu1 %v13078_v25  ;;  %v128_v32 = vld [vmem:[%s16085_s0 + $0x38] sm:$0xff]  ;;  %vm330_vm1 = vcmask 1042432  }
  0x92   :  { %v127_v31 = vld [vmem:[%s16085_s0 + $0x30] sm:$0xff]  ;;  %6769 = vmatpush1.bf16.msra.mxu1 %v13080_v28  ;;  %v13069_v35 = vld [vmem:[#allocation9 + $0x60] ss:$8 sps:$4 sm:$0xff]   ;;  %v140_v20 = vshrl.u32 %v139_v19, 7  ;;  %v137_v22 = vld [vmem:[#allocation7] sm:$0x3] }
  0x93   :  { %6559 = vmatpush1.bf16.msra.mxu0 %v13057_v24  ;;  %v13063_v33 = vld [vmem:[#allocation9 + $0x50] ss:$8 sps:$4 sm:$0xff]   ;;  %v13071_v34 = vld [vmem:[#allocation9 + $0x64] ss:$8 sps:$4 sm:$0xff]   ;;  %v132_v36 = vpack.c.bf16 %v128_v32, %v127_v31  ;;  %v13077_v37 = vld [vmem:[#allocation9 + $0x74] ss:$8 sps:$4 sm:$0xff]  }
  0x94   :  { %6560 = vmatprep.subr.bf16.mxu0 %v13062_v26  ;;  %v13075_v38 = vld [vmem:[#allocation9 + $0x70] ss:$8 sps:$4 sm:$0xff]   ;;  %v13083_v39 = vld [vmem:[#allocation9 + $0x84] ss:$8 sps:$4 sm:$0xff]   ;;  %v13081_v40 = vld [vmem:[#allocation9 + $0x80] ss:$8 sps:$4 sm:$0xff]  }
  0x95   :  { %v13084_v41 = vld [vmem:[#allocation9 + $0x434] ss:$8 sps:$4 sm:$0xff]   ;;  %v13086_v42 = vld [vmem:[#allocation9 + $0x430] ss:$8 sps:$4 sm:$0xff]   ;;  %v13090_v45 = vld [vmem:[#allocation9 + $0x444] ss:$8 sps:$4 sm:$0xff]  }
  0x96   :  { %11597 = vmatmul.mubr.msk.bf16.gmra.mrb[8].mxu0 %vm169_vm0, %v131_v29  ;;  %6770 = vmatprep.subr.bf16.mxu1 %v13084_v41  ;;  %v13089_v43 = vld [vmem:[#allocation9 + $0x94] ss:$8 sps:$4 sm:$0xff]   ;;  %v13087_v44 = vld [vmem:[#allocation9 + $0x90] ss:$8 sps:$4 sm:$0xff]   ;;  %v13092_v46 = vld [vmem:[#allocation9 + $0x440] ss:$8 sps:$4 sm:$0xff]  }
  0x97   :  { %244 = vmatprep.mubr.bf16.mxu0 %v14555_v0  ;;  %6561 = vmatpush1.bf16.msra.mxu0 %v13060_v27  ;;  %v13095_v47 = vld [vmem:[#allocation9 + $0xa4] ss:$8 sps:$4 sm:$0xff]   ;;  %v13093_v48 = vld [vmem:[#allocation9 + $0xa0] ss:$8 sps:$4 sm:$0xff]   ;;  %v13096_v49 = vld [vmem:[#allocation9 + $0x454] ss:$8 sps:$4 sm:$0xff]  }
  0x98   :  { %6562 = vmatprep.subr.bf16.mxu0 %v13065_v30  ;;  %6771 = vmatpush1.bf16.msra.mxu1 %v13086_v42  ;;  %v13098_v50 = vld [vmem:[#allocation9 + $0x450] ss:$8 sps:$4 sm:$0xff]   ;;  %v13101_v52 = vld [vmem:[#allocation9 + $0xb4] ss:$8 sps:$4 sm:$0xff]   ;;  %v13102_v53 = vld [vmem:[#allocation9 + $0x464] ss:$8 sps:$4 sm:$0xff]  }
  0x99   :  { %6772 = vmatprep.subr.bf16.mxu1 %v13090_v45  ;;  %v13099_v51 = vld [vmem:[#allocation9 + $0xb0] ss:$8 sps:$4 sm:$0xff]   ;;  %v13104_v54 = vld [vmem:[#allocation9 + $0x460] ss:$8 sps:$4 sm:$0xff]   ;;  %v13107_v55 = vld [vmem:[#allocation9 + $0xc4] ss:$8 sps:$4 sm:$0xff]  }
  0x9a   :  { %v13105_v56 = vld [vmem:[#allocation9 + $0xc0] ss:$8 sps:$4 sm:$0xff]   ;;  %v13108_v57 = vld [vmem:[#allocation9 + $0x474] ss:$8 sps:$4 sm:$0xff]   ;;  %v13110_v58 = vld [vmem:[#allocation9 + $0x470] ss:$8 sps:$4 sm:$0xff]  }
  0x9b   :  { %6563 = vmatpush1.bf16.msra.mxu0 %v13063_v33  ;;  %v13113_v59 = vld [vmem:[#allocation9 + $0xd4] ss:$8 sps:$4 sm:$0xff]   ;;  %v13111_v60 = vld [vmem:[#allocation9 + $0xd0] ss:$8 sps:$4 sm:$0xff]   ;;  %v13114_v61 = vld [vmem:[#allocation9 + $0x484] ss:$8 sps:$4 sm:$0xff]  }
  0x9c   :  { %6564 = vmatprep.subr.bf16.mxu0 %v13071_v34  ;;  %6773 = vmatpush1.bf16.msra.mxu1 %v13092_v46  ;;  %v13116_v62 = vld [vmem:[#allocation9 + $0x480] ss:$8 sps:$4 sm:$0xff]   ;;  %v13119_v63 = vld [vmem:[#allocation9 + $0xe4] ss:$8 sps:$4 sm:$0xff]   ;;  %v13120_v1 = vld [vmem:[#allocation9 + $0x494] ss:$8 sps:$4 sm:$0xff]  }
  0x9d   :  { %6774 = vmatprep.subr.bf16.mxu1 %v13096_v49  ;;  %v13117_v0 = vld [vmem:[#allocation9 + $0xe0] ss:$8 sps:$4 sm:$0xff]   ;;  %v13122_v2 = vld [vmem:[#allocation9 + $0x490] ss:$8 sps:$4 sm:$0xff]   ;;  %v13125_v3 = vld [vmem:[#allocation9 + $0xf4] ss:$8 sps:$4 sm:$0xff]  }
  0x9e   :  { %11598 = vmatmul.mubr.msk.bf16.gmra.mrb[12].mxu0 %vm169_vm0, %v132_v36  ;;  %v13123_v4 = vld [vmem:[#allocation9 + $0xf0] ss:$8 sps:$4 sm:$0xff]   ;;  %v13126_v5 = vld [vmem:[#allocation9 + $0x4a4] ss:$8 sps:$4 sm:$0xff]   ;;  %v13128_v6 = vld [vmem:[#allocation9 + $0x4a0] ss:$8 sps:$4 sm:$0xff]  }
  0x9f   :  { %6565 = vmatpush1.bf16.msra.mxu0 %v13069_v35  ;;  %v13131_v7 = vld [vmem:[#allocation9 + $0x104] ss:$8 sps:$4 sm:$0xff]   ;;  %v13132_v8 = vld [vmem:[#allocation9 + $0x4b4] ss:$8 sps:$4 sm:$0xff]   ;;  %v13134_v9 = vld [vmem:[#allocation9 + $0x4b0] ss:$8 sps:$4 sm:$0xff]  }
  0xa0   :  { %6566 = vmatprep.subr.bf16.mxu0 %v13077_v37  ;;  %6775 = vmatpush1.bf16.msra.mxu1 %v13098_v50  ;;  %v13138_v10 = vld [vmem:[#allocation9 + $0x4c4] ss:$8 sps:$4 sm:$0xff]   ;;  %v13140_v11 = vld [vmem:[#allocation9 + $0x4c0] ss:$8 sps:$4 sm:$0xff]   ;;  %v13144_v12 = vld [vmem:[#allocation9 + $0x4d4] ss:$8 sps:$4 sm:$0xff]  }
  0xa1   :  { %6776 = vmatprep.subr.bf16.mxu1 %v13102_v53  ;;  %v13146_v13 = vld [vmem:[#allocation9 + $0x4d0] ss:$8 sps:$4 sm:$0xff]   ;;  %v13150_v14 = vld [vmem:[#allocation9 + $0x4e4] ss:$8 sps:$4 sm:$0xff]   ;;  %v13152_v15 = vld [vmem:[#allocation9 + $0x4e0] ss:$8 sps:$4 sm:$0xff]  }
  0xa2   :  { %v13156_v16 = vld [vmem:[#allocation9 + $0x4f4] ss:$8 sps:$4 sm:$0xff]   ;;  %v13158_v17 = vld [vmem:[#allocation9 + $0x4f0] ss:$8 sps:$4 sm:$0xff]   ;;  %v13164_v18 = vld [vmem:[#allocation9 + $0x504] ss:$8 sps:$4 sm:$0xff]  }
  0xa3   :  { %6567 = vmatpush1.bf16.msra.mxu0 %v13075_v38  ;;  %v14783_v21 = vsub.s32 0, %v140_v20  ;;  %v14785_v23 = vsub.s32 1, %v140_v20  ;;  %v14556_v27 = vmov 1983009808   ;;  %vm331_vm2 = vsmask.f32 2306 }
  0xa4   :  { %6568 = vmatprep.subr.bf16.mxu0 %v13083_v39  ;;  %6777 = vmatpush1.bf16.msra.mxu1 %v13104_v54  ;;  %v2369_v28 = vunpack.c.l.s4 %v14556_v27  ;;  %vm334_vm3 = vsmask.f32 6418  ;;  %vm333_vm4 = vcmask 1046532   ;;  %vm14797_vm5 = vmand %vm330_vm1, %vm331_vm2  ;;  %v400_v27 = vld [vmem:[#allocation2 + $0x40] sm:$0x77]  ;;  %vm1093_vm8 = vcmask 1040384  }
  0xa5   :  { %6778 = vmatprep.subr.bf16.mxu1 %v13108_v57  ;;  %16114 = vst [vmem:[#allocation22_spill] sm:$0xff] %v14783_v21  ;;  %16115 = vst [vmem:[#allocation23_spill] sm:$0xff] %v14785_v23  ;;  %v14788_v24 = vrot.slane %v137_v22, %v14783_v21  ;;  %v14791_v25 = vrot.slane %v137_v22, %v14785_v23  ;;  %v11639_v39 = vld.sshfl [vmem:[#allocation2] sm:$0x5a pattern:$0x76325410] }
  0xa6   :  { %v2370_v36 = vunpack.c.0.s8 %v2369_v28  ;;  %vm14804_vm6 = vmand %vm333_vm4, %vm334_vm3  ;;  %v14828_v22 = vld.sshfl [vmem:[#allocation2 + $0x8] sm:$0x5f pattern:$0x76325410]  ;;  %vm1094_vm9 = vcmask 1042434   ;;  %vm1096_vm10 = vcmask 1044484  }
  0xa7   :  { %6569 = vmatpush1.bf16.msra.mxu0 %v13081_v40  ;;  %v11640_v40 = vld.sshfl [vmem:[#allocation2 + $0x8] sm:$0x5a pattern:$0x76325410]  ;;  %vm14816_vm7 = vmor %vm14804_vm6, %vm14797_vm5  ;;  %vm1098_vm11 = vcmask 1046534   ;;  %vm11427_vm6 = vcmask 1041409  }
  0xa8   :  { %6570 = vmatprep.subr.bf16.mxu0 %v13089_v43  ;;  %6779 = vmatpush1.bf16.msra.mxu1 %v13110_v58  ;;  %v14801_v43 = vld.sshfl [vmem:[#allocation2 + $0x60] sm:$0x5a pattern:$0x76325410]  ;;  %vm14883_vm12 = vmor %vm1093_vm8, %vm1094_vm9  ;;  %vm814_vm15 = vsmask.f32 1280 }
  0xa9   :  { %6780 = vmatprep.subr.bf16.mxu1 %v13114_v61  ;;  %vm14898_vm13 = vmor %vm14883_vm12, %vm1096_vm10  ;;  %vm815_vm0 = vsmask.f32 3336  ;;  %vm817_vm1 = vsmask.f32 5392  ;;  %vm819_vm2 = vsmask.f32 7448 }
  0xaa   :  { %vm14910_vm14 = vmor %vm14898_vm13, %vm1098_vm11 }
  0xab   :  { %6571 = vmatpush1.bf16.msra.mxu0 %v13087_v44  ;;  %vm15021_vm3 = vmor %vm814_vm15, %vm815_vm0 }
  0xac   :  { %6572 = vmatprep.subr.bf16.mxu0 %v13095_v47  ;;  %6781 = vmatpush1.bf16.msra.mxu1 %v13116_v62  ;;  %v11648_v47 = vld.sshfl [vmem:[#allocation2 + $0x68] sm:$0x5a pattern:$0x76325410]  ;;  %vm15034_vm4 = vmor %vm15021_vm3, %vm817_vm1 }
  0xad   :  { %6782 = vmatprep.subr.bf16.mxu1 %v13120_v1  ;;  %v1043_v57 = vcombine.low %v14801_v43, %v11648_v47  ;;  %vm15047_vm5 = vmor %vm15034_vm4, %vm819_vm2 }
  0xaf   :  { %6573 = vmatpush1.bf16.msra.mxu0 %v13093_v48  ;;  %v14808_v48 = vsub.s32 %v2370_v36, %v140_v20  ;;  %v1044_v20 = vcombine.high %v14801_v43, %v11648_v47 }
  0xb0   :  { %6574 = vmatprep.subr.bf16.mxu0 %v13101_v52  ;;  %6783 = vmatpush1.bf16.msra.mxu1 %v13122_v2 }
  0xb1   :  { %6784 = vmatprep.subr.bf16.mxu1 %v13126_v5 }
  0xb3   :  { %6575 = vmatpush1.bf16.msra.mxu0 %v13099_v51 }
  0xb4   :  { %6576 = vmatprep.subr.bf16.mxu0 %v13107_v55  ;;  %6785 = vmatpush1.bf16.msra.mxu1 %v13128_v6  ;;  %v979_v55 = vcombine.low %v11639_v39, %v11640_v40 }
  0xb5   :  { %6786 = vmatprep.subr.bf16.mxu1 %v13132_v8  ;;  %v354_v8 = vld [vmem:[#allocation2 + $0x20] sm:$0x77] }
  0xb7   :  { %6577 = vmatpush1.bf16.msra.mxu0 %v13105_v56  ;;  %v980_v56 = vcombine.high %v11639_v39, %v11640_v40 }
  0xb8   :  { %6578 = vmatprep.subr.bf16.mxu0 %v13113_v59  ;;  %6787 = vmatpush1.bf16.msra.mxu1 %v13134_v9 }
  0xb9   :  { %6788 = vmatprep.subr.bf16.mxu1 %v13138_v10 }
  0xbb   :  { %6579 = vmatpush1.bf16.msra.mxu0 %v13111_v60 }
  0xbc   :  { %6580 = vmatprep.subr.bf16.mxu0 %v13119_v63  ;;  %6789 = vmatpush1.bf16.msra.mxu1 %v13140_v11  ;;  %v16120_v63 = vmov 0  ;;  %v383_v11 = vld [vmem:[#allocation2 + $0x30] sm:$0x77] }
  0xbd   :  { %6790 = vmatprep.subr.bf16.mxu1 %v13144_v12  ;;  %v16121_v63 = vsel %vm14816_vm7, 4294967295, %v16120_v63 }
  0xbe   :  { %16122 = vst [vmem:[#allocation24_spill] sm:$0xff] %v16121_v63 }
  0xbf   :  { %6581 = vmatpush1.bf16.msra.mxu0 %v13117_v0  ;;  %v337_v0 = vld [vmem:[#allocation2 + $0x10] sm:$0x77] }
  0xc0   :  { %6582 = vmatprep.subr.bf16.mxu0 %v13125_v3  ;;  %6791 = vmatpush1.bf16.msra.mxu1 %v13146_v13 }
  0xc1   :  { %6792 = vmatprep.subr.bf16.mxu1 %v13150_v14 }
  0xc3   :  { %6583 = vmatpush1.bf16.msra.mxu0 %v13123_v4 }
  0xc4   :  { %6605 = vmatprep.subr.bf16.mxu0 %v13131_v7  ;;  %6793 = vmatpush1.bf16.msra.mxu1 %v13152_v15 }
  0xc5   :  { %6794 = vmatprep.subr.bf16.mxu1 %v13156_v16  ;;  %v14823_v16 = vld.sshfl [vmem:[#allocation2] sm:$0x5f pattern:$0x76325410] }
  0xc6   :  { %v14846_v45 = vcombine.low %v14823_v16, %v14828_v22 }
  0xc8   :  { %6795 = vmatpush1.bf16.msra.mxu1 %v13158_v17 }
  0xc9   :  { %6817 = vmatprep.subr.bf16.mxu1 %v13164_v18 }
 0x159   :  { %v216_v26 = vpop.f32.mrb[0].mxu0 }
 0x15a   :  { %v217_v29 = vadd.f32 %v216_v26, %v14788_v24  ;;  %v218_v30 = vpop.f32.mrb[1].mxu0 }
 0x15b   :  { %v219_v31 = vadd.f32 %v218_v30, %v14791_v25  ;;  %v220_v32 = vpop.f32.mrb[2].mxu0  ;;  %v14830_v30 = vrot.slane %v979_v55, 9 }
 0x15c   :  { %v255_v33 = vmax.f32 %v217_v29, 0.0  ;;  %v221_v34 = vadd.f32 %v220_v32, %v14788_v24  ;;  %v222_v35 = vpop.f32.mrb[3].mxu0 }
 0x15d   :  { %v256_v37 = vmax.f32 %v219_v31, 0.0  ;;  %v223_v38 = vadd.f32 %v222_v35, %v14791_v25  ;;  %v14838_v35 = vrot.slane %v1043_v57, 9 }
 0x15e   :  { %v257_v42 = vmax.f32 %v221_v34, 0.0  ;;  %v14836_v34 = vrot.slane %v980_v56, 7 }
 0x15f   :  { %v12780_v44 = vpack.c.bf16 %v256_v37, %v255_v33  ;;  %v258_v46 = vmax.f32 %v223_v38, 0.0 }
 0x161   :  { %v314_v49 = vshrl.u32 %v12780_v44, 16  ;;  %v317_v50 = vshll.u32 %v12780_v44, 16  ;;  %v12782_v51 = vpack.c.bf16 %v258_v46, %v257_v42  ;;  %v226_v52 = vpop.f32.mrb[4].mxu0  ;;  %v14842_v44 = vrot.slane %v1044_v20, 7 }
 0x162   :  { %v227_v53 = vadd.f32 %v226_v52, %v14788_v24  ;;  %v228_v54 = vpop.f32.mrb[5].mxu0 }
 0x163   :  { %v316_v58 = vrot.slane %v314_v49, 7  ;;  %v343_v59 = vrot.slane %v314_v49, 5  ;;  %v344_v60 = vrot.slane %v317_v50, 6  ;;  %v367_v61 = vshrl.u32 %v12782_v51, 16  ;;  %v230_v62 = vpop.f32.mrb[6].mxu0 }
 0x164   :  { %v370_v1 = vshll.u32 %v12782_v51, 16  ;;  %v259_v2 = vmax.f32 %v227_v53, 0.0  ;;  %v229_v3 = vadd.f32 %v228_v54, %v14791_v25  ;;  %v231_v4 = vadd.f32 %v230_v62, %v14788_v24  ;;  %v232_v5 = vpop.f32.mrb[7].mxu0  ;;  %v433_v49 = vld [vmem:[#allocation2 + $0x70] sm:$0x77] }
 0x165   :  { %v319_v6 = vor.u32 %v317_v50, %v316_v58  ;;  %v345_v7 = vor.u32 %v344_v60, %v343_v59  ;;  %v369_v9 = vrot.slane %v367_v61, 7  ;;  %v389_v10 = vrot.slane %v367_v61, 5  ;;  %v450_v59 = vld [vmem:[#allocation2 + $0x80] sm:$0x77] }
 0x166   :  { %v390_v12 = vrot.slane %v370_v1, 6  ;;  %v260_v13 = vmax.f32 %v229_v3, 0.0  ;;  %v261_v14 = vmax.f32 %v231_v4, 0.0  ;;  %v233_v15 = vadd.f32 %v232_v5, %v14791_v25 }
 0x167   :  { %v338_v17 = vsel %vm14816_vm7, %v319_v6, %v337_v0  ;;  %v346_v18 = vrot.slane %v345_v7, 4  ;;  %v372_v19 = vor.u32 %v370_v1, %v369_v9  ;;  %v479_v0 = vld [vmem:[#allocation2 + $0x90] sm:$0x77] }
 0x168   :  { %339 = vst [vmem:[#allocation2 + $0x10] sm:$0x77] %v338_v17  ;;  %v391_v26 = vor.u32 %v390_v12, %v389_v10  ;;  %v12784_v28 = vpack.c.bf16 %v260_v13, %v259_v2  ;;  %v262_v29 = vmax.f32 %v233_v15, 0.0 }
 0x169   :  { %v355_v31 = vsel %vm14816_vm7, %v346_v18, %v354_v8  ;;  %v384_v32 = vsel %vm14816_vm7, %v372_v19, %v383_v11  ;;  %v236_v33 = vpop.f32.mrb[8].mxu0  ;;  %v822_v19 = vshrl.u32 %v14846_v45, 16 }
 0x16a   :  { %356 = vst [vmem:[#allocation2 + $0x20] sm:$0x77] %v355_v31  ;;  %385 = vst [vmem:[#allocation2 + $0x30] sm:$0x77] %v384_v32  ;;  %v392_v36 = vrot.slane %v391_v26, 4  ;;  %v417_v37 = vshrl.u32 %v12784_v28, 16  ;;  %v12786_v39 = vpack.c.bf16 %v262_v29, %v261_v14  ;;  %v237_v41 = vadd.f32 %v236_v33, %v14788_v24 }
 0x16b   :  { %v420_v38 = vshll.u32 %v12784_v28, 16  ;;  %v238_v40 = vpop.f32.mrb[9].mxu0  ;;  %v496_v14 = vld [vmem:[#allocation2 + $0xa0] sm:$0x77]  ;;  %v340_v28 = vld [vmem:[#allocation2 + $0x18] sm:$0x77] }
 0x16c   :  { %v239_v42 = vadd.f32 %v238_v40, %v14791_v25  ;;  %v240_v43 = vpop.f32.mrb[10].mxu0  ;;  %v401_v46 = vsel %vm14816_vm7, %v392_v36, %v400_v27  ;;  %v419_v47 = vrot.slane %v417_v37, 7  ;;  %v439_v50 = vrot.slane %v417_v37, 5 }
 0x16d   :  { %v440_v51 = vrot.slane %v420_v38, 6  ;;  %v242_v52 = vpop.f32.mrb[11].mxu0  ;;  %402 = vst [vmem:[#allocation2 + $0x40] sm:$0x77] %v401_v46  ;;  %v463_v53 = vshrl.u32 %v12786_v39, 16  ;;  %v466_v54 = vshll.u32 %v12786_v39, 16  ;;  %v241_v60 = vadd.f32 %v240_v43, %v14788_v24 }
 0x16e   :  { %v263_v55 = vmax.f32 %v237_v41, 0.0  ;;  %v264_v56 = vmax.f32 %v239_v42, 0.0  ;;  %v422_v57 = vor.u32 %v420_v38, %v419_v47  ;;  %v243_v61 = vadd.f32 %v242_v52, %v14791_v25  ;;  %v11607_v32 = vld.sshfl [vmem:[#allocation2] sm:$0xf pattern:$0x76325410] }
 0x16f   :  { %v441_v58 = vor.u32 %v440_v51, %v439_v50  ;;  %v465_v62 = vrot.slane %v463_v53, 7  ;;  %v485_v1 = vrot.slane %v463_v53, 5  ;;  %v486_v2 = vrot.slane %v466_v54, 6  ;;  %v357_v46 = vld [vmem:[#allocation2 + $0x28] sm:$0x77] }
 0x170   :  { %v12781_v3 = vpack.c.bf16 %v264_v56, %v263_v55  ;;  %v434_v4 = vsel %vm14816_vm7, %v422_v57, %v433_v49  ;;  %v265_v6 = vmax.f32 %v241_v60, 0.0  ;;  %v266_v7 = vmax.f32 %v243_v61, 0.0  ;;  %v14860_v33 = vld.sshfl [vmem:[#allocation2 + $0x10] sm:$0xf pattern:$0x76325410] }
 0x171   :  { %v442_v5 = vrot.slane %v441_v58, 4  ;;  %435 = vst [vmem:[#allocation2 + $0x70] sm:$0x77] %v434_v4  ;;  %v468_v8 = vor.u32 %v466_v54, %v465_v62  ;;  %v487_v9 = vor.u32 %v486_v2, %v485_v1  ;;  %v246_v12 = vpop.f32.mrb[12].mxu0  ;;  %v386_v53 = vld [vmem:[#allocation2 + $0x38] sm:$0x77] }
 0x172   :  { %v321_v10 = vshrl.u32 %v12781_v3, 16  ;;  %v324_v11 = vshll.u32 %v12781_v3, 16  ;;  %v12783_v15 = vpack.c.bf16 %v266_v7, %v265_v6  ;;  %v247_v17 = vadd.f32 %v246_v12, %v14788_v24  ;;  %v248_v18 = vpop.f32.mrb[13].mxu0  ;;  %v403_v2 = vld [vmem:[#allocation2 + $0x48] sm:$0x77] }
 0x173   :  { %v451_v13 = vsel %vm14816_vm7, %v442_v5, %v450_v59  ;;  %v480_v20 = vsel %vm14816_vm7, %v468_v8, %v479_v0  ;;  %v488_v26 = vrot.slane %v487_v9, 4  ;;  %v250_v31 = vpop.f32.mrb[14].mxu0  ;;  %v11615_v41 = vld.sshfl [vmem:[#allocation2 + $0x60] sm:$0xf pattern:$0x76325410]  ;;  %v249_v47 = vadd.f32 %v248_v18, %v14791_v25 }
 0x174   :  { %452 = vst [vmem:[#allocation2 + $0x80] sm:$0x77] %v451_v13  ;;  %v323_v27 = vrot.slane %v321_v10, 7  ;;  %v347_v29 = vrot.slane %v321_v10, 5  ;;  %481 = vst [vmem:[#allocation2 + $0x90] sm:$0x77] %v480_v20  ;;  %v251_v49 = vadd.f32 %v250_v31, %v14788_v24  ;;  %v11775_v0 = vcombine.low %v11607_v32, %v14860_v33 }
 0x175   :  { %v348_v36 = vrot.slane %v324_v11, 6  ;;  %v374_v37 = vshrl.u32 %v12783_v15, 16  ;;  %v377_v38 = vshll.u32 %v12783_v15, 16  ;;  %v267_v39 = vmax.f32 %v247_v17, 0.0  ;;  %v252_v40 = vpop.f32.mrb[15].mxu0 }
 0x176   :  { %v497_v42 = vsel %vm14816_vm7, %v488_v26, %v496_v14  ;;  %v326_v43 = vor.u32 %v324_v11, %v323_v27  ;;  %v14866_v50 = vld.sshfl [vmem:[#allocation2 + $0x20] sm:$0xf pattern:$0x76325410]  ;;  %v268_v57 = vmax.f32 %v249_v47, 0.0  ;;  %v269_v58 = vmax.f32 %v251_v49, 0.0 }
 0x177   :  { %498 = vst [vmem:[#allocation2 + $0xa0] sm:$0x77] %v497_v42  ;;  %v349_v51 = vor.u32 %v348_v36, %v347_v29  ;;  %v376_v52 = vrot.slane %v374_v37, 7  ;;  %v393_v54 = vrot.slane %v374_v37, 5  ;;  %v394_v55 = vrot.slane %v377_v38, 6 }
 0x178   :  { %v341_v56 = vsel %vm14816_vm7, %v326_v43, %v340_v28  ;;  %v253_v59 = vadd.f32 %v252_v40, %v14791_v25  ;;  %v14871_v60 = vld.sshfl [vmem:[#allocation2 + $0x30] sm:$0xf pattern:$0x76325410]  ;;  %v12785_v3 = vpack.c.bf16 %v268_v57, %v267_v39  ;;  %v2374_v9 = vrot.slane %v11775_v0, %v14808_v48  ;;  %v436_v20 = vld [vmem:[#allocation2 + $0x78] sm:$0x77] }
 0x179   :  { %342 = vst [vmem:[#allocation2 + $0x18] sm:$0x77] %v341_v56  ;;  %v350_v24 = vrot.slane %v349_v51, 4  ;;  %v379_v61 = vor.u32 %v377_v38, %v376_v52  ;;  %v395_v62 = vor.u32 %v394_v55, %v393_v54  ;;  %v11777_v5 = vcombine.low %v14866_v50, %v14871_v60  ;;  %v13129_v26 = vld [vmem:[#allocation9 + $0x100] ss:$8 sps:$4 sm:$0xff]  }
 0x17a   :  { %v11617_v1 = vld.sshfl [vmem:[#allocation2 + $0x70] sm:$0xf pattern:$0x76325410]  ;;  %v270_v4 = vmax.f32 %v253_v59, 0.0  ;;  %v424_v12 = vshrl.u32 %v12785_v3, 16  ;;  %v11783_v31 = vcombine.low %v14860_v33, %v14866_v50 }
 0x17b   :  { %v11779_v6 = vcombine.low %v11615_v41, %v11617_v1  ;;  %v358_v7 = vsel %vm14816_vm7, %v350_v24, %v357_v46  ;;  %v387_v25 = vsel %vm14816_vm7, %v379_v61, %v386_v53  ;;  %v396_v8 = vrot.slane %v395_v62, 4  ;;  %v11619_v10 = vld.sshfl [vmem:[#allocation2 + $0x80] sm:$0xf pattern:$0x76325410] }
 0x17c   :  { %359 = vst [vmem:[#allocation2 + $0x28] sm:$0x77] %v358_v7  ;;  %388 = vst [vmem:[#allocation2 + $0x38] sm:$0x77] %v387_v25  ;;  %v427_v13 = vshll.u32 %v12785_v3, 16  ;;  %v12787_v14 = vpack.c.bf16 %v270_v4, %v269_v58  ;;  %v2388_v15 = vrot.slane %v11777_v5, %v14808_v48  ;;  %v426_v32 = vrot.slane %v424_v12, 7 }
 0x17d   :  { %v11621_v17 = vld.sshfl [vmem:[#allocation2 + $0x90] sm:$0xf pattern:$0x76325410]  ;;  %v404_v18 = vsel %vm14816_vm7, %v396_v8, %v403_v2  ;;  %v14891_v28 = vrot.slane %v11779_v6, %v14808_v48  ;;  %v443_v36 = vrot.slane %v424_v12, 5  ;;  %v14344_v61 = vld [vmem:[%s16092_s7 + $0x40] sm:$0xff]  }
 0x17e   :  { %v11781_v27 = vcombine.low %v11619_v10, %v11621_v17  ;;  %v11608_v29 = vld.sshfl [vmem:[#allocation2 + $0x8] sm:$0xf pattern:$0x76325410]  ;;  %405 = vst [vmem:[#allocation2 + $0x48] sm:$0x77] %v404_v18  ;;  %v2396_v46 = vcombine.low %v2374_v9, %v2388_v15  ;;  %v2397_v47 = vcombine.high %v2374_v9, %v2388_v15  ;;  %v429_v52 = vor.u32 %v427_v13, %v426_v32 }
 0x17f   :  { %v444_v37 = vrot.slane %v427_v13, 6  ;;  %v470_v38 = vshrl.u32 %v12787_v14, 16  ;;  %v13137_v39 = vld [vmem:[#allocation9 + $0x114] ss:$8 sps:$4 sm:$0xff]   ;;  %v453_v41 = vld [vmem:[#allocation2 + $0x88] sm:$0x77]  ;;  %v14929_v15 = vsel %vm14910_vm14, %v14830_v30, %v14836_v34 }
 0x180   :  { %v473_v42 = vshll.u32 %v12787_v14, 16  ;;  %v482_v43 = vld [vmem:[#allocation2 + $0x98] sm:$0x77]  ;;  %v14903_v49 = vrot.slane %v11781_v27, %v14808_v48  ;;  %6584 = vmatprep.mubr.bf16.mxu0 %v2397_v47  ;;  %v437_v62 = vsel %vm14816_vm7, %v429_v52, %v436_v20  ;;  %v499_v2 = vld [vmem:[#allocation2 + $0xa8] sm:$0x77]  ;;  %v14918_v9 = vrot.slane %v822_v19, 6 }
 0x181   :  { %v11641_v51 = vld.sshfl [vmem:[#allocation2 + $0x10] sm:$0x5a pattern:$0x76325410]  ;;  %v445_v53 = vor.u32 %v444_v37, %v443_v36  ;;  %v472_v54 = vrot.slane %v470_v38, 7  ;;  %v489_v55 = vrot.slane %v470_v38, 5  ;;  %6585 = vmatmul.mubr.bf16.vlgmr.msra.gmra.mrb[16].mxu0 %v2396_v46 }
 0x182   :  { %v11610_v56 = vld.sshfl [vmem:[#allocation2 + $0x18] sm:$0xf pattern:$0x76325410]  ;;  %v490_v57 = vrot.slane %v473_v42, 6  ;;  %v2433_v58 = vcombine.high %v14891_v28, %v14903_v49  ;;  %6606 = vmatpush1.bf16.msra.mxu0 %v13129_v26  ;;  %v825_v10 = vshll.u32 %v14846_v45, 16  ;;  %v701_v26 = vcombine.high %v14823_v16, %v14828_v22 }
 0x183   :  { %v11776_v59 = vcombine.low %v11608_v29, %v11610_v56  ;;  %v11642_v24 = vld.sshfl [vmem:[#allocation2 + $0x18] sm:$0x5a pattern:$0x76325410]  ;;  %v446_v0 = vrot.slane %v445_v53, 4  ;;  %v475_v1 = vor.u32 %v473_v42, %v472_v54  ;;  %6607 = vmatprep.subr.bf16.mxu0 %v13137_v39  ;;  %v2432_v27 = vcombine.low %v14891_v28, %v14903_v49 }
 0x184   :  { %v13135_v3 = vld [vmem:[#allocation9 + $0x110] ss:$8 sps:$4 sm:$0xff]   ;;  %v13143_v4 = vld [vmem:[#allocation9 + $0x124] ss:$8 sps:$4 sm:$0xff]   ;;  %v995_v5 = vcombine.low %v11641_v51, %v11642_v24  ;;  %438 = vst [vmem:[#allocation2 + $0x78] sm:$0x77] %v437_v62  ;;  %v491_v6 = vor.u32 %v490_v57, %v489_v55  ;;  %6594 = vmatprep.mubr.bf16.mxu0 %v2433_v58  ;;  %v996_v8 = vcombine.high %v11641_v51, %v11642_v24 }
 0x185   :  { %v11612_v7 = vld.sshfl [vmem:[#allocation2 + $0x28] sm:$0xf pattern:$0x76325410]  ;;  %v454_v11 = vsel %vm14816_vm7, %v446_v0, %v453_v41  ;;  %v483_v12 = vsel %vm14816_vm7, %v475_v1, %v482_v43  ;;  %v14936_v29 = vrot.slane %v11776_v59, %v14808_v48  ;;  %v13149_v16 = vld [vmem:[#allocation9 + $0x134] ss:$8 sps:$4 sm:$0xff]  }
 0x186   :  { %v11643_v25 = vld.sshfl [vmem:[#allocation2 + $0x20] sm:$0x5a pattern:$0x76325410]  ;;  %v11656_v17 = vrot.slane %v995_v5, 9  ;;  %v492_v19 = vrot.slane %v491_v6, 4  ;;  %6608 = vmatpush1.bf16.msra.mxu0 %v13135_v3  ;;  %v14969_v3 = vsel %vm14910_vm14, %v14838_v35, %v14842_v44 }
 0x187   :  { %v11614_v13 = vld.sshfl [vmem:[#allocation2 + $0x38] sm:$0xf pattern:$0x76325410]  ;;  %455 = vst [vmem:[#allocation2 + $0x88] sm:$0x77] %v454_v11  ;;  %6609 = vmatprep.subr.bf16.mxu0 %v13143_v4 }
 0x188   :  { %v11645_v14 = vld.sshfl [vmem:[#allocation2 + $0x30] sm:$0x5a pattern:$0x76325410]  ;;  %484 = vst [vmem:[#allocation2 + $0x98] sm:$0x77] %v483_v12  ;;  %v11778_v45 = vcombine.low %v11612_v7, %v11614_v13  ;;  %v500_v34 = vsel %vm14816_vm7, %v492_v19, %v499_v2 }
 0x189   :  { %v11644_v18 = vld.sshfl [vmem:[#allocation2 + $0x28] sm:$0x5a pattern:$0x76325410]  ;;  %v1106_v20 = vrot.slane %v996_v8, 7  ;;  %v827_v42 = vrot.slane %v825_v10, 7  ;;  %6595 = vmatmul.mubr.bf16.gmra.mrb[20].mxu0 %v2432_v27 }
 0x18a   :  { %v11646_v32 = vld.sshfl [vmem:[#allocation2 + $0x38] sm:$0x5a pattern:$0x76325410]  ;;  %v1011_v36 = vcombine.low %v11643_v25, %v11644_v18  ;;  %v1012_v30 = vcombine.high %v11643_v25, %v11644_v18  ;;  %v13141_v37 = vld [vmem:[#allocation9 + $0x120] ss:$8 sps:$4 sm:$0xff]   ;;  %v14941_v38 = vrot.slane %v11778_v45, %v14808_v48 }
 0x18b   :  { %v1027_v39 = vcombine.low %v11645_v14, %v11646_v32  ;;  %v1028_v40 = vcombine.high %v11645_v14, %v11646_v32  ;;  %501 = vst [vmem:[#allocation2 + $0xa8] sm:$0x77] %v500_v34  ;;  %v14945_v22 = vsel %vm14910_vm14, %v11656_v17, %v1106_v20  ;;  %v13147_v43 = vld [vmem:[#allocation9 + $0x130] ss:$8 sps:$4 sm:$0xff]   ;;  %v13155_v52 = vld [vmem:[#allocation9 + $0x144] ss:$8 sps:$4 sm:$0xff]   ;;  %6610 = vmatpush1.bf16.msra.mxu0 %v13141_v37 }
 0x18c   :  { %v11657_v28 = vrot.slane %v1011_v36, 9  ;;  %v1110_v41 = vrot.slane %v1012_v30, 7  ;;  %v2399_v46 = vcombine.high %v14936_v29, %v14941_v38  ;;  %v11649_v51 = vld.sshfl [vmem:[#allocation2 + $0x70] sm:$0x5a pattern:$0x76325410]  ;;  %v2524_v54 = vcombine.low %v14929_v15, %v14945_v22  ;;  %6611 = vmatprep.subr.bf16.mxu0 %v13149_v16 }
 0x18d   :  { %v11658_v47 = vrot.slane %v1027_v39, 9  ;;  %v1114_v49 = vrot.slane %v1028_v40, 7  ;;  %v11650_v55 = vld.sshfl [vmem:[#allocation2 + $0x78] sm:$0x5a pattern:$0x76325410]  ;;  %v828_v4 = vor.u32 %v827_v42, %v14918_v9  ;;  %v2525_v42 = vcombine.high %v14929_v15, %v14945_v22 }
 0x18e   :  { %v14951_v53 = vsel %vm14910_vm14, %v11657_v28, %v1110_v41  ;;  %v11651_v56 = vld.sshfl [vmem:[#allocation2 + $0x80] sm:$0x5a pattern:$0x76325410]  ;;  %6637 = vmatprep.mubr.bf16.mxu0 %v2399_v46  ;;  %v1059_v62 = vcombine.low %v11649_v51, %v11650_v55  ;;  %v1060_v0 = vcombine.high %v11649_v51, %v11650_v55  ;;  %v14972_v5 = vshll.u32 %v701_v26, 16 }
 0x18f   :  { %v14955_v57 = vld.sshfl [vmem:[#allocation2 + $0x60] sm:$0x5f pattern:$0x76325410]  ;;  %v14961_v59 = vsel %vm14910_vm14, %v11658_v47, %v1114_v49  ;;  %v2534_v13 = vrot.slane %v2524_v54, %v14808_v48  ;;  %6612 = vmatpush1.bf16.msra.mxu0 %v13147_v43  ;;  %v13159_v37 = vld [vmem:[#allocation9 + $0x150] ss:$8 sps:$4 sm:$0xff]  }
 0x190   :  { %v14957_v58 = vld.sshfl [vmem:[#allocation2 + $0x68] sm:$0x5f pattern:$0x76325410]  ;;  %v2526_v1 = vcombine.low %v14951_v53, %v14961_v59  ;;  %v11660_v8 = vrot.slane %v1059_v62, 9  ;;  %v1122_v10 = vrot.slane %v1060_v0, 7  ;;  %6613 = vmatprep.subr.bf16.mxu0 %v13155_v52  ;;  %v2527_v43 = vcombine.high %v14951_v53, %v14961_v59 }
 0x191   :  { %v11653_v24 = vld.sshfl [vmem:[#allocation2 + $0x90] sm:$0x5a pattern:$0x76325410]  ;;  %v13153_v11 = vld [vmem:[#allocation9 + $0x140] ss:$8 sps:$4 sm:$0xff]   ;;  %v14982_v26 = vcombine.low %v14955_v57, %v14957_v58 }
 0x192   :  { %v11652_v2 = vld.sshfl [vmem:[#allocation2 + $0x88] sm:$0x5a pattern:$0x76325410]  ;;  %v13161_v12 = vld [vmem:[#allocation9 + $0x154] ss:$8 sps:$4 sm:$0xff]   ;;  %v2548_v14 = vrot.slane %v2526_v1, %v14808_v48  ;;  %v14978_v44 = vsel %vm14910_vm14, %v11660_v8, %v1122_v10  ;;  %v15014_v8 = vrot.slane %v2525_v42, %v14808_v48  ;;  %v15017_v10 = vrot.slane %v2527_v43, %v14808_v48 }
 0x193   :  { %v11654_v6 = vld.sshfl [vmem:[#allocation2 + $0x98] sm:$0x5a pattern:$0x76325410]  ;;  %v1075_v7 = vcombine.low %v11651_v56, %v11652_v2  ;;  %v1076_v25 = vcombine.high %v11651_v56, %v11652_v2  ;;  %v13162_v17 = vld [vmem:[#allocation9 + $0x500] ss:$8 sps:$4 sm:$0xff]   ;;  %v2560_v40 = vcombine.low %v14969_v3, %v14978_v44  ;;  %6614 = vmatpush1.bf16.msra.mxu0 %v13153_v11  ;;  %v15059_v11 = vrot.slane %v11783_v31, %v14808_v48 }
 0x194   :  { %v1091_v19 = vcombine.low %v11653_v24, %v11654_v6  ;;  %v1092_v45 = vcombine.high %v11653_v24, %v11654_v6  ;;  %v13170_v35 = vld [vmem:[#allocation9 + $0x514] ss:$8 sps:$4 sm:$0xff]   ;;  %v2557_v27 = vcombine.high %v2534_v13, %v2548_v14  ;;  %v2556_v32 = vcombine.low %v2534_v13, %v2548_v14  ;;  %v13167_v46 = vld [vmem:[#allocation9 + $0x164] ss:$8 sps:$4 sm:$0xff]   ;;  %v13168_v47 = vld [vmem:[#allocation9 + $0x510] ss:$8 sps:$4 sm:$0xff]   ;;  %6615 = vmatprep.subr.bf16.mxu0 %v13161_v12 }
 0x195   :  { %v11661_v9 = vrot.slane %v1075_v7, 9  ;;  %v1126_v18 = vrot.slane %v1076_v25, 7  ;;  %v11625_v20 = vld.sshfl [vmem:[#allocation2 + $0x10] sm:$0x5f pattern:$0x76325410]  ;;  %v2570_v53 = vrot.slane %v2560_v40, %v14808_v48  ;;  %v765_v13 = vcombine.high %v14955_v57, %v14957_v58 }
 0x196   :  { %v11662_v36 = vrot.slane %v1091_v19, 9  ;;  %v1130_v30 = vrot.slane %v1092_v45, 7  ;;  %v11626_v34 = vld.sshfl [vmem:[#allocation2 + $0x18] sm:$0x5f pattern:$0x76325410]  ;;  %6796 = vmatprep.mubr.bf16.mxu1 %v2557_v27 }
 0x197   :  { %v14986_v39 = vsel %vm14910_vm14, %v11661_v9, %v1126_v18  ;;  %v11627_v16 = vld.sshfl [vmem:[#allocation2 + $0x20] sm:$0x5f pattern:$0x76325410]  ;;  %v14990_v28 = vrot.slane %v828_v4, 2  ;;  %v833_v41 = vrot.slane %v14972_v5, 7  ;;  %v716_v52 = vcombine.low %v11625_v20, %v11626_v34  ;;  %6797 = vmatmul.mubr.bf16.vlgmr.msra.gmra.mrb[0].mxu1 %v2556_v32  ;;  %6616 = vmatpush1.bf16.msra.mxu0 %v13159_v37 }
 0x198   :  { %v14999_v49 = vsel %vm14910_vm14, %v11662_v36, %v1130_v30  ;;  %v11628_v51 = vld.sshfl [vmem:[#allocation2 + $0x28] sm:$0x5f pattern:$0x76325410]  ;;  %v878_v15 = vshrl.u32 %v14982_v26, 16  ;;  %v881_v22 = vshll.u32 %v14982_v26, 16  ;;  %6818 = vmatpush1.bf16.msra.mxu1 %v13162_v17  ;;  %v717_v59 = vcombine.high %v11625_v20, %v11626_v34  ;;  %6617 = vmatprep.subr.bf16.mxu0 %v13167_v46 }
 0x199   :  { %v2562_v54 = vcombine.low %v14986_v39, %v14999_v49  ;;  %v15003_v55 = vld.sshfl [vmem:[#allocation2 + $0x30] sm:$0x5f pattern:$0x76325410]  ;;  %v732_v24 = vcombine.low %v11627_v16, %v11628_v51  ;;  %v836_v62 = vshrl.u32 %v716_v52, 16  ;;  %6819 = vmatprep.subr.bf16.mxu1 %v13170_v35  ;;  %v733_v2 = vcombine.high %v11627_v16, %v11628_v51 }
 0x19a   :  { %v15008_v56 = vld.sshfl [vmem:[#allocation2 + $0x38] sm:$0x5f pattern:$0x76325410]  ;;  %v13176_v1 = vld [vmem:[#allocation9 + $0x524] ss:$8 sps:$4 sm:$0xff]   ;;  %v2559_v51 = vcombine.high %v15014_v8, %v15017_v10 }
 0x19b   :  { %v2584_v0 = vrot.slane %v2562_v54, %v14808_v48  ;;  %v748_v4 = vcombine.low %v15003_v55, %v15008_v56  ;;  %v839_v6 = vshll.u32 %v716_v52, 16  ;;  %v13165_v7 = vld [vmem:[#allocation9 + $0x160] ss:$8 sps:$4 sm:$0xff]   ;;  %v13173_v25 = vld [vmem:[#allocation9 + $0x174] ss:$8 sps:$4 sm:$0xff]   ;;  %v838_v12 = vrot.slane %v836_v62, 6 }
 0x19c   :  { %v850_v45 = vshrl.u32 %v732_v24, 16  ;;  %v11669_v35 = vld.sshfl [vmem:[#allocation2 + $0x40] sm:$0xf pattern:$0x76325410]  ;;  %6820 = vmatpush1.bf16.msra.mxu1 %v13168_v47  ;;  %v749_v18 = vcombine.high %v15003_v55, %v15008_v56  ;;  %v15029_v20 = vshll.u32 %v717_v59, 16  ;;  %6618 = vmatpush1.bf16.msra.mxu0 %v13165_v7 }
 0x19d   :  { %v2593_v14 = vcombine.high %v2570_v53, %v2584_v0  ;;  %v2592_v17 = vcombine.low %v2570_v53, %v2584_v0  ;;  %v841_v19 = vrot.slane %v839_v6, 7  ;;  %v13174_v9 = vld [vmem:[#allocation9 + $0x520] ss:$8 sps:$4 sm:$0xff]   ;;  %v853_v26 = vshll.u32 %v732_v24, 16  ;;  %v13171_v32 = vld [vmem:[#allocation9 + $0x170] ss:$8 sps:$4 sm:$0xff]   ;;  %6821 = vmatprep.subr.bf16.mxu1 %v13176_v1  ;;  %6619 = vmatprep.subr.bf16.mxu0 %v13173_v25 }
 0x19e   :  { %v864_v27 = vshrl.u32 %v748_v4, 16  ;;  %v13182_v57 = vld [vmem:[#allocation9 + $0x534] ss:$8 sps:$4 sm:$0xff]   ;;  %v852_v30 = vrot.slane %v850_v45, 6  ;;  %v859_v34 = vshll.u32 %v733_v2, 16  ;;  %v867_v37 = vshll.u32 %v748_v4, 16 }
 0x19f   :  { %6806 = vmatprep.mubr.bf16.mxu1 %v2593_v14  ;;  %v842_v36 = vor.u32 %v841_v19, %v838_v12  ;;  %v13179_v40 = vld [vmem:[#allocation9 + $0x184] ss:$8 sps:$4 sm:$0xff]   ;;  %v13180_v16 = vld [vmem:[#allocation9 + $0x530] ss:$8 sps:$4 sm:$0xff]   ;;  %v855_v42 = vrot.slane %v853_v26, 7  ;;  %v15038_v46 = vrot.slane %v878_v15, 6  ;;  %v11785_v53 = vcombine.low %v14871_v60, %v11669_v35 }
 0x1a0   :  { %v866_v43 = vrot.slane %v864_v27, 6  ;;  %v15040_v47 = vrot.slane %v881_v22, 7  ;;  %6807 = vmatmul.mubr.bf16.gmra.mrb[4].mxu1 %v2592_v17  ;;  %v869_v52 = vrot.slane %v867_v37, 7  ;;  %v16133_v55 = vmov 0  ;;  %v13177_v24 = vld [vmem:[#allocation9 + $0x180] ss:$8 sps:$4 sm:$0xff]   ;;  %6620 = vmatpush1.bf16.msra.mxu0 %v13171_v32 }
 0x1a1   :  { %v11633_v54 = vld.sshfl [vmem:[#allocation2 + $0x70] sm:$0x5f pattern:$0x76325410]  ;;  %6822 = vmatpush1.bf16.msra.mxu1 %v13174_v9  ;;  %v16134_v55 = vsel %vm15047_vm5, 4294967295, %v16133_v55  ;;  %v847_v15 = vrot.slane %v15029_v20, 7  ;;  %v856_v22 = vor.u32 %v855_v42, %v852_v30  ;;  %6849 = vmatprep.mubr.bf16.mxu1 %v2559_v51  ;;  %v15062_v60 = vrot.slane %v11785_v53, %v14808_v48 }
 0x1a2   :  { %16135 = vst [vmem:[#allocation25_spill] sm:$0xff] %v16134_v55  ;;  %v11634_v56 = vld.sshfl [vmem:[#allocation2 + $0x78] sm:$0x5f pattern:$0x76325410]  ;;  %v15053_v59 = vshll.u32 %v765_v13, 16  ;;  %6823 = vmatprep.subr.bf16.mxu1 %v13182_v57  ;;  %v870_v2 = vor.u32 %v869_v52, %v866_v43  ;;  %v15069_v17 = vsel %vm15047_vm5, %v14990_v28, %v833_v41  ;;  %6621 = vmatprep.subr.bf16.mxu0 %v13179_v40 }
 0x1a3   :  { %v13188_v62 = vld [vmem:[#allocation9 + $0x544] ss:$8 sps:$4 sm:$0xff]   ;;  %v843_v0 = vrot.slane %v842_v36, 2  ;;  %v861_v1 = vrot.slane %v859_v34, 7  ;;  %v873_v4 = vshll.u32 %v749_v18, 16  ;;  %v857_v25 = vrot.slane %v856_v22, 2 }
 0x1a4   :  { %v13185_v6 = vld [vmem:[#allocation9 + $0x194] ss:$8 sps:$4 sm:$0xff]   ;;  %v13186_v7 = vld [vmem:[#allocation9 + $0x540] ss:$8 sps:$4 sm:$0xff]   ;;  %v780_v13 = vcombine.low %v11633_v54, %v11634_v56  ;;  %v871_v19 = vrot.slane %v870_v2, 2  ;;  %v781_v31 = vcombine.high %v11633_v54, %v11634_v56  ;;  %v884_v35 = vor.u32 %v15040_v47, %v15038_v46  ;;  %6622 = vmatpush1.bf16.msra.mxu0 %v13177_v24 }
 0x1a5   :  { %v11636_v12 = vld.sshfl [vmem:[#allocation2 + $0x88] sm:$0x5f pattern:$0x76325410]  ;;  %v13194_v14 = vld [vmem:[#allocation9 + $0x554] ss:$8 sps:$4 sm:$0xff]   ;;  %6824 = vmatpush1.bf16.msra.mxu1 %v13180_v16  ;;  %v2637_v18 = vcombine.high %v15059_v11, %v15062_v60  ;;  %v15079_v27 = vsel %vm15047_vm5, %v843_v0, %v847_v15  ;;  %v15083_v32 = vsel %vm15047_vm5, %v857_v25, %v861_v1  ;;  %6623 = vmatprep.subr.bf16.mxu0 %v13185_v6 }
 0x1a6   :  { %v11635_v45 = vld.sshfl [vmem:[#allocation2 + $0x80] sm:$0x5f pattern:$0x76325410]  ;;  %v892_v9 = vshrl.u32 %v780_v13, 16  ;;  %6825 = vmatprep.subr.bf16.mxu1 %v13188_v62  ;;  %v875_v5 = vrot.slane %v873_v4, 7 }
 0x1a7   :  { %v11638_v50 = vld.sshfl [vmem:[#allocation2 + $0x98] sm:$0x5f pattern:$0x76325410]  ;;  %v796_v41 = vcombine.low %v11635_v45, %v11636_v12  ;;  %v797_v20 = vcombine.high %v11635_v45, %v11636_v12  ;;  %v13191_v36 = vld [vmem:[#allocation9 + $0x1a4] ss:$8 sps:$4 sm:$0xff]   ;;  %v2445_v12 = vcombine.high %v15069_v17, %v15079_v27 }
 0x1a8   :  { %v11637_v28 = vld.sshfl [vmem:[#allocation2 + $0x90] sm:$0x5f pattern:$0x76325410]  ;;  %v894_v30 = vrot.slane %v892_v9, 6  ;;  %v895_v34 = vshll.u32 %v780_v13, 16  ;;  %v15087_v42 = vsel %vm15047_vm5, %v871_v19, %v875_v5 }
 0x1a9   :  { %v13183_v26 = vld [vmem:[#allocation9 + $0x190] ss:$8 sps:$4 sm:$0xff]   ;;  %v812_v57 = vcombine.low %v11637_v28, %v11638_v50  ;;  %v813_v58 = vcombine.high %v11637_v28, %v11638_v50  ;;  %v906_v37 = vshrl.u32 %v796_v41, 16  ;;  %v909_v40 = vshll.u32 %v796_v41, 16  ;;  %6826 = vmatpush1.bf16.msra.mxu1 %v13186_v7  ;;  %v13200_v51 = vld [vmem:[#allocation9 + $0x564] ss:$8 sps:$4 sm:$0xff]  }
 0x1aa   :  { %v13192_v16 = vld [vmem:[#allocation9 + $0x550] ss:$8 sps:$4 sm:$0xff]   ;;  %v901_v43 = vshll.u32 %v781_v31, 16  ;;  %6827 = vmatprep.subr.bf16.mxu1 %v13194_v14  ;;  %v897_v52 = vrot.slane %v895_v34, 7  ;;  %v915_v22 = vshll.u32 %v797_v20, 16  ;;  %v885_v53 = vrot.slane %v884_v35, 2  ;;  %6624 = vmatpush1.bf16.msra.mxu0 %v13183_v26 }
 0x1ab   :  { %v920_v46 = vshrl.u32 %v812_v57, 16  ;;  %v923_v47 = vshll.u32 %v812_v57, 16  ;;  %v908_v54 = vrot.slane %v906_v37, 6  ;;  %v911_v15 = vrot.slane %v909_v40, 7  ;;  %v13189_v62 = vld [vmem:[#allocation9 + $0x1a0] ss:$8 sps:$4 sm:$0xff]   ;;  %6625 = vmatprep.subr.bf16.mxu0 %v13191_v36 }
 0x1ac   :  { %v889_v56 = vrot.slane %v15053_v59, 7  ;;  %v898_v0 = vor.u32 %v897_v52, %v894_v30  ;;  %v929_v4 = vshll.u32 %v813_v58, 16  ;;  %v13197_v6 = vld [vmem:[#allocation9 + $0x1b4] ss:$8 sps:$4 sm:$0xff]   ;;  %v13198_v7 = vld [vmem:[#allocation9 + $0x560] ss:$8 sps:$4 sm:$0xff]   ;;  %v2447_v13 = vcombine.high %v15083_v32, %v15087_v42 }
 0x1ad   :  { %v922_v24 = vrot.slane %v920_v46, 6  ;;  %v912_v1 = vor.u32 %v911_v15, %v908_v54  ;;  %v925_v2 = vrot.slane %v923_v47, 7  ;;  %6828 = vmatpush1.bf16.msra.mxu1 %v13192_v16  ;;  %v903_v25 = vrot.slane %v901_v43, 7  ;;  %v13206_v59 = vld [vmem:[#allocation9 + $0x574] ss:$8 sps:$4 sm:$0xff]  }
 0x1ae   :  { %6829 = vmatprep.subr.bf16.mxu1 %v13200_v51  ;;  %v899_v14 = vrot.slane %v898_v0, 2  ;;  %v917_v45 = vrot.slane %v915_v22, 7  ;;  %v15096_v31 = vsel %vm15047_vm5, %v885_v53, %v889_v56  ;;  %v15099_v35 = vrot.slane %v2445_v12, %v14808_v48  ;;  %6626 = vmatpush1.bf16.msra.mxu0 %v13189_v62  ;;  %v13195_v5 = vld [vmem:[#allocation9 + $0x1b0] ss:$8 sps:$4 sm:$0xff]   ;;  %v13203_v57 = vld [vmem:[#allocation9 + $0x1c4] ss:$8 sps:$4 sm:$0xff]  }
 0x1af   :  { %v913_v19 = vrot.slane %v912_v1, 2  ;;  %v926_v50 = vor.u32 %v925_v2, %v922_v24  ;;  %v15102_v9 = vrot.slane %v2447_v13, %v14808_v48  ;;  %v931_v26 = vrot.slane %v929_v4, 7  ;;  %6627 = vmatprep.subr.bf16.mxu0 %v13197_v6  ;;  %v13204_v58 = vld [vmem:[#allocation9 + $0x570] ss:$8 sps:$4 sm:$0xff]   ;;  %v13212_v34 = vld [vmem:[#allocation9 + $0x584] ss:$8 sps:$4 sm:$0xff]  }
 0x1b0   :  { %v15106_v28 = vsel %vm15047_vm5, %v899_v14, %v903_v25  ;;  %v13201_v46 = vld [vmem:[#allocation9 + $0x1c0] ss:$8 sps:$4 sm:$0xff]   ;;  %v13209_v51 = vld [vmem:[#allocation9 + $0x1d4] ss:$8 sps:$4 sm:$0xff]   ;;  %v13207_v53 = vld [vmem:[#allocation9 + $0x1d0] ss:$8 sps:$4 sm:$0xff]  }
 0x1b1   :  { %v15110_v41 = vsel %vm15047_vm5, %v913_v19, %v917_v45  ;;  %v927_v20 = vrot.slane %v926_v50, 2  ;;  %6830 = vmatpush1.bf16.msra.mxu1 %v13198_v7  ;;  %v2481_v40 = vcombine.high %v15096_v31, %v15106_v28  ;;  %v13210_v52 = vld [vmem:[#allocation9 + $0x580] ss:$8 sps:$4 sm:$0xff]   ;;  %v13218_v15 = vld [vmem:[#allocation9 + $0x594] ss:$8 sps:$4 sm:$0xff]  }
 0x1b2   :  { %6831 = vmatprep.subr.bf16.mxu1 %v13206_v59  ;;  %v2720_v16 = vcombine.low %v15106_v28, %v15110_v41  ;;  %6628 = vmatpush1.bf16.msra.mxu0 %v13195_v5  ;;  %v2721_v47 = vcombine.high %v15106_v28, %v15110_v41  ;;  %v11616_v56 = vld.sshfl [vmem:[#allocation2 + $0x68] sm:$0xf pattern:$0x76325410]  ;;  %v13216_v4 = vld [vmem:[#allocation9 + $0x590] ss:$8 sps:$4 sm:$0xff]  }
 0x1b3   :  { %v15118_v37 = vsel %vm15047_vm5, %v927_v20, %v931_v26  ;;  %6629 = vmatprep.subr.bf16.mxu0 %v13203_v57  ;;  %v15132_v22 = vrot.slane %v2481_v40, %v14808_v48  ;;  %v11618_v24 = vld.sshfl [vmem:[#allocation2 + $0x78] sm:$0xf pattern:$0x76325410]  ;;  %v13215_v62 = vld [vmem:[#allocation9 + $0x1e4] ss:$8 sps:$4 sm:$0xff]  }
 0x1b4   :  { %v2483_v43 = vcombine.high %v15110_v41, %v15118_v37  ;;  %v11620_v0 = vld.sshfl [vmem:[#allocation2 + $0x88] sm:$0xf pattern:$0x76325410]  ;;  %v11780_v12 = vcombine.low %v11616_v56, %v11618_v24  ;;  %v13221_v59 = vld [vmem:[#allocation9 + $0x1f4] ss:$8 sps:$4 sm:$0xff]  }
 0x1b5   :  { %6832 = vmatpush1.bf16.msra.mxu1 %v13204_v58  ;;  %v11622_v6 = vld.sshfl [vmem:[#allocation2 + $0x98] sm:$0xf pattern:$0x76325410]  ;;  %v13224_v7 = vld [vmem:[#allocation9 + $0x5a4] ss:$8 sps:$4 sm:$0xff]  }
 0x1b6   :  { %v15129_v54 = vrot.slane %v2483_v43, %v14808_v48  ;;  %6833 = vmatprep.subr.bf16.mxu1 %v13212_v34  ;;  %6630 = vmatpush1.bf16.msra.mxu0 %v13201_v46  ;;  %v13213_v25 = vld [vmem:[#allocation9 + $0x1e0] ss:$8 sps:$4 sm:$0xff]   ;;  %v11782_v13 = vcombine.low %v11620_v0, %v11622_v6  ;;  %v13230_v19 = vld [vmem:[#allocation9 + $0x5b4] ss:$8 sps:$4 sm:$0xff]   ;;  %v13219_v45 = vld [vmem:[#allocation9 + $0x1f0] ss:$8 sps:$4 sm:$0xff]   ;;  %v15139_v50 = vrot.slane %v11780_v12, %v14808_v48 }
 0x1b7   :  { %6631 = vmatprep.subr.bf16.mxu0 %v13209_v51  ;;  %v13222_v14 = vld [vmem:[#allocation9 + $0x5a0] ss:$8 sps:$4 sm:$0xff]   ;;  %v13227_v20 = vld [vmem:[#allocation9 + $0x204] ss:$8 sps:$4 sm:$0xff]   ;;  %v13228_v26 = vld [vmem:[#allocation9 + $0x5b0] ss:$8 sps:$4 sm:$0xff]   ;;  %v2398_v46 = vcombine.low %v14936_v29, %v14941_v38 }
 0x1b8   :  { %v15142_v5 = vrot.slane %v11782_v13, %v14808_v48  ;;  %v13236_v57 = vld [vmem:[#allocation9 + $0x5c4] ss:$8 sps:$4 sm:$0xff]   ;;  %v13225_v58 = vld [vmem:[#allocation9 + $0x200] ss:$8 sps:$4 sm:$0xff]   ;;  %v13233_v40 = vld [vmem:[#allocation9 + $0x214] ss:$8 sps:$4 sm:$0xff]  }
 0x1b9   :  { %6834 = vmatpush1.bf16.msra.mxu1 %v13210_v52  ;;  %v13234_v43 = vld [vmem:[#allocation9 + $0x5c0] ss:$8 sps:$4 sm:$0xff]   ;;  %v13242_v51 = vld [vmem:[#allocation9 + $0x5d4] ss:$8 sps:$4 sm:$0xff]   ;;  %v2446_v52 = vcombine.low %v15083_v32, %v15087_v42  ;;  %v13231_v56 = vld [vmem:[#allocation9 + $0x210] ss:$8 sps:$4 sm:$0xff]  }
 0x1ba   :  { %6835 = vmatprep.subr.bf16.mxu1 %v13218_v15  ;;  %6632 = vmatpush1.bf16.msra.mxu0 %v13207_v53  ;;  %v2435_v34 = vcombine.high %v15139_v50, %v15142_v5  ;;  %v11679_v15 = vld.sshfl [vmem:[#allocation2 + $0x10] sm:$0x5f pattern:$0x76325410] }
 0x1bb   :  { %6633 = vmatprep.subr.bf16.mxu0 %v13215_v62  ;;  %v11680_v53 = vld.sshfl [vmem:[#allocation2 + $0x18] sm:$0x5f pattern:$0x76325410]  ;;  %v13239_v24 = vld [vmem:[#allocation9 + $0x224] ss:$8 sps:$4 sm:$0xff]   ;;  %v2444_v62 = vcombine.low %v15069_v17, %v15079_v27  ;;  %v15153_v32 = vrot.slane %v2446_v52, %v14808_v48 }
 0x1bc   :  { %v13240_v0 = vld [vmem:[#allocation9 + $0x5d0] ss:$8 sps:$4 sm:$0xff]   ;;  %v1331_v29 = vcombine.high %v11679_v15, %v11680_v53  ;;  %v13248_v38 = vld [vmem:[#allocation9 + $0x5e4] ss:$8 sps:$4 sm:$0xff]   ;;  %v13245_v13 = vld [vmem:[#allocation9 + $0x234] ss:$8 sps:$4 sm:$0xff]  }
 0x1bd   :  { %6836 = vmatpush1.bf16.msra.mxu1 %v13216_v4  ;;  %v1330_v4 = vcombine.low %v11679_v15, %v11680_v53  ;;  %v11681_v6 = vld.sshfl [vmem:[#allocation2 + $0x20] sm:$0x5f pattern:$0x76325410] }
 0x1be   :  { %6837 = vmatprep.subr.bf16.mxu1 %v13224_v7  ;;  %6634 = vmatpush1.bf16.msra.mxu0 %v13213_v25  ;;  %v13237_v7 = vld [vmem:[#allocation9 + $0x220] ss:$8 sps:$4 sm:$0xff]   ;;  %v15155_v27 = vshll.u32 %v1331_v29, 16 }
 0x1bf   :  { %6635 = vmatprep.subr.bf16.mxu0 %v13221_v59  ;;  %v11682_v42 = vld.sshfl [vmem:[#allocation2 + $0x28] sm:$0x5f pattern:$0x76325410]  ;;  %v1445_v25 = vshrl.u32 %v1330_v4, 16  ;;  %v1448_v12 = vshll.u32 %v1330_v4, 16 }
 0x1c0   :  { %v13246_v59 = vld [vmem:[#allocation9 + $0x5e0] ss:$8 sps:$4 sm:$0xff]   ;;  %v1347_v17 = vcombine.high %v11681_v6, %v11682_v42  ;;  %v13251_v4 = vld [vmem:[#allocation9 + $0x244] ss:$8 sps:$4 sm:$0xff]  }
 0x1c1   :  { %6838 = vmatpush1.bf16.msra.mxu1 %v13222_v14  ;;  %v11683_v14 = vld.sshfl [vmem:[#allocation2 + $0x30] sm:$0x5f pattern:$0x76325410] }
 0x1c2   :  { %6839 = vmatprep.subr.bf16.mxu1 %v13230_v19  ;;  %6636 = vmatpush1.bf16.msra.mxu0 %v13219_v45  ;;  %v1346_v19 = vcombine.low %v11681_v6, %v11682_v42  ;;  %v15158_v45 = vrot.slane %v2444_v62, %v14808_v48  ;;  %v11686_v53 = vld.sshfl [vmem:[#allocation2 + $0x48] sm:$0x5f pattern:$0x76325410] }
 0x1c3   :  { %6658 = vmatprep.subr.bf16.mxu0 %v13227_v20  ;;  %v13254_v20 = vld [vmem:[#allocation9 + $0x5f4] ss:$8 sps:$4 sm:$0xff]   ;;  %v15317_v2 = vld.sshfl [vmem:[#allocation2 + $0x70] sm:$0xf pattern:$0x76325410] }
 0x1c4   :  { %v1459_v52 = vshrl.u32 %v1346_v19, 16  ;;  %v2477_v15 = vcombine.high %v15158_v45, %v15153_v32  ;;  %v1462_v62 = vshll.u32 %v1346_v19, 16  ;;  %v11675_v21 = vld.sshfl [vmem:[#allocation2 + $0x90] sm:$0xf pattern:$0x76325410] }
 0x1c5   :  { %6840 = vmatpush1.bf16.msra.mxu1 %v13228_v26  ;;  %6638 = vmatmul.mubr.bf16.vlgmr.msra.gmra.mrb[16].mxu0 %v2398_v46  ;;  %v2563_v26 = vcombine.high %v14986_v39, %v14999_v49  ;;  %v1468_v39 = vshll.u32 %v1347_v17, 16  ;;  %v13243_v49 = vld [vmem:[#allocation9 + $0x230] ss:$8 sps:$4 sm:$0xff]   ;;  %v13249_v17 = vld [vmem:[#allocation9 + $0x240] ss:$8 sps:$4 sm:$0xff]  }
 0x1c6   :  { %6841 = vmatprep.subr.bf16.mxu1 %v13236_v57  ;;  %6659 = vmatpush1.bf16.msra.mxu0 %v13225_v58  ;;  %v11684_v57 = vld.sshfl [vmem:[#allocation2 + $0x38] sm:$0x5f pattern:$0x76325410]  ;;  %v1447_v58 = vrot.slane %v1445_v25, 6  ;;  %v1461_v6 = vrot.slane %v1459_v52, 6 }
 0x1c7   :  { %6647 = vmatprep.mubr.bf16.mxu0 %v2435_v34  ;;  %6660 = vmatprep.subr.bf16.mxu0 %v13233_v40  ;;  %v1450_v34 = vrot.slane %v1448_v12, 7  ;;  %v2434_v40 = vcombine.low %v15139_v50, %v15142_v5  ;;  %v1362_v46 = vcombine.low %v11683_v14, %v11684_v57  ;;  %v2561_v50 = vcombine.high %v14969_v3, %v14978_v44  ;;  %v13260_v3 = vld [vmem:[#allocation9 + $0x604] ss:$8 sps:$4 sm:$0xff]   ;;  %v13258_v52 = vld [vmem:[#allocation9 + $0x600] ss:$8 sps:$4 sm:$0xff]  }
 0x1c8   :  { %v15169_v29 = vrot.slane %v2563_v26, %v14808_v48  ;;  %v1464_v42 = vrot.slane %v1462_v62, 7 }
 0x1c9   :  { %6842 = vmatpush1.bf16.msra.mxu1 %v13234_v43  ;;  %v11685_v43 = vld.sshfl [vmem:[#allocation2 + $0x40] sm:$0x5f pattern:$0x76325410]  ;;  %v1473_v25 = vshrl.u32 %v1362_v46, 16  ;;  %v1476_v12 = vshll.u32 %v1362_v46, 16 }
 0x1ca   :  { %6843 = vmatprep.subr.bf16.mxu1 %v13242_v51  ;;  %6661 = vmatpush1.bf16.msra.mxu0 %v13231_v56  ;;  %v1363_v51 = vcombine.high %v11683_v14, %v11684_v57  ;;  %v1451_v56 = vor.u32 %v1450_v34, %v1447_v58  ;;  %v1378_v5 = vcombine.low %v11685_v43, %v11686_v53  ;;  %v1470_v57 = vrot.slane %v1468_v39, 7  ;;  %v13257_v34 = vld [vmem:[#allocation9 + $0x254] ss:$8 sps:$4 sm:$0xff]  }
 0x1cb   :  { %6662 = vmatprep.subr.bf16.mxu0 %v13239_v24  ;;  %v1379_v24 = vcombine.high %v11685_v43, %v11686_v53  ;;  %v1475_v26 = vrot.slane %v1473_v25, 6  ;;  %v11693_v53 = vld.sshfl [vmem:[#allocation2 + $0xa0] sm:$0x5f pattern:$0x76325410] }
 0x1cc   :  { %v1482_v14 = vshll.u32 %v1363_v51, 16  ;;  %v1487_v19 = vshrl.u32 %v1378_v5, 16  ;;  %v1452_v44 = vrot.slane %v1451_v56, 2  ;;  %v1490_v58 = vshll.u32 %v1378_v5, 16  ;;  %v13255_v56 = vld [vmem:[#allocation9 + $0x250] ss:$8 sps:$4 sm:$0xff]  }
 0x1cd   :  { %6844 = vmatpush1.bf16.msra.mxu1 %v13240_v0  ;;  %6648 = vmatmul.mubr.bf16.gmra.mrb[20].mxu0 %v2434_v40  ;;  %v13252_v0 = vld [vmem:[#allocation9 + $0x5f0] ss:$8 sps:$4 sm:$0xff]   ;;  %v1478_v40 = vrot.slane %v1476_v12, 7 }
 0x1ce   :  { %6845 = vmatprep.subr.bf16.mxu1 %v13248_v38  ;;  %6663 = vmatpush1.bf16.msra.mxu0 %v13237_v7  ;;  %v1456_v38 = vrot.slane %v15155_v27, 7  ;;  %v1465_v7 = vor.u32 %v1464_v42, %v1461_v6  ;;  %v1489_v43 = vrot.slane %v1487_v19, 6  ;;  %v1496_v27 = vshll.u32 %v1379_v24, 16 }
 0x1cf   :  { %6690 = vmatprep.mubr.bf16.mxu0 %v2477_v15  ;;  %6664 = vmatprep.subr.bf16.mxu0 %v13245_v13  ;;  %v15173_v13 = vrot.slane %v2561_v50, %v14808_v48  ;;  %v1484_v46 = vrot.slane %v1482_v14, 7  ;;  %v1492_v51 = vrot.slane %v1490_v58, 7  ;;  %v1479_v15 = vor.u32 %v1478_v40, %v1475_v26  ;;  %v11694_v5 = vld.sshfl [vmem:[#allocation2 + $0xa8] sm:$0x5f pattern:$0x76325410] }
 0x1d0   :  { %v15181_v39 = vsel %vm15047_vm5, %v1452_v44, %v1456_v38  ;;  %v1498_v24 = vrot.slane %v1496_v27, 7  ;;  %v1443_v6 = vcombine.high %v11693_v53, %v11694_v5  ;;  %v11696_v38 = vld.sshfl [vmem:[#allocation2 + $0x18] sm:$0x5a pattern:$0x76325410] }
 0x1d1   :  { %6846 = vmatpush1.bf16.msra.mxu1 %v13246_v59  ;;  %v1466_v59 = vrot.slane %v1465_v7, 2  ;;  %v2595_v62 = vcombine.high %v15173_v13, %v15169_v29  ;;  %v1493_v50 = vor.u32 %v1492_v51, %v1489_v43  ;;  %v11695_v19 = vld.sshfl [vmem:[#allocation2 + $0x10] sm:$0x5a pattern:$0x76325410] }
 0x1d2   :  { %6847 = vmatprep.subr.bf16.mxu1 %v13254_v20  ;;  %6665 = vmatpush1.bf16.msra.mxu0 %v13243_v49  ;;  %v2558_v20 = vcombine.low %v15014_v8, %v15017_v10  ;;  %v13263_v8 = vld [vmem:[#allocation9 + $0x264] ss:$8 sps:$4 sm:$0xff]   ;;  %v13266_v10 = vld [vmem:[#allocation9 + $0x614] ss:$8 sps:$4 sm:$0xff]   ;;  %v13264_v44 = vld [vmem:[#allocation9 + $0x610] ss:$8 sps:$4 sm:$0xff]   ;;  %v1602_v26 = vcombine.low %v11695_v19, %v11696_v38 }
 0x1d3   :  { %6666 = vmatprep.subr.bf16.mxu0 %v13251_v4  ;;  %v15185_v49 = vsel %vm15047_vm5, %v1466_v59, %v1470_v57  ;;  %v1480_v4 = vrot.slane %v1479_v15, 2  ;;  %v1494_v42 = vrot.slane %v1493_v50, 2  ;;  %v13272_v7 = vld [vmem:[#allocation9 + $0x624] ss:$8 sps:$4 sm:$0xff]   ;;  %v1552_v58 = vshll.u32 %v1443_v6, 16 }
 0x1d4   :  { %v2685_v25 = vcombine.high %v15181_v39, %v15185_v49  ;;  %v13270_v59 = vld [vmem:[#allocation9 + $0x620] ss:$8 sps:$4 sm:$0xff]   ;;  %v11711_v15 = vrot.slane %v1602_v26, 9 }
 0x1d5   :  { %6848 = vmatpush1.bf16.msra.mxu1 %v13252_v0  ;;  %v1442_v0 = vcombine.low %v11693_v53, %v11694_v5  ;;  %v15191_v57 = vsel %vm15047_vm5, %v1480_v4, %v1484_v46  ;;  %v1554_v51 = vrot.slane %v1552_v58, 7  ;;  %v1603_v46 = vcombine.high %v11695_v19, %v11696_v38  ;;  %v13278_v53 = vld [vmem:[#allocation9 + $0x634] ss:$8 sps:$4 sm:$0xff]  }
 0x1d6   :  { %6870 = vmatprep.subr.bf16.mxu1 %v13260_v3  ;;  %6667 = vmatpush1.bf16.msra.mxu0 %v13249_v17  ;;  %v13261_v3 = vld [vmem:[#allocation9 + $0x260] ss:$8 sps:$4 sm:$0xff]   ;;  %v15195_v17 = vsel %vm15047_vm5, %v1494_v42, %v1498_v24  ;;  %v15200_v50 = vrot.slane %v2685_v25, %v14808_v48  ;;  %v13267_v24 = vld [vmem:[#allocation9 + $0x270] ss:$8 sps:$4 sm:$0xff]   ;;  %v15211_v25 = vrot.slane %v2720_v16, %v14808_v48  ;;  %v13275_v16 = vld [vmem:[#allocation9 + $0x284] ss:$8 sps:$4 sm:$0xff]  }
 0x1d7   :  { %6668 = vmatprep.subr.bf16.mxu0 %v13257_v34  ;;  %v1543_v12 = vshrl.u32 %v1442_v0, 16  ;;  %v1546_v14 = vshll.u32 %v1442_v0, 16  ;;  %v13269_v34 = vld [vmem:[#allocation9 + $0x274] ss:$8 sps:$4 sm:$0xff]   ;;  %v2687_v27 = vcombine.high %v15191_v57, %v15195_v17  ;;  %v1718_v42 = vrot.slane %v1603_v46, 7 }
 0x1d8   :  { %6850 = vmatmul.mubr.bf16.vlgmr.msra.gmra.mrb[0].mxu1 %v2558_v20  ;;  %v11698_v20 = vld.sshfl [vmem:[#allocation2 + $0x28] sm:$0x5a pattern:$0x76325410]  ;;  %v13281_v46 = vld [vmem:[#allocation9 + $0x294] ss:$8 sps:$4 sm:$0xff]  }
 0x1d9   :  { %6859 = vmatprep.mubr.bf16.mxu1 %v2595_v62  ;;  %6871 = vmatpush1.bf16.msra.mxu1 %v13258_v52  ;;  %v1545_v40 = vrot.slane %v1543_v12, 6  ;;  %v1548_v43 = vrot.slane %v1546_v14, 7  ;;  %v11697_v52 = vld.sshfl [vmem:[#allocation2 + $0x20] sm:$0x5a pattern:$0x76325410]  ;;  %v15203_v5 = vrot.slane %v2687_v27, %v14808_v48 }
 0x1da   :  { %6872 = vmatprep.subr.bf16.mxu1 %v13266_v10  ;;  %6669 = vmatpush1.bf16.msra.mxu0 %v13255_v56  ;;  %v11699_v10 = vld.sshfl [vmem:[#allocation2 + $0x30] sm:$0x5a pattern:$0x76325410]  ;;  %v1618_v4 = vcombine.low %v11697_v52, %v11698_v20  ;;  %v2594_v56 = vcombine.low %v15173_v13, %v15169_v29  ;;  %v1619_v6 = vcombine.high %v11697_v52, %v11698_v20 }
 0x1db   :  { %6670 = vmatprep.subr.bf16.mxu0 %v13263_v8  ;;  %v1549_v62 = vor.u32 %v1548_v43, %v1545_v40  ;;  %v11700_v0 = vld.sshfl [vmem:[#allocation2 + $0x38] sm:$0x5a pattern:$0x76325410]  ;;  %v13273_v40 = vld [vmem:[#allocation9 + $0x280] ss:$8 sps:$4 sm:$0xff]  }
 0x1dc   :  { %v11701_v12 = vld.sshfl [vmem:[#allocation2 + $0x40] sm:$0x5a pattern:$0x76325410]  ;;  %v1634_v14 = vcombine.low %v11699_v10, %v11700_v0  ;;  %v1635_v19 = vcombine.high %v11699_v10, %v11700_v0  ;;  %v13276_v43 = vld [vmem:[#allocation9 + $0x630] ss:$8 sps:$4 sm:$0xff]  }
 0x1dd   :  { %6873 = vmatpush1.bf16.msra.mxu1 %v13264_v44  ;;  %v1550_v8 = vrot.slane %v1549_v62, 2  ;;  %v11702_v13 = vld.sshfl [vmem:[#allocation2 + $0x48] sm:$0x5a pattern:$0x76325410]  ;;  %v11712_v44 = vrot.slane %v1618_v4, 9 }
 0x1de   :  { %6874 = vmatprep.subr.bf16.mxu1 %v13272_v7  ;;  %6671 = vmatpush1.bf16.msra.mxu0 %v13261_v3  ;;  %v1650_v58 = vcombine.low %v11701_v12, %v11702_v13  ;;  %v1651_v26 = vcombine.high %v11701_v12, %v11702_v13  ;;  %v1722_v3 = vrot.slane %v1619_v6, 7  ;;  %v13284_v27 = vld [vmem:[#allocation9 + $0x644] ss:$8 sps:$4 sm:$0xff]   ;;  %v1726_v62 = vrot.slane %v1635_v19, 7  ;;  %v13282_v4 = vld [vmem:[#allocation9 + $0x640] ss:$8 sps:$4 sm:$0xff]  }
 0x1df   :  { %6672 = vmatprep.subr.bf16.mxu0 %v13269_v34  ;;  %v1555_v7 = vsel %vm15047_vm5, %v1550_v8, %v1554_v51  ;;  %v15226_v34 = vsel %vm14910_vm14, %v11711_v15, %v1718_v42  ;;  %v15239_v15 = vrot.slane %v2721_v47, %v14808_v48  ;;  %v13290_v6 = vld [vmem:[#allocation9 + $0x654] ss:$8 sps:$4 sm:$0xff]   ;;  %v13279_v8 = vld [vmem:[#allocation9 + $0x290] ss:$8 sps:$4 sm:$0xff]   ;;  %v13333_v12 = vld [vmem:[#allocation9 + $0x320] ss:$8 sps:$4 sm:$0xff]  }
 0x1e0   :  { %6860 = vmatmul.mubr.bf16.gmra.mrb[4].mxu1 %v2594_v56  ;;  %v2722_v52 = vcombine.low %v15118_v37, %v1555_v7  ;;  %v2723_v20 = vcombine.high %v15118_v37, %v1555_v7  ;;  %v15230_v51 = vsel %vm14910_vm14, %v11712_v44, %v1722_v3  ;;  %v1730_v10 = vrot.slane %v1651_v26, 7  ;;  %v11704_v42 = vld.sshfl [vmem:[#allocation2 + $0x78] sm:$0x5a pattern:$0x76325410] }
 0x1e1   :  { %6902 = vmatprep.mubr.bf16.mxu1 %v2637_v18  ;;  %6875 = vmatpush1.bf16.msra.mxu1 %v13270_v59  ;;  %v11713_v18 = vrot.slane %v1634_v14, 9  ;;  %v11714_v59 = vrot.slane %v1650_v58, 9  ;;  %v2765_v0 = vcombine.high %v15226_v34, %v15230_v51  ;;  %v11703_v19 = vld.sshfl [vmem:[#allocation2 + $0x70] sm:$0x5a pattern:$0x76325410] }
 0x1e2   :  { %6876 = vmatprep.subr.bf16.mxu1 %v13278_v53  ;;  %6673 = vmatpush1.bf16.msra.mxu0 %v13267_v24  ;;  %v15233_v56 = vrot.slane %v2722_v52, %v14808_v48  ;;  %v15242_v53 = vrot.slane %v2723_v20, %v14808_v48  ;;  %v13287_v44 = vld [vmem:[#allocation9 + $0x2a4] ss:$8 sps:$4 sm:$0xff]   ;;  %v1666_v58 = vcombine.low %v11703_v19, %v11704_v42  ;;  %v13288_v52 = vld [vmem:[#allocation9 + $0x650] ss:$8 sps:$4 sm:$0xff]  }
 0x1e3   :  { %6674 = vmatprep.subr.bf16.mxu0 %v13275_v16  ;;  %v15248_v24 = vsel %vm14910_vm14, %v11714_v59, %v1730_v10  ;;  %v15260_v16 = vsel %vm14910_vm14, %v11713_v18, %v1726_v62  ;;  %v11705_v7 = vld.sshfl [vmem:[#allocation2 + $0x80] sm:$0x5a pattern:$0x76325410]  ;;  %v1667_v26 = vcombine.high %v11703_v19, %v11704_v42  ;;  %v15265_v18 = vrot.slane %v2765_v0, %v14808_v48 }
 0x1e4   :  { %v11706_v3 = vld.sshfl [vmem:[#allocation2 + $0x88] sm:$0x5a pattern:$0x76325410]  ;;  %v11715_v14 = vrot.slane %v1666_v58, 9 }
 0x1e5   :  { %6877 = vmatpush1.bf16.msra.mxu1 %v13276_v43  ;;  %v2767_v43 = vcombine.high %v15260_v16, %v15248_v24  ;;  %v13296_v20 = vld [vmem:[#allocation9 + $0x664] ss:$8 sps:$4 sm:$0xff]   ;;  %v1682_v59 = vcombine.low %v11705_v7, %v11706_v3  ;;  %v1683_v10 = vcombine.high %v11705_v7, %v11706_v3  ;;  %v1734_v38 = vrot.slane %v1667_v26, 7 }
 0x1e6   :  { %6878 = vmatprep.subr.bf16.mxu1 %v13284_v27  ;;  %6675 = vmatpush1.bf16.msra.mxu0 %v13273_v40  ;;  %v13285_v27 = vld [vmem:[#allocation9 + $0x2a0] ss:$8 sps:$4 sm:$0xff]   ;;  %v11707_v13 = vld.sshfl [vmem:[#allocation2 + $0x90] sm:$0x5a pattern:$0x76325410] }
 0x1e7   :  { %6676 = vmatprep.subr.bf16.mxu0 %v13281_v46  ;;  %v15268_v62 = vrot.slane %v2767_v43, %v14808_v48  ;;  %v13293_v40 = vld [vmem:[#allocation9 + $0x2b4] ss:$8 sps:$4 sm:$0xff]   ;;  %v11716_v19 = vrot.slane %v1682_v59, 9  ;;  %v1738_v46 = vrot.slane %v1683_v10, 7  ;;  %v15274_v0 = vsel %vm14910_vm14, %v11715_v14, %v1734_v38  ;;  %v13291_v38 = vld [vmem:[#allocation9 + $0x2b0] ss:$8 sps:$4 sm:$0xff]  }
 0x1e8   :  { %v11708_v42 = vld.sshfl [vmem:[#allocation2 + $0x98] sm:$0x5a pattern:$0x76325410] }
 0x1e9   :  { %6879 = vmatpush1.bf16.msra.mxu1 %v13282_v4  ;;  %16136 = vst [vmem:[#allocation26_spill] sm:$0xff] %v15268_v62  ;;  %v11709_v29 = vld.sshfl [vmem:[#allocation2 + $0xa0] sm:$0x5a pattern:$0x76325410]  ;;  %v1698_v47 = vcombine.low %v11707_v13, %v11708_v42  ;;  %v1699_v7 = vcombine.high %v11707_v13, %v11708_v42 }
 0x1ea   :  { %6880 = vmatprep.subr.bf16.mxu1 %v13290_v6  ;;  %6677 = vmatpush1.bf16.msra.mxu0 %v13279_v8  ;;  %v11710_v58 = vld.sshfl [vmem:[#allocation2 + $0xa8] sm:$0x5a pattern:$0x76325410]  ;;  %v15278_v6 = vsel %vm14910_vm14, %v11716_v19, %v1738_v46  ;;  %v13300_v46 = vld [vmem:[#allocation9 + $0x670] ss:$8 sps:$4 sm:$0xff]  }
 0x1eb   :  { %6678 = vmatprep.subr.bf16.mxu0 %v13287_v44  ;;  %v13294_v8 = vld [vmem:[#allocation9 + $0x660] ss:$8 sps:$4 sm:$0xff]   ;;  %v1714_v3 = vcombine.low %v11709_v29, %v11710_v58  ;;  %v1715_v13 = vcombine.high %v11709_v29, %v11710_v58  ;;  %v11717_v43 = vrot.slane %v1698_v47, 9  ;;  %v1742_v59 = vrot.slane %v1699_v7, 7  ;;  %v13302_v44 = vld [vmem:[#allocation9 + $0x674] ss:$8 sps:$4 sm:$0xff]  }
 0x1ec   :  { %v2801_v10 = vcombine.high %v15274_v0, %v15278_v6  ;;  %v13299_v19 = vld [vmem:[#allocation9 + $0x2c4] ss:$8 sps:$4 sm:$0xff]  }
 0x1ed   :  { %6881 = vmatpush1.bf16.msra.mxu1 %v13288_v52  ;;  %v11718_v14 = vrot.slane %v1714_v3, 9  ;;  %v1746_v42 = vrot.slane %v1715_v13, 7  ;;  %v15286_v52 = vsel %vm14910_vm14, %v11717_v43, %v1742_v59  ;;  %v13308_v47 = vld [vmem:[#allocation9 + $0x684] ss:$8 sps:$4 sm:$0xff]   ;;  %v13314_v3 = vld [vmem:[#allocation9 + $0x694] ss:$8 sps:$4 sm:$0xff]  }
 0x1ee   :  { %6882 = vmatprep.subr.bf16.mxu1 %v13296_v20  ;;  %6679 = vmatpush1.bf16.msra.mxu0 %v13285_v27  ;;  %v13297_v27 = vld [vmem:[#allocation9 + $0x2c0] ss:$8 sps:$4 sm:$0xff]   ;;  %v15295_v7 = vrot.slane %v2801_v10, %v14808_v48  ;;  %v13303_v59 = vld [vmem:[#allocation9 + $0x2d0] ss:$8 sps:$4 sm:$0xff]  }
 0x1ef   :  { %6680 = vmatprep.subr.bf16.mxu0 %v13293_v40  ;;  %v15290_v29 = vsel %vm14910_vm14, %v11718_v14, %v1746_v42  ;;  %v13305_v40 = vld [vmem:[#allocation9 + $0x2d4] ss:$8 sps:$4 sm:$0xff]   ;;  %v13312_v10 = vld [vmem:[#allocation9 + $0x690] ss:$8 sps:$4 sm:$0xff]   ;;  %v13309_v14 = vld [vmem:[#allocation9 + $0x2e0] ss:$8 sps:$4 sm:$0xff]  }
 0x1f0   :  { %v2803_v20 = vcombine.high %v15286_v52, %v15290_v29  ;;  %16137 = vst [vmem:[#allocation27_spill] sm:$0xff] %v15295_v7  ;;  %v13317_v42 = vld [vmem:[#allocation9 + $0x2f4] ss:$8 sps:$4 sm:$0xff]  }
 0x1f1   :  { %6883 = vmatpush1.bf16.msra.mxu1 %v13294_v8  ;;  %v13306_v8 = vld [vmem:[#allocation9 + $0x680] ss:$8 sps:$4 sm:$0xff]   ;;  %v11737_v43 = vld.sshfl [vmem:[#allocation2 + $0x30] sm:$0x5f pattern:$0x76325410] }
 0x1f2   :  { %6884 = vmatprep.subr.bf16.mxu1 %v13302_v44  ;;  %6681 = vmatpush1.bf16.msra.mxu0 %v13291_v38  ;;  %v15298_v58 = vrot.slane %v2803_v20, %v14808_v48  ;;  %v13311_v44 = vld [vmem:[#allocation9 + $0x2e4] ss:$8 sps:$4 sm:$0xff]   ;;  %v13315_v20 = vld [vmem:[#allocation9 + $0x2f0] ss:$8 sps:$4 sm:$0xff]  }
 0x1f3   :  { %6682 = vmatprep.subr.bf16.mxu0 %v13299_v19  ;;  %v13320_v38 = vld [vmem:[#allocation9 + $0x6a4] ss:$8 sps:$4 sm:$0xff]   ;;  %v13318_v19 = vld [vmem:[#allocation9 + $0x6a0] ss:$8 sps:$4 sm:$0xff]  }
 0x1f4   :  { %16138 = vst [vmem:[#allocation28_spill] sm:$0xff] %v15298_v58  ;;  %v11738_v13 = vld.sshfl [vmem:[#allocation2 + $0x38] sm:$0x5f pattern:$0x76325410] }
 0x1f5   :  { %6885 = vmatpush1.bf16.msra.mxu1 %v13300_v46  ;;  %v2482_v46 = vcombine.low %v15110_v41, %v15118_v37  ;;  %v11735_v37 = vld.sshfl [vmem:[#allocation2 + $0x20] sm:$0x5f pattern:$0x76325410]  ;;  %v1963_v26 = vcombine.high %v11737_v43, %v11738_v13 }
 0x1f6   :  { %6886 = vmatprep.subr.bf16.mxu1 %v13308_v47  ;;  %6683 = vmatpush1.bf16.msra.mxu0 %v13297_v27  ;;  %v13326_v47 = vld [vmem:[#allocation9 + $0x6b4] ss:$8 sps:$4 sm:$0xff]   ;;  %v2480_v27 = vcombine.low %v15096_v31, %v15106_v28  ;;  %v11736_v31 = vld.sshfl [vmem:[#allocation2 + $0x28] sm:$0x5f pattern:$0x76325410] }
 0x1f7   :  { %6684 = vmatprep.subr.bf16.mxu0 %v13305_v40  ;;  %v13323_v40 = vld [vmem:[#allocation9 + $0x304] ss:$8 sps:$4 sm:$0xff]   ;;  %v2084_v23 = vshll.u32 %v1963_v26, 16 }
 0x1f8   :  { %v2490_v41 = vrot.slane %v2480_v27, %v14808_v48  ;;  %v13336_v27 = vld [vmem:[#allocation9 + $0x6d0] ss:$8 sps:$4 sm:$0xff]  }
 0x1f9   :  { %6887 = vmatpush1.bf16.msra.mxu1 %v13306_v8  ;;  %v13321_v8 = vld [vmem:[#allocation9 + $0x300] ss:$8 sps:$4 sm:$0xff]  }
 0x1fa   :  { %6888 = vmatprep.subr.bf16.mxu1 %v13314_v3  ;;  %6685 = vmatpush1.bf16.msra.mxu0 %v13303_v59  ;;  %v15309_v3 = vrot.slane %v2482_v46, %v14808_v48  ;;  %v13324_v59 = vld [vmem:[#allocation9 + $0x6b0] ss:$8 sps:$4 sm:$0xff]   ;;  %v1946_v46 = vcombine.low %v11735_v37, %v11736_v31 }
 0x1fb   :  { %6686 = vmatprep.subr.bf16.mxu0 %v13311_v44  ;;  %v13329_v44 = vld [vmem:[#allocation9 + $0x314] ss:$8 sps:$4 sm:$0xff]  }
 0x1fc   :  { %v2513_v28 = vcombine.high %v2490_v41, %v15309_v3  ;;  %v2061_v4 = vshrl.u32 %v1946_v46, 16 }
 0x1fd   :  { %6889 = vmatpush1.bf16.msra.mxu1 %v13312_v10  ;;  %v13332_v10 = vld [vmem:[#allocation9 + $0x6c4] ss:$8 sps:$4 sm:$0xff]  }
 0x1fe   :  { %6890 = vmatprep.subr.bf16.mxu1 %v13320_v38  ;;  %6687 = vmatpush1.bf16.msra.mxu0 %v13309_v14  ;;  %v2476_v38 = vcombine.low %v15158_v45, %v15153_v32  ;;  %v13327_v14 = vld [vmem:[#allocation9 + $0x310] ss:$8 sps:$4 sm:$0xff]   ;;  %v2064_v32 = vshll.u32 %v1946_v46, 16  ;;  %v13344_v45 = vld [vmem:[#allocation9 + $0x6e4] ss:$8 sps:$4 sm:$0xff]   ;;  %v2063_v1 = vrot.slane %v2061_v4, 6 }
 0x1ff   :  { %6688 = vmatprep.subr.bf16.mxu0 %v13317_v42  ;;  %v13330_v42 = vld [vmem:[#allocation9 + $0x6c0] ss:$8 sps:$4 sm:$0xff]   ;;  %v11741_v46 = vld.sshfl [vmem:[#allocation2 + $0x50] sm:$0x5f pattern:$0x76325410] }
 0x201   :  { %6891 = vmatpush1.bf16.msra.mxu1 %v13318_v19  ;;  %v13338_v19 = vld [vmem:[#allocation9 + $0x6d4] ss:$8 sps:$4 sm:$0xff]  }
 0x202   :  { %6892 = vmatprep.subr.bf16.mxu1 %v13326_v47  ;;  %6689 = vmatpush1.bf16.msra.mxu0 %v13315_v20  ;;  %v13335_v47 = vld [vmem:[#allocation9 + $0x324] ss:$8 sps:$4 sm:$0xff]   ;;  %v1947_v20 = vcombine.high %v11735_v37, %v11736_v31  ;;  %v2066_v37 = vrot.slane %v2064_v32, 7 }
 0x203   :  { %6711 = vmatprep.subr.bf16.mxu0 %v13323_v40  ;;  %v15315_v40 = vld.sshfl [vmem:[#allocation2 + $0x80] sm:$0xf pattern:$0x76325410] }
 0x204   :  { %v11740_v31 = vld.sshfl [vmem:[#allocation2 + $0x48] sm:$0x5f pattern:$0x76325410]  ;;  %v2067_v63 = vor.u32 %v2066_v37, %v2063_v1  ;;  %v11787_v4 = vcombine.low %v15317_v2, %v15315_v40  ;;  %v16139_v2 = vcombine.high %v15099_v35, %v15102_v9  ;;  %v2086_v37 = vrot.slane %v2084_v23, 7 }
 0x205   :  { %6893 = vmatpush1.bf16.msra.mxu1 %v13324_v59  ;;  %6691 = vmatmul.mubr.bf16.vlgmr.msra.gmra.mrb[16].mxu0 %v2476_v38  ;;  %v1962_v59 = vcombine.low %v11737_v43, %v11738_v13  ;;  %v11739_v38 = vld.sshfl [vmem:[#allocation2 + $0x40] sm:$0x5f pattern:$0x76325410]  ;;  %v2512_v43 = vcombine.low %v2490_v41, %v15309_v3 }
 0x206   :  { %6894 = vmatprep.subr.bf16.mxu1 %v13332_v10  ;;  %6700 = vmatprep.mubr.bf16.mxu0 %v2513_v28  ;;  %v11677_v10 = vld.sshfl [vmem:[#allocation2 + $0xa0] sm:$0xf pattern:$0x76325410]  ;;  %v2070_v28 = vshll.u32 %v1947_v20, 16  ;;  %v1978_v33 = vcombine.low %v11739_v38, %v11740_v31  ;;  %v1979_v30 = vcombine.high %v11739_v38, %v11740_v31  ;;  %v2068_v7 = vrot.slane %v2067_v63, 2 }
 0x207   :  { %6712 = vmatpush1.bf16.msra.mxu0 %v13321_v8  ;;  %v13341_v8 = vld [vmem:[#allocation9 + $0x334] ss:$8 sps:$4 sm:$0xff]   ;;  %v2075_v36 = vshrl.u32 %v1962_v59, 16  ;;  %v2078_v13 = vshll.u32 %v1962_v59, 16  ;;  %v13339_v20 = vld [vmem:[#allocation9 + $0x330] ss:$8 sps:$4 sm:$0xff]   ;;  %v11789_v59 = vcombine.low %v11675_v21, %v11677_v10 }
 0x208   :  { %6713 = vmatprep.subr.bf16.mxu0 %v13329_v44  ;;  %v13342_v44 = vld [vmem:[#allocation9 + $0x6e0] ss:$8 sps:$4 sm:$0xff]   ;;  %v11742_v32 = vld.sshfl [vmem:[#allocation2 + $0x58] sm:$0x5f pattern:$0x76325410] }
 0x209   :  { %6895 = vmatpush1.bf16.msra.mxu1 %v13330_v42  ;;  %v13350_v42 = vld [vmem:[#allocation9 + $0x6f4] ss:$8 sps:$4 sm:$0xff]   ;;  %v1995_v58 = vcombine.high %v11741_v46, %v11742_v32  ;;  %v2080_v62 = vrot.slane %v2078_v13, 7  ;;  %v13347_v1 = vld [vmem:[#allocation9 + $0x344] ss:$8 sps:$4 sm:$0xff]   ;;  %v2089_v3 = vshrl.u32 %v1978_v33, 16  ;;  %v15334_v23 = vrot.slane %v11789_v59, %v14808_v48 }
 0x20a   :  { %6896 = vmatprep.subr.bf16.mxu1 %v13338_v19  ;;  %v2077_v19 = vrot.slane %v2075_v36, 6  ;;  %v2092_v41 = vshll.u32 %v1978_v33, 16  ;;  %v13348_v36 = vld [vmem:[#allocation9 + $0x6f0] ss:$8 sps:$4 sm:$0xff]   ;;  %v2072_v26 = vrot.slane %v2070_v28, 7 }
 0x20b   :  { %6714 = vmatpush1.bf16.msra.mxu0 %v13327_v14  ;;  %v1994_v14 = vcombine.low %v11741_v46, %v11742_v32  ;;  %v15325_v63 = vld.sshfl [vmem:[#allocation2 + $0x48] sm:$0xf pattern:$0x76325410]  ;;  %v2112_v21 = vshll.u32 %v1995_v58, 16 }
 0x20c   :  { %6715 = vmatprep.subr.bf16.mxu0 %v13335_v47  ;;  %v2098_v47 = vshll.u32 %v1979_v30, 16  ;;  %v2094_v31 = vrot.slane %v2092_v41, 7  ;;  %v11743_v10 = vld.sshfl [vmem:[#allocation2 + $0x80] sm:$0x5f pattern:$0x76325410]  ;;  %v15331_v46 = vsel %vm15047_vm5, %v2068_v7, %v2072_v26 }
 0x20d   :  { %6897 = vmatpush1.bf16.msra.mxu1 %v13336_v27  ;;  %6701 = vmatmul.mubr.bf16.gmra.mrb[20].mxu0 %v2512_v43  ;;  %v2081_v27 = vor.u32 %v2080_v62, %v2077_v19  ;;  %v2103_v40 = vshrl.u32 %v1994_v14, 16  ;;  %v2106_v38 = vshll.u32 %v1994_v14, 16  ;;  %v13345_v33 = vld [vmem:[#allocation9 + $0x340] ss:$8 sps:$4 sm:$0xff]   ;;  %v13356_v30 = vld [vmem:[#allocation9 + $0x704] ss:$8 sps:$4 sm:$0xff]  }
 0x20e   :  { %6898 = vmatprep.subr.bf16.mxu1 %v13344_v45  ;;  %6743 = vmatprep.mubr.bf16.mxu0 %v16139_v2  ;;  %v2091_v45 = vrot.slane %v2089_v3, 6  ;;  %16140 = vst [vmem:[#allocation29_spill] sm:$0xff] %v15331_v46  ;;  %v2100_v28 = vrot.slane %v2098_v47, 7  ;;  %v13354_v14 = vld [vmem:[#allocation9 + $0x700] ss:$8 sps:$4 sm:$0xff]   ;;  %v15337_v3 = vrot.slane %v11787_v4, %v14808_v48 }
 0x20f   :  { %6716 = vmatpush1.bf16.msra.mxu0 %v13333_v12  ;;  %v15327_v12 = vld.sshfl [vmem:[#allocation2 + $0x28] sm:$0xf pattern:$0x76325410]  ;;  %v2082_v62 = vrot.slane %v2081_v27, 2  ;;  %v2105_v13 = vrot.slane %v2103_v40, 6 }
 0x210   :  { %6717 = vmatprep.subr.bf16.mxu0 %v13341_v8  ;;  %v13353_v8 = vld [vmem:[#allocation9 + $0x354] ss:$8 sps:$4 sm:$0xff]   ;;  %v2095_v58 = vor.u32 %v2094_v31, %v2091_v45  ;;  %v2108_v32 = vrot.slane %v2106_v38, 7 }
 0x211   :  { %6899 = vmatpush1.bf16.msra.mxu1 %v13342_v44  ;;  %v11668_v43 = vld.sshfl [vmem:[#allocation2 + $0x38] sm:$0xf pattern:$0x76325410]  ;;  %v2114_v44 = vrot.slane %v2112_v21, 7  ;;  %v15341_v41 = vsel %vm15047_vm5, %v2082_v62, %v2086_v37  ;;  %v2673_v37 = vcombine.high %v15337_v3, %v15334_v23 }
 0x212   :  { %6900 = vmatprep.subr.bf16.mxu1 %v13350_v42  ;;  %v11744_v19 = vld.sshfl [vmem:[#allocation2 + $0x88] sm:$0x5f pattern:$0x76325410]  ;;  %16141 = vst [vmem:[#allocation30_spill] sm:$0xff] %v15341_v41  ;;  %v2096_v2 = vrot.slane %v2095_v58, 2  ;;  %v2109_v26 = vor.u32 %v2108_v32, %v2105_v13  ;;  %v11786_v4 = vcombine.low %v11668_v43, %v15325_v63 }
 0x213   :  { %6718 = vmatpush1.bf16.msra.mxu0 %v13339_v20  ;;  %v11664_v7 = vld.sshfl [vmem:[#allocation2 + $0x18] sm:$0xf pattern:$0x76325410]  ;;  %v2010_v47 = vcombine.low %v11743_v10, %v11744_v19  ;;  %v2011_v40 = vcombine.high %v11743_v10, %v11744_v19  ;;  %v2925_v20 = vcombine.high %v15331_v46, %v15341_v41  ;;  %v13359_v32 = vld [vmem:[#allocation9 + $0x364] ss:$8 sps:$4 sm:$0xff]  }
 0x214   :  { %v11745_v42 = vld.sshfl [vmem:[#allocation2 + $0x90] sm:$0x5f pattern:$0x76325410]  ;;  %6719 = vmatprep.subr.bf16.mxu0 %v13347_v1  ;;  %v11784_v1 = vcombine.low %v11664_v7, %v15327_v12  ;;  %v2110_v62 = vrot.slane %v2109_v26, 2  ;;  %v15361_v26 = vrot.slane %v11786_v4, %v14808_v48 }
 0x215   :  { %v13362_v59 = vld [vmem:[#allocation9 + $0x714] ss:$8 sps:$4 sm:$0xff]   ;;  %6901 = vmatpush1.bf16.msra.mxu1 %v13348_v36  ;;  %v2117_v31 = vshrl.u32 %v2010_v47, 16  ;;  %v2120_v21 = vshll.u32 %v2010_v47, 16  ;;  %v13351_v10 = vld [vmem:[#allocation9 + $0x350] ss:$8 sps:$4 sm:$0xff]   ;;  %v15351_v36 = vsel %vm15047_vm5, %v2096_v2, %v2100_v28  ;;  %v15373_v41 = vrot.slane %v2925_v20, %v14808_v48 }
 0x216   :  { %v11746_v27 = vld.sshfl [vmem:[#allocation2 + $0x98] sm:$0x5f pattern:$0x76325410]  ;;  %6923 = vmatprep.subr.bf16.mxu1 %v13356_v30  ;;  %v16142_v30 = vcombine.low %v15059_v11, %v15062_v60  ;;  %v15358_v12 = vsel %vm15047_vm5, %v2110_v62, %v2114_v44  ;;  %v13357_v47 = vld [vmem:[#allocation9 + $0x360] ss:$8 sps:$4 sm:$0xff]   ;;  %v15364_v60 = vrot.slane %v11784_v1, %v14808_v48 }
 0x217   :  { %v11747_v38 = vld.sshfl [vmem:[#allocation2 + $0xa0] sm:$0x5f pattern:$0x76325410]  ;;  %v2026_v45 = vcombine.low %v11745_v42, %v11746_v27  ;;  %v2027_v58 = vcombine.high %v11745_v42, %v11746_v27  ;;  %6720 = vmatpush1.bf16.msra.mxu0 %v13345_v33  ;;  %v2119_v43 = vrot.slane %v2117_v31, 6  ;;  %v2122_v19 = vrot.slane %v2120_v21, 7 }
 0x218   :  { %v11748_v13 = vld.sshfl [vmem:[#allocation2 + $0xa8] sm:$0x5f pattern:$0x76325410]  ;;  %6721 = vmatprep.subr.bf16.mxu0 %v13353_v8  ;;  %6903 = vmatmul.mubr.bf16.vlgmr.msra.gmra.mrb[0].mxu1 %v16142_v30  ;;  %v2126_v33 = vshll.u32 %v2011_v40, 16 }
 0x219   :  { %v2042_v63 = vcombine.low %v11747_v38, %v11748_v13  ;;  %v11749_v7 = vld.sshfl [vmem:[#allocation2 + $0xb0] sm:$0x5f pattern:$0x76325410]  ;;  %v2131_v42 = vshrl.u32 %v2026_v45, 16  ;;  %6912 = vmatprep.mubr.bf16.mxu1 %v2673_v37  ;;  %6924 = vmatpush1.bf16.msra.mxu1 %v13354_v14  ;;  %v2043_v8 = vcombine.high %v11747_v38, %v11748_v13  ;;  %v2123_v27 = vor.u32 %v2122_v19, %v2119_v43 }
 0x21a   :  { %v13360_v28 = vld [vmem:[#allocation9 + $0x710] ss:$8 sps:$4 sm:$0xff]   ;;  %v13368_v2 = vld [vmem:[#allocation9 + $0x724] ss:$8 sps:$4 sm:$0xff]   ;;  %v2134_v31 = vshll.u32 %v2026_v45, 16  ;;  %6925 = vmatprep.subr.bf16.mxu1 %v13362_v59  ;;  %v2927_v14 = vcombine.high %v15351_v36, %v15358_v12  ;;  %v2140_v46 = vshll.u32 %v2027_v58, 16  ;;  %v2672_v19 = vcombine.low %v15337_v3, %v15334_v23 }
 0x21b   :  { %v13365_v11 = vld [vmem:[#allocation9 + $0x374] ss:$8 sps:$4 sm:$0xff]   ;;  %v2133_v21 = vrot.slane %v2131_v42, 6  ;;  %v2145_v40 = vshrl.u32 %v2042_v63, 16  ;;  %6722 = vmatpush1.bf16.msra.mxu0 %v13351_v10  ;;  %v13366_v37 = vld [vmem:[#allocation9 + $0x720] ss:$8 sps:$4 sm:$0xff]   ;;  %v2639_v42 = vcombine.high %v15364_v60, %v15361_v26 }
 0x21c   :  { %v11750_v44 = vld.sshfl [vmem:[#allocation2 + $0xb8] sm:$0x5f pattern:$0x76325410]  ;;  %v2124_v4 = vrot.slane %v2123_v27, 2  ;;  %6723 = vmatprep.subr.bf16.mxu0 %v13359_v32  ;;  %v2128_v45 = vrot.slane %v2126_v33, 7 }
 0x21d   :  { %v2058_v62 = vcombine.low %v11749_v7, %v11750_v44  ;;  %v2059_v30 = vcombine.high %v11749_v7, %v11750_v44  ;;  %v13374_v38 = vld [vmem:[#allocation9 + $0x734] ss:$8 sps:$4 sm:$0xff]   ;;  %v2136_v59 = vrot.slane %v2134_v31, 7  ;;  %v2147_v13 = vrot.slane %v2145_v40, 6  ;;  %6926 = vmatpush1.bf16.msra.mxu1 %v13360_v28  ;;  %v13363_v1 = vld [vmem:[#allocation9 + $0x370] ss:$8 sps:$4 sm:$0xff]  }
 0x21e   :  { %v2148_v43 = vshll.u32 %v2042_v63, 16  ;;  %v2154_v10 = vshll.u32 %v2043_v8, 16  ;;  %v11752_v7 = vld.sshfl [vmem:[#allocation2 + $0x28] sm:$0x5a pattern:$0x76325410]  ;;  %6927 = vmatprep.subr.bf16.mxu1 %v13368_v2  ;;  %v15377_v28 = vsel %vm15047_vm5, %v2124_v4, %v2128_v45  ;;  %v15380_v8 = vrot.slane %v2927_v14, %v14808_v48 }
 0x21f   :  { %v13371_v58 = vld [vmem:[#allocation9 + $0x384] ss:$8 sps:$4 sm:$0xff]   ;;  %v2137_v32 = vor.u32 %v2136_v59, %v2133_v21  ;;  %v2159_v27 = vshrl.u32 %v2058_v62, 16  ;;  %v2162_v31 = vshll.u32 %v2058_v62, 16  ;;  %6724 = vmatpush1.bf16.msra.mxu0 %v13357_v47  ;;  %v13372_v63 = vld [vmem:[#allocation9 + $0x730] ss:$8 sps:$4 sm:$0xff]  }
 0x220   :  { %v2150_v33 = vrot.slane %v2148_v43, 7  ;;  %v2142_v23 = vrot.slane %v2140_v46, 7  ;;  %v2168_v3 = vshll.u32 %v2059_v30, 16  ;;  %6725 = vmatprep.subr.bf16.mxu0 %v13365_v11  ;;  %6913 = vmatmul.mubr.bf16.gmra.mrb[4].mxu1 %v2672_v19  ;;  %v13380_v2 = vld [vmem:[#allocation9 + $0x744] ss:$8 sps:$4 sm:$0xff]   ;;  %v2156_v40 = vrot.slane %v2154_v10, 7 }
 0x221   :  { %v11751_v20 = vld.sshfl [vmem:[#allocation2 + $0x20] sm:$0x5a pattern:$0x76325410]  ;;  %v2138_v44 = vrot.slane %v2137_v32, 2  ;;  %v2161_v59 = vrot.slane %v2159_v27, 6  ;;  %6928 = vmatpush1.bf16.msra.mxu1 %v13366_v37  ;;  %6955 = vmatprep.mubr.bf16.mxu1 %v2639_v42 }
 0x222   :  { %v2151_v21 = vor.u32 %v2150_v33, %v2147_v13  ;;  %v13369_v47 = vld [vmem:[#allocation9 + $0x380] ss:$8 sps:$4 sm:$0xff]   ;;  %v2164_v62 = vrot.slane %v2162_v31, 7  ;;  %v2218_v30 = vcombine.low %v11751_v20, %v11752_v7  ;;  %6929 = vmatprep.subr.bf16.mxu1 %v13374_v38  ;;  %v13377_v11 = vld [vmem:[#allocation9 + $0x394] ss:$8 sps:$4 sm:$0xff]   ;;  %v2170_v43 = vrot.slane %v2168_v3, 7 }
 0x223   :  { %v11753_v14 = vld.sshfl [vmem:[#allocation2 + $0x30] sm:$0x5a pattern:$0x76325410]  ;;  %v15388_v45 = vsel %vm15047_vm5, %v2138_v44, %v2142_v23  ;;  %v2219_v19 = vcombine.high %v11751_v20, %v11752_v7  ;;  %6726 = vmatpush1.bf16.msra.mxu0 %v13363_v1  ;;  %v13378_v42 = vld [vmem:[#allocation9 + $0x740] ss:$8 sps:$4 sm:$0xff]  }
 0x224   :  { %v2152_v13 = vrot.slane %v2151_v21, 2  ;;  %v11754_v37 = vld.sshfl [vmem:[#allocation2 + $0x38] sm:$0x5a pattern:$0x76325410]  ;;  %v2165_v10 = vor.u32 %v2164_v62, %v2161_v59  ;;  %v2961_v32 = vcombine.high %v15377_v28, %v15388_v45  ;;  %6727 = vmatprep.subr.bf16.mxu0 %v13371_v58  ;;  %v11767_v1 = vrot.slane %v2218_v30, 9 }
 0x225   :  { %v11755_v33 = vld.sshfl [vmem:[#allocation2 + $0x40] sm:$0x5a pattern:$0x76325410]  ;;  %v2234_v27 = vcombine.low %v11753_v14, %v11754_v37  ;;  %v2235_v38 = vcombine.high %v11753_v14, %v11754_v37  ;;  %6930 = vmatpush1.bf16.msra.mxu1 %v13372_v63  ;;  %v13375_v4 = vld [vmem:[#allocation9 + $0x390] ss:$8 sps:$4 sm:$0xff]  }
 0x226   :  { %v11756_v31 = vld.sshfl [vmem:[#allocation2 + $0x48] sm:$0x5a pattern:$0x76325410]  ;;  %v13386_v46 = vld [vmem:[#allocation9 + $0x754] ss:$8 sps:$4 sm:$0xff]   ;;  %v15394_v23 = vsel %vm15047_vm5, %v2152_v13, %v2156_v40  ;;  %6931 = vmatprep.subr.bf16.mxu1 %v13380_v2 }
 0x227   :  { %v2166_v3 = vrot.slane %v2165_v10, 2  ;;  %v2250_v7 = vcombine.low %v11755_v33, %v11756_v31  ;;  %v13383_v20 = vld [vmem:[#allocation9 + $0x3a4] ss:$8 sps:$4 sm:$0xff]   ;;  %v2251_v21 = vcombine.high %v11755_v33, %v11756_v31  ;;  %v2334_v59 = vrot.slane %v2219_v19, 7  ;;  %6728 = vmatpush1.bf16.msra.mxu0 %v13369_v47  ;;  %v13384_v58 = vld [vmem:[#allocation9 + $0x750] ss:$8 sps:$4 sm:$0xff]  }
 0x228   :  { %v11757_v44 = vld.sshfl [vmem:[#allocation2 + $0x50] sm:$0x5a pattern:$0x76325410]  ;;  %v11768_v62 = vrot.slane %v2234_v27, 9  ;;  %v2338_v37 = vrot.slane %v2235_v38, 7  ;;  %6729 = vmatprep.subr.bf16.mxu0 %v13377_v11  ;;  %v15403_v31 = vrot.slane %v2961_v32, %v14808_v48 }
 0x229   :  { %v15398_v63 = vsel %vm15047_vm5, %v2166_v3, %v2170_v43  ;;  %v11758_v14 = vld.sshfl [vmem:[#allocation2 + $0x58] sm:$0x5a pattern:$0x76325410]  ;;  %v13392_v40 = vld [vmem:[#allocation9 + $0x764] ss:$8 sps:$4 sm:$0xff]   ;;  %6932 = vmatpush1.bf16.msra.mxu1 %v13378_v42 }
 0x22a   :  { %v2963_v13 = vcombine.high %v15394_v23, %v15398_v63  ;;  %v2266_v30 = vcombine.low %v11757_v44, %v11758_v14  ;;  %v2267_v2 = vcombine.high %v11757_v44, %v11758_v14  ;;  %v11769_v10 = vrot.slane %v2250_v7, 9  ;;  %v13381_v33 = vld [vmem:[#allocation9 + $0x3a0] ss:$8 sps:$4 sm:$0xff]   ;;  %6933 = vmatprep.subr.bf16.mxu1 %v13386_v46  ;;  %v13389_v47 = vld [vmem:[#allocation9 + $0x3b4] ss:$8 sps:$4 sm:$0xff]  }
 0x22b   :  { %v2342_v19 = vrot.slane %v2251_v21, 7  ;;  %v11759_v27 = vld.sshfl [vmem:[#allocation2 + $0x80] sm:$0x5a pattern:$0x76325410]  ;;  %6730 = vmatpush1.bf16.msra.mxu0 %v13375_v4  ;;  %v15410_v44 = vsel %vm14910_vm14, %v11767_v1, %v2334_v59  ;;  %v15414_v42 = vsel %vm14910_vm14, %v11768_v62, %v2338_v37 }
 0x22c   :  { %v15406_v43 = vrot.slane %v2963_v13, %v14808_v48  ;;  %v11770_v11 = vrot.slane %v2266_v30, 9  ;;  %v2346_v38 = vrot.slane %v2267_v2, 7  ;;  %v11760_v3 = vld.sshfl [vmem:[#allocation2 + $0x88] sm:$0x5a pattern:$0x76325410]  ;;  %6731 = vmatprep.subr.bf16.mxu0 %v13383_v20 }
 0x22d   :  { %16144 = vst [vmem:[#allocation32_spill] sm:$0xff] %v15410_v44  ;;  %v11761_v46 = vld.sshfl [vmem:[#allocation2 + $0x90] sm:$0x5a pattern:$0x76325410]  ;;  %v2282_v7 = vcombine.low %v11759_v27, %v11760_v3  ;;  %v2283_v21 = vcombine.high %v11759_v27, %v11760_v3  ;;  %v15422_v4 = vsel %vm14910_vm14, %v11769_v10, %v2342_v19  ;;  %6934 = vmatpush1.bf16.msra.mxu1 %v13384_v58 }
 0x22e   :  { %16143 = vst [vmem:[#allocation31_spill] sm:$0xff] %v15406_v43  ;;  %v11762_v1 = vld.sshfl [vmem:[#allocation2 + $0x98] sm:$0x5a pattern:$0x76325410]  ;;  %v15426_v37 = vsel %vm14910_vm14, %v11770_v11, %v2346_v38  ;;  %6935 = vmatprep.subr.bf16.mxu1 %v13392_v40  ;;  %v3005_v10 = vcombine.high %v15410_v44, %v15414_v42 }
 0x22f   :  { %v13387_v59 = vld [vmem:[#allocation9 + $0x3b0] ss:$8 sps:$4 sm:$0xff]   ;;  %v13390_v13 = vld [vmem:[#allocation9 + $0x760] ss:$8 sps:$4 sm:$0xff]   ;;  %v13398_v62 = vld [vmem:[#allocation9 + $0x774] ss:$8 sps:$4 sm:$0xff]   ;;  %v2298_v20 = vcombine.low %v11761_v46, %v11762_v1  ;;  %v2299_v30 = vcombine.high %v11761_v46, %v11762_v1  ;;  %6732 = vmatpush1.bf16.msra.mxu0 %v13381_v33  ;;  %v3007_v55 = vcombine.high %v15422_v4, %v15426_v37 }
 0x230   :  { %v13395_v2 = vld [vmem:[#allocation9 + $0x3c4] ss:$8 sps:$4 sm:$0xff]   ;;  %v11771_v3 = vrot.slane %v2282_v7, 9  ;;  %v2350_v14 = vrot.slane %v2283_v21, 7  ;;  %6733 = vmatprep.subr.bf16.mxu0 %v13389_v47  ;;  %v13393_v40 = vld [vmem:[#allocation9 + $0x3c0] ss:$8 sps:$4 sm:$0xff]   ;;  %v15441_v21 = vrot.slane %v3005_v10, %v14808_v48 }
 0x231   :  { %v11763_v27 = vld.sshfl [vmem:[#allocation2 + $0xa0] sm:$0x5a pattern:$0x76325410]  ;;  %v11772_v58 = vrot.slane %v2298_v20, 9  ;;  %v2354_v32 = vrot.slane %v2299_v30, 7  ;;  %6936 = vmatpush1.bf16.msra.mxu1 %v13390_v13  ;;  %v15444_v47 = vrot.slane %v3007_v55, %v14808_v48 }
 0x232   :  { %v11764_v19 = vld.sshfl [vmem:[#allocation2 + $0xa8] sm:$0x5a pattern:$0x76325410]  ;;  %v13396_v46 = vld [vmem:[#allocation9 + $0x770] ss:$8 sps:$4 sm:$0xff]   ;;  %v15434_v7 = vsel %vm14910_vm14, %v11771_v3, %v2350_v14  ;;  %6937 = vmatprep.subr.bf16.mxu1 %v13398_v62 }
 0x233   :  { %v11765_v11 = vld.sshfl [vmem:[#allocation2 + $0xb0] sm:$0x5a pattern:$0x76325410]  ;;  %v2314_v38 = vcombine.low %v11763_v27, %v11764_v19  ;;  %v2315_v43 = vcombine.high %v11763_v27, %v11764_v19  ;;  %v15438_v33 = vsel %vm14910_vm14, %v11772_v58, %v2354_v32  ;;  %6734 = vmatpush1.bf16.msra.mxu0 %v13387_v59  ;;  %v3039_v32 = vcombine.high %v15441_v21, %v15444_v47  ;;  %v13402_v62 = vld [vmem:[#allocation9 + $0x780] ss:$8 sps:$4 sm:$0xff]  }
 0x234   :  { %v13404_v1 = vld [vmem:[#allocation9 + $0x784] ss:$8 sps:$4 sm:$0xff]   ;;  %v13401_v20 = vld [vmem:[#allocation9 + $0x3d4] ss:$8 sps:$4 sm:$0xff]   ;;  %6735 = vmatprep.subr.bf16.mxu0 %v13395_v2  ;;  %v3041_v3 = vcombine.high %v15434_v7, %v15438_v33  ;;  %v13399_v55 = vld [vmem:[#allocation9 + $0x3d0] ss:$8 sps:$4 sm:$0xff]  }
 0x235   :  { %v11766_v13 = vld.sshfl [vmem:[#allocation2 + $0xb8] sm:$0x5a pattern:$0x76325410]  ;;  %v11773_v30 = vrot.slane %v2314_v38, 9  ;;  %v2358_v27 = vrot.slane %v2315_v43, 7  ;;  %6938 = vmatpush1.bf16.msra.mxu1 %v13396_v46 }
 0x236   :  { %v2330_v19 = vcombine.low %v11765_v11, %v11766_v13  ;;  %v2331_v44 = vcombine.high %v11765_v11, %v11766_v13  ;;  %v13410_v10 = vld [vmem:[#allocation9 + $0x794] ss:$8 sps:$4 sm:$0xff]   ;;  %6939 = vmatprep.subr.bf16.mxu1 %v13404_v1  ;;  %v13407_v11 = vld [vmem:[#allocation9 + $0x3e4] ss:$8 sps:$4 sm:$0xff]   ;;  %v13405_v46 = vld [vmem:[#allocation9 + $0x3e0] ss:$8 sps:$4 sm:$0xff]  }
 0x237   :  { %v15454_v43 = vsel %vm14910_vm14, %v11773_v30, %v2358_v27  ;;  %6736 = vmatpush1.bf16.msra.mxu0 %v13393_v40  ;;  %v13408_v13 = vld [vmem:[#allocation9 + $0x790] ss:$8 sps:$4 sm:$0xff]   ;;  %v13416_v14 = vld [vmem:[#allocation9 + $0x7a4] ss:$8 sps:$4 sm:$0xff]   ;;  %v13413_v30 = vld [vmem:[#allocation9 + $0x3f4] ss:$8 sps:$4 sm:$0xff]   ;;  %v15463_v27 = vrot.slane %v3041_v3, %v14808_v48 }
 0x238   :  { %v11774_v59 = vrot.slane %v2330_v19, 9  ;;  %v2362_v58 = vrot.slane %v2331_v44, 7  ;;  %6737 = vmatprep.subr.bf16.mxu0 %v13401_v20  ;;  %v13411_v20 = vld [vmem:[#allocation9 + $0x3f0] ss:$8 sps:$4 sm:$0xff]   ;;  %v13414_v19 = vld [vmem:[#allocation9 + $0x7a0] ss:$8 sps:$4 sm:$0xff]  }
 0x239   :  { %6940 = vmatpush1.bf16.msra.mxu1 %v13402_v62  ;;  %v13419_v62 = vld [vmem:[#allocation9 + $0x7b4] ss:$8 sps:$4 sm:$0xff]   ;;  %v13417_v3 = vld [vmem:[#allocation9 + $0x7b0] ss:$8 sps:$4 sm:$0xff]  }
 0x23a   :  { %v15458_v2 = vsel %vm14910_vm14, %v11774_v59, %v2362_v58  ;;  %6941 = vmatprep.subr.bf16.mxu1 %v13410_v10  ;;  %v13422_v10 = vld [vmem:[#allocation9 + $0x7c4] ss:$8 sps:$4 sm:$0xff]   ;;  %v13425_v59 = vld [vmem:[#allocation9 + $0x7d4] ss:$8 sps:$4 sm:$0xff]   ;;  %v16145_v58 = vcombine.low %v15099_v35, %v15102_v9  ;;  %v16147_v35 = vcombine.low %v15132_v22, %v15129_v54 }
 0x23b   :  { %v3043_v38 = vcombine.high %v15454_v43, %v15458_v2  ;;  %6738 = vmatpush1.bf16.msra.mxu0 %v13399_v55  ;;  %v13420_v55 = vld [vmem:[#allocation9 + $0x7c0] ss:$8 sps:$4 sm:$0xff]   ;;  %v13437_v1 = vld [vmem:[#allocation9 + $0x814] ss:$8 sps:$4 sm:$0xff]  }
 0x23c   :  { %6739 = vmatprep.subr.bf16.mxu0 %v13407_v11  ;;  %v16146_v11 = vcombine.high %v15132_v22, %v15129_v54  ;;  %v2686_v22 = vcombine.low %v15191_v57, %v15195_v17  ;;  %v13441_v17 = vld [vmem:[#allocation9 + $0x830] ss:$8 sps:$4 sm:$0xff]  }
 0x23d   :  { %v15466_v44 = vrot.slane %v3043_v38, %v14808_v48  ;;  %6942 = vmatpush1.bf16.msra.mxu1 %v13408_v13  ;;  %v13428_v38 = vld [vmem:[#allocation9 + $0x7e4] ss:$8 sps:$4 sm:$0xff]  }
 0x23e   :  { %6943 = vmatprep.subr.bf16.mxu1 %v13416_v14  ;;  %v13423_v14 = vld [vmem:[#allocation9 + $0x7d0] ss:$8 sps:$4 sm:$0xff]   ;;  %v11674_v13 = vld.sshfl [vmem:[#allocation2 + $0x88] sm:$0xf pattern:$0x76325410] }
 0x23f   :  { %v3075_v40 = vcombine.high %v15463_v27, %v15466_v44  ;;  %6740 = vmatpush1.bf16.msra.mxu0 %v13405_v46  ;;  %v11672_v46 = vld.sshfl [vmem:[#allocation2 + $0x78] sm:$0xf pattern:$0x76325410] }
 0x240   :  { %6741 = vmatprep.subr.bf16.mxu0 %v13413_v30  ;;  %v11676_v30 = vld.sshfl [vmem:[#allocation2 + $0x98] sm:$0xf pattern:$0x76325410]  ;;  %v11788_v9 = vcombine.low %v11672_v46, %v11674_v13  ;;  %v13440_v46 = vld [vmem:[#allocation9 + $0x824] ss:$8 sps:$4 sm:$0xff]   ;;  %v2684_v13 = vcombine.low %v15181_v39, %v15185_v49 }
 0x241   :  { %6944 = vmatpush1.bf16.msra.mxu1 %v13414_v19  ;;  %v13426_v19 = vld [vmem:[#allocation9 + $0x7e0] ss:$8 sps:$4 sm:$0xff]   ;;  %v13446_v39 = vld [vmem:[#allocation9 + $0x844] ss:$8 sps:$4 sm:$0xff]  }
 0x242   :  { %6945 = vmatprep.subr.bf16.mxu1 %v13419_v62  ;;  %v13431_v62 = vld [vmem:[#allocation9 + $0x7f4] ss:$8 sps:$4 sm:$0xff]   ;;  %v13444_v49 = vld [vmem:[#allocation9 + $0x840] ss:$8 sps:$4 sm:$0xff]  }
 0x243   :  { %6742 = vmatpush1.bf16.msra.mxu0 %v13411_v20  ;;  %v11678_v20 = vld.sshfl [vmem:[#allocation2 + $0xa8] sm:$0xf pattern:$0x76325410] }
 0x245   :  { %6946 = vmatpush1.bf16.msra.mxu1 %v13417_v3  ;;  %v11790_v3 = vcombine.low %v11676_v30, %v11678_v20  ;;  %v13438_v30 = vld [vmem:[#allocation9 + $0x820] ss:$8 sps:$4 sm:$0xff]   ;;  %v15490_v20 = vrot.slane %v2686_v22, %v14808_v48  ;;  %v13467_v22 = vld [vmem:[#allocation9 + $0x8b4] ss:$8 sps:$4 sm:$0xff]  }
 0x246   :  { %6744 = vmatmul.mubr.bf16.vlgmr.msra.gmra.mrb[16].mxu0 %v16145_v58  ;;  %6947 = vmatprep.subr.bf16.mxu1 %v13422_v10  ;;  %v13429_v10 = vld [vmem:[#allocation9 + $0x7f0] ss:$8 sps:$4 sm:$0xff]   ;;  %v13432_v58 = vld [vmem:[#allocation9 + $0x800] ss:$8 sps:$4 sm:$0xff]  }
 0x247   :  { %6753 = vmatprep.mubr.bf16.mxu0 %v16146_v11  ;;  %v2671_v11 = vrot.slane %v11790_v3, %v14808_v48  ;;  %v13455_v3 = vld [vmem:[#allocation9 + $0x874] ss:$8 sps:$4 sm:$0xff]  }
 0x249   :  { %6948 = vmatpush1.bf16.msra.mxu1 %v13420_v55  ;;  %v13434_v55 = vld [vmem:[#allocation9 + $0x804] ss:$8 sps:$4 sm:$0xff]  }
 0x24a   :  { %6949 = vmatprep.subr.bf16.mxu1 %v13425_v59  ;;  %v2657_v59 = vrot.slane %v11788_v9, %v14808_v48  ;;  %v13450_v9 = vld [vmem:[#allocation9 + $0x860] ss:$8 sps:$4 sm:$0xff]  }
 0x24c   :  { %v2675_v54 = vcombine.high %v2657_v59, %v2671_v11 }
 0x24d   :  { %6950 = vmatpush1.bf16.msra.mxu1 %v13423_v14  ;;  %v2638_v14 = vcombine.low %v15364_v60, %v15361_v26  ;;  %v15493_v26 = vrot.slane %v2684_v13, %v14808_v48  ;;  %v2674_v60 = vcombine.low %v2657_v59, %v2671_v11  ;;  %v13461_v59 = vld [vmem:[#allocation9 + $0x894] ss:$8 sps:$4 sm:$0xff]   ;;  %v13459_v11 = vld [vmem:[#allocation9 + $0x890] ss:$8 sps:$4 sm:$0xff]   ;;  %v13468_v13 = vld [vmem:[#allocation9 + $0x8c0] ss:$8 sps:$4 sm:$0xff]  }
 0x24e   :  { %6754 = vmatmul.mubr.bf16.gmra.mrb[20].mxu0 %v16147_v35  ;;  %6951 = vmatprep.subr.bf16.mxu1 %v13428_v38  ;;  %v13435_v38 = vld [vmem:[#allocation9 + $0x810] ss:$8 sps:$4 sm:$0xff]   ;;  %v13452_v35 = vld [vmem:[#allocation9 + $0x864] ss:$8 sps:$4 sm:$0xff]  }
 0x24f   :  { %v2717_v57 = vcombine.high %v15493_v26, %v15490_v20 }
 0x251   :  { %6952 = vmatpush1.bf16.msra.mxu1 %v13426_v19  ;;  %v13443_v19 = vld [vmem:[#allocation9 + $0x834] ss:$8 sps:$4 sm:$0xff]  }
 0x252   :  { %6953 = vmatprep.subr.bf16.mxu1 %v13431_v62  ;;  %v13447_v62 = vld [vmem:[#allocation9 + $0x850] ss:$8 sps:$4 sm:$0xff]  }
 0x255   :  { %6954 = vmatpush1.bf16.msra.mxu1 %v13429_v10  ;;  %v13453_v10 = vld [vmem:[#allocation9 + $0x870] ss:$8 sps:$4 sm:$0xff]  }
 0x256   :  { %6976 = vmatprep.subr.bf16.mxu1 %v13434_v55  ;;  %v13458_v55 = vld [vmem:[#allocation9 + $0x884] ss:$8 sps:$4 sm:$0xff]  }
 0x258   :  { %6956 = vmatmul.mubr.bf16.vlgmr.msra.gmra.mrb[0].mxu1 %v2638_v14  ;;  %v13464_v14 = vld [vmem:[#allocation9 + $0x8a4] ss:$8 sps:$4 sm:$0xff]  }
 0x259   :  { %6965 = vmatprep.mubr.bf16.mxu1 %v2675_v54  ;;  %6977 = vmatpush1.bf16.msra.mxu1 %v13432_v58  ;;  %v13456_v58 = vld [vmem:[#allocation9 + $0x880] ss:$8 sps:$4 sm:$0xff]  }
 0x25a   :  { %6978 = vmatprep.subr.bf16.mxu1 %v13437_v1  ;;  %v13449_v1 = vld [vmem:[#allocation9 + $0x854] ss:$8 sps:$4 sm:$0xff]   ;;  %v13462_v54 = vld [vmem:[#allocation9 + $0x8a0] ss:$8 sps:$4 sm:$0xff]  }
 0x25d   :  { %6979 = vmatpush1.bf16.msra.mxu1 %v13435_v38  ;;  %v13465_v38 = vld [vmem:[#allocation9 + $0x8b0] ss:$8 sps:$4 sm:$0xff]  }
 0x25e   :  { %6980 = vmatprep.subr.bf16.mxu1 %v13440_v46  ;;  %v13470_v46 = vld [vmem:[#allocation9 + $0x8c4] ss:$8 sps:$4 sm:$0xff]  }
 0x260   :  { %6966 = vmatmul.mubr.bf16.gmra.mrb[4].mxu1 %v2674_v60  ;;  %v13476_v60 = vld [vmem:[#allocation9 + $0x8e4] ss:$8 sps:$4 sm:$0xff]  }
 0x261   :  { %6981 = vmatpush1.bf16.msra.mxu1 %v13438_v30  ;;  %7008 = vmatprep.mubr.bf16.mxu1 %v2717_v57  ;;  %v13473_v30 = vld [vmem:[#allocation9 + $0x8d4] ss:$8 sps:$4 sm:$0xff]   ;;  %v13474_v57 = vld [vmem:[#allocation9 + $0x8e0] ss:$8 sps:$4 sm:$0xff]  }
 0x262   :  { %6982 = vmatprep.subr.bf16.mxu1 %v13443_v19  ;;  %v13471_v19 = vld [vmem:[#allocation9 + $0x8d0] ss:$8 sps:$4 sm:$0xff]  }
 0x265   :  { %6983 = vmatpush1.bf16.msra.mxu1 %v13441_v17  ;;  %v13479_v17 = vld [vmem:[#allocation9 + $0x8f4] ss:$8 sps:$4 sm:$0xff]  }
 0x266   :  { %6984 = vmatprep.subr.bf16.mxu1 %v13446_v39  ;;  %v13477_v39 = vld [vmem:[#allocation9 + $0x8f0] ss:$8 sps:$4 sm:$0xff]  }
 0x269   :  { %6985 = vmatpush1.bf16.msra.mxu1 %v13444_v49  ;;  %v13482_v49 = vld [vmem:[#allocation9 + $0x904] ss:$8 sps:$4 sm:$0xff]  }
 0x26a   :  { %6986 = vmatprep.subr.bf16.mxu1 %v13449_v1  ;;  %v13480_v1 = vld [vmem:[#allocation9 + $0x900] ss:$8 sps:$4 sm:$0xff]  }
 0x26d   :  { %6987 = vmatpush1.bf16.msra.mxu1 %v13447_v62  ;;  %v13485_v62 = vld [vmem:[#allocation9 + $0x914] ss:$8 sps:$4 sm:$0xff]  }
 0x26e   :  { %6988 = vmatprep.subr.bf16.mxu1 %v13452_v35  ;;  %v2716_v35 = vcombine.low %v15493_v26, %v15490_v20  ;;  %v16150_v20 = vcombine.high %v15200_v50, %v15203_v5  ;;  %v13489_v26 = vld [vmem:[#allocation9 + $0x930] ss:$8 sps:$4 sm:$0xff]  }
 0x271   :  { %6989 = vmatpush1.bf16.msra.mxu1 %v13450_v9  ;;  %v16148_v9 = vcombine.high %v15211_v25, %v15233_v56 }
 0x272   :  { %6990 = vmatprep.subr.bf16.mxu1 %v13455_v3  ;;  %v13483_v3 = vld [vmem:[#allocation9 + $0x910] ss:$8 sps:$4 sm:$0xff]  }
 0x275   :  { %6991 = vmatpush1.bf16.msra.mxu1 %v13453_v10  ;;  %v13488_v10 = vld [vmem:[#allocation9 + $0x924] ss:$8 sps:$4 sm:$0xff]  }
 0x276   :  { %6992 = vmatprep.subr.bf16.mxu1 %v13458_v55  ;;  %v13486_v55 = vld [vmem:[#allocation9 + $0x920] ss:$8 sps:$4 sm:$0xff]  }
 0x279   :  { %6993 = vmatpush1.bf16.msra.mxu1 %v13456_v58  ;;  %v13491_v58 = vld [vmem:[#allocation9 + $0x934] ss:$8 sps:$4 sm:$0xff]  }
 0x27a   :  { %6994 = vmatprep.subr.bf16.mxu1 %v13461_v59  ;;  %v16149_v59 = vcombine.low %v15211_v25, %v15233_v56  ;;  %v13503_v25 = vld [vmem:[#allocation9 + $0x974] ss:$8 sps:$4 sm:$0xff]   ;;  %v13501_v56 = vld [vmem:[#allocation9 + $0x970] ss:$8 sps:$4 sm:$0xff]  }
 0x27d   :  { %6995 = vmatpush1.bf16.msra.mxu1 %v13459_v11  ;;  %v13494_v11 = vld [vmem:[#allocation9 + $0x944] ss:$8 sps:$4 sm:$0xff]  }
 0x27e   :  { %6996 = vmatprep.subr.bf16.mxu1 %v13464_v14  ;;  %v13492_v14 = vld [vmem:[#allocation9 + $0x940] ss:$8 sps:$4 sm:$0xff]  }
 0x281   :  { %6997 = vmatpush1.bf16.msra.mxu1 %v13462_v54  ;;  %v13497_v54 = vld [vmem:[#allocation9 + $0x954] ss:$8 sps:$4 sm:$0xff]  }
 0x282   :  { %6998 = vmatprep.subr.bf16.mxu1 %v13467_v22  ;;  %v13495_v22 = vld [vmem:[#allocation9 + $0x950] ss:$8 sps:$4 sm:$0xff]  }
 0x285   :  { %6999 = vmatpush1.bf16.msra.mxu1 %v13465_v38  ;;  %v13500_v38 = vld [vmem:[#allocation9 + $0x964] ss:$8 sps:$4 sm:$0xff]  }
 0x286   :  { %7000 = vmatprep.subr.bf16.mxu1 %v13470_v46  ;;  %v13498_v46 = vld [vmem:[#allocation9 + $0x960] ss:$8 sps:$4 sm:$0xff]  }
 0x289   :  { %7001 = vmatpush1.bf16.msra.mxu1 %v13468_v13  ;;  %v13506_v13 = vld [vmem:[#allocation9 + $0x984] ss:$8 sps:$4 sm:$0xff]  }
 0x28a   :  { %7002 = vmatprep.subr.bf16.mxu1 %v13473_v30  ;;  %v13504_v30 = vld [vmem:[#allocation9 + $0x980] ss:$8 sps:$4 sm:$0xff]  }
 0x28d   :  { %7003 = vmatpush1.bf16.msra.mxu1 %v13471_v19  ;;  %v13509_v19 = vld [vmem:[#allocation9 + $0x994] ss:$8 sps:$4 sm:$0xff]  }
 0x28e   :  { %7004 = vmatprep.subr.bf16.mxu1 %v13476_v60  ;;  %v13507_v60 = vld [vmem:[#allocation9 + $0x990] ss:$8 sps:$4 sm:$0xff]  }
 0x291   :  { %7005 = vmatpush1.bf16.msra.mxu1 %v13474_v57  ;;  %v13512_v57 = vld [vmem:[#allocation9 + $0x9a4] ss:$8 sps:$4 sm:$0xff]  }
 0x292   :  { %7006 = vmatprep.subr.bf16.mxu1 %v13479_v17  ;;  %v13510_v17 = vld [vmem:[#allocation9 + $0x9a0] ss:$8 sps:$4 sm:$0xff]  }
 0x295   :  { %7007 = vmatpush1.bf16.msra.mxu1 %v13477_v39  ;;  %v13515_v39 = vld [vmem:[#allocation9 + $0x9b4] ss:$8 sps:$4 sm:$0xff]  }
 0x296   :  { %7029 = vmatprep.subr.bf16.mxu1 %v13482_v49  ;;  %v13513_v49 = vld [vmem:[#allocation9 + $0x9b0] ss:$8 sps:$4 sm:$0xff]  }
 0x298   :  { %7009 = vmatmul.mubr.bf16.vlgmr.msra.gmra.mrb[0].mxu1 %v2716_v35  ;;  %v13521_v35 = vld [vmem:[#allocation9 + $0x9d4] ss:$8 sps:$4 sm:$0xff]  }
 0x299   :  { %7018 = vmatprep.mubr.bf16.mxu1 %v16148_v9  ;;  %7030 = vmatpush1.bf16.msra.mxu1 %v13480_v1  ;;  %v13518_v1 = vld [vmem:[#allocation9 + $0x9c4] ss:$8 sps:$4 sm:$0xff]   ;;  %v13519_v9 = vld [vmem:[#allocation9 + $0x9d0] ss:$8 sps:$4 sm:$0xff]  }
 0x29a   :  { %7031 = vmatprep.subr.bf16.mxu1 %v13485_v62  ;;  %v13516_v62 = vld [vmem:[#allocation9 + $0x9c0] ss:$8 sps:$4 sm:$0xff]  }
 0x29d   :  { %7032 = vmatpush1.bf16.msra.mxu1 %v13483_v3  ;;  %v13524_v3 = vld [vmem:[#allocation9 + $0x9e4] ss:$8 sps:$4 sm:$0xff]  }
 0x29e   :  { %7033 = vmatprep.subr.bf16.mxu1 %v13488_v10  ;;  %v13522_v10 = vld [vmem:[#allocation9 + $0x9e0] ss:$8 sps:$4 sm:$0xff]  }
 0x2a0   :  { %7019 = vmatmul.mubr.bf16.gmra.mrb[4].mxu1 %v16149_v59  ;;  %v13530_v59 = vld [vmem:[#allocation9 + $0xa04] ss:$8 sps:$4 sm:$0xff]  }
 0x2a1   :  { %7034 = vmatpush1.bf16.msra.mxu1 %v13486_v55  ;;  %7061 = vmatprep.mubr.bf16.mxu1 %v16150_v20  ;;  %v13527_v55 = vld [vmem:[#allocation9 + $0x9f4] ss:$8 sps:$4 sm:$0xff]   ;;  %v13528_v20 = vld [vmem:[#allocation9 + $0xa00] ss:$8 sps:$4 sm:$0xff]  }
 0x2a2   :  { %7035 = vmatprep.subr.bf16.mxu1 %v13491_v58  ;;  %v13525_v58 = vld [vmem:[#allocation9 + $0x9f0] ss:$8 sps:$4 sm:$0xff]  }
 0x2a5   :  { %7036 = vmatpush1.bf16.msra.mxu1 %v13489_v26  ;;  %v13533_v26 = vld [vmem:[#allocation9 + $0xa14] ss:$8 sps:$4 sm:$0xff]  }
 0x2a6   :  { %7037 = vmatprep.subr.bf16.mxu1 %v13494_v11  ;;  %v2766_v11 = vcombine.low %v15260_v16, %v15248_v24  ;;  %v13534_v24 = vld [vmem:[#allocation9 + $0xa20] ss:$8 sps:$4 sm:$0xff]  }
 0x2a9   :  { %7038 = vmatpush1.bf16.msra.mxu1 %v13492_v14  ;;  %v16151_v14 = vcombine.low %v15200_v50, %v15203_v5  ;;  %v13539_v50 = vld [vmem:[#allocation9 + $0xa34] ss:$8 sps:$4 sm:$0xff]  }
 0x2aa   :  { %7039 = vmatprep.subr.bf16.mxu1 %v13497_v54  ;;  %v16152_v54 = vcombine.high %v15239_v15, %v15242_v53 }
 0x2ad   :  { %7040 = vmatpush1.bf16.msra.mxu1 %v13495_v22  ;;  %v13531_v22 = vld [vmem:[#allocation9 + $0xa10] ss:$8 sps:$4 sm:$0xff]  }
 0x2ae   :  { %7041 = vmatprep.subr.bf16.mxu1 %v13500_v38  ;;  %v2764_v38 = vcombine.low %v15226_v34, %v15230_v51  ;;  %v13537_v34 = vld [vmem:[#allocation9 + $0xa30] ss:$8 sps:$4 sm:$0xff]   ;;  %v13542_v51 = vld [vmem:[#allocation9 + $0xa44] ss:$8 sps:$4 sm:$0xff]  }
 0x2b0   :  { %v15522_v16 = vrot.slane %v2764_v38, %v14808_v48  ;;  %v13578_v38 = vld [vmem:[#allocation9 + $0xb04] ss:$8 sps:$4 sm:$0xff]  }
 0x2b1   :  { %7042 = vmatpush1.bf16.msra.mxu1 %v13498_v46  ;;  %v13536_v46 = vld [vmem:[#allocation9 + $0xa24] ss:$8 sps:$4 sm:$0xff]  }
 0x2b2   :  { %7043 = vmatprep.subr.bf16.mxu1 %v13503_v25  ;;  %v15519_v25 = vrot.slane %v2766_v11, %v14808_v48  ;;  %v13575_v11 = vld [vmem:[#allocation9 + $0xaf4] ss:$8 sps:$4 sm:$0xff]  }
 0x2b4   :  { %v2797_v5 = vcombine.high %v15522_v16, %v15519_v25 }
 0x2b5   :  { %7044 = vmatpush1.bf16.msra.mxu1 %v13501_v56  ;;  %v16153_v56 = vcombine.low %v15239_v15, %v15242_v53  ;;  %v13549_v15 = vld [vmem:[#allocation9 + $0xa70] ss:$8 sps:$4 sm:$0xff]   ;;  %v13554_v53 = vld [vmem:[#allocation9 + $0xa84] ss:$8 sps:$4 sm:$0xff]  }
 0x2b6   :  { %7045 = vmatprep.subr.bf16.mxu1 %v13506_v13  ;;  %v13540_v13 = vld [vmem:[#allocation9 + $0xa40] ss:$8 sps:$4 sm:$0xff]  }
 0x2b9   :  { %7046 = vmatpush1.bf16.msra.mxu1 %v13504_v30  ;;  %v13545_v30 = vld [vmem:[#allocation9 + $0xa54] ss:$8 sps:$4 sm:$0xff]  }
 0x2ba   :  { %7047 = vmatprep.subr.bf16.mxu1 %v13509_v19  ;;  %v13543_v19 = vld [vmem:[#allocation9 + $0xa50] ss:$8 sps:$4 sm:$0xff]  }
 0x2bd   :  { %7048 = vmatpush1.bf16.msra.mxu1 %v13507_v60  ;;  %v13548_v60 = vld [vmem:[#allocation9 + $0xa64] ss:$8 sps:$4 sm:$0xff]  }
 0x2be   :  { %7049 = vmatprep.subr.bf16.mxu1 %v13512_v57  ;;  %v13546_v57 = vld [vmem:[#allocation9 + $0xa60] ss:$8 sps:$4 sm:$0xff]  }
 0x2c1   :  { %7050 = vmatpush1.bf16.msra.mxu1 %v13510_v17  ;;  %v13551_v17 = vld [vmem:[#allocation9 + $0xa74] ss:$8 sps:$4 sm:$0xff]  }
 0x2c2   :  { %7051 = vmatprep.subr.bf16.mxu1 %v13515_v39  ;;  %v13552_v39 = vld [vmem:[#allocation9 + $0xa80] ss:$8 sps:$4 sm:$0xff]  }
 0x2c5   :  { %7052 = vmatpush1.bf16.msra.mxu1 %v13513_v49  ;;  %v13557_v49 = vld [vmem:[#allocation9 + $0xa94] ss:$8 sps:$4 sm:$0xff]  }
 0x2c6   :  { %7053 = vmatprep.subr.bf16.mxu1 %v13518_v1  ;;  %v13555_v1 = vld [vmem:[#allocation9 + $0xa90] ss:$8 sps:$4 sm:$0xff]  }
 0x2c9   :  { %7054 = vmatpush1.bf16.msra.mxu1 %v13516_v62  ;;  %v13560_v62 = vld [vmem:[#allocation9 + $0xaa4] ss:$8 sps:$4 sm:$0xff]  }
 0x2ca   :  { %7055 = vmatprep.subr.bf16.mxu1 %v13521_v35  ;;  %v13558_v35 = vld [vmem:[#allocation9 + $0xaa0] ss:$8 sps:$4 sm:$0xff]  }
 0x2cd   :  { %7056 = vmatpush1.bf16.msra.mxu1 %v13519_v9  ;;  %v13563_v9 = vld [vmem:[#allocation9 + $0xab4] ss:$8 sps:$4 sm:$0xff]  }
 0x2ce   :  { %7057 = vmatprep.subr.bf16.mxu1 %v13524_v3  ;;  %v13561_v3 = vld [vmem:[#allocation9 + $0xab0] ss:$8 sps:$4 sm:$0xff]  }
 0x2d1   :  { %7058 = vmatpush1.bf16.msra.mxu1 %v13522_v10  ;;  %v13566_v10 = vld [vmem:[#allocation9 + $0xac4] ss:$8 sps:$4 sm:$0xff]  }
 0x2d2   :  { %7059 = vmatprep.subr.bf16.mxu1 %v13527_v55  ;;  %v13564_v55 = vld [vmem:[#allocation9 + $0xac0] ss:$8 sps:$4 sm:$0xff]  }
 0x2d5   :  { %7060 = vmatpush1.bf16.msra.mxu1 %v13525_v58  ;;  %v13569_v58 = vld [vmem:[#allocation9 + $0xad4] ss:$8 sps:$4 sm:$0xff]  }
 0x2d6   :  { %7082 = vmatprep.subr.bf16.mxu1 %v13530_v59  ;;  %v13567_v59 = vld [vmem:[#allocation9 + $0xad0] ss:$8 sps:$4 sm:$0xff]  }
 0x2d8   :  { %7062 = vmatmul.mubr.bf16.vlgmr.msra.gmra.mrb[0].mxu1 %v16151_v14  ;;  %v2802_v14 = vcombine.low %v15286_v52, %v15290_v29  ;;  %v13584_v29 = vld [vmem:[#allocation9 + $0xb24] ss:$8 sps:$4 sm:$0xff]  }
 0x2d9   :  { %7071 = vmatprep.mubr.bf16.mxu1 %v16152_v54  ;;  %7083 = vmatpush1.bf16.msra.mxu1 %v13528_v20  ;;  %v13572_v20 = vld [vmem:[#allocation9 + $0xae4] ss:$8 sps:$4 sm:$0xff]   ;;  %v13573_v54 = vld [vmem:[#allocation9 + $0xaf0] ss:$8 sps:$4 sm:$0xff]  }
 0x2da   :  { %7084 = vmatprep.subr.bf16.mxu1 %v13533_v26  ;;  %v13570_v26 = vld [vmem:[#allocation9 + $0xae0] ss:$8 sps:$4 sm:$0xff]  }
 0x2dd   :  { %7085 = vmatpush1.bf16.msra.mxu1 %v13531_v22  ;;  %v2800_v22 = vcombine.low %v15274_v0, %v15278_v6  ;;  %v13579_v0 = vld [vmem:[#allocation9 + $0xb10] ss:$8 sps:$4 sm:$0xff]  }
 0x2de   :  { %7086 = vmatprep.subr.bf16.mxu1 %v13536_v46  ;;  %v2824_v46 = vrot.slane %v2802_v14, %v14808_v48  ;;  %v13606_v14 = vld [vmem:[#allocation9 + $0xba0] ss:$8 sps:$4 sm:$0xff]  }
 0x2e0   :  { %7072 = vmatmul.mubr.bf16.gmra.mrb[4].mxu1 %v16153_v56  ;;  %v13581_v56 = vld [vmem:[#allocation9 + $0xb14] ss:$8 sps:$4 sm:$0xff]  }
 0x2e1   :  { %7087 = vmatpush1.bf16.msra.mxu1 %v13534_v24  ;;  %7114 = vmatprep.mubr.bf16.mxu1 %v2797_v5  ;;  %v13576_v24 = vld [vmem:[#allocation9 + $0xb00] ss:$8 sps:$4 sm:$0xff]   ;;  %v2796_v5 = vcombine.low %v15522_v16, %v15519_v25  ;;  %v13587_v16 = vld [vmem:[#allocation9 + $0xb34] ss:$8 sps:$4 sm:$0xff]  }
 0x2e2   :  { %7088 = vmatprep.subr.bf16.mxu1 %v13539_v50  ;;  %v2810_v50 = vrot.slane %v2800_v22, %v14808_v48  ;;  %v13609_v22 = vld [vmem:[#allocation9 + $0xbb0] ss:$8 sps:$4 sm:$0xff]  }
 0x2e4   :  { %v2832_v25 = vcombine.low %v2810_v50, %v2824_v46 }
 0x2e5   :  { %7089 = vmatpush1.bf16.msra.mxu1 %v13537_v34  ;;  %v2833_v34 = vcombine.high %v2810_v50, %v2824_v46  ;;  %v13612_v46 = vld [vmem:[#allocation9 + $0xbc0] ss:$8 sps:$4 sm:$0xff]   ;;  %v13615_v50 = vld [vmem:[#allocation9 + $0xbd0] ss:$8 sps:$4 sm:$0xff]  }
 0x2e6   :  { %7090 = vmatprep.subr.bf16.mxu1 %v13542_v51 }
 0x2e9   :  { %7091 = vmatpush1.bf16.msra.mxu1 %v13540_v13 }
 0x2ea   :  { %7092 = vmatprep.subr.bf16.mxu1 %v13545_v30  ;;  %v13582_v30 = vld [vmem:[#allocation9 + $0xb20] ss:$8 sps:$4 sm:$0xff]  }
 0x2ed   :  { %7093 = vmatpush1.bf16.msra.mxu1 %v13543_v19 }
 0x2ee   :  { %7094 = vmatprep.subr.bf16.mxu1 %v13548_v60  ;;  %v16154_v60 = vld [vmem:[#allocation26_spill] sm:$0xff] }
 0x2f1   :  { %7095 = vmatpush1.bf16.msra.mxu1 %v13546_v57  ;;  %v16155_v57 = vcombine.high %v15265_v18, %v16154_v60 }
 0x2f2   :  { %7096 = vmatprep.subr.bf16.mxu1 %v13551_v17  ;;  %v13585_v17 = vld [vmem:[#allocation9 + $0xb30] ss:$8 sps:$4 sm:$0xff]  }
 0x2f5   :  { %7097 = vmatpush1.bf16.msra.mxu1 %v13549_v15 }
 0x2f6   :  { %7098 = vmatprep.subr.bf16.mxu1 %v13554_v53  ;;  %v13590_v53 = vld [vmem:[#allocation9 + $0xb44] ss:$8 sps:$4 sm:$0xff]  }
 0x2f9   :  { %7099 = vmatpush1.bf16.msra.mxu1 %v13552_v39 }
 0x2fa   :  { %7100 = vmatprep.subr.bf16.mxu1 %v13557_v49 }
 0x2fd   :  { %7101 = vmatpush1.bf16.msra.mxu1 %v13555_v1  ;;  %v13588_v1 = vld [vmem:[#allocation9 + $0xb40] ss:$8 sps:$4 sm:$0xff]  }
 0x2fe   :  { %7102 = vmatprep.subr.bf16.mxu1 %v13560_v62  ;;  %v13593_v62 = vld [vmem:[#allocation9 + $0xb54] ss:$8 sps:$4 sm:$0xff]  }
 0x301   :  { %7103 = vmatpush1.bf16.msra.mxu1 %v13558_v35  ;;  %v13591_v35 = vld [vmem:[#allocation9 + $0xb50] ss:$8 sps:$4 sm:$0xff]  }
 0x302   :  { %7104 = vmatprep.subr.bf16.mxu1 %v13563_v9  ;;  %v13596_v9 = vld [vmem:[#allocation9 + $0xb64] ss:$8 sps:$4 sm:$0xff]  }
 0x305   :  { %7105 = vmatpush1.bf16.msra.mxu1 %v13561_v3  ;;  %v13594_v3 = vld [vmem:[#allocation9 + $0xb60] ss:$8 sps:$4 sm:$0xff]  }
 0x306   :  { %7106 = vmatprep.subr.bf16.mxu1 %v13566_v10  ;;  %v13599_v10 = vld [vmem:[#allocation9 + $0xb74] ss:$8 sps:$4 sm:$0xff]  }
 0x309   :  { %7107 = vmatpush1.bf16.msra.mxu1 %v13564_v55  ;;  %v13597_v55 = vld [vmem:[#allocation9 + $0xb70] ss:$8 sps:$4 sm:$0xff]  }
 0x30a   :  { %7108 = vmatprep.subr.bf16.mxu1 %v13569_v58  ;;  %v13602_v58 = vld [vmem:[#allocation9 + $0xb84] ss:$8 sps:$4 sm:$0xff]  }
 0x30d   :  { %7109 = vmatpush1.bf16.msra.mxu1 %v13567_v59  ;;  %v13600_v59 = vld [vmem:[#allocation9 + $0xb80] ss:$8 sps:$4 sm:$0xff]  }
 0x30e   :  { %7110 = vmatprep.subr.bf16.mxu1 %v13572_v20  ;;  %v13605_v20 = vld [vmem:[#allocation9 + $0xb94] ss:$8 sps:$4 sm:$0xff]  }
 0x311   :  { %7111 = vmatpush1.bf16.msra.mxu1 %v13570_v26  ;;  %v13603_v26 = vld [vmem:[#allocation9 + $0xb90] ss:$8 sps:$4 sm:$0xff]  }
 0x312   :  { %7112 = vmatprep.subr.bf16.mxu1 %v13575_v11  ;;  %v13608_v11 = vld [vmem:[#allocation9 + $0xba4] ss:$8 sps:$4 sm:$0xff]  }
 0x315   :  { %7113 = vmatpush1.bf16.msra.mxu1 %v13573_v54  ;;  %v13611_v54 = vld [vmem:[#allocation9 + $0xbb4] ss:$8 sps:$4 sm:$0xff]  }
 0x316   :  { %7135 = vmatprep.subr.bf16.mxu1 %v13578_v38  ;;  %v13614_v38 = vld [vmem:[#allocation9 + $0xbc4] ss:$8 sps:$4 sm:$0xff]  }
 0x318   :  { %7115 = vmatmul.mubr.bf16.vlgmr.msra.gmra.mrb[0].mxu1 %v2796_v5  ;;  %v13620_v5 = vld [vmem:[#allocation9 + $0xbe4] ss:$8 sps:$4 sm:$0xff]  }
 0x319   :  { %v15537_v52 = vpop.f32.mrb[16].mxu0  ;;  %7124 = vmatprep.mubr.bf16.mxu1 %v2833_v34  ;;  %7136 = vmatpush1.bf16.msra.mxu1 %v13576_v24  ;;  %v13617_v24 = vld [vmem:[#allocation9 + $0xbd4] ss:$8 sps:$4 sm:$0xff]  }
 0x31a   :  { %v15539_v6 = vpop.f32.mrb[17].mxu0  ;;  %7137 = vmatprep.subr.bf16.mxu1 %v13581_v56  ;;  %v13618_v56 = vld [vmem:[#allocation9 + $0xbe0] ss:$8 sps:$4 sm:$0xff]   ;;  %v13623_v34 = vld [vmem:[#allocation9 + $0xbf4] ss:$8 sps:$4 sm:$0xff]  }
 0x31b   :  { %v15541_v51 = vpop.f32.mrb[18].mxu0 }
 0x31c   :  { %v15543_v13 = vpop.f32.mrb[19].mxu0 }
 0x31d   :  { %7138 = vmatpush1.bf16.msra.mxu1 %v13579_v0  ;;  %v13621_v0 = vld [vmem:[#allocation9 + $0xbf0] ss:$8 sps:$4 sm:$0xff]  }
 0x31e   :  { %7139 = vmatprep.subr.bf16.mxu1 %v13584_v29  ;;  %v13626_v29 = vld [vmem:[#allocation9 + $0xc04] ss:$8 sps:$4 sm:$0xff]  }
 0x320   :  { %7125 = vmatmul.mubr.bf16.gmra.mrb[4].mxu1 %v2832_v25  ;;  %v11725_v25 = vld.sshfl [vmem:[#allocation2 + $0x50] sm:$0xf pattern:$0x76325410] }
 0x321   :  { %v15545_v19 = vpop.f32.mrb[20].mxu0  ;;  %7140 = vmatpush1.bf16.msra.mxu1 %v13582_v30  ;;  %7167 = vmatprep.mubr.bf16.mxu1 %v16155_v57  ;;  %v11723_v30 = vld.sshfl [vmem:[#allocation2 + $0x40] sm:$0xf pattern:$0x76325410] }
 0x322   :  { %v15550_v15 = vpop.f32.mrb[21].mxu0  ;;  %7141 = vmatprep.subr.bf16.mxu1 %v13587_v16  ;;  %v13624_v16 = vld [vmem:[#allocation9 + $0xc00] ss:$8 sps:$4 sm:$0xff]  }
 0x323   :  { %v15552_v39 = vpop.f32.mrb[22].mxu0  ;;  %v11719_v57 = vld.sshfl [vmem:[#allocation2 + $0x20] sm:$0xf pattern:$0x76325410] }
 0x324   :  { %v15554_v49 = vpop.f32.mrb[23].mxu0 }
 0x325   :  { %7142 = vmatpush1.bf16.msra.mxu1 %v13585_v17  ;;  %v13629_v17 = vld [vmem:[#allocation9 + $0xc14] ss:$8 sps:$4 sm:$0xff]  }
 0x326   :  { %7143 = vmatprep.subr.bf16.mxu1 %v13590_v53  ;;  %v11721_v53 = vld.sshfl [vmem:[#allocation2 + $0x30] sm:$0xf pattern:$0x76325410] }
 0x329   :  { %7144 = vmatpush1.bf16.msra.mxu1 %v13588_v1  ;;  %v11793_v1 = vcombine.low %v11723_v30, %v11725_v25  ;;  %v13651_v30 = vld [vmem:[#allocation9 + $0xc90] ss:$8 sps:$4 sm:$0xff]   ;;  %v13656_v25 = vld [vmem:[#allocation9 + $0xca4] ss:$8 sps:$4 sm:$0xff]  }
 0x32a   :  { %7145 = vmatprep.subr.bf16.mxu1 %v13593_v62  ;;  %v16156_v62 = vcombine.low %v15265_v18, %v16154_v60  ;;  %v13635_v18 = vld [vmem:[#allocation9 + $0xc34] ss:$8 sps:$4 sm:$0xff]  }
 0x32d   :  { %7146 = vmatpush1.bf16.msra.mxu1 %v13591_v35  ;;  %v16157_v35 = vld [vmem:[#allocation27_spill] sm:$0xff] }
 0x32e   :  { %7147 = vmatprep.subr.bf16.mxu1 %v13596_v9  ;;  %v16158_v9 = vld [vmem:[#allocation28_spill] sm:$0xff] }
 0x331   :  { %7148 = vmatpush1.bf16.msra.mxu1 %v13594_v3  ;;  %v16159_v3 = vcombine.high %v16157_v35, %v16158_v9 }
 0x332   :  { %7149 = vmatprep.subr.bf16.mxu1 %v13599_v10  ;;  %v13627_v10 = vld [vmem:[#allocation9 + $0xc10] ss:$8 sps:$4 sm:$0xff]  }
 0x335   :  { %7150 = vmatpush1.bf16.msra.mxu1 %v13597_v55  ;;  %v11791_v55 = vcombine.low %v11719_v57, %v11721_v53  ;;  %v13659_v57 = vld [vmem:[#allocation9 + $0xcb4] ss:$8 sps:$4 sm:$0xff]   ;;  %v13662_v53 = vld [vmem:[#allocation9 + $0xcc4] ss:$8 sps:$4 sm:$0xff]  }
 0x336   :  { %7151 = vmatprep.subr.bf16.mxu1 %v13602_v58  ;;  %v13632_v58 = vld [vmem:[#allocation9 + $0xc24] ss:$8 sps:$4 sm:$0xff]  }
 0x339   :  { %7152 = vmatpush1.bf16.msra.mxu1 %v13600_v59  ;;  %v15563_v59 = vrot.slane %v11793_v1, %v14808_v48  ;;  %v13660_v1 = vld [vmem:[#allocation9 + $0xcc0] ss:$8 sps:$4 sm:$0xff]  }
 0x33a   :  { %7153 = vmatprep.subr.bf16.mxu1 %v13605_v20  ;;  %v13630_v20 = vld [vmem:[#allocation9 + $0xc20] ss:$8 sps:$4 sm:$0xff]  }
 0x33d   :  { %7154 = vmatpush1.bf16.msra.mxu1 %v13603_v26  ;;  %v15566_v26 = vrot.slane %v11791_v55, %v14808_v48  ;;  %v13666_v55 = vld [vmem:[#allocation9 + $0xce0] ss:$8 sps:$4 sm:$0xff]  }
 0x33e   :  { %7155 = vmatprep.subr.bf16.mxu1 %v13608_v11  ;;  %v16160_v11 = vcombine.low %v16157_v35, %v16158_v9  ;;  %v13663_v35 = vld [vmem:[#allocation9 + $0xcd0] ss:$8 sps:$4 sm:$0xff]   ;;  %v13668_v9 = vld [vmem:[#allocation9 + $0xce4] ss:$8 sps:$4 sm:$0xff]  }
 0x33f   :  { %v2877_v60 = vcombine.high %v15566_v26, %v15563_v59 }
 0x341   :  { %7156 = vmatpush1.bf16.msra.mxu1 %v13606_v14  ;;  %v13633_v14 = vld [vmem:[#allocation9 + $0xc30] ss:$8 sps:$4 sm:$0xff]  }
 0x342   :  { %7157 = vmatprep.subr.bf16.mxu1 %v13611_v54  ;;  %v13638_v54 = vld [vmem:[#allocation9 + $0xc44] ss:$8 sps:$4 sm:$0xff]  }
 0x345   :  { %7158 = vmatpush1.bf16.msra.mxu1 %v13609_v22  ;;  %v13636_v22 = vld [vmem:[#allocation9 + $0xc40] ss:$8 sps:$4 sm:$0xff]  }
 0x346   :  { %7159 = vmatprep.subr.bf16.mxu1 %v13614_v38  ;;  %v13641_v38 = vld [vmem:[#allocation9 + $0xc54] ss:$8 sps:$4 sm:$0xff]  }
 0x349   :  { %7160 = vmatpush1.bf16.msra.mxu1 %v13612_v46  ;;  %v13639_v46 = vld [vmem:[#allocation9 + $0xc50] ss:$8 sps:$4 sm:$0xff]  }
 0x34a   :  { %7161 = vmatprep.subr.bf16.mxu1 %v13617_v24  ;;  %v13644_v24 = vld [vmem:[#allocation9 + $0xc64] ss:$8 sps:$4 sm:$0xff]  }
 0x34d   :  { %7162 = vmatpush1.bf16.msra.mxu1 %v13615_v50  ;;  %v13642_v50 = vld [vmem:[#allocation9 + $0xc60] ss:$8 sps:$4 sm:$0xff]  }
 0x34e   :  { %7163 = vmatprep.subr.bf16.mxu1 %v13620_v5  ;;  %v13647_v5 = vld [vmem:[#allocation9 + $0xc74] ss:$8 sps:$4 sm:$0xff]  }
 0x351   :  { %7164 = vmatpush1.bf16.msra.mxu1 %v13618_v56  ;;  %v13645_v56 = vld [vmem:[#allocation9 + $0xc70] ss:$8 sps:$4 sm:$0xff]  }
 0x352   :  { %7165 = vmatprep.subr.bf16.mxu1 %v13623_v34  ;;  %v13650_v34 = vld [vmem:[#allocation9 + $0xc84] ss:$8 sps:$4 sm:$0xff]  }
 0x355   :  { %7166 = vmatpush1.bf16.msra.mxu1 %v13621_v0  ;;  %v13648_v0 = vld [vmem:[#allocation9 + $0xc80] ss:$8 sps:$4 sm:$0xff]  }
 0x356   :  { %7188 = vmatprep.subr.bf16.mxu1 %v13626_v29  ;;  %v13653_v29 = vld [vmem:[#allocation9 + $0xc94] ss:$8 sps:$4 sm:$0xff]  }
 0x358   :  { %7168 = vmatmul.mubr.bf16.vlgmr.msra.gmra.mrb[0].mxu1 %v16156_v62  ;;  %v13665_v62 = vld [vmem:[#allocation9 + $0xcd4] ss:$8 sps:$4 sm:$0xff]  }
 0x359   :  { %7177 = vmatprep.mubr.bf16.mxu1 %v16159_v3  ;;  %7189 = vmatpush1.bf16.msra.mxu1 %v13624_v16  ;;  %v13654_v16 = vld [vmem:[#allocation9 + $0xca0] ss:$8 sps:$4 sm:$0xff]  }
 0x35a   :  { %7190 = vmatprep.subr.bf16.mxu1 %v13629_v17  ;;  %v13657_v17 = vld [vmem:[#allocation9 + $0xcb0] ss:$8 sps:$4 sm:$0xff]   ;;  %v11731_v3 = vld.sshfl [vmem:[#allocation2 + $0xa0] sm:$0xf pattern:$0x76325410] }
 0x35d   :  { %7191 = vmatpush1.bf16.msra.mxu1 %v13627_v10  ;;  %v11733_v10 = vld.sshfl [vmem:[#allocation2 + $0xb0] sm:$0xf pattern:$0x76325410] }
 0x35e   :  { %7192 = vmatprep.subr.bf16.mxu1 %v13632_v58  ;;  %v11727_v58 = vld.sshfl [vmem:[#allocation2 + $0x80] sm:$0xf pattern:$0x76325410] }
 0x360   :  { %7178 = vmatmul.mubr.bf16.gmra.mrb[4].mxu1 %v16160_v11  ;;  %v13669_v11 = vld [vmem:[#allocation9 + $0xcf0] ss:$8 sps:$4 sm:$0xff]  }
 0x361   :  { %7193 = vmatpush1.bf16.msra.mxu1 %v13630_v20  ;;  %7220 = vmatprep.mubr.bf16.mxu1 %v2877_v60  ;;  %v13671_v20 = vld [vmem:[#allocation9 + $0xcf4] ss:$8 sps:$4 sm:$0xff]   ;;  %v11797_v60 = vcombine.low %v11731_v3, %v11733_v10  ;;  %v13684_v3 = vld [vmem:[#allocation9 + $0xd40] ss:$8 sps:$4 sm:$0xff]  }
 0x362   :  { %7194 = vmatprep.subr.bf16.mxu1 %v13635_v18  ;;  %v11729_v18 = vld.sshfl [vmem:[#allocation2 + $0x90] sm:$0xf pattern:$0x76325410]  ;;  %v13689_v10 = vld [vmem:[#allocation9 + $0xd54] ss:$8 sps:$4 sm:$0xff]  }
 0x365   :  { %7195 = vmatpush1.bf16.msra.mxu1 %v13633_v14  ;;  %v11795_v14 = vcombine.low %v11727_v58, %v11729_v18  ;;  %v13692_v58 = vld [vmem:[#allocation9 + $0xd64] ss:$8 sps:$4 sm:$0xff]   ;;  %v13695_v18 = vld [vmem:[#allocation9 + $0xd74] ss:$8 sps:$4 sm:$0xff]  }
 0x366   :  { %7196 = vmatprep.subr.bf16.mxu1 %v13638_v54  ;;  %v13674_v54 = vld [vmem:[#allocation9 + $0xd04] ss:$8 sps:$4 sm:$0xff]  }
 0x369   :  { %7197 = vmatpush1.bf16.msra.mxu1 %v13636_v22  ;;  %v2904_v22 = vrot.slane %v11797_v60, %v14808_v48  ;;  %v13693_v60 = vld [vmem:[#allocation9 + $0xd70] ss:$8 sps:$4 sm:$0xff]  }
 0x36a   :  { %7198 = vmatprep.subr.bf16.mxu1 %v13641_v38  ;;  %v11724_v38 = vld.sshfl [vmem:[#allocation2 + $0x48] sm:$0xf pattern:$0x76325410] }
 0x36d   :  { %7199 = vmatpush1.bf16.msra.mxu1 %v13639_v46  ;;  %v11726_v46 = vld.sshfl [vmem:[#allocation2 + $0x58] sm:$0xf pattern:$0x76325410] }
 0x36e   :  { %7200 = vmatprep.subr.bf16.mxu1 %v13644_v24  ;;  %v13672_v24 = vld [vmem:[#allocation9 + $0xd00] ss:$8 sps:$4 sm:$0xff]  }
 0x371   :  { %7201 = vmatpush1.bf16.msra.mxu1 %v13642_v50  ;;  %v2890_v50 = vrot.slane %v11795_v14, %v14808_v48  ;;  %v13696_v14 = vld [vmem:[#allocation9 + $0xd80] ss:$8 sps:$4 sm:$0xff]  }
 0x372   :  { %7202 = vmatprep.subr.bf16.mxu1 %v13647_v5  ;;  %v11720_v5 = vld.sshfl [vmem:[#allocation2 + $0x28] sm:$0xf pattern:$0x76325410] }
 0x375   :  { %7203 = vmatpush1.bf16.msra.mxu1 %v13645_v56  ;;  %v2876_v56 = vcombine.low %v15566_v26, %v15563_v59  ;;  %v2912_v59 = vcombine.low %v2890_v50, %v2904_v22  ;;  %v13683_v26 = vld [vmem:[#allocation9 + $0xd34] ss:$8 sps:$4 sm:$0xff]  }
 0x376   :  { %7204 = vmatprep.subr.bf16.mxu1 %v13650_v34  ;;  %v13677_v34 = vld [vmem:[#allocation9 + $0xd14] ss:$8 sps:$4 sm:$0xff]  }
 0x379   :  { %7205 = vmatpush1.bf16.msra.mxu1 %v13648_v0  ;;  %v11722_v0 = vld.sshfl [vmem:[#allocation2 + $0x38] sm:$0xf pattern:$0x76325410] }
 0x37a   :  { %7206 = vmatprep.subr.bf16.mxu1 %v13653_v29  ;;  %v2913_v29 = vcombine.high %v2890_v50, %v2904_v22  ;;  %v13699_v22 = vld [vmem:[#allocation9 + $0xd90] ss:$8 sps:$4 sm:$0xff]  }
 0x37b   :  { %v13705_v50 = vld [vmem:[#allocation9 + $0xdb0] ss:$8 sps:$4 sm:$0xff]  }
 0x37d   :  { %7207 = vmatpush1.bf16.msra.mxu1 %v13651_v30  ;;  %v11794_v30 = vcombine.low %v11724_v38, %v11726_v46  ;;  %v13704_v38 = vld [vmem:[#allocation9 + $0xda4] ss:$8 sps:$4 sm:$0xff]   ;;  %v13702_v46 = vld [vmem:[#allocation9 + $0xda0] ss:$8 sps:$4 sm:$0xff]  }
 0x37e   :  { %7208 = vmatprep.subr.bf16.mxu1 %v13656_v25  ;;  %v13675_v25 = vld [vmem:[#allocation9 + $0xd10] ss:$8 sps:$4 sm:$0xff]  }
 0x381   :  { %7209 = vmatpush1.bf16.msra.mxu1 %v13654_v16  ;;  %v11792_v16 = vcombine.low %v11720_v5, %v11722_v0  ;;  %v13710_v5 = vld [vmem:[#allocation9 + $0xdc4] ss:$8 sps:$4 sm:$0xff]   ;;  %v13711_v0 = vld [vmem:[#allocation9 + $0xdd0] ss:$8 sps:$4 sm:$0xff]  }
 0x382   :  { %7210 = vmatprep.subr.bf16.mxu1 %v13659_v57  ;;  %v13680_v57 = vld [vmem:[#allocation9 + $0xd24] ss:$8 sps:$4 sm:$0xff]  }
 0x385   :  { %7211 = vmatpush1.bf16.msra.mxu1 %v13657_v17  ;;  %v15578_v17 = vrot.slane %v11794_v30, %v14808_v48  ;;  %v11728_v30 = vld.sshfl [vmem:[#allocation2 + $0x88] sm:$0xf pattern:$0x76325410] }
 0x386   :  { %7212 = vmatprep.subr.bf16.mxu1 %v13662_v53  ;;  %v13678_v53 = vld [vmem:[#allocation9 + $0xd20] ss:$8 sps:$4 sm:$0xff]  }
 0x389   :  { %7213 = vmatpush1.bf16.msra.mxu1 %v13660_v1  ;;  %v15581_v1 = vrot.slane %v11792_v16, %v14808_v48  ;;  %v11732_v16 = vld.sshfl [vmem:[#allocation2 + $0xa8] sm:$0xf pattern:$0x76325410] }
 0x38a   :  { %7214 = vmatprep.subr.bf16.mxu1 %v13665_v62 }
 0x38b   :  { %v2879_v62 = vcombine.high %v15581_v1, %v15578_v17 }
 0x38d   :  { %7215 = vmatpush1.bf16.msra.mxu1 %v13663_v35  ;;  %v13681_v35 = vld [vmem:[#allocation9 + $0xd30] ss:$8 sps:$4 sm:$0xff]  }
 0x38e   :  { %7216 = vmatprep.subr.bf16.mxu1 %v13668_v9  ;;  %v13686_v9 = vld [vmem:[#allocation9 + $0xd44] ss:$8 sps:$4 sm:$0xff]  }
 0x391   :  { %7217 = vmatpush1.bf16.msra.mxu1 %v13666_v55  ;;  %v13687_v55 = vld [vmem:[#allocation9 + $0xd50] ss:$8 sps:$4 sm:$0xff]  }
 0x392   :  { %7218 = vmatprep.subr.bf16.mxu1 %v13671_v20  ;;  %v13690_v20 = vld [vmem:[#allocation9 + $0xd60] ss:$8 sps:$4 sm:$0xff]  }
 0x395   :  { %7219 = vmatpush1.bf16.msra.mxu1 %v13669_v11  ;;  %v13698_v11 = vld [vmem:[#allocation9 + $0xd84] ss:$8 sps:$4 sm:$0xff]  }
 0x396   :  { %7241 = vmatprep.subr.bf16.mxu1 %v13674_v54  ;;  %v13701_v54 = vld [vmem:[#allocation9 + $0xd94] ss:$8 sps:$4 sm:$0xff]  }
 0x398   :  { %7221 = vmatmul.mubr.bf16.vlgmr.msra.gmra.mrb[0].mxu1 %v2876_v56  ;;  %v13708_v56 = vld [vmem:[#allocation9 + $0xdc0] ss:$8 sps:$4 sm:$0xff]  }
 0x399   :  { %7230 = vmatprep.mubr.bf16.mxu1 %v2913_v29  ;;  %7242 = vmatpush1.bf16.msra.mxu1 %v13672_v24  ;;  %v13707_v24 = vld [vmem:[#allocation9 + $0xdb4] ss:$8 sps:$4 sm:$0xff]   ;;  %v13716_v29 = vld [vmem:[#allocation9 + $0xde4] ss:$8 sps:$4 sm:$0xff]  }
 0x39a   :  { %7243 = vmatprep.subr.bf16.mxu1 %v13677_v34  ;;  %v13713_v34 = vld [vmem:[#allocation9 + $0xdd4] ss:$8 sps:$4 sm:$0xff]  }
 0x39d   :  { %7244 = vmatpush1.bf16.msra.mxu1 %v13675_v25  ;;  %v11730_v25 = vld.sshfl [vmem:[#allocation2 + $0x98] sm:$0xf pattern:$0x76325410] }
 0x39e   :  { %7245 = vmatprep.subr.bf16.mxu1 %v13680_v57  ;;  %v11734_v57 = vld.sshfl [vmem:[#allocation2 + $0xb8] sm:$0xf pattern:$0x76325410] }
 0x3a0   :  { %7231 = vmatmul.mubr.bf16.gmra.mrb[4].mxu1 %v2912_v59  ;;  %v13719_v59 = vld [vmem:[#allocation9 + $0xdf4] ss:$8 sps:$4 sm:$0xff]  }
 0x3a1   :  { %7246 = vmatpush1.bf16.msra.mxu1 %v13678_v53  ;;  %7273 = vmatprep.mubr.bf16.mxu1 %v2879_v62  ;;  %v13714_v53 = vld [vmem:[#allocation9 + $0xde0] ss:$8 sps:$4 sm:$0xff]   ;;  %v11798_v62 = vcombine.low %v11732_v16, %v11734_v57  ;;  %v13741_v16 = vld [vmem:[#allocation9 + $0xe70] ss:$8 sps:$4 sm:$0xff]   ;;  %v13746_v57 = vld [vmem:[#allocation9 + $0xe84] ss:$8 sps:$4 sm:$0xff]  }
 0x3a2   :  { %7247 = vmatprep.subr.bf16.mxu1 %v13683_v26  ;;  %v11796_v26 = vcombine.low %v11728_v30, %v11730_v25  ;;  %v13738_v30 = vld [vmem:[#allocation9 + $0xe60] ss:$8 sps:$4 sm:$0xff]   ;;  %v13743_v25 = vld [vmem:[#allocation9 + $0xe74] ss:$8 sps:$4 sm:$0xff]  }
 0x3a5   :  { %7248 = vmatpush1.bf16.msra.mxu1 %v13681_v35  ;;  %v13717_v35 = vld [vmem:[#allocation9 + $0xdf0] ss:$8 sps:$4 sm:$0xff]  }
 0x3a6   :  { %7249 = vmatprep.subr.bf16.mxu1 %v13686_v9  ;;  %v13722_v9 = vld [vmem:[#allocation9 + $0xe04] ss:$8 sps:$4 sm:$0xff]  }
 0x3a9   :  { %7250 = vmatpush1.bf16.msra.mxu1 %v13684_v3  ;;  %v2897_v3 = vrot.slane %v11796_v26, %v14808_v48  ;;  %v13747_v26 = vld [vmem:[#allocation9 + $0xe90] ss:$8 sps:$4 sm:$0xff]  }
 0x3aa   :  { %7251 = vmatprep.subr.bf16.mxu1 %v13689_v10  ;;  %v2911_v10 = vrot.slane %v11798_v62, %v14808_v48  ;;  %v13752_v62 = vld [vmem:[#allocation9 + $0xea4] ss:$8 sps:$4 sm:$0xff]  }
 0x3ad   :  { %7252 = vmatpush1.bf16.msra.mxu1 %v13687_v55  ;;  %v13720_v55 = vld [vmem:[#allocation9 + $0xe00] ss:$8 sps:$4 sm:$0xff]  }
 0x3ae   :  { %7253 = vmatprep.subr.bf16.mxu1 %v13692_v58  ;;  %v2878_v58 = vcombine.low %v15581_v1, %v15578_v17  ;;  %v13726_v17 = vld [vmem:[#allocation9 + $0xe20] ss:$8 sps:$4 sm:$0xff]  }
 0x3b1   :  { %7254 = vmatpush1.bf16.msra.mxu1 %v13690_v20  ;;  %v13725_v20 = vld [vmem:[#allocation9 + $0xe14] ss:$8 sps:$4 sm:$0xff]  }
 0x3b2   :  { %7255 = vmatprep.subr.bf16.mxu1 %v13695_v18  ;;  %v2915_v18 = vcombine.high %v2897_v3, %v2911_v10 }
 0x3b5   :  { %7256 = vmatpush1.bf16.msra.mxu1 %v13693_v60  ;;  %v2926_v60 = vcombine.low %v15351_v36, %v15358_v12  ;;  %v13731_v36 = vld [vmem:[#allocation9 + $0xe34] ss:$8 sps:$4 sm:$0xff]  }
 0x3b6   :  { %7257 = vmatprep.subr.bf16.mxu1 %v13698_v11  ;;  %v13723_v11 = vld [vmem:[#allocation9 + $0xe10] ss:$8 sps:$4 sm:$0xff]  }
 0x3b9   :  { %7258 = vmatpush1.bf16.msra.mxu1 %v13696_v14  ;;  %v16161_v14 = vld [vmem:[#allocation30_spill] sm:$0xff] }
 0x3ba   :  { %7259 = vmatprep.subr.bf16.mxu1 %v13701_v54  ;;  %v16162_v54 = vld [vmem:[#allocation29_spill] sm:$0xff] }
 0x3bd   :  { %7260 = vmatpush1.bf16.msra.mxu1 %v13699_v22  ;;  %v2924_v22 = vcombine.low %v16162_v54, %v16161_v14  ;;  %v2962_v14 = vcombine.low %v15394_v23, %v15398_v63  ;;  %v13765_v54 = vld [vmem:[#allocation9 + $0xef0] ss:$8 sps:$4 sm:$0xff]  }
 0x3be   :  { %7261 = vmatprep.subr.bf16.mxu1 %v13704_v38  ;;  %v13728_v38 = vld [vmem:[#allocation9 + $0xe24] ss:$8 sps:$4 sm:$0xff]   ;;  %v13771_v23 = vld [vmem:[#allocation9 + $0xf10] ss:$8 sps:$4 sm:$0xff]  }
 0x3bf   :  { %v15597_v1 = vrot.slane %v2924_v22, %v14808_v48  ;;  %v2960_v22 = vcombine.low %v15377_v28, %v15388_v45  ;;  %v13776_v28 = vld [vmem:[#allocation9 + $0xf24] ss:$8 sps:$4 sm:$0xff]   ;;  %v13774_v45 = vld [vmem:[#allocation9 + $0xf20] ss:$8 sps:$4 sm:$0xff]  }
 0x3c1   :  { %7262 = vmatpush1.bf16.msra.mxu1 %v13702_v46  ;;  %v15594_v46 = vrot.slane %v2926_v60, %v14808_v48  ;;  %v13762_v60 = vld [vmem:[#allocation9 + $0xee0] ss:$8 sps:$4 sm:$0xff]  }
 0x3c2   :  { %7263 = vmatprep.subr.bf16.mxu1 %v13707_v24  ;;  %v2914_v24 = vcombine.low %v2897_v3, %v2911_v10  ;;  %v13753_v3 = vld [vmem:[#allocation9 + $0xeb0] ss:$8 sps:$4 sm:$0xff]   ;;  %v13758_v10 = vld [vmem:[#allocation9 + $0xec4] ss:$8 sps:$4 sm:$0xff]  }
 0x3c3   :  { %v2957_v12 = vcombine.high %v15597_v1, %v15594_v46 }
 0x3c5   :  { %7264 = vmatpush1.bf16.msra.mxu1 %v13705_v50  ;;  %v13729_v50 = vld [vmem:[#allocation9 + $0xe30] ss:$8 sps:$4 sm:$0xff]  }
 0x3c6   :  { %7265 = vmatprep.subr.bf16.mxu1 %v13710_v5  ;;  %v13734_v5 = vld [vmem:[#allocation9 + $0xe44] ss:$8 sps:$4 sm:$0xff]  }
 0x3c9   :  { %7266 = vmatpush1.bf16.msra.mxu1 %v13708_v56  ;;  %v13732_v56 = vld [vmem:[#allocation9 + $0xe40] ss:$8 sps:$4 sm:$0xff]  }
 0x3ca   :  { %7267 = vmatprep.subr.bf16.mxu1 %v13713_v34  ;;  %v13737_v34 = vld [vmem:[#allocation9 + $0xe54] ss:$8 sps:$4 sm:$0xff]  }
 0x3cd   :  { %7268 = vmatpush1.bf16.msra.mxu1 %v13711_v0  ;;  %v13735_v0 = vld [vmem:[#allocation9 + $0xe50] ss:$8 sps:$4 sm:$0xff]  }
 0x3ce   :  { %7269 = vmatprep.subr.bf16.mxu1 %v13716_v29  ;;  %v13740_v29 = vld [vmem:[#allocation9 + $0xe64] ss:$8 sps:$4 sm:$0xff]  }
 0x3d1   :  { %7270 = vmatpush1.bf16.msra.mxu1 %v13714_v53  ;;  %v13744_v53 = vld [vmem:[#allocation9 + $0xe80] ss:$8 sps:$4 sm:$0xff]  }
 0x3d2   :  { %7271 = vmatprep.subr.bf16.mxu1 %v13719_v59  ;;  %v13749_v59 = vld [vmem:[#allocation9 + $0xe94] ss:$8 sps:$4 sm:$0xff]  }
 0x3d5   :  { %7272 = vmatpush1.bf16.msra.mxu1 %v13717_v35  ;;  %v13750_v35 = vld [vmem:[#allocation9 + $0xea0] ss:$8 sps:$4 sm:$0xff]  }
 0x3d6   :  { %7294 = vmatprep.subr.bf16.mxu1 %v13722_v9  ;;  %v13755_v9 = vld [vmem:[#allocation9 + $0xeb4] ss:$8 sps:$4 sm:$0xff]  }
 0x3d8   :  { %7274 = vmatmul.mubr.bf16.vlgmr.msra.gmra.mrb[0].mxu1 %v2878_v58  ;;  %v13761_v58 = vld [vmem:[#allocation9 + $0xed4] ss:$8 sps:$4 sm:$0xff]  }
 0x3d9   :  { %7283 = vmatprep.mubr.bf16.mxu1 %v2915_v18  ;;  %7295 = vmatpush1.bf16.msra.mxu1 %v13720_v55  ;;  %v13756_v55 = vld [vmem:[#allocation9 + $0xec0] ss:$8 sps:$4 sm:$0xff]   ;;  %v13764_v18 = vld [vmem:[#allocation9 + $0xee4] ss:$8 sps:$4 sm:$0xff]  }
 0x3da   :  { %7296 = vmatprep.subr.bf16.mxu1 %v13725_v20  ;;  %v13759_v20 = vld [vmem:[#allocation9 + $0xed0] ss:$8 sps:$4 sm:$0xff]  }
 0x3dd   :  { %7297 = vmatpush1.bf16.msra.mxu1 %v13723_v11  ;;  %v13767_v11 = vld [vmem:[#allocation9 + $0xef4] ss:$8 sps:$4 sm:$0xff]  }
 0x3de   :  { %7298 = vmatprep.subr.bf16.mxu1 %v13728_v38  ;;  %v13770_v38 = vld [vmem:[#allocation9 + $0xf04] ss:$8 sps:$4 sm:$0xff]  }
 0x3e0   :  { %7284 = vmatmul.mubr.bf16.gmra.mrb[4].mxu1 %v2914_v24  ;;  %v13768_v24 = vld [vmem:[#allocation9 + $0xf00] ss:$8 sps:$4 sm:$0xff]  }
 0x3e1   :  { %7299 = vmatpush1.bf16.msra.mxu1 %v13726_v17  ;;  %7326 = vmatprep.mubr.bf16.mxu1 %v2957_v12  ;;  %v2984_v17 = vrot.slane %v2962_v14, %v14808_v48  ;;  %v2956_v12 = vcombine.low %v15597_v1, %v15594_v46  ;;  %v13777_v46 = vld [vmem:[#allocation9 + $0xf30] ss:$8 sps:$4 sm:$0xff]   ;;  %v13782_v1 = vld [vmem:[#allocation9 + $0xf44] ss:$8 sps:$4 sm:$0xff]   ;;  %v13810_v14 = vld [vmem:[#allocation9 + $0xfe0] ss:$8 sps:$4 sm:$0xff]  }
 0x3e2   :  { %7300 = vmatprep.subr.bf16.mxu1 %v13731_v36  ;;  %v2970_v36 = vrot.slane %v2960_v22, %v14808_v48  ;;  %v13813_v22 = vld [vmem:[#allocation9 + $0xff0] ss:$8 sps:$4 sm:$0xff]  }
 0x3e4   :  { %v2992_v63 = vcombine.low %v2970_v36, %v2984_v17 }
 0x3e5   :  { %7301 = vmatpush1.bf16.msra.mxu1 %v13729_v50  ;;  %v13773_v50 = vld [vmem:[#allocation9 + $0xf14] ss:$8 sps:$4 sm:$0xff]  }
 0x3e6   :  { %7302 = vmatprep.subr.bf16.mxu1 %v13734_v5  ;;  %v2993_v5 = vcombine.high %v2970_v36, %v2984_v17  ;;  %v13816_v17 = vld [vmem:[#allocation9 + $0x1000] ss:$8 sps:$4 sm:$0xff]   ;;  %v3006_v36 = vcombine.low %v15422_v4, %v15426_v37 }
 0x3e7   :  { %v13822_v4 = vld [vmem:[#allocation9 + $0x1020] ss:$8 sps:$4 sm:$0xff]  }
 0x3e9   :  { %7303 = vmatpush1.bf16.msra.mxu1 %v13732_v56  ;;  %v13779_v56 = vld [vmem:[#allocation9 + $0xf34] ss:$8 sps:$4 sm:$0xff]  }
 0x3ea   :  { %7304 = vmatprep.subr.bf16.mxu1 %v13737_v34  ;;  %v16163_v34 = vcombine.high %v15373_v41, %v15380_v8 }
 0x3ed   :  { %7305 = vmatpush1.bf16.msra.mxu1 %v13735_v0  ;;  %v13780_v0 = vld [vmem:[#allocation9 + $0xf40] ss:$8 sps:$4 sm:$0xff]  }
 0x3ee   :  { %7306 = vmatprep.subr.bf16.mxu1 %v13740_v29  ;;  %v13785_v29 = vld [vmem:[#allocation9 + $0xf54] ss:$8 sps:$4 sm:$0xff]  }
 0x3f1   :  { %7307 = vmatpush1.bf16.msra.mxu1 %v13738_v30  ;;  %v13783_v30 = vld [vmem:[#allocation9 + $0xf50] ss:$8 sps:$4 sm:$0xff]  }
 0x3f2   :  { %7308 = vmatprep.subr.bf16.mxu1 %v13743_v25  ;;  %v13788_v25 = vld [vmem:[#allocation9 + $0xf64] ss:$8 sps:$4 sm:$0xff]  }
 0x3f5   :  { %7309 = vmatpush1.bf16.msra.mxu1 %v13741_v16  ;;  %v13786_v16 = vld [vmem:[#allocation9 + $0xf60] ss:$8 sps:$4 sm:$0xff]  }
 0x3f6   :  { %7310 = vmatprep.subr.bf16.mxu1 %v13746_v57  ;;  %v13791_v57 = vld [vmem:[#allocation9 + $0xf74] ss:$8 sps:$4 sm:$0xff]  }
 0x3f9   :  { %7311 = vmatpush1.bf16.msra.mxu1 %v13744_v53  ;;  %v13789_v53 = vld [vmem:[#allocation9 + $0xf70] ss:$8 sps:$4 sm:$0xff]  }
 0x3fa   :  { %7312 = vmatprep.subr.bf16.mxu1 %v13749_v59  ;;  %v13794_v59 = vld [vmem:[#allocation9 + $0xf84] ss:$8 sps:$4 sm:$0xff]  }
 0x3fd   :  { %7313 = vmatpush1.bf16.msra.mxu1 %v13747_v26  ;;  %v13792_v26 = vld [vmem:[#allocation9 + $0xf80] ss:$8 sps:$4 sm:$0xff]  }
 0x3fe   :  { %7314 = vmatprep.subr.bf16.mxu1 %v13752_v62  ;;  %v13797_v62 = vld [vmem:[#allocation9 + $0xf94] ss:$8 sps:$4 sm:$0xff]  }
 0x401   :  { %7315 = vmatpush1.bf16.msra.mxu1 %v13750_v35  ;;  %v13795_v35 = vld [vmem:[#allocation9 + $0xf90] ss:$8 sps:$4 sm:$0xff]  }
 0x402   :  { %7316 = vmatprep.subr.bf16.mxu1 %v13755_v9  ;;  %v13800_v9 = vld [vmem:[#allocation9 + $0xfa4] ss:$8 sps:$4 sm:$0xff]  }
 0x405   :  { %7317 = vmatpush1.bf16.msra.mxu1 %v13753_v3  ;;  %v13798_v3 = vld [vmem:[#allocation9 + $0xfa0] ss:$8 sps:$4 sm:$0xff]  }
 0x406   :  { %7318 = vmatprep.subr.bf16.mxu1 %v13758_v10  ;;  %v13803_v10 = vld [vmem:[#allocation9 + $0xfb4] ss:$8 sps:$4 sm:$0xff]  }
 0x409   :  { %7319 = vmatpush1.bf16.msra.mxu1 %v13756_v55  ;;  %v13801_v55 = vld [vmem:[#allocation9 + $0xfb0] ss:$8 sps:$4 sm:$0xff]  }
 0x40a   :  { %7320 = vmatprep.subr.bf16.mxu1 %v13761_v58  ;;  %v13806_v58 = vld [vmem:[#allocation9 + $0xfc4] ss:$8 sps:$4 sm:$0xff]  }
 0x40d   :  { %7321 = vmatpush1.bf16.msra.mxu1 %v13759_v20  ;;  %v13804_v20 = vld [vmem:[#allocation9 + $0xfc0] ss:$8 sps:$4 sm:$0xff]  }
 0x40e   :  { %7322 = vmatprep.subr.bf16.mxu1 %v13764_v18  ;;  %v13809_v18 = vld [vmem:[#allocation9 + $0xfd4] ss:$8 sps:$4 sm:$0xff]  }
 0x411   :  { %7323 = vmatpush1.bf16.msra.mxu1 %v13762_v60  ;;  %v13807_v60 = vld [vmem:[#allocation9 + $0xfd0] ss:$8 sps:$4 sm:$0xff]  }
 0x412   :  { %7324 = vmatprep.subr.bf16.mxu1 %v13767_v11  ;;  %v13812_v11 = vld [vmem:[#allocation9 + $0xfe4] ss:$8 sps:$4 sm:$0xff]  }
 0x415   :  { %7325 = vmatpush1.bf16.msra.mxu1 %v13765_v54  ;;  %v13815_v54 = vld [vmem:[#allocation9 + $0xff4] ss:$8 sps:$4 sm:$0xff]  }
 0x416   :  { %7347 = vmatprep.subr.bf16.mxu1 %v13770_v38  ;;  %v13818_v38 = vld [vmem:[#allocation9 + $0x1004] ss:$8 sps:$4 sm:$0xff]  }
 0x418   :  { %7327 = vmatmul.mubr.bf16.vlgmr.msra.gmra.mrb[0].mxu1 %v2956_v12  ;;  %v16164_v12 = vcombine.low %v15373_v41, %v15380_v8  ;;  %v13827_v41 = vld [vmem:[#allocation9 + $0x1034] ss:$8 sps:$4 sm:$0xff]  }
 0x419   :  { %7336 = vmatprep.mubr.bf16.mxu1 %v2993_v5  ;;  %7348 = vmatpush1.bf16.msra.mxu1 %v13768_v24  ;;  %v13821_v24 = vld [vmem:[#allocation9 + $0x1014] ss:$8 sps:$4 sm:$0xff]  }
 0x41a   :  { %7349 = vmatprep.subr.bf16.mxu1 %v13773_v50  ;;  %v16165_v50 = vld [vmem:[#allocation31_spill] sm:$0xff] }
 0x41b   :  { %v16166_v5 = vcombine.high %v15403_v31, %v16165_v50 }
 0x41d   :  { %7350 = vmatpush1.bf16.msra.mxu1 %v13771_v23  ;;  %v13819_v23 = vld [vmem:[#allocation9 + $0x1010] ss:$8 sps:$4 sm:$0xff]  }
 0x41e   :  { %7351 = vmatprep.subr.bf16.mxu1 %v13776_v28  ;;  %v16167_v28 = vld [vmem:[#allocation32_spill] sm:$0xff] }
 0x420   :  { %7337 = vmatmul.mubr.bf16.gmra.mrb[4].mxu1 %v2992_v63  ;;  %v13824_v63 = vld [vmem:[#allocation9 + $0x1024] ss:$8 sps:$4 sm:$0xff]  }
 0x421   :  { %7352 = vmatpush1.bf16.msra.mxu1 %v13774_v45  ;;  %7379 = vmatprep.mubr.bf16.mxu1 %v16163_v34  ;;  %v3004_v45 = vcombine.low %v16167_v28, %v15414_v42  ;;  %v16168_v34 = vcombine.low %v15403_v31, %v16165_v50  ;;  %v13912_v42 = vld [vmem:[#allocation12] ss:$8 sps:$4 sm:$0xff]   ;;  %v13851_v50 = vld [vmem:[#allocation9 + $0x10b4] ss:$8 sps:$4 sm:$0xff]  }
 0x422   :  { %7353 = vmatprep.subr.bf16.mxu1 %v13779_v56  ;;  %v15623_v56 = vrot.slane %v3006_v36, %v14808_v48  ;;  %v13918_v31 = vld [vmem:[#allocation12 + $0x20] ss:$8 sps:$4 sm:$0xff]   ;;  %v13938_v36 = vld [vmem:[#allocation12 + $0x84] ss:$8 sps:$4 sm:$0xff]  }
 0x423   :  { %v15626_v37 = vrot.slane %v3004_v45, %v14808_v48  ;;  %v13854_v28 = vld [vmem:[#allocation9 + $0x10c4] ss:$8 sps:$4 sm:$0xff]   ;;  %v13852_v45 = vld [vmem:[#allocation9 + $0x10c0] ss:$8 sps:$4 sm:$0xff]  }
 0x425   :  { %7354 = vmatpush1.bf16.msra.mxu1 %v13777_v46  ;;  %v3037_v8 = vcombine.high %v15626_v37, %v15623_v56  ;;  %v13914_v46 = vld [vmem:[#allocation12 + $0x4] ss:$8 sps:$4 sm:$0xff]  }
 0x426   :  { %7355 = vmatprep.subr.bf16.mxu1 %v13782_v1  ;;  %v13825_v1 = vld [vmem:[#allocation9 + $0x1030] ss:$8 sps:$4 sm:$0xff]   ;;  %10858 = vmatprep.subr.bf16.mxu0 %v13914_v46 }
 0x427   :  { %10859 = vmatpush1.bf16.msra.mxu0 %v13912_v42  ;;  %v3042_v42 = vcombine.low %v15454_v43, %v15458_v2  ;;  %v13861_v46 = vld [vmem:[#allocation9 + $0x10f0] ss:$8 sps:$4 sm:$0xff]  }
 0x428   :  { %v13867_v43 = vld [vmem:[#allocation9 + $0x1110] ss:$8 sps:$4 sm:$0xff]  }
 0x429   :  { %7356 = vmatpush1.bf16.msra.mxu1 %v13780_v0  ;;  %v13917_v0 = vld [vmem:[#allocation12 + $0x14] ss:$8 sps:$4 sm:$0xff]  }
 0x42a   :  { %7357 = vmatprep.subr.bf16.mxu1 %v13785_v29  ;;  %v13830_v29 = vld [vmem:[#allocation9 + $0x1044] ss:$8 sps:$4 sm:$0xff]   ;;  %10860 = vmatprep.subr.bf16.mxu0 %v13917_v0 }
 0x42b   :  { %v13866_v0 = vld [vmem:[#allocation9 + $0x1104] ss:$8 sps:$4 sm:$0xff]  }
 0x42d   :  { %7358 = vmatpush1.bf16.msra.mxu1 %v13783_v30  ;;  %v13915_v30 = vld [vmem:[#allocation12 + $0x10] ss:$8 sps:$4 sm:$0xff]  }
 0x42e   :  { %7359 = vmatprep.subr.bf16.mxu1 %v13788_v25  ;;  %v13920_v25 = vld [vmem:[#allocation12 + $0x24] ss:$8 sps:$4 sm:$0xff]   ;;  %10861 = vmatpush1.bf16.msra.mxu0 %v13915_v30 }
 0x42f   :  { %10862 = vmatprep.subr.bf16.mxu0 %v13920_v25  ;;  %v13864_v30 = vld [vmem:[#allocation9 + $0x1100] ss:$8 sps:$4 sm:$0xff]  }
 0x431   :  { %7360 = vmatpush1.bf16.msra.mxu1 %v13786_v16  ;;  %v13828_v16 = vld [vmem:[#allocation9 + $0x1040] ss:$8 sps:$4 sm:$0xff]  }
 0x432   :  { %7361 = vmatprep.subr.bf16.mxu1 %v13791_v57  ;;  %v13833_v57 = vld [vmem:[#allocation9 + $0x1054] ss:$8 sps:$4 sm:$0xff]   ;;  %10863 = vmatpush1.bf16.msra.mxu0 %v13918_v31 }
 0x435   :  { %7362 = vmatpush1.bf16.msra.mxu1 %v13789_v53  ;;  %v13923_v53 = vld [vmem:[#allocation12 + $0x34] ss:$8 sps:$4 sm:$0xff]  }
 0x436   :  { %7363 = vmatprep.subr.bf16.mxu1 %v13794_v59  ;;  %v13831_v59 = vld [vmem:[#allocation9 + $0x1050] ss:$8 sps:$4 sm:$0xff]   ;;  %10864 = vmatprep.subr.bf16.mxu0 %v13923_v53  ;;  %v13875_v53 = vld [vmem:[#allocation9 + $0x1134] ss:$8 sps:$4 sm:$0xff]  }
 0x439   :  { %7364 = vmatpush1.bf16.msra.mxu1 %v13792_v26  ;;  %v13836_v26 = vld [vmem:[#allocation9 + $0x1064] ss:$8 sps:$4 sm:$0xff]  }
 0x43a   :  { %7365 = vmatprep.subr.bf16.mxu1 %v13797_v62  ;;  %v13921_v62 = vld [vmem:[#allocation12 + $0x30] ss:$8 sps:$4 sm:$0xff]  }
 0x43b   :  { %10865 = vmatpush1.bf16.msra.mxu0 %v13921_v62  ;;  %v13879_v62 = vld [vmem:[#allocation9 + $0x1150] ss:$8 sps:$4 sm:$0xff]  }
 0x43d   :  { %7366 = vmatpush1.bf16.msra.mxu1 %v13795_v35  ;;  %v13926_v35 = vld [vmem:[#allocation12 + $0x44] ss:$8 sps:$4 sm:$0xff]  }
 0x43e   :  { %7367 = vmatprep.subr.bf16.mxu1 %v13800_v9  ;;  %v13834_v9 = vld [vmem:[#allocation9 + $0x1060] ss:$8 sps:$4 sm:$0xff]   ;;  %10866 = vmatprep.subr.bf16.mxu0 %v13926_v35  ;;  %v13884_v35 = vld [vmem:[#allocation9 + $0x1164] ss:$8 sps:$4 sm:$0xff]  }
 0x441   :  { %7368 = vmatpush1.bf16.msra.mxu1 %v13798_v3  ;;  %v13839_v3 = vld [vmem:[#allocation9 + $0x1074] ss:$8 sps:$4 sm:$0xff]  }
 0x442   :  { %7369 = vmatprep.subr.bf16.mxu1 %v13803_v10  ;;  %v13924_v10 = vld [vmem:[#allocation12 + $0x40] ss:$8 sps:$4 sm:$0xff]  }
 0x443   :  { %10867 = vmatpush1.bf16.msra.mxu0 %v13924_v10  ;;  %v13885_v10 = vld [vmem:[#allocation9 + $0x1170] ss:$8 sps:$4 sm:$0xff]  }
 0x445   :  { %7370 = vmatpush1.bf16.msra.mxu1 %v13801_v55  ;;  %v13929_v55 = vld [vmem:[#allocation12 + $0x54] ss:$8 sps:$4 sm:$0xff]  }
 0x446   :  { %7371 = vmatprep.subr.bf16.mxu1 %v13806_v58  ;;  %v13837_v58 = vld [vmem:[#allocation9 + $0x1070] ss:$8 sps:$4 sm:$0xff]   ;;  %10868 = vmatprep.subr.bf16.mxu0 %v13929_v55  ;;  %v13890_v55 = vld [vmem:[#allocation9 + $0x1184] ss:$8 sps:$4 sm:$0xff]  }
 0x449   :  { %7372 = vmatpush1.bf16.msra.mxu1 %v13804_v20  ;;  %v13842_v20 = vld [vmem:[#allocation9 + $0x1084] ss:$8 sps:$4 sm:$0xff]  }
 0x44a   :  { %7373 = vmatprep.subr.bf16.mxu1 %v13809_v18  ;;  %v13927_v18 = vld [vmem:[#allocation12 + $0x50] ss:$8 sps:$4 sm:$0xff]  }
 0x44b   :  { %10869 = vmatpush1.bf16.msra.mxu0 %v13927_v18  ;;  %v13896_v18 = vld [vmem:[#allocation9 + $0x11a4] ss:$8 sps:$4 sm:$0xff]  }
 0x44d   :  { %7374 = vmatpush1.bf16.msra.mxu1 %v13807_v60  ;;  %v13932_v60 = vld [vmem:[#allocation12 + $0x64] ss:$8 sps:$4 sm:$0xff]  }
 0x44e   :  { %7375 = vmatprep.subr.bf16.mxu1 %v13812_v11  ;;  %v13840_v11 = vld [vmem:[#allocation9 + $0x1080] ss:$8 sps:$4 sm:$0xff]   ;;  %10870 = vmatprep.subr.bf16.mxu0 %v13932_v60 }
 0x44f   :  { %v13894_v60 = vld [vmem:[#allocation9 + $0x11a0] ss:$8 sps:$4 sm:$0xff]  }
 0x451   :  { %7376 = vmatpush1.bf16.msra.mxu1 %v13810_v14  ;;  %v13845_v14 = vld [vmem:[#allocation9 + $0x1094] ss:$8 sps:$4 sm:$0xff]  }
 0x452   :  { %7377 = vmatprep.subr.bf16.mxu1 %v13815_v54  ;;  %v13930_v54 = vld [vmem:[#allocation12 + $0x60] ss:$8 sps:$4 sm:$0xff]  }
 0x453   :  { %10871 = vmatpush1.bf16.msra.mxu0 %v13930_v54  ;;  %v13902_v54 = vld [vmem:[#allocation9 + $0x11c4] ss:$8 sps:$4 sm:$0xff]  }
 0x455   :  { %7378 = vmatpush1.bf16.msra.mxu1 %v13813_v22  ;;  %v13935_v22 = vld [vmem:[#allocation12 + $0x74] ss:$8 sps:$4 sm:$0xff]  }
 0x456   :  { %7400 = vmatprep.subr.bf16.mxu1 %v13818_v38  ;;  %v13843_v38 = vld [vmem:[#allocation9 + $0x1090] ss:$8 sps:$4 sm:$0xff]   ;;  %10872 = vmatprep.subr.bf16.mxu0 %v13935_v22  ;;  %v13900_v22 = vld [vmem:[#allocation9 + $0x11c0] ss:$8 sps:$4 sm:$0xff]  }
 0x458   :  { %7380 = vmatmul.mubr.bf16.vlgmr.msra.gmra.mrb[0].mxu1 %v16164_v12  ;;  %v13846_v12 = vld [vmem:[#allocation9 + $0x10a0] ss:$8 sps:$4 sm:$0xff]  }
 0x459   :  { %7389 = vmatprep.mubr.bf16.mxu1 %v16166_v5  ;;  %7401 = vmatpush1.bf16.msra.mxu1 %v13816_v17  ;;  %v13848_v17 = vld [vmem:[#allocation9 + $0x10a4] ss:$8 sps:$4 sm:$0xff]  }
 0x45a   :  { %7402 = vmatprep.subr.bf16.mxu1 %v13821_v24  ;;  %v13933_v24 = vld [vmem:[#allocation12 + $0x70] ss:$8 sps:$4 sm:$0xff]   ;;  %v13936_v5 = vld [vmem:[#allocation12 + $0x80] ss:$8 sps:$4 sm:$0xff]  }
 0x45b   :  { %10873 = vmatpush1.bf16.msra.mxu0 %v13933_v24  ;;  %v13908_v24 = vld [vmem:[#allocation9 + $0x11e4] ss:$8 sps:$4 sm:$0xff]  }
 0x45c   :  { %10874 = vmatprep.subr.bf16.mxu0 %v13938_v36  ;;  %v13906_v36 = vld [vmem:[#allocation9 + $0x11e0] ss:$8 sps:$4 sm:$0xff]  }
 0x45d   :  { %7403 = vmatpush1.bf16.msra.mxu1 %v13819_v23  ;;  %v13849_v23 = vld [vmem:[#allocation9 + $0x10b0] ss:$8 sps:$4 sm:$0xff]  }
 0x45e   :  { %7404 = vmatprep.subr.bf16.mxu1 %v13824_v63  ;;  %v13857_v63 = vld [vmem:[#allocation9 + $0x10d4] ss:$8 sps:$4 sm:$0xff]  }
 0x45f   :  { %10875 = vmatpush1.bf16.msra.mxu0 %v13936_v5  ;;  %v16169_v5 = vcombine.low %v15441_v21, %v15444_v47  ;;  %v13950_v21 = vld [vmem:[#allocation12 + $0xc4] ss:$8 sps:$4 sm:$0xff]   ;;  %v13948_v47 = vld [vmem:[#allocation12 + $0xc0] ss:$8 sps:$4 sm:$0xff]  }
 0x460   :  { %7390 = vmatmul.mubr.bf16.gmra.mrb[4].mxu1 %v16168_v34  ;;  %v13863_v34 = vld [vmem:[#allocation9 + $0x10f4] ss:$8 sps:$4 sm:$0xff]  }
 0x461   :  { %7405 = vmatpush1.bf16.msra.mxu1 %v13822_v4  ;;  %7432 = vmatprep.mubr.bf16.mxu1 %v3037_v8  ;;  %v13855_v4 = vld [vmem:[#allocation9 + $0x10d0] ss:$8 sps:$4 sm:$0xff]   ;;  %v13858_v8 = vld [vmem:[#allocation9 + $0x10e0] ss:$8 sps:$4 sm:$0xff]  }
 0x462   :  { %7406 = vmatprep.subr.bf16.mxu1 %v13827_v41  ;;  %v13860_v41 = vld [vmem:[#allocation9 + $0x10e4] ss:$8 sps:$4 sm:$0xff]  }
 0x465   :  { %7407 = vmatpush1.bf16.msra.mxu1 %v13825_v1  ;;  %v3040_v1 = vcombine.low %v15434_v7, %v15438_v33  ;;  %v13872_v7 = vld [vmem:[#allocation9 + $0x1124] ss:$8 sps:$4 sm:$0xff]   ;;  %v13870_v33 = vld [vmem:[#allocation9 + $0x1120] ss:$8 sps:$4 sm:$0xff]  }
 0x466   :  { %7408 = vmatprep.subr.bf16.mxu1 %v13830_v29  ;;  %v3064_v29 = vrot.slane %v3042_v42, %v14808_v48  ;;  %v13959_v42 = vld [vmem:[#allocation12 + $0xf4] ss:$8 sps:$4 sm:$0xff]  }
 0x467   :  { %v3050_v25 = vrot.slane %v3040_v1, %v14808_v48  ;;  %v13962_v1 = vld [vmem:[#allocation12 + $0x104] ss:$8 sps:$4 sm:$0xff]  }
 0x469   :  { %7409 = vmatpush1.bf16.msra.mxu1 %v13828_v16  ;;  %v3036_v16 = vcombine.low %v15626_v37, %v15623_v56  ;;  %v3073_v31 = vcombine.high %v3050_v25, %v3064_v29  ;;  %v3072_v2 = vcombine.low %v3050_v25, %v3064_v29  ;;  %v13873_v56 = vld [vmem:[#allocation9 + $0x1130] ss:$8 sps:$4 sm:$0xff]   ;;  %v13878_v37 = vld [vmem:[#allocation9 + $0x1144] ss:$8 sps:$4 sm:$0xff]  }
 0x46a   :  { %7410 = vmatprep.subr.bf16.mxu1 %v13833_v57  ;;  %v13869_v57 = vld [vmem:[#allocation9 + $0x1114] ss:$8 sps:$4 sm:$0xff]   ;;  %v16171_v29 = vld [vmem:[#allocation22_spill] sm:$0xff] }
 0x46b   :  { %v16172_v25 = vld [vmem:[#allocation23_spill] sm:$0xff] }
 0x46d   :  { %7411 = vmatpush1.bf16.msra.mxu1 %v13831_v59  ;;  %v13876_v59 = vld [vmem:[#allocation9 + $0x1140] ss:$8 sps:$4 sm:$0xff]  }
 0x46e   :  { %7412 = vmatprep.subr.bf16.mxu1 %v13836_v26  ;;  %v13881_v26 = vld [vmem:[#allocation9 + $0x1154] ss:$8 sps:$4 sm:$0xff]  }
 0x471   :  { %7413 = vmatpush1.bf16.msra.mxu1 %v13834_v9  ;;  %v13882_v9 = vld [vmem:[#allocation9 + $0x1160] ss:$8 sps:$4 sm:$0xff]  }
 0x472   :  { %7414 = vmatprep.subr.bf16.mxu1 %v13839_v3  ;;  %v13887_v3 = vld [vmem:[#allocation9 + $0x1174] ss:$8 sps:$4 sm:$0xff]  }
 0x475   :  { %7415 = vmatpush1.bf16.msra.mxu1 %v13837_v58  ;;  %v13893_v58 = vld [vmem:[#allocation9 + $0x1194] ss:$8 sps:$4 sm:$0xff]  }
 0x476   :  { %7416 = vmatprep.subr.bf16.mxu1 %v13842_v20  ;;  %v13891_v20 = vld [vmem:[#allocation9 + $0x1190] ss:$8 sps:$4 sm:$0xff]  }
 0x479   :  { %7417 = vmatpush1.bf16.msra.mxu1 %v13840_v11  ;;  %v13899_v11 = vld [vmem:[#allocation9 + $0x11b4] ss:$8 sps:$4 sm:$0xff]  }
 0x47a   :  { %7418 = vmatprep.subr.bf16.mxu1 %v13845_v14  ;;  %v13897_v14 = vld [vmem:[#allocation9 + $0x11b0] ss:$8 sps:$4 sm:$0xff]  }
 0x47d   :  { %7419 = vmatpush1.bf16.msra.mxu1 %v13843_v38  ;;  %v13905_v38 = vld [vmem:[#allocation9 + $0x11d4] ss:$8 sps:$4 sm:$0xff]  }
 0x47e   :  { %7420 = vmatprep.subr.bf16.mxu1 %v13848_v17  ;;  %v13903_v17 = vld [vmem:[#allocation9 + $0x11d0] ss:$8 sps:$4 sm:$0xff]  }
 0x481   :  { %7421 = vmatpush1.bf16.msra.mxu1 %v13846_v12  ;;  %v13911_v12 = vld [vmem:[#allocation9 + $0x11f4] ss:$8 sps:$4 sm:$0xff]  }
 0x482   :  { %7422 = vmatprep.subr.bf16.mxu1 %v13851_v50  ;;  %v13909_v50 = vld [vmem:[#allocation9 + $0x11f0] ss:$8 sps:$4 sm:$0xff]  }
 0x485   :  { %7423 = vmatpush1.bf16.msra.mxu1 %v13849_v23  ;;  %v16170_v23 = vcombine.low %v15463_v27, %v15466_v44  ;;  %v13956_v27 = vld [vmem:[#allocation12 + $0xe4] ss:$8 sps:$4 sm:$0xff]   ;;  %v13954_v44 = vld [vmem:[#allocation12 + $0xe0] ss:$8 sps:$4 sm:$0xff]  }
 0x486   :  { %7424 = vmatprep.subr.bf16.mxu1 %v13854_v28  ;;  %v13939_v28 = vld [vmem:[#allocation12 + $0x90] ss:$8 sps:$4 sm:$0xff]  }
 0x489   :  { %7425 = vmatpush1.bf16.msra.mxu1 %v13852_v45  ;;  %v13941_v45 = vld [vmem:[#allocation12 + $0x94] ss:$8 sps:$4 sm:$0xff]  }
 0x48a   :  { %7426 = vmatprep.subr.bf16.mxu1 %v13857_v63  ;;  %v13944_v63 = vld [vmem:[#allocation12 + $0xa4] ss:$8 sps:$4 sm:$0xff]   ;;  %10876 = vmatprep.subr.bf16.mxu0 %v13941_v45 }
 0x48b   :  { %10877 = vmatpush1.bf16.msra.mxu0 %v13939_v28 }
 0x48c   :  { %10878 = vmatprep.subr.bf16.mxu0 %v13944_v63  ;;  %v12387_v63 = vld.sshfl [vmem:[#allocation3] sm:$0x5f pattern:$0x76325410] }
 0x48d   :  { %7427 = vmatpush1.bf16.msra.mxu1 %v13855_v4  ;;  %v13942_v4 = vld [vmem:[#allocation12 + $0xa0] ss:$8 sps:$4 sm:$0xff]  }
 0x48e   :  { %7428 = vmatprep.subr.bf16.mxu1 %v13860_v41  ;;  %v13945_v41 = vld [vmem:[#allocation12 + $0xb0] ss:$8 sps:$4 sm:$0xff]  }
 0x48f   :  { %10879 = vmatpush1.bf16.msra.mxu0 %v13942_v4 }
 0x491   :  { %7429 = vmatpush1.bf16.msra.mxu1 %v13858_v8  ;;  %v13947_v8 = vld [vmem:[#allocation12 + $0xb4] ss:$8 sps:$4 sm:$0xff]  }
 0x492   :  { %7430 = vmatprep.subr.bf16.mxu1 %v13863_v34  ;;  %10880 = vmatprep.subr.bf16.mxu0 %v13947_v8  ;;  %v13951_v34 = vld [vmem:[#allocation12 + $0xd0] ss:$8 sps:$4 sm:$0xff]  }
 0x493   :  { %10881 = vmatpush1.bf16.msra.mxu0 %v13945_v41 }
 0x494   :  { %10882 = vmatprep.subr.bf16.mxu0 %v13950_v21 }
 0x495   :  { %7431 = vmatpush1.bf16.msra.mxu1 %v13861_v46  ;;  %v13957_v46 = vld [vmem:[#allocation12 + $0xf0] ss:$8 sps:$4 sm:$0xff]  }
 0x496   :  { %7453 = vmatprep.subr.bf16.mxu1 %v13866_v0  ;;  %v3660_v0 = vld [vmem:[#allocation10] sm:$0x3] }
 0x497   :  { %10883 = vmatpush1.bf16.msra.mxu0 %v13948_v47 }
 0x498   :  { %7433 = vmatmul.mubr.bf16.vlgmr.msra.gmra.mrb[0].mxu1 %v3036_v16  ;;  %v3669_v16 = vrot.slane %v3660_v0, %v16172_v25 }
 0x499   :  { %7442 = vmatprep.mubr.bf16.mxu1 %v3073_v31  ;;  %7454 = vmatpush1.bf16.msra.mxu1 %v13864_v30  ;;  %v3665_v30 = vrot.slane %v3660_v0, %v16171_v29 }
 0x49a   :  { %7455 = vmatprep.subr.bf16.mxu1 %v13869_v57  ;;  %v12816_v31 = vadd.f32 %v15539_v6, %v3669_v16 }
 0x49b   :  { %v12814_v57 = vadd.f32 %v15537_v52, %v3665_v30  ;;  %v12822_v52 = vadd.f32 %v15545_v19, %v3665_v30 }
 0x49d   :  { %7456 = vmatpush1.bf16.msra.mxu1 %v13867_v43 }
 0x49e   :  { %7457 = vmatprep.subr.bf16.mxu1 %v13872_v7  ;;  %v12818_v7 = vadd.f32 %v15541_v51, %v3665_v30 }
 0x4a0   :  { %7443 = vmatmul.mubr.bf16.gmra.mrb[4].mxu1 %v3072_v2 }
 0x4a1   :  { %7458 = vmatpush1.bf16.msra.mxu1 %v13870_v33  ;;  %7485 = vmatprep.mubr.bf16.mxu1 %v3039_v32  ;;  %v13888_v32 = vld [vmem:[#allocation9 + $0x1180] ss:$8 sps:$4 sm:$0xff]  }
 0x4a2   :  { %7459 = vmatprep.subr.bf16.mxu1 %v13875_v53  ;;  %v12820_v53 = vadd.f32 %v15543_v13, %v3669_v16  ;;  %v12826_v13 = vadd.f32 %v15552_v39, %v3665_v30  ;;  %v7577_v30 = vld [vmem:[#allocation3 + $0x20] sm:$0x77] }
 0x4a5   :  { %7460 = vmatpush1.bf16.msra.mxu1 %v13873_v56 }
 0x4a6   :  { %7461 = vmatprep.subr.bf16.mxu1 %v13878_v37 }
 0x4a9   :  { %7462 = vmatpush1.bf16.msra.mxu1 %v13876_v59 }
 0x4aa   :  { %7463 = vmatprep.subr.bf16.mxu1 %v13881_v26 }
 0x4ad   :  { %7464 = vmatpush1.bf16.msra.mxu1 %v13879_v62 }
 0x4ae   :  { %7465 = vmatprep.subr.bf16.mxu1 %v13884_v35 }
 0x4b1   :  { %7466 = vmatpush1.bf16.msra.mxu1 %v13882_v9 }
 0x4b2   :  { %7467 = vmatprep.subr.bf16.mxu1 %v13887_v3 }
 0x4b5   :  { %7468 = vmatpush1.bf16.msra.mxu1 %v13885_v10 }
 0x4b6   :  { %7469 = vmatprep.subr.bf16.mxu1 %v13890_v55 }
 0x4b9   :  { %7470 = vmatpush1.bf16.msra.mxu1 %v13888_v32 }
 0x4ba   :  { %7471 = vmatprep.subr.bf16.mxu1 %v13893_v58 }
 0x4bd   :  { %7472 = vmatpush1.bf16.msra.mxu1 %v13891_v20  ;;  %v12824_v20 = vadd.f32 %v15550_v15, %v3669_v16 }
 0x4be   :  { %7473 = vmatprep.subr.bf16.mxu1 %v13896_v18  ;;  %v12828_v18 = vadd.f32 %v15554_v49, %v3669_v16  ;;  %v7568_v49 = vld [vmem:[#allocation3 + $0x18] sm:$0x77]  ;;  %v7783_v16 = vshrl.u32 %v12387_v63, 16 }
 0x4c1   :  { %7474 = vmatpush1.bf16.msra.mxu1 %v13894_v60  ;;  %v7544_v60 = vld [vmem:[#allocation3 + $0x8] sm:$0x77] }
 0x4c2   :  { %7475 = vmatprep.subr.bf16.mxu1 %v13899_v11 }
 0x4c5   :  { %7476 = vmatpush1.bf16.msra.mxu1 %v13897_v14 }
 0x4c6   :  { %7477 = vmatprep.subr.bf16.mxu1 %v13902_v54 }
 0x4c9   :  { %7478 = vmatpush1.bf16.msra.mxu1 %v13900_v22 }
 0x4ca   :  { %7479 = vmatprep.subr.bf16.mxu1 %v13905_v38 }
 0x4cd   :  { %7480 = vmatpush1.bf16.msra.mxu1 %v13903_v17 }
 0x4ce   :  { %7481 = vmatprep.subr.bf16.mxu1 %v13908_v24 }
 0x4d1   :  { %7482 = vmatpush1.bf16.msra.mxu1 %v13906_v36  ;;  %v7553_v36 = vld [vmem:[#allocation3 + $0x10] sm:$0x77] }
 0x4d2   :  { %7483 = vmatprep.subr.bf16.mxu1 %v13911_v12 }
 0x4d5   :  { %7484 = vmatpush1.bf16.msra.mxu1 %v13909_v50 }
 0x4d8   :  { %7486 = vmatmul.mubr.bf16.vlgmr.msra.gmra.mrb[0].mxu1 %v16169_v5 }
 0x4d9   :  { %7495 = vmatprep.mubr.bf16.mxu1 %v3075_v40  ;;  %v13953_v40 = vld [vmem:[#allocation12 + $0xd4] ss:$8 sps:$4 sm:$0xff]  }
 0x4da   :  { %10884 = vmatprep.subr.bf16.mxu0 %v13953_v40 }
 0x4db   :  { %10885 = vmatpush1.bf16.msra.mxu0 %v13951_v34 }
 0x4dc   :  { %10886 = vmatprep.subr.bf16.mxu0 %v13956_v27 }
 0x4df   :  { %10887 = vmatpush1.bf16.msra.mxu0 %v13954_v44 }
 0x4e0   :  { %7496 = vmatmul.mubr.bf16.gmra.mrb[4].mxu1 %v16170_v23  ;;  %10888 = vmatprep.subr.bf16.mxu0 %v13959_v42 }
 0x4e3   :  { %10889 = vmatpush1.bf16.msra.mxu0 %v13957_v46 }
 0x4e4   :  { %10911 = vmatprep.subr.bf16.mxu0 %v13962_v1 }
 0x5ab   :  { %v7487_v43 = vpop.f32.mrb[0].mxu1 }
 0x5ac   :  { %v12815_v33 = vadd.f32 %v12814_v57, %v7487_v43  ;;  %v7489_v2 = vpop.f32.mrb[1].mxu1 }
 0x5ad   :  { %v12817_v56 = vadd.f32 %v12816_v31, %v7489_v2  ;;  %v7491_v37 = vpop.f32.mrb[2].mxu1 }
 0x5ae   :  { %v7506_v59 = vmax.f32 %v12815_v33, 0.0  ;;  %v12819_v26 = vadd.f32 %v12818_v7, %v7491_v37  ;;  %v7493_v62 = vpop.f32.mrb[3].mxu1  ;;  %v7786_v33 = vshll.u32 %v12387_v63, 16 }
 0x5af   :  { %v7507_v35 = vmax.f32 %v12817_v56, 0.0  ;;  %v12821_v9 = vadd.f32 %v12820_v53, %v7493_v62 }
 0x5b0   :  { %v7508_v3 = vmax.f32 %v12819_v26, 0.0  ;;  %v7603_v26 = vld [vmem:[#allocation3 + $0x40] sm:$0x77] }
 0x5b1   :  { %v12788_v10 = vpack.c.bf16 %v7507_v35, %v7506_v59  ;;  %v7509_v55 = vmax.f32 %v12821_v9, 0.0  ;;  %v7594_v59 = vld [vmem:[#allocation3 + $0x38] sm:$0x77] }
 0x5b3   :  { %v7536_v6 = vshrl.u32 %v12788_v10, 16  ;;  %v7539_v32 = vshll.u32 %v12788_v10, 16  ;;  %v12789_v58 = vpack.c.bf16 %v7509_v55, %v7508_v3  ;;  %v7497_v51 = vpop.f32.mrb[4].mxu1  ;;  %v7725_v55 = vcombine.high %v12387_v63, %v12387_v63 }
 0x5b4   :  { %v12823_v11 = vadd.f32 %v12822_v52, %v7497_v51  ;;  %v7499_v14 = vpop.f32.mrb[5].mxu1  ;;  %v12379_v10 = vld.sshfl [vmem:[#allocation3] sm:$0xf pattern:$0x76325410]  ;;  %v7785_v52 = vrot.slane %v7783_v16, 6 }
 0x5b5   :  { %v7538_v54 = vrot.slane %v7536_v6, 7  ;;  %v7547_v22 = vrot.slane %v7536_v6, 5  ;;  %v7548_v38 = vrot.slane %v7539_v32, 6  ;;  %v7560_v17 = vshrl.u32 %v12789_v58, 16  ;;  %v7501_v24 = vpop.f32.mrb[6].mxu1 }
 0x5b6   :  { %v7563_v19 = vshll.u32 %v12789_v58, 16  ;;  %v7510_v12 = vmax.f32 %v12823_v11, 0.0  ;;  %v12825_v50 = vadd.f32 %v12824_v20, %v7499_v14  ;;  %v12827_v5 = vadd.f32 %v12826_v13, %v7501_v24  ;;  %v7503_v23 = vpop.f32.mrb[7].mxu1 }
 0x5b7   :  { %v7541_v28 = vor.u32 %v7539_v32, %v7538_v54  ;;  %v7549_v15 = vor.u32 %v7548_v38, %v7547_v22  ;;  %v7562_v45 = vrot.slane %v7560_v17, 7  ;;  %v7571_v39 = vrot.slane %v7560_v17, 5  ;;  %v7618_v32 = vld [vmem:[#allocation3 + $0x48] sm:$0x77]  ;;  %v7627_v54 = vld [vmem:[#allocation3 + $0x50] sm:$0x77] }
 0x5b8   :  { %v7572_v4 = vrot.slane %v7563_v19, 6  ;;  %v7511_v41 = vmax.f32 %v12825_v50, 0.0  ;;  %v7512_v8 = vmax.f32 %v12827_v5, 0.0  ;;  %v12829_v21 = vadd.f32 %v12828_v18, %v7503_v23 }
 0x5b9   :  { %v7545_v40 = vsel %vm14816_vm7, %v7541_v28, %v7544_v60  ;;  %v7550_v34 = vrot.slane %v7549_v15, 4  ;;  %v7565_v27 = vor.u32 %v7563_v19, %v7562_v45  ;;  %v7788_v20 = vrot.slane %v7786_v33, 7  ;;  %v13963_v33 = vld [vmem:[#allocation12 + $0x110] ss:$8 sps:$4 sm:$0xff]  }
 0x5ba   :  { %7546 = vst [vmem:[#allocation3 + $0x8] sm:$0x77] %v7545_v40  ;;  %v7573_v44 = vor.u32 %v7572_v4, %v7571_v39  ;;  %v12790_v42 = vpack.c.bf16 %v7511_v41, %v7510_v12  ;;  %v7513_v46 = vmax.f32 %v12829_v21, 0.0  ;;  %v13960_v41 = vld [vmem:[#allocation12 + $0x100] ss:$8 sps:$4 sm:$0xff]  }
 0x5bb   :  { %v7554_v1 = vsel %vm14816_vm7, %v7550_v34, %v7553_v36  ;;  %v7569_v0 = vsel %vm14816_vm7, %v7565_v27, %v7568_v49  ;;  %v7792_v36 = vshll.u32 %v7725_v55, 16  ;;  %v7789_v23 = vor.u32 %v7788_v20, %v7785_v52  ;;  %v13965_v34 = vld [vmem:[#allocation12 + $0x114] ss:$8 sps:$4 sm:$0xff]  }
 0x5bc   :  { %7555 = vst [vmem:[#allocation3 + $0x10] sm:$0x77] %v7554_v1  ;;  %7570 = vst [vmem:[#allocation3 + $0x18] sm:$0x77] %v7569_v0  ;;  %v7574_v57 = vrot.slane %v7573_v44, 4  ;;  %v7586_v31 = vshrl.u32 %v12790_v42, 16  ;;  %v12791_v7 = vpack.c.bf16 %v7513_v46, %v7512_v8 }
 0x5bd   :  { %v7589_v43 = vshll.u32 %v12790_v42, 16  ;;  %v12383_v0 = vld.sshfl [vmem:[#allocation3 + $0x30] sm:$0xf pattern:$0x76325410] }
 0x5be   :  { %v7578_v2 = vsel %vm14816_vm7, %v7574_v57, %v7577_v30  ;;  %v7588_v53 = vrot.slane %v7586_v31, 7  ;;  %v7597_v56 = vrot.slane %v7586_v31, 5  ;;  %v7610_v62 = vshrl.u32 %v12791_v7, 16 }
 0x5bf   :  { %v7598_v37 = vrot.slane %v7589_v43, 6  ;;  %7579 = vst [vmem:[#allocation3 + $0x20] sm:$0x77] %v7578_v2  ;;  %v7613_v35 = vshll.u32 %v12791_v7, 16  ;;  %v7790_v31 = vrot.slane %v7789_v23, 2 }
 0x5c0   :  { %v7591_v9 = vor.u32 %v7589_v43, %v7588_v53  ;;  %v7612_v6 = vrot.slane %v7610_v62, 7  ;;  %v7621_v58 = vrot.slane %v7610_v62, 5  ;;  %v7794_v43 = vrot.slane %v7792_v36, 7 }
 0x5c1   :  { %v7599_v3 = vor.u32 %v7598_v37, %v7597_v56  ;;  %v7622_v51 = vrot.slane %v7613_v35, 6  ;;  %v15673_v60 = vld.sshfl [vmem:[#allocation3 + $0x8] sm:$0xf pattern:$0x76325410] }
 0x5c2   :  { %v7595_v13 = vsel %vm14816_vm7, %v7591_v9, %v7594_v59  ;;  %v7615_v11 = vor.u32 %v7613_v35, %v7612_v6  ;;  %v8758_v38 = vcombine.low %v12379_v10, %v15673_v60  ;;  %v12388_v5 = vld.sshfl [vmem:[#allocation3 + $0x8] sm:$0x5f pattern:$0x76325410] }
 0x5c3   :  { %v7600_v18 = vrot.slane %v7599_v3, 4  ;;  %7596 = vst [vmem:[#allocation3 + $0x38] sm:$0x77] %v7595_v13  ;;  %v7623_v14 = vor.u32 %v7622_v51, %v7621_v58  ;;  %v7733_v45 = vcombine.high %v12388_v5, %v12388_v5  ;;  %v7797_v39 = vshrl.u32 %v12388_v5, 16  ;;  %v13968_v6 = vld [vmem:[#allocation12 + $0x124] ss:$8 sps:$4 sm:$0xff]  }
 0x5c4   :  { %v15675_v22 = vld.sshfl [vmem:[#allocation3 + $0x10] sm:$0xf pattern:$0x76325410]  ;;  %v7619_v19 = vsel %vm14816_vm7, %v7615_v11, %v7618_v32  ;;  %v8766_v28 = vrot.slane %v8758_v38, %v14808_v48  ;;  %v7800_v63 = vshll.u32 %v12388_v5, 16  ;;  %v7795_v58 = vsel %vm15047_vm5, %v7790_v31, %v7794_v43 }
 0x5c5   :  { %v7604_v17 = vsel %vm14816_vm7, %v7600_v18, %v7603_v26  ;;  %v15680_v24 = vld.sshfl [vmem:[#allocation3 + $0x18] sm:$0xf pattern:$0x76325410]  ;;  %v7624_v12 = vrot.slane %v7623_v14, 4  ;;  %v7799_v27 = vrot.slane %v7797_v39, 6 }
 0x5c6   :  { %7605 = vst [vmem:[#allocation3 + $0x40] sm:$0x77] %v7604_v17  ;;  %v8759_v50 = vcombine.low %v15675_v22, %v15680_v24  ;;  %7620 = vst [vmem:[#allocation3 + $0x48] sm:$0x77] %v7619_v19  ;;  %v7802_v44 = vrot.slane %v7800_v63, 7  ;;  %v7806_v42 = vshll.u32 %v7733_v45, 16 }
 0x5c7   :  { %v12389_v15 = vld.sshfl [vmem:[#allocation3 + $0x10] sm:$0x5f pattern:$0x76325410]  ;;  %v7628_v49 = vsel %vm14816_vm7, %v7624_v12, %v7627_v54  ;;  %v13966_v12 = vld [vmem:[#allocation12 + $0x120] ss:$8 sps:$4 sm:$0xff]  }
 0x5c8   :  { %v8773_v4 = vrot.slane %v8759_v50, %v14808_v48  ;;  %v12390_v8 = vld.sshfl [vmem:[#allocation3 + $0x18] sm:$0x5f pattern:$0x76325410]  ;;  %v7741_v21 = vcombine.high %v12389_v15, %v12389_v15  ;;  %v7811_v40 = vshrl.u32 %v12389_v15, 16  ;;  %v7814_v16 = vshll.u32 %v12389_v15, 16 }
 0x5c9   :  { %7629 = vst [vmem:[#allocation3 + $0x50] sm:$0x77] %v7628_v49  ;;  %v7749_v47 = vcombine.high %v12390_v8, %v12390_v8  ;;  %v7803_v7 = vor.u32 %v7802_v44, %v7799_v27  ;;  %v7825_v56 = vshrl.u32 %v12390_v8, 16  ;;  %v7828_v37 = vshll.u32 %v12390_v8, 16  ;;  %v13969_v63 = vld [vmem:[#allocation12 + $0x130] ss:$8 sps:$4 sm:$0xff]  }
 0x5ca   :  { %v8774_v46 = vcombine.low %v8766_v28, %v8773_v4  ;;  %v8775_v1 = vcombine.high %v8766_v28, %v8773_v4  ;;  %v7813_v30 = vrot.slane %v7811_v40, 6  ;;  %v15690_v57 = vld.sshfl [vmem:[#allocation3 + $0x38] sm:$0xf pattern:$0x76325410]  ;;  %v7816_v2 = vrot.slane %v7814_v16, 7 }
 0x5cb   :  { %v7820_v53 = vshll.u32 %v7741_v21, 16  ;;  %v8776_v26 = vcombine.low %v12383_v0, %v15690_v57  ;;  %v7804_v62 = vrot.slane %v7803_v7, 2  ;;  %v7808_v35 = vrot.slane %v7806_v42, 7  ;;  %v13971_v28 = vld [vmem:[#allocation12 + $0x134] ss:$8 sps:$4 sm:$0xff]  }
 0x5cc   :  { %10890 = vmatprep.mubr.bf16.mxu0 %v8775_v1  ;;  %v7817_v3 = vor.u32 %v7816_v2, %v7813_v30  ;;  %v7827_v10 = vrot.slane %v7825_v56, 6  ;;  %v7830_v55 = vrot.slane %v7828_v37, 7  ;;  %v7834_v51 = vshll.u32 %v7749_v47, 16  ;;  %v13974_v49 = vld [vmem:[#allocation12 + $0x144] ss:$8 sps:$4 sm:$0xff]  }
 0x5cd   :  { %10891 = vmatmul.mubr.bf16.vlgmr.msra.gmra.mrb[24].mxu0 %v8774_v46  ;;  %v15692_v59 = vld.sshfl [vmem:[#allocation3 + $0x40] sm:$0xf pattern:$0x76325410]  ;;  %v15703_v20 = vsel %vm15047_vm5, %v7804_v62, %v7808_v35  ;;  %v7822_v18 = vrot.slane %v7820_v53, 7  ;;  %v8784_v14 = vrot.slane %v8776_v26, %v14808_v48  ;;  %vm11571_vm7 = vcmask 91136  }
 0x5ce   :  { %10912 = vmatpush1.bf16.msra.mxu0 %v13960_v41  ;;  %v15695_v9 = vld.sshfl [vmem:[#allocation3 + $0x48] sm:$0xf pattern:$0x76325410]  ;;  %v7818_v13 = vrot.slane %v7817_v3, 2  ;;  %v7831_v11 = vor.u32 %v7830_v55, %v7827_v10  ;;  %v7836_v36 = vrot.slane %v7834_v51, 7  ;;  %v8798_v5 = vcombine.low %v7795_v58, %v15703_v20 }
 0x5cf   :  { %10913 = vmatprep.subr.bf16.mxu0 %v13965_v34  ;;  %v8777_v52 = vcombine.low %v15692_v59, %v15695_v9  ;;  %v12392_v41 = vld.sshfl [vmem:[#allocation3 + $0x38] sm:$0x5f pattern:$0x76325410]  ;;  %v13972_v8 = vld [vmem:[#allocation12 + $0x140] ss:$8 sps:$4 sm:$0xff]   ;;  %v8878_v3 = vcombine.low %v15673_v60, %v15675_v22 }
 0x5d0   :  { %v15709_v38 = vsel %vm15047_vm5, %v7818_v13, %v7822_v18  ;;  %v7832_v17 = vrot.slane %v7831_v11, 2  ;;  %v15719_v45 = vrot.slane %v8798_v5, %v14808_v48  ;;  %v13977_v21 = vld [vmem:[#allocation12 + $0x154] ss:$8 sps:$4 sm:$0xff]   ;;  %v7853_v40 = vshrl.u32 %v12392_v41, 16  ;;  %v13975_v44 = vld [vmem:[#allocation12 + $0x150] ss:$8 sps:$4 sm:$0xff]  }
 0x5d1   :  { %v8791_v54 = vrot.slane %v8777_v52, %v14808_v48  ;;  %v12393_v34 = vld.sshfl [vmem:[#allocation3 + $0x40] sm:$0x5f pattern:$0x76325410]  ;;  %v7856_v27 = vshll.u32 %v12392_v41, 16  ;;  %v7765_v7 = vcombine.high %v12392_v41, %v12392_v41  ;;  %v15733_v11 = vrot.slane %v8878_v3, %v14808_v48 }
 0x5d2   :  { %10914 = vmatpush1.bf16.msra.mxu0 %v13963_v33  ;;  %v15714_v23 = vsel %vm15047_vm5, %v7832_v17, %v7836_v36  ;;  %v13980_v42 = vld [vmem:[#allocation12 + $0x164] ss:$8 sps:$4 sm:$0xff]   ;;  %v7855_v0 = vrot.slane %v7853_v40, 6  ;;  %v7867_v30 = vshrl.u32 %v12393_v34, 16  ;;  %v7870_v47 = vshll.u32 %v12393_v34, 16 }
 0x5d3   :  { %v8793_v19 = vcombine.high %v8784_v14, %v8791_v54  ;;  %10915 = vmatprep.subr.bf16.mxu0 %v13968_v6  ;;  %v8792_v50 = vcombine.low %v8784_v14, %v8791_v54  ;;  %v8799_v15 = vcombine.low %v15709_v38, %v15714_v23  ;;  %v12391_v46 = vld.sshfl [vmem:[#allocation3 + $0x30] sm:$0x5f pattern:$0x76325410]  ;;  %v7858_v16 = vrot.slane %v7856_v27, 7 }
 0x5d4   :  { %v12394_v1 = vld.sshfl [vmem:[#allocation3 + $0x48] sm:$0x5f pattern:$0x76325410]  ;;  %v13983_v2 = vld [vmem:[#allocation12 + $0x174] ss:$8 sps:$4 sm:$0xff]   ;;  %v7773_v53 = vcombine.high %v12393_v34, %v12393_v34  ;;  %v7757_v13 = vcombine.high %v12391_v46, %v12391_v46 }
 0x5d5   :  { %10900 = vmatprep.mubr.bf16.mxu0 %v8793_v19  ;;  %v15722_v39 = vrot.slane %v8799_v15, %v14808_v48  ;;  %v15726_v31 = vld.sshfl [vmem:[#allocation3 + $0x20] sm:$0xf pattern:$0x76325410]  ;;  %v7839_v56 = vshrl.u32 %v12391_v46, 16  ;;  %v7842_v37 = vshll.u32 %v12391_v46, 16  ;;  %v7859_v55 = vor.u32 %v7858_v16, %v7855_v0 }
 0x5d6   :  { %10901 = vmatmul.mubr.bf16.gmra.mrb[28].mxu0 %v8792_v50  ;;  %v13978_v43 = vld [vmem:[#allocation12 + $0x160] ss:$8 sps:$4 sm:$0xff]   ;;  %v12397_v33 = vld.sshfl [vmem:[#allocation3 + $0x10] sm:$0x5a pattern:$0x76325410]  ;;  %v8879_v10 = vcombine.low %v15680_v24, %v15726_v31  ;;  %v7781_v60 = vcombine.high %v12394_v1, %v12394_v1 }
 0x5d7   :  { %10916 = vmatpush1.bf16.msra.mxu0 %v13966_v12  ;;  %v8815_v4 = vcombine.high %v15719_v45, %v15722_v39  ;;  %v7869_v26 = vrot.slane %v7867_v30, 6  ;;  %v7881_v62 = vshrl.u32 %v12394_v1, 16  ;;  %v12396_v35 = vld.sshfl [vmem:[#allocation3 + $0x8] sm:$0x5a pattern:$0x76325410]  ;;  %v7933_v58 = vcombine.high %v12397_v33, %v12397_v33 }
 0x5d8   :  { %10917 = vmatprep.subr.bf16.mxu0 %v13971_v28  ;;  %v7872_v52 = vrot.slane %v7870_v47, 7  ;;  %v7884_v6 = vshll.u32 %v12394_v1, 16  ;;  %v13981_v51 = vld [vmem:[#allocation12 + $0x170] ss:$8 sps:$4 sm:$0xff]   ;;  %v7862_v18 = vshll.u32 %v7765_v7, 16  ;;  %v15736_v14 = vrot.slane %v8879_v10, %v14808_v48 }
 0x5d9   :  { %10943 = vmatprep.mubr.bf16.mxu0 %v8815_v4  ;;  %v13986_v54 = vld [vmem:[#allocation12 + $0x184] ss:$8 sps:$4 sm:$0xff]   ;;  %v15738_v22 = vrot.slane %v7839_v56, 6  ;;  %v15740_v24 = vrot.slane %v7842_v37, 7  ;;  %v7925_v17 = vcombine.high %v12396_v35, %v12396_v35  ;;  %v7876_v36 = vshll.u32 %v7773_v53, 16 }
 0x5da   :  { %v7883_v19 = vrot.slane %v7881_v62, 6  ;;  %v12398_v12 = vld.sshfl [vmem:[#allocation3 + $0x18] sm:$0x5a pattern:$0x76325410]  ;;  %v8894_v50 = vcombine.low %v15733_v11, %v15736_v14  ;;  %v8895_v5 = vcombine.high %v15733_v11, %v15736_v14  ;;  %v7860_v15 = vrot.slane %v7859_v55, 2 }
 0x5db   :  { %10918 = vmatpush1.bf16.msra.mxu0 %v13969_v63  ;;  %v13984_v28 = vld [vmem:[#allocation12 + $0x180] ss:$8 sps:$4 sm:$0xff]   ;;  %v7873_v63 = vor.u32 %v7872_v52, %v7869_v26  ;;  %v7984_v4 = vrot.slane %v7933_v58, 7  ;;  %v13989_v41 = vld [vmem:[#allocation12 + $0x194] ss:$8 sps:$4 sm:$0xff]   ;;  %v12404_v40 = vrot.slane %v12396_v35, 9  ;;  %v7941_v34 = vcombine.high %v12398_v12, %v12398_v12 }
 0x5dc   :  { %10919 = vmatprep.subr.bf16.mxu0 %v13974_v49  ;;  %v7886_v49 = vrot.slane %v7884_v6, 7  ;;  %v7980_v27 = vrot.slane %v7925_v17, 7  ;;  %v13987_v46 = vld [vmem:[#allocation12 + $0x190] ss:$8 sps:$4 sm:$0xff]   ;;  %v7845_v1 = vor.u32 %v15740_v24, %v15738_v22  ;;  %v7878_v0 = vrot.slane %v7876_v36, 7 }
 0x5dd   :  { %v15750_v30 = vshll.u32 %v7781_v60, 16  ;;  %v15752_v16 = vld.sshfl [vmem:[#allocation3 + $0x38] sm:$0x5a pattern:$0x76325410]  ;;  %v7874_v7 = vrot.slane %v7873_v63, 2 }
 0x5de   :  { %v13992_v47 = vld [vmem:[#allocation12 + $0x1a4] ss:$8 sps:$4 sm:$0xff]   ;;  %v12422_v53 = vld.sshfl [vmem:[#allocation3 + $0x20] sm:$0x5f pattern:$0x76325410]  ;;  %v15766_v3 = vsel %vm14910_vm14, %v12404_v40, %v7980_v27  ;;  %v7957_v52 = vcombine.high %v15752_v16, %v15752_v16 }
 0x5df   :  { %10920 = vmatpush1.bf16.msra.mxu0 %v13972_v8  ;;  %v15746_v8 = vshll.u32 %v7757_v13, 16  ;;  %v15762_v56 = vld.sshfl [vmem:[#allocation3 + $0x48] sm:$0x5a pattern:$0x76325410]  ;;  %v8125_v26 = vcombine.high %v12422_v53, %v12422_v53  ;;  %v8201_v62 = vshrl.u32 %v12422_v53, 16 }
 0x5e0   :  { %10921 = vmatprep.subr.bf16.mxu0 %v13977_v21  ;;  %v7864_v21 = vrot.slane %v7862_v18, 7  ;;  %v8204_v35 = vshll.u32 %v12422_v53, 16  ;;  %v12406_v10 = vrot.slane %v12398_v12, 9  ;;  %v7988_v55 = vrot.slane %v7941_v34, 7  ;;  %v14004_v22 = vld [vmem:[#allocation12 + $0x1e4] ss:$8 sps:$4 sm:$0xff]  }
 0x5e1   :  { %v12430_v6 = vld.sshfl [vmem:[#allocation3 + $0x20] sm:$0x5a pattern:$0x76325410]  ;;  %v8203_v58 = vrot.slane %v8201_v62, 6  ;;  %v8210_v13 = vshll.u32 %v8125_v26, 16  ;;  %v7973_v17 = vcombine.high %v15762_v56, %v15762_v56  ;;  %v8896_v34 = vcombine.low %v15690_v57, %v15692_v59 }
 0x5e2   :  { %v8317_v18 = vcombine.high %v12430_v6, %v12430_v6  ;;  %v12426_v62 = vld.sshfl [vmem:[#allocation3 + $0x50] sm:$0x5f pattern:$0x76325410] }
 0x5e3   :  { %10922 = vmatpush1.bf16.msra.mxu0 %v13975_v44  ;;  %v12405_v44 = vrot.slane %v12397_v33, 9  ;;  %v12395_v24 = vld.sshfl [vmem:[#allocation3] sm:$0x5a pattern:$0x76325410] }
 0x5e4   :  { %10923 = vmatprep.subr.bf16.mxu0 %v13980_v42  ;;  %v12401_v42 = vld.sshfl [vmem:[#allocation3 + $0x40] sm:$0x5a pattern:$0x76325410]  ;;  %v8364_v63 = vrot.slane %v8317_v18, 7 }
 0x5e5   :  { %v15760_v33 = vsel %vm14910_vm14, %v12405_v44, %v7984_v4  ;;  %v7965_v37 = vcombine.high %v12401_v42, %v12401_v42  ;;  %v15782_v4 = vsel %vm14910_vm14, %v12406_v10, %v7988_v55  ;;  %v12409_v40 = vrot.slane %v12401_v42, 9  ;;  %v13996_v18 = vld [vmem:[#allocation12 + $0x1c0] ss:$8 sps:$4 sm:$0xff]   ;;  %v14113_v11 = vld [vmem:[#allocation12 + $0x430] ss:$8 sps:$4 sm:$0xff]  }
 0x5e6   :  { %v8958_v36 = vcombine.low %v15766_v3, %v15760_v33  ;;  %v8212_v44 = vrot.slane %v8210_v13, 7  ;;  %v8157_v10 = vcombine.high %v12426_v62, %v12426_v62  ;;  %v8257_v55 = vshrl.u32 %v12426_v62, 16  ;;  %v14118_v14 = vld [vmem:[#allocation12 + $0x444] ss:$8 sps:$4 sm:$0xff]  }
 0x5e7   :  { %10924 = vmatpush1.bf16.msra.mxu0 %v13978_v43  ;;  %v15756_v43 = vsel %vm15047_vm5, %v7860_v15, %v7864_v21  ;;  %v8000_v12 = vrot.slane %v7965_v37, 7  ;;  %v12438_v15 = vrot.slane %v12430_v6, 9  ;;  %v7996_v21 = vrot.slane %v7957_v52, 7 }
 0x5e8   :  { %10925 = vmatprep.subr.bf16.mxu0 %v13983_v2  ;;  %v7887_v2 = vor.u32 %v7886_v49, %v7883_v19  ;;  %v13990_v19 = vld [vmem:[#allocation12 + $0x1a0] ss:$8 sps:$4 sm:$0xff]   ;;  %v13995_v49 = vld [vmem:[#allocation12 + $0x1b4] ss:$8 sps:$4 sm:$0xff]   ;;  %v8260_v52 = vshll.u32 %v12426_v62, 16 }
 0x5e9   :  { %v15800_v57 = vsel %vm14910_vm14, %v12409_v40, %v8000_v12  ;;  %v12434_v6 = vld.sshfl [vmem:[#allocation3 + $0x50] sm:$0x5a pattern:$0x76325410]  ;;  %v8266_v40 = vshll.u32 %v8157_v10, 16 }
 0x5ea   :  { %v15774_v60 = vrot.slane %v7887_v2, 2  ;;  %v8918_v2 = vcombine.low %v15703_v20, %v15709_v38  ;;  %v13998_v20 = vld [vmem:[#allocation12 + $0x1c4] ss:$8 sps:$4 sm:$0xff]   ;;  %v15812_v38 = vrot.slane %v8896_v34, %v14808_v48  ;;  %v8349_v13 = vcombine.high %v12434_v6, %v12434_v6 }
 0x5eb   :  { %10926 = vmatpush1.bf16.msra.mxu0 %v13981_v51  ;;  %v8206_v51 = vrot.slane %v8204_v35, 7  ;;  %v8262_v12 = vrot.slane %v8260_v52, 7  ;;  %v8268_v62 = vrot.slane %v8266_v40, 7  ;;  %v14002_v52 = vld [vmem:[#allocation12 + $0x1e0] ss:$8 sps:$4 sm:$0xff]  }
 0x5ec   :  { %10927 = vmatprep.subr.bf16.mxu0 %v13986_v54  ;;  %v15772_v54 = vsel %vm15047_vm5, %v7874_v7, %v7878_v0  ;;  %v12410_v0 = vrot.slane %v15762_v56, 9  ;;  %v15792_v7 = vld.sshfl [vmem:[#allocation3 + $0x50] sm:$0xf pattern:$0x76325410]  ;;  %v15809_v56 = vrot.slane %v8958_v36, %v14808_v48  ;;  %v15817_v26 = vrot.slane %v8918_v2, %v14808_v48 }
 0x5ed   :  { %v8897_v59 = vcombine.low %v15695_v9, %v15792_v7 }
 0x5ef   :  { %10928 = vmatpush1.bf16.msra.mxu0 %v13984_v28  ;;  %v8207_v28 = vor.u32 %v8206_v51, %v8203_v58  ;;  %v15823_v35 = vrot.slane %v8897_v59, %v14808_v48  ;;  %v13999_v59 = vld [vmem:[#allocation12 + $0x1d0] ss:$8 sps:$4 sm:$0xff]  }
 0x5f0   :  { %10929 = vmatprep.subr.bf16.mxu0 %v13989_v41  ;;  %v12408_v41 = vrot.slane %v15752_v16, 9  ;;  %v13993_v16 = vld [vmem:[#allocation12 + $0x1b0] ss:$8 sps:$4 sm:$0xff]  }
 0x5f1   :  { %v8208_v27 = vrot.slane %v8207_v28, 2  ;;  %v8912_v36 = vcombine.low %v15812_v38, %v15823_v35  ;;  %v14001_v28 = vld [vmem:[#allocation12 + $0x1d4] ss:$8 sps:$4 sm:$0xff]  }
 0x5f3   :  { %10930 = vmatpush1.bf16.msra.mxu0 %v13987_v46  ;;  %v15789_v46 = vsel %vm14910_vm14, %v12438_v15, %v8364_v63  ;;  %v15806_v53 = vsel %vm15047_vm5, %v8208_v27, %v8212_v44  ;;  %v15838_v15 = vsel %vm14910_vm14, %v12408_v41, %v7996_v21  ;;  %v12442_v27 = vrot.slane %v12434_v6, 9 }
 0x5f4   :  { %10931 = vmatprep.subr.bf16.mxu0 %v13992_v47  ;;  %v8004_v47 = vrot.slane %v7973_v17, 7  ;;  %v8959_v42 = vcombine.low %v15782_v4, %v15789_v46  ;;  %v8919_v37 = vcombine.low %v15714_v23, %v15806_v53  ;;  %v8913_v17 = vcombine.high %v15812_v38, %v15823_v35  ;;  %v14127_v38 = vld [vmem:[#allocation12 + $0x474] ss:$8 sps:$4 sm:$0xff]   ;;  %v14125_v35 = vld [vmem:[#allocation12 + $0x470] ss:$8 sps:$4 sm:$0xff]  }
 0x5f5   :  { %v8380_v44 = vrot.slane %v8349_v13, 7  ;;  %v8976_v2 = vcombine.low %v15838_v15, %v15800_v57  ;;  %v7850_v41 = vrot.slane %v15746_v8, 7  ;;  %v7892_v21 = vrot.slane %v15750_v30, 7 }
 0x5f6   :  { %v15820_v9 = vrot.slane %v8959_v42, %v14808_v48  ;;  %v15826_v58 = vrot.slane %v8919_v37, %v14808_v48  ;;  %v7846_v42 = vrot.slane %v7845_v1, 2  ;;  %v7917_v13 = vcombine.high %v12395_v24, %v12395_v24 }
 0x5f7   :  { %10932 = vmatpush1.bf16.msra.mxu0 %v13990_v19  ;;  %v8259_v19 = vrot.slane %v8257_v55, 6  ;;  %v15859_v10 = vsel %vm14910_vm14, %v12442_v27, %v8380_v44  ;;  %v7893_v1 = vsel %vm15047_vm5, %v15774_v60, %v7892_v21  ;;  %v14007_v60 = vld [vmem:[#allocation12 + $0x1f4] ss:$8 sps:$4 sm:$0xff]   ;;  %v14005_v44 = vld [vmem:[#allocation12 + $0x1f0] ss:$8 sps:$4 sm:$0xff]  }
 0x5f8   :  { %10933 = vmatprep.subr.bf16.mxu0 %v13995_v49  ;;  %v8974_v23 = vcombine.low %v15809_v56, %v15820_v9  ;;  %v8975_v51 = vcombine.high %v15809_v56, %v15820_v9  ;;  %v8934_v63 = vcombine.low %v15817_v26, %v15826_v58  ;;  %v8935_v49 = vcombine.high %v15817_v26, %v15826_v58  ;;  %v14161_v26 = vld [vmem:[#allocation12 + $0x530] ss:$8 sps:$4 sm:$0xff]   ;;  %v14166_v58 = vld [vmem:[#allocation12 + $0x544] ss:$8 sps:$4 sm:$0xff]   ;;  %v14211_v56 = vld [vmem:[#allocation12 + $0x634] ss:$8 sps:$4 sm:$0xff]  }
 0x5f9   :  { %v8263_v34 = vor.u32 %v8262_v12, %v8259_v19  ;;  %v7851_v6 = vsel %vm15047_vm5, %v7846_v42, %v7850_v41  ;;  %v8817_v40 = vcombine.low %v15772_v54, %v7893_v1  ;;  %v14010_v42 = vld [vmem:[#allocation12 + $0x204] ss:$8 sps:$4 sm:$0xff]   ;;  %v12403_v41 = vrot.slane %v12395_v24, 9  ;;  %v14011_v24 = vld [vmem:[#allocation12 + $0x210] ss:$8 sps:$4 sm:$0xff]  }
 0x5fa   :  { %v7976_v21 = vrot.slane %v7917_v13, 7  ;;  %v14019_v13 = vld [vmem:[#allocation12 + $0x234] ss:$8 sps:$4 sm:$0xff]  }
 0x5fb   :  { %10934 = vmatpush1.bf16.msra.mxu0 %v13993_v16  ;;  %v8936_v16 = vcombine.low %v15756_v43, %v15772_v54  ;;  %v8264_v37 = vrot.slane %v8263_v34, 2 }
 0x5fc   :  { %10935 = vmatprep.subr.bf16.mxu0 %v13998_v20  ;;  %v15855_v20 = vsel %vm14910_vm14, %v12410_v0, %v8004_v47  ;;  %v15872_v47 = vrot.slane %v8976_v2, %v14808_v48  ;;  %v8816_v2 = vcombine.low %v7851_v6, %v15756_v43  ;;  %v8839_v43 = vcombine.low %v15760_v33, %v15782_v4  ;;  %v14022_v4 = vld [vmem:[#allocation12 + $0x244] ss:$8 sps:$4 sm:$0xff]  }
 0x5fd   :  { %v8977_v8 = vcombine.low %v15855_v20, %v15859_v10  ;;  %v15868_v30 = vsel %vm15047_vm5, %v8264_v37, %v8268_v62  ;;  %v8814_v37 = vcombine.low %v15719_v45, %v15722_v39  ;;  %v14013_v62 = vld [vmem:[#allocation12 + $0x214] ss:$8 sps:$4 sm:$0xff]   ;;  %v14014_v45 = vld [vmem:[#allocation12 + $0x220] ss:$8 sps:$4 sm:$0xff]  }
 0x5fe   :  { %v8937_v0 = vcombine.low %v7893_v1, %v15868_v30  ;;  %v8824_v54 = vrot.slane %v8816_v2, %v14808_v48  ;;  %v14028_v2 = vld [vmem:[#allocation12 + $0x264] ss:$8 sps:$4 sm:$0xff]  }
 0x5ff   :  { %10936 = vmatpush1.bf16.msra.mxu0 %v13996_v18  ;;  %v15875_v55 = vrot.slane %v8977_v8, %v14808_v48  ;;  %v15880_v18 = vrot.slane %v8936_v16, %v14808_v48  ;;  %v8831_v16 = vrot.slane %v8817_v40, %v14808_v48  ;;  %v14025_v40 = vld [vmem:[#allocation12 + $0x254] ss:$8 sps:$4 sm:$0xff]  }
 0x600   :  { %10937 = vmatprep.subr.bf16.mxu0 %v14001_v28  ;;  %v15883_v19 = vrot.slane %v8937_v0, %v14808_v48  ;;  %v14016_v0 = vld [vmem:[#allocation12 + $0x224] ss:$8 sps:$4 sm:$0xff]  }
 0x601   :  { %v8993_v12 = vcombine.high %v15872_v47, %v15875_v55  ;;  %v8992_v28 = vcombine.low %v15872_v47, %v15875_v55  ;;  %v8833_v8 = vcombine.high %v8824_v54, %v8831_v16  ;;  %v8832_v6 = vcombine.low %v8824_v54, %v8831_v16  ;;  %v14034_v16 = vld [vmem:[#allocation12 + $0x284] ss:$8 sps:$4 sm:$0xff]   ;;  %v14037_v54 = vld [vmem:[#allocation12 + $0x294] ss:$8 sps:$4 sm:$0xff]   ;;  %v14221_v47 = vld [vmem:[#allocation12 + $0x670] ss:$8 sps:$4 sm:$0xff]  }
 0x602   :  { %v8953_v34 = vcombine.high %v15880_v18, %v15883_v19  ;;  %v8952_v27 = vcombine.low %v15880_v18, %v15883_v19  ;;  %v14175_v18 = vld [vmem:[#allocation12 + $0x574] ss:$8 sps:$4 sm:$0xff]   ;;  %v14173_v19 = vld [vmem:[#allocation12 + $0x570] ss:$8 sps:$4 sm:$0xff]   ;;  %v14226_v55 = vld [vmem:[#allocation12 + $0x684] ss:$8 sps:$4 sm:$0xff]  }
 0x603   :  { %10938 = vmatpush1.bf16.msra.mxu0 %v13999_v59  ;;  %v14008_v59 = vld [vmem:[#allocation12 + $0x200] ss:$8 sps:$4 sm:$0xff]  }
 0x604   :  { %10939 = vmatprep.subr.bf16.mxu0 %v14004_v22  ;;  %v7977_v22 = vsel %vm14910_vm14, %v12403_v41, %v7976_v21  ;;  %v14031_v41 = vld [vmem:[#allocation12 + $0x274] ss:$8 sps:$4 sm:$0xff]   ;;  %v14029_v21 = vld [vmem:[#allocation12 + $0x270] ss:$8 sps:$4 sm:$0xff]  }
 0x605   :  { %v8838_v1 = vcombine.low %v7977_v22, %v15766_v3  ;;  %v14017_v3 = vld [vmem:[#allocation12 + $0x230] ss:$8 sps:$4 sm:$0xff]   ;;  %v14038_v22 = vld [vmem:[#allocation12 + $0x2a0] ss:$8 sps:$4 sm:$0xff]  }
 0x607   :  { %10940 = vmatpush1.bf16.msra.mxu0 %v14002_v52  ;;  %v15905_v52 = vrot.slane %v8839_v43, %v14808_v48  ;;  %v15908_v39 = vrot.slane %v8838_v1, %v14808_v48  ;;  %v14041_v43 = vld [vmem:[#allocation12 + $0x2b0] ss:$8 sps:$4 sm:$0xff]  }
 0x608   :  { %10941 = vmatprep.subr.bf16.mxu0 %v14007_v60  ;;  %v14020_v60 = vld [vmem:[#allocation12 + $0x240] ss:$8 sps:$4 sm:$0xff]   ;;  %v12399_v1 = vld.sshfl [vmem:[#allocation3 + $0x30] sm:$0x5a pattern:$0x76325410] }
 0x609   :  { %v8855_v33 = vcombine.high %v15908_v39, %v15905_v52 }
 0x60b   :  { %10942 = vmatpush1.bf16.msra.mxu0 %v14005_v44  ;;  %v14023_v44 = vld [vmem:[#allocation12 + $0x250] ss:$8 sps:$4 sm:$0xff]  }
 0x60c   :  { %10964 = vmatprep.subr.bf16.mxu0 %v14010_v42  ;;  %v14026_v42 = vld [vmem:[#allocation12 + $0x260] ss:$8 sps:$4 sm:$0xff]  }
 0x60e   :  { %10944 = vmatmul.mubr.bf16.vlgmr.msra.gmra.mrb[24].mxu0 %v8814_v37  ;;  %v14035_v37 = vld [vmem:[#allocation12 + $0x290] ss:$8 sps:$4 sm:$0xff]  }
 0x60f   :  { %10953 = vmatprep.mubr.bf16.mxu0 %v8833_v8  ;;  %10965 = vmatpush1.bf16.msra.mxu0 %v14008_v59  ;;  %v14032_v59 = vld [vmem:[#allocation12 + $0x280] ss:$8 sps:$4 sm:$0xff]   ;;  %v14043_v8 = vld [vmem:[#allocation12 + $0x2b4] ss:$8 sps:$4 sm:$0xff]  }
 0x610   :  { %10966 = vmatprep.subr.bf16.mxu0 %v14013_v62  ;;  %v14040_v62 = vld [vmem:[#allocation12 + $0x2a4] ss:$8 sps:$4 sm:$0xff]  }
 0x613   :  { %10967 = vmatpush1.bf16.msra.mxu0 %v14011_v24  ;;  %v14046_v24 = vld [vmem:[#allocation12 + $0x2c4] ss:$8 sps:$4 sm:$0xff]  }
 0x614   :  { %10968 = vmatprep.subr.bf16.mxu0 %v14016_v0  ;;  %v14044_v0 = vld [vmem:[#allocation12 + $0x2c0] ss:$8 sps:$4 sm:$0xff]  }
 0x616   :  { %10954 = vmatmul.mubr.bf16.gmra.mrb[28].mxu0 %v8832_v6  ;;  %v7949_v6 = vcombine.high %v12399_v1, %v12399_v1 }
 0x617   :  { %10969 = vmatpush1.bf16.msra.mxu0 %v14014_v45  ;;  %10996 = vmatprep.mubr.bf16.mxu0 %v8855_v33  ;;  %v14049_v45 = vld [vmem:[#allocation12 + $0x2d4] ss:$8 sps:$4 sm:$0xff]   ;;  %v14052_v33 = vld [vmem:[#allocation12 + $0x2e4] ss:$8 sps:$4 sm:$0xff]  }
 0x618   :  { %10970 = vmatprep.subr.bf16.mxu0 %v14019_v13  ;;  %v14047_v13 = vld [vmem:[#allocation12 + $0x2d0] ss:$8 sps:$4 sm:$0xff]  }
 0x61b   :  { %10971 = vmatpush1.bf16.msra.mxu0 %v14017_v3  ;;  %v12407_v3 = vrot.slane %v12399_v1, 9  ;;  %v14073_v1 = vld [vmem:[#allocation12 + $0x354] ss:$8 sps:$4 sm:$0xff]  }
 0x61c   :  { %10972 = vmatprep.subr.bf16.mxu0 %v14022_v4  ;;  %v7992_v4 = vrot.slane %v7949_v6, 7  ;;  %v14074_v6 = vld [vmem:[#allocation12 + $0x360] ss:$8 sps:$4 sm:$0xff]  }
 0x61f   :  { %10973 = vmatpush1.bf16.msra.mxu0 %v14020_v60  ;;  %v14050_v60 = vld [vmem:[#allocation12 + $0x2e0] ss:$8 sps:$4 sm:$0xff]  }
 0x620   :  { %10974 = vmatprep.subr.bf16.mxu0 %v14025_v40  ;;  %v14055_v40 = vld [vmem:[#allocation12 + $0x2f4] ss:$8 sps:$4 sm:$0xff]  }
 0x623   :  { %10975 = vmatpush1.bf16.msra.mxu0 %v14023_v44  ;;  %v7993_v44 = vsel %vm14910_vm14, %v12407_v3, %v7992_v4  ;;  %v14082_v3 = vld [vmem:[#allocation12 + $0x384] ss:$8 sps:$4 sm:$0xff]   ;;  %v14085_v4 = vld [vmem:[#allocation12 + $0x394] ss:$8 sps:$4 sm:$0xff]  }
 0x624   :  { %10976 = vmatprep.subr.bf16.mxu0 %v14028_v2  ;;  %v8857_v2 = vcombine.low %v15800_v57, %v15855_v20  ;;  %v14059_v57 = vld [vmem:[#allocation12 + $0x310] ss:$8 sps:$4 sm:$0xff]   ;;  %v14062_v20 = vld [vmem:[#allocation12 + $0x320] ss:$8 sps:$4 sm:$0xff]  }
 0x627   :  { %10977 = vmatpush1.bf16.msra.mxu0 %v14026_v42  ;;  %v14053_v42 = vld [vmem:[#allocation12 + $0x2f0] ss:$8 sps:$4 sm:$0xff]  }
 0x628   :  { %10978 = vmatprep.subr.bf16.mxu0 %v14031_v41  ;;  %v8856_v41 = vcombine.low %v7993_v44, %v15838_v15  ;;  %v14064_v15 = vld [vmem:[#allocation12 + $0x324] ss:$8 sps:$4 sm:$0xff]   ;;  %v14086_v44 = vld [vmem:[#allocation12 + $0x3a0] ss:$8 sps:$4 sm:$0xff]  }
 0x62b   :  { %10979 = vmatpush1.bf16.msra.mxu0 %v14029_v21  ;;  %v14058_v21 = vld [vmem:[#allocation12 + $0x304] ss:$8 sps:$4 sm:$0xff]  }
 0x62c   :  { %10980 = vmatprep.subr.bf16.mxu0 %v14034_v16  ;;  %v8871_v16 = vrot.slane %v8857_v2, %v14808_v48  ;;  %v14091_v2 = vld [vmem:[#allocation12 + $0x3b4] ss:$8 sps:$4 sm:$0xff]  }
 0x62f   :  { %10981 = vmatpush1.bf16.msra.mxu0 %v14032_v59  ;;  %v14056_v59 = vld [vmem:[#allocation12 + $0x300] ss:$8 sps:$4 sm:$0xff]  }
 0x630   :  { %10982 = vmatprep.subr.bf16.mxu0 %v14037_v54  ;;  %v8864_v54 = vrot.slane %v8856_v41, %v14808_v48  ;;  %v14094_v41 = vld [vmem:[#allocation12 + $0x3c4] ss:$8 sps:$4 sm:$0xff]  }
 0x633   :  { %10983 = vmatpush1.bf16.msra.mxu0 %v14035_v37  ;;  %v8854_v37 = vcombine.low %v15908_v39, %v15905_v52  ;;  %v14065_v52 = vld [vmem:[#allocation12 + $0x330] ss:$8 sps:$4 sm:$0xff]   ;;  %v14070_v39 = vld [vmem:[#allocation12 + $0x344] ss:$8 sps:$4 sm:$0xff]  }
 0x634   :  { %10984 = vmatprep.subr.bf16.mxu0 %v14040_v62  ;;  %v14061_v62 = vld [vmem:[#allocation12 + $0x314] ss:$8 sps:$4 sm:$0xff]  }
 0x637   :  { %10985 = vmatpush1.bf16.msra.mxu0 %v14038_v22  ;;  %v8873_v22 = vcombine.high %v8864_v54, %v8871_v16 }
 0x638   :  { %10986 = vmatprep.subr.bf16.mxu0 %v14043_v8  ;;  %v8872_v8 = vcombine.low %v8864_v54, %v8871_v16  ;;  %v14097_v16 = vld [vmem:[#allocation12 + $0x3d4] ss:$8 sps:$4 sm:$0xff]   ;;  %v14100_v54 = vld [vmem:[#allocation12 + $0x3e4] ss:$8 sps:$4 sm:$0xff]  }
 0x63b   :  { %10987 = vmatpush1.bf16.msra.mxu0 %v14041_v43  ;;  %v14067_v43 = vld [vmem:[#allocation12 + $0x334] ss:$8 sps:$4 sm:$0xff]  }
 0x63c   :  { %10988 = vmatprep.subr.bf16.mxu0 %v14046_v24  ;;  %v14068_v24 = vld [vmem:[#allocation12 + $0x340] ss:$8 sps:$4 sm:$0xff]  }
 0x63f   :  { %10989 = vmatpush1.bf16.msra.mxu0 %v14044_v0  ;;  %v14071_v0 = vld [vmem:[#allocation12 + $0x350] ss:$8 sps:$4 sm:$0xff]  }
 0x640   :  { %10990 = vmatprep.subr.bf16.mxu0 %v14049_v45  ;;  %v14076_v45 = vld [vmem:[#allocation12 + $0x364] ss:$8 sps:$4 sm:$0xff]  }
 0x643   :  { %10991 = vmatpush1.bf16.msra.mxu0 %v14047_v13  ;;  %v14079_v13 = vld [vmem:[#allocation12 + $0x374] ss:$8 sps:$4 sm:$0xff]  }
 0x644   :  { %10992 = vmatprep.subr.bf16.mxu0 %v14052_v33  ;;  %v14077_v33 = vld [vmem:[#allocation12 + $0x370] ss:$8 sps:$4 sm:$0xff]  }
 0x647   :  { %10993 = vmatpush1.bf16.msra.mxu0 %v14050_v60  ;;  %v14083_v60 = vld [vmem:[#allocation12 + $0x390] ss:$8 sps:$4 sm:$0xff]  }
 0x648   :  { %10994 = vmatprep.subr.bf16.mxu0 %v14055_v40  ;;  %v14088_v40 = vld [vmem:[#allocation12 + $0x3a4] ss:$8 sps:$4 sm:$0xff]  }
 0x64b   :  { %10995 = vmatpush1.bf16.msra.mxu0 %v14053_v42  ;;  %v14089_v42 = vld [vmem:[#allocation12 + $0x3b0] ss:$8 sps:$4 sm:$0xff]  }
 0x64c   :  { %11017 = vmatprep.subr.bf16.mxu0 %v14058_v21  ;;  %v14092_v21 = vld [vmem:[#allocation12 + $0x3c0] ss:$8 sps:$4 sm:$0xff]  }
 0x64e   :  { %10997 = vmatmul.mubr.bf16.vlgmr.msra.gmra.mrb[24].mxu0 %v8854_v37  ;;  %v14098_v37 = vld [vmem:[#allocation12 + $0x3e0] ss:$8 sps:$4 sm:$0xff]  }
 0x64f   :  { %11006 = vmatprep.mubr.bf16.mxu0 %v8873_v22  ;;  %11018 = vmatpush1.bf16.msra.mxu0 %v14056_v59  ;;  %v14095_v59 = vld [vmem:[#allocation12 + $0x3d0] ss:$8 sps:$4 sm:$0xff]  }
 0x650   :  { %11019 = vmatprep.subr.bf16.mxu0 %v14061_v62  ;;  %v14103_v62 = vld [vmem:[#allocation12 + $0x3f4] ss:$8 sps:$4 sm:$0xff]   ;;  %v14101_v22 = vld [vmem:[#allocation12 + $0x3f0] ss:$8 sps:$4 sm:$0xff]  }
 0x653   :  { %11020 = vmatpush1.bf16.msra.mxu0 %v14059_v57  ;;  %v14106_v57 = vld [vmem:[#allocation12 + $0x404] ss:$8 sps:$4 sm:$0xff]  }
 0x654   :  { %11021 = vmatprep.subr.bf16.mxu0 %v14064_v15  ;;  %v14104_v15 = vld [vmem:[#allocation12 + $0x400] ss:$8 sps:$4 sm:$0xff]  }
 0x656   :  { %11007 = vmatmul.mubr.bf16.gmra.mrb[28].mxu0 %v8872_v8  ;;  %v14107_v8 = vld [vmem:[#allocation12 + $0x410] ss:$8 sps:$4 sm:$0xff]  }
 0x657   :  { %11022 = vmatpush1.bf16.msra.mxu0 %v14062_v20  ;;  %11049 = vmatprep.mubr.bf16.mxu0 %v8895_v5  ;;  %v14080_v5 = vld [vmem:[#allocation12 + $0x380] ss:$8 sps:$4 sm:$0xff]   ;;  %v14109_v20 = vld [vmem:[#allocation12 + $0x414] ss:$8 sps:$4 sm:$0xff]  }
 0x658   :  { %11023 = vmatprep.subr.bf16.mxu0 %v14067_v43  ;;  %v14112_v43 = vld [vmem:[#allocation12 + $0x424] ss:$8 sps:$4 sm:$0xff]  }
 0x65b   :  { %11024 = vmatpush1.bf16.msra.mxu0 %v14065_v52  ;;  %v14110_v52 = vld [vmem:[#allocation12 + $0x420] ss:$8 sps:$4 sm:$0xff]  }
 0x65c   :  { %11025 = vmatprep.subr.bf16.mxu0 %v14070_v39  ;;  %v14115_v39 = vld [vmem:[#allocation12 + $0x434] ss:$8 sps:$4 sm:$0xff]  }
 0x65f   :  { %11026 = vmatpush1.bf16.msra.mxu0 %v14068_v24  ;;  %v14119_v24 = vld [vmem:[#allocation12 + $0x450] ss:$8 sps:$4 sm:$0xff]  }
 0x660   :  { %11027 = vmatprep.subr.bf16.mxu0 %v14073_v1  ;;  %v14124_v1 = vld [vmem:[#allocation12 + $0x464] ss:$8 sps:$4 sm:$0xff]  }
 0x663   :  { %11028 = vmatpush1.bf16.msra.mxu0 %v14071_v0  ;;  %v14122_v0 = vld [vmem:[#allocation12 + $0x460] ss:$8 sps:$4 sm:$0xff]  }
 0x664   :  { %11029 = vmatprep.subr.bf16.mxu0 %v14076_v45  ;;  %v14133_v45 = vld [vmem:[#allocation12 + $0x494] ss:$8 sps:$4 sm:$0xff]  }
 0x667   :  { %11030 = vmatpush1.bf16.msra.mxu0 %v14074_v6  ;;  %v14131_v6 = vld [vmem:[#allocation12 + $0x490] ss:$8 sps:$4 sm:$0xff]  }
 0x668   :  { %11031 = vmatprep.subr.bf16.mxu0 %v14079_v13  ;;  %v14136_v13 = vld [vmem:[#allocation12 + $0x4a4] ss:$8 sps:$4 sm:$0xff]  }
 0x66b   :  { %11032 = vmatpush1.bf16.msra.mxu0 %v14077_v33  ;;  %v14134_v33 = vld [vmem:[#allocation12 + $0x4a0] ss:$8 sps:$4 sm:$0xff]  }
 0x66c   :  { %11033 = vmatprep.subr.bf16.mxu0 %v14082_v3  ;;  %v14139_v3 = vld [vmem:[#allocation12 + $0x4b4] ss:$8 sps:$4 sm:$0xff]  }
 0x66f   :  { %11034 = vmatpush1.bf16.msra.mxu0 %v14080_v5  ;;  %v14137_v5 = vld [vmem:[#allocation12 + $0x4b0] ss:$8 sps:$4 sm:$0xff]  }
 0x670   :  { %11035 = vmatprep.subr.bf16.mxu0 %v14085_v4  ;;  %v14142_v4 = vld [vmem:[#allocation12 + $0x4c4] ss:$8 sps:$4 sm:$0xff]  }
 0x673   :  { %11036 = vmatpush1.bf16.msra.mxu0 %v14083_v60  ;;  %v14140_v60 = vld [vmem:[#allocation12 + $0x4c0] ss:$8 sps:$4 sm:$0xff]  }
 0x674   :  { %11037 = vmatprep.subr.bf16.mxu0 %v14088_v40  ;;  %v14145_v40 = vld [vmem:[#allocation12 + $0x4d4] ss:$8 sps:$4 sm:$0xff]  }
 0x677   :  { %11038 = vmatpush1.bf16.msra.mxu0 %v14086_v44  ;;  %v14143_v44 = vld [vmem:[#allocation12 + $0x4d0] ss:$8 sps:$4 sm:$0xff]  }
 0x678   :  { %11039 = vmatprep.subr.bf16.mxu0 %v14091_v2  ;;  %v14148_v2 = vld [vmem:[#allocation12 + $0x4e4] ss:$8 sps:$4 sm:$0xff]  }
 0x67b   :  { %11040 = vmatpush1.bf16.msra.mxu0 %v14089_v42  ;;  %v14146_v42 = vld [vmem:[#allocation12 + $0x4e0] ss:$8 sps:$4 sm:$0xff]  }
 0x67c   :  { %11041 = vmatprep.subr.bf16.mxu0 %v14094_v41  ;;  %v14151_v41 = vld [vmem:[#allocation12 + $0x4f4] ss:$8 sps:$4 sm:$0xff]  }
 0x67f   :  { %11042 = vmatpush1.bf16.msra.mxu0 %v14092_v21  ;;  %v14149_v21 = vld [vmem:[#allocation12 + $0x4f0] ss:$8 sps:$4 sm:$0xff]  }
 0x680   :  { %11043 = vmatprep.subr.bf16.mxu0 %v14097_v16  ;;  %v14154_v16 = vld [vmem:[#allocation12 + $0x504] ss:$8 sps:$4 sm:$0xff]  }
 0x683   :  { %11044 = vmatpush1.bf16.msra.mxu0 %v14095_v59  ;;  %v14152_v59 = vld [vmem:[#allocation12 + $0x500] ss:$8 sps:$4 sm:$0xff]  }
 0x684   :  { %11045 = vmatprep.subr.bf16.mxu0 %v14100_v54  ;;  %v14157_v54 = vld [vmem:[#allocation12 + $0x514] ss:$8 sps:$4 sm:$0xff]  }
 0x687   :  { %11046 = vmatpush1.bf16.msra.mxu0 %v14098_v37  ;;  %v14155_v37 = vld [vmem:[#allocation12 + $0x510] ss:$8 sps:$4 sm:$0xff]  }
 0x688   :  { %11047 = vmatprep.subr.bf16.mxu0 %v14103_v62  ;;  %v14160_v62 = vld [vmem:[#allocation12 + $0x524] ss:$8 sps:$4 sm:$0xff]  }
 0x68b   :  { %11048 = vmatpush1.bf16.msra.mxu0 %v14101_v22  ;;  %v14158_v22 = vld [vmem:[#allocation12 + $0x520] ss:$8 sps:$4 sm:$0xff]  }
 0x68c   :  { %11070 = vmatprep.subr.bf16.mxu0 %v14106_v57  ;;  %v14163_v57 = vld [vmem:[#allocation12 + $0x534] ss:$8 sps:$4 sm:$0xff]  }
 0x68e   :  { %11050 = vmatmul.mubr.bf16.vlgmr.msra.gmra.mrb[24].mxu0 %v8894_v50  ;;  %v14116_v50 = vld [vmem:[#allocation12 + $0x440] ss:$8 sps:$4 sm:$0xff]  }
 0x68f   :  { %11059 = vmatprep.mubr.bf16.mxu0 %v8913_v17  ;;  %11071 = vmatpush1.bf16.msra.mxu0 %v14104_v15  ;;  %v14121_v17 = vld [vmem:[#allocation12 + $0x454] ss:$8 sps:$4 sm:$0xff]   ;;  %v14167_v15 = vld [vmem:[#allocation12 + $0x550] ss:$8 sps:$4 sm:$0xff]  }
 0x690   :  { %11072 = vmatprep.subr.bf16.mxu0 %v14109_v20  ;;  %v14172_v20 = vld [vmem:[#allocation12 + $0x564] ss:$8 sps:$4 sm:$0xff]  }
 0x693   :  { %11073 = vmatpush1.bf16.msra.mxu0 %v14107_v8  ;;  %v14170_v8 = vld [vmem:[#allocation12 + $0x560] ss:$8 sps:$4 sm:$0xff]  }
 0x694   :  { %11074 = vmatprep.subr.bf16.mxu0 %v14112_v43  ;;  %v14181_v43 = vld [vmem:[#allocation12 + $0x594] ss:$8 sps:$4 sm:$0xff]  }
 0x696   :  { %11060 = vmatmul.mubr.bf16.gmra.mrb[28].mxu0 %v8912_v36  ;;  %v14130_v36 = vld [vmem:[#allocation12 + $0x484] ss:$8 sps:$4 sm:$0xff]  }
 0x697   :  { %11075 = vmatpush1.bf16.msra.mxu0 %v14110_v52  ;;  %11102 = vmatprep.mubr.bf16.mxu0 %v8935_v49  ;;  %v14128_v49 = vld [vmem:[#allocation12 + $0x480] ss:$8 sps:$4 sm:$0xff]   ;;  %v14179_v52 = vld [vmem:[#allocation12 + $0x590] ss:$8 sps:$4 sm:$0xff]  }
 0x698   :  { %11076 = vmatprep.subr.bf16.mxu0 %v14115_v39  ;;  %v14184_v39 = vld [vmem:[#allocation12 + $0x5a4] ss:$8 sps:$4 sm:$0xff]  }
 0x69b   :  { %11077 = vmatpush1.bf16.msra.mxu0 %v14113_v11  ;;  %v14182_v11 = vld [vmem:[#allocation12 + $0x5a0] ss:$8 sps:$4 sm:$0xff]  }
 0x69c   :  { %11078 = vmatprep.subr.bf16.mxu0 %v14118_v14  ;;  %v14187_v14 = vld [vmem:[#allocation12 + $0x5b4] ss:$8 sps:$4 sm:$0xff]  }
 0x69f   :  { %11079 = vmatpush1.bf16.msra.mxu0 %v14116_v50  ;;  %v14185_v50 = vld [vmem:[#allocation12 + $0x5b0] ss:$8 sps:$4 sm:$0xff]  }
 0x6a0   :  { %11080 = vmatprep.subr.bf16.mxu0 %v14121_v17  ;;  %v14190_v17 = vld [vmem:[#allocation12 + $0x5c4] ss:$8 sps:$4 sm:$0xff]  }
 0x6a3   :  { %11081 = vmatpush1.bf16.msra.mxu0 %v14119_v24  ;;  %v14188_v24 = vld [vmem:[#allocation12 + $0x5c0] ss:$8 sps:$4 sm:$0xff]  }
 0x6a4   :  { %11082 = vmatprep.subr.bf16.mxu0 %v14124_v1  ;;  %v14193_v1 = vld [vmem:[#allocation12 + $0x5d4] ss:$8 sps:$4 sm:$0xff]  }
 0x6a7   :  { %11083 = vmatpush1.bf16.msra.mxu0 %v14122_v0  ;;  %v14191_v0 = vld [vmem:[#allocation12 + $0x5d0] ss:$8 sps:$4 sm:$0xff]  }
 0x6a8   :  { %11084 = vmatprep.subr.bf16.mxu0 %v14127_v38  ;;  %v14196_v38 = vld [vmem:[#allocation12 + $0x5e4] ss:$8 sps:$4 sm:$0xff]  }
 0x6ab   :  { %11085 = vmatpush1.bf16.msra.mxu0 %v14125_v35  ;;  %v14194_v35 = vld [vmem:[#allocation12 + $0x5e0] ss:$8 sps:$4 sm:$0xff]  }
 0x6ac   :  { %11086 = vmatprep.subr.bf16.mxu0 %v14130_v36  ;;  %v14199_v36 = vld [vmem:[#allocation12 + $0x5f4] ss:$8 sps:$4 sm:$0xff]  }
 0x6af   :  { %11087 = vmatpush1.bf16.msra.mxu0 %v14128_v49  ;;  %v14197_v49 = vld [vmem:[#allocation12 + $0x5f0] ss:$8 sps:$4 sm:$0xff]  }
 0x6b0   :  { %11088 = vmatprep.subr.bf16.mxu0 %v14133_v45  ;;  %v14202_v45 = vld [vmem:[#allocation12 + $0x604] ss:$8 sps:$4 sm:$0xff]  }
 0x6b3   :  { %11089 = vmatpush1.bf16.msra.mxu0 %v14131_v6  ;;  %v12446_v6 = vld.sshfl [vmem:[#allocation3 + $0x28] sm:$0xf pattern:$0x76325410] }
 0x6b4   :  { %11090 = vmatprep.subr.bf16.mxu0 %v14136_v13  ;;  %v14200_v13 = vld [vmem:[#allocation12 + $0x600] ss:$8 sps:$4 sm:$0xff]  }
 0x6b7   :  { %11091 = vmatpush1.bf16.msra.mxu0 %v14134_v33  ;;  %v12443_v33 = vld.sshfl [vmem:[#allocation3 + $0x10] sm:$0xf pattern:$0x76325410] }
 0x6b8   :  { %11092 = vmatprep.subr.bf16.mxu0 %v14139_v3  ;;  %v14205_v3 = vld [vmem:[#allocation12 + $0x614] ss:$8 sps:$4 sm:$0xff]  }
 0x6bb   :  { %11093 = vmatpush1.bf16.msra.mxu0 %v14137_v5  ;;  %v12444_v5 = vld.sshfl [vmem:[#allocation3 + $0x18] sm:$0xf pattern:$0x76325410] }
 0x6bc   :  { %11094 = vmatprep.subr.bf16.mxu0 %v14142_v4  ;;  %v8999_v4 = vcombine.low %v15726_v31, %v12446_v6 }
 0x6bf   :  { %11095 = vmatpush1.bf16.msra.mxu0 %v14140_v60  ;;  %v14203_v60 = vld [vmem:[#allocation12 + $0x610] ss:$8 sps:$4 sm:$0xff]  }
 0x6c0   :  { %11096 = vmatprep.subr.bf16.mxu0 %v14145_v40  ;;  %v8998_v40 = vcombine.low %v12443_v33, %v12444_v5  ;;  %v12447_v5 = vld.sshfl [vmem:[#allocation3 + $0x40] sm:$0xf pattern:$0x76325410] }
 0x6c2   :  { %v15959_v31 = vrot.slane %v8998_v40, %v14808_v48 }
 0x6c3   :  { %11097 = vmatpush1.bf16.msra.mxu0 %v14143_v44  ;;  %v14208_v44 = vld [vmem:[#allocation12 + $0x624] ss:$8 sps:$4 sm:$0xff]  }
 0x6c4   :  { %11098 = vmatprep.subr.bf16.mxu0 %v14148_v2  ;;  %v15956_v2 = vrot.slane %v8999_v4, %v14808_v48  ;;  %v14247_v4 = vld [vmem:[#allocation12 + $0x6f4] ss:$8 sps:$4 sm:$0xff]  }
 0x6c6   :  { %v9015_v9 = vcombine.high %v15959_v31, %v15956_v2 }
 0x6c7   :  { %11099 = vmatpush1.bf16.msra.mxu0 %v14146_v42  ;;  %v14206_v42 = vld [vmem:[#allocation12 + $0x620] ss:$8 sps:$4 sm:$0xff]  }
 0x6c8   :  { %11100 = vmatprep.subr.bf16.mxu0 %v14151_v41  ;;  %v14212_v41 = vld [vmem:[#allocation12 + $0x640] ss:$8 sps:$4 sm:$0xff]  }
 0x6cb   :  { %11101 = vmatpush1.bf16.msra.mxu0 %v14149_v21  ;;  %v14217_v21 = vld [vmem:[#allocation12 + $0x654] ss:$8 sps:$4 sm:$0xff]  }
 0x6cc   :  { %11123 = vmatprep.subr.bf16.mxu0 %v14154_v16  ;;  %v14215_v16 = vld [vmem:[#allocation12 + $0x650] ss:$8 sps:$4 sm:$0xff]  }
 0x6ce   :  { %11103 = vmatmul.mubr.bf16.vlgmr.msra.gmra.mrb[24].mxu0 %v8934_v63  ;;  %v14164_v63 = vld [vmem:[#allocation12 + $0x540] ss:$8 sps:$4 sm:$0xff]  }
 0x6cf   :  { %11112 = vmatprep.mubr.bf16.mxu0 %v8953_v34  ;;  %11124 = vmatpush1.bf16.msra.mxu0 %v14152_v59  ;;  %v14169_v34 = vld [vmem:[#allocation12 + $0x554] ss:$8 sps:$4 sm:$0xff]   ;;  %v14220_v59 = vld [vmem:[#allocation12 + $0x664] ss:$8 sps:$4 sm:$0xff]  }
 0x6d0   :  { %11125 = vmatprep.subr.bf16.mxu0 %v14157_v54  ;;  %v14218_v54 = vld [vmem:[#allocation12 + $0x660] ss:$8 sps:$4 sm:$0xff]  }
 0x6d3   :  { %11126 = vmatpush1.bf16.msra.mxu0 %v14155_v37  ;;  %v14223_v37 = vld [vmem:[#allocation12 + $0x674] ss:$8 sps:$4 sm:$0xff]  }
 0x6d4   :  { %11127 = vmatprep.subr.bf16.mxu0 %v14160_v62  ;;  %v14229_v62 = vld [vmem:[#allocation12 + $0x694] ss:$8 sps:$4 sm:$0xff]  }
 0x6d6   :  { %11113 = vmatmul.mubr.bf16.gmra.mrb[28].mxu0 %v8952_v27  ;;  %v14178_v27 = vld [vmem:[#allocation12 + $0x584] ss:$8 sps:$4 sm:$0xff]  }
 0x6d7   :  { %11128 = vmatpush1.bf16.msra.mxu0 %v14158_v22  ;;  %11155 = vmatprep.mubr.bf16.mxu0 %v8975_v51  ;;  %v14176_v51 = vld [vmem:[#allocation12 + $0x580] ss:$8 sps:$4 sm:$0xff]   ;;  %v14227_v22 = vld [vmem:[#allocation12 + $0x690] ss:$8 sps:$4 sm:$0xff]  }
 0x6d8   :  { %11129 = vmatprep.subr.bf16.mxu0 %v14163_v57  ;;  %v14232_v57 = vld [vmem:[#allocation12 + $0x6a4] ss:$8 sps:$4 sm:$0xff]  }
 0x6db   :  { %11130 = vmatpush1.bf16.msra.mxu0 %v14161_v26  ;;  %v14230_v26 = vld [vmem:[#allocation12 + $0x6a0] ss:$8 sps:$4 sm:$0xff]  }
 0x6dc   :  { %11131 = vmatprep.subr.bf16.mxu0 %v14166_v58  ;;  %v14235_v58 = vld [vmem:[#allocation12 + $0x6b4] ss:$8 sps:$4 sm:$0xff]  }
 0x6df   :  { %11132 = vmatpush1.bf16.msra.mxu0 %v14164_v63  ;;  %v14233_v63 = vld [vmem:[#allocation12 + $0x6b0] ss:$8 sps:$4 sm:$0xff]  }
 0x6e0   :  { %11133 = vmatprep.subr.bf16.mxu0 %v14169_v34  ;;  %v12454_v34 = vld.sshfl [vmem:[#allocation3 + $0x28] sm:$0x5f pattern:$0x76325410] }
 0x6e3   :  { %11134 = vmatpush1.bf16.msra.mxu0 %v14167_v15  ;;  %v14238_v15 = vld [vmem:[#allocation12 + $0x6c4] ss:$8 sps:$4 sm:$0xff]  }
 0x6e4   :  { %11135 = vmatprep.subr.bf16.mxu0 %v14172_v20  ;;  %v12451_v20 = vld.sshfl [vmem:[#allocation3 + $0x10] sm:$0x5f pattern:$0x76325410] }
 0x6e7   :  { %11136 = vmatpush1.bf16.msra.mxu0 %v14170_v8  ;;  %v12452_v8 = vld.sshfl [vmem:[#allocation3 + $0x18] sm:$0x5f pattern:$0x76325410] }
 0x6e8   :  { %11137 = vmatprep.subr.bf16.mxu0 %v14175_v18  ;;  %v8577_v18 = vshrl.u32 %v12454_v34, 16  ;;  %v8485_v6 = vcombine.high %v12452_v8, %v12452_v8 }
 0x6eb   :  { %11138 = vmatpush1.bf16.msra.mxu0 %v14173_v19  ;;  %v8580_v19 = vshll.u32 %v12454_v34, 16 }
 0x6ec   :  { %11139 = vmatprep.subr.bf16.mxu0 %v14178_v27  ;;  %v14236_v27 = vld [vmem:[#allocation12 + $0x6c0] ss:$8 sps:$4 sm:$0xff]  }
 0x6ef   :  { %11140 = vmatpush1.bf16.msra.mxu0 %v14176_v51  ;;  %v14241_v51 = vld [vmem:[#allocation12 + $0x6d4] ss:$8 sps:$4 sm:$0xff]  }
 0x6f0   :  { %11141 = vmatprep.subr.bf16.mxu0 %v14181_v43  ;;  %v8535_v43 = vshrl.u32 %v12451_v20, 16 }
 0x6f3   :  { %11142 = vmatpush1.bf16.msra.mxu0 %v14179_v52  ;;  %v8538_v52 = vshll.u32 %v12451_v20, 16 }
 0x6f4   :  { %11143 = vmatprep.subr.bf16.mxu0 %v14184_v39  ;;  %v8549_v39 = vshrl.u32 %v12452_v8, 16 }
 0x6f7   :  { %11144 = vmatpush1.bf16.msra.mxu0 %v14182_v11  ;;  %v8552_v11 = vshll.u32 %v12452_v8, 16  ;;  %v14256_v8 = vld [vmem:[#allocation12 + $0x724] ss:$8 sps:$4 sm:$0xff]  }
 0x6f8   :  { %11145 = vmatprep.subr.bf16.mxu0 %v14187_v14  ;;  %v8501_v14 = vcombine.high %v12454_v34, %v12454_v34 }
 0x6fa   :  { %v8586_v33 = vshll.u32 %v8501_v14, 16  ;;  %v14268_v14 = vld [vmem:[#allocation12 + $0x764] ss:$8 sps:$4 sm:$0xff]  }
 0x6fb   :  { %11146 = vmatpush1.bf16.msra.mxu0 %v14185_v50  ;;  %v8579_v50 = vrot.slane %v8577_v18, 6 }
 0x6fc   :  { %11147 = vmatprep.subr.bf16.mxu0 %v14190_v17  ;;  %v8582_v17 = vrot.slane %v8580_v19, 7 }
 0x6ff   :  { %11148 = vmatpush1.bf16.msra.mxu0 %v14188_v24  ;;  %v14239_v24 = vld [vmem:[#allocation12 + $0x6d0] ss:$8 sps:$4 sm:$0xff]  }
 0x700   :  { %11149 = vmatprep.subr.bf16.mxu0 %v14193_v1  ;;  %v14244_v1 = vld [vmem:[#allocation12 + $0x6e4] ss:$8 sps:$4 sm:$0xff]  }
 0x703   :  { %11150 = vmatpush1.bf16.msra.mxu0 %v14191_v0  ;;  %v8537_v0 = vrot.slane %v8535_v43, 6  ;;  %v14262_v43 = vld [vmem:[#allocation12 + $0x744] ss:$8 sps:$4 sm:$0xff]  }
 0x704   :  { %11151 = vmatprep.subr.bf16.mxu0 %v14196_v38  ;;  %v8540_v38 = vrot.slane %v8538_v52, 7  ;;  %v14260_v52 = vld [vmem:[#allocation12 + $0x740] ss:$8 sps:$4 sm:$0xff]  }
 0x706   :  { %v8541_v40 = vor.u32 %v8540_v38, %v8537_v0  ;;  %v14272_v0 = vld [vmem:[#allocation12 + $0x780] ss:$8 sps:$4 sm:$0xff]   ;;  %v14277_v38 = vld [vmem:[#allocation12 + $0x794] ss:$8 sps:$4 sm:$0xff]  }
 0x707   :  { %11152 = vmatpush1.bf16.msra.mxu0 %v14194_v35  ;;  %v8551_v35 = vrot.slane %v8549_v39, 6  ;;  %v14265_v39 = vld [vmem:[#allocation12 + $0x754] ss:$8 sps:$4 sm:$0xff]  }
 0x708   :  { %11153 = vmatprep.subr.bf16.mxu0 %v14199_v36  ;;  %v8554_v36 = vrot.slane %v8552_v11, 7  ;;  %v14263_v11 = vld [vmem:[#allocation12 + $0x750] ss:$8 sps:$4 sm:$0xff]  }
 0x70b   :  { %11154 = vmatpush1.bf16.msra.mxu0 %v14197_v49  ;;  %v12450_v49 = vld.sshfl [vmem:[#allocation3 + $0x58] sm:$0xf pattern:$0x76325410] }
 0x70c   :  { %11176 = vmatprep.subr.bf16.mxu0 %v14202_v45  ;;  %v8477_v45 = vcombine.high %v12451_v20, %v12451_v20 }
 0x70e   :  { %11156 = vmatmul.mubr.bf16.vlgmr.msra.gmra.mrb[24].mxu0 %v8974_v23  ;;  %v14209_v23 = vld [vmem:[#allocation12 + $0x630] ss:$8 sps:$4 sm:$0xff]  }
 0x70f   :  { %11165 = vmatprep.mubr.bf16.mxu0 %v8993_v12  ;;  %11177 = vmatpush1.bf16.msra.mxu0 %v14200_v13  ;;  %v14214_v12 = vld [vmem:[#allocation12 + $0x644] ss:$8 sps:$4 sm:$0xff]   ;;  %v8583_v13 = vor.u32 %v8582_v17, %v8579_v50  ;;  %v14266_v50 = vld [vmem:[#allocation12 + $0x760] ss:$8 sps:$4 sm:$0xff]   ;;  %v14271_v17 = vld [vmem:[#allocation12 + $0x774] ss:$8 sps:$4 sm:$0xff]  }
 0x710   :  { %11178 = vmatprep.subr.bf16.mxu0 %v14205_v3  ;;  %v14242_v3 = vld [vmem:[#allocation12 + $0x6e0] ss:$8 sps:$4 sm:$0xff]  }
 0x713   :  { %11179 = vmatpush1.bf16.msra.mxu0 %v14203_v60  ;;  %v12448_v60 = vld.sshfl [vmem:[#allocation3 + $0x48] sm:$0xf pattern:$0x76325410] }
 0x714   :  { %11180 = vmatprep.subr.bf16.mxu0 %v14208_v44  ;;  %v8555_v44 = vor.u32 %v8554_v36, %v8551_v35  ;;  %v14275_v35 = vld [vmem:[#allocation12 + $0x790] ss:$8 sps:$4 sm:$0xff]  }
 0x715   :  { %v12458_v36 = vld.sshfl [vmem:[#allocation3 + $0x58] sm:$0x5f pattern:$0x76325410] }
 0x716   :  { %11166 = vmatmul.mubr.bf16.gmra.mrb[28].mxu0 %v8992_v28  ;;  %v14224_v28 = vld [vmem:[#allocation12 + $0x680] ss:$8 sps:$4 sm:$0xff]  }
 0x717   :  { %11181 = vmatpush1.bf16.msra.mxu0 %v14206_v42  ;;  %11208 = vmatprep.mubr.bf16.mxu0 %v9015_v9  ;;  %v9017_v42 = vcombine.low %v15792_v7, %v12450_v49  ;;  %v8558_v9 = vshll.u32 %v8485_v6, 16  ;;  %v14248_v7 = vld [vmem:[#allocation12 + $0x700] ss:$8 sps:$4 sm:$0xff]   ;;  %v14280_v49 = vld [vmem:[#allocation12 + $0x7a4] ss:$8 sps:$4 sm:$0xff]  }
 0x718   :  { %11182 = vmatprep.subr.bf16.mxu0 %v14211_v56  ;;  %v8544_v56 = vshll.u32 %v8477_v45, 16  ;;  %v12455_v45 = vld.sshfl [vmem:[#allocation3 + $0x40] sm:$0x5f pattern:$0x76325410] }
 0x719   :  { %v12456_v6 = vld.sshfl [vmem:[#allocation3 + $0x48] sm:$0x5f pattern:$0x76325410] }
 0x71b   :  { %11183 = vmatpush1.bf16.msra.mxu0 %v14209_v23  ;;  %v8584_v23 = vrot.slane %v8583_v13, 2  ;;  %v8633_v13 = vshrl.u32 %v12458_v36, 16 }
 0x71c   :  { %11184 = vmatprep.subr.bf16.mxu0 %v14214_v12  ;;  %v8588_v12 = vrot.slane %v8586_v33, 7  ;;  %v8636_v33 = vshll.u32 %v12458_v36, 16 }
 0x71f   :  { %11185 = vmatpush1.bf16.msra.mxu0 %v14212_v41  ;;  %v14245_v41 = vld [vmem:[#allocation12 + $0x6f0] ss:$8 sps:$4 sm:$0xff]  }
 0x720   :  { %11186 = vmatprep.subr.bf16.mxu0 %v14217_v21  ;;  %v9016_v21 = vcombine.low %v12447_v5, %v12448_v60  ;;  %v14283_v5 = vld [vmem:[#allocation12 + $0x7b4] ss:$8 sps:$4 sm:$0xff]   ;;  %v8594_v60 = vshll.u32 %v12455_v45, 16 }
 0x723   :  { %11187 = vmatpush1.bf16.msra.mxu0 %v14215_v16  ;;  %v14250_v16 = vld [vmem:[#allocation12 + $0x704] ss:$8 sps:$4 sm:$0xff]  }
 0x724   :  { %11188 = vmatprep.subr.bf16.mxu0 %v14220_v59  ;;  %v8542_v59 = vrot.slane %v8541_v40, 2  ;;  %v8605_v40 = vshrl.u32 %v12456_v6, 16 }
 0x727   :  { %11189 = vmatpush1.bf16.msra.mxu0 %v14218_v54  ;;  %v8556_v54 = vrot.slane %v8555_v44, 2  ;;  %v8608_v44 = vshll.u32 %v12456_v6, 16 }
 0x728   :  { %11190 = vmatprep.subr.bf16.mxu0 %v14223_v37  ;;  %v9031_v37 = vrot.slane %v9017_v42, %v14808_v48  ;;  %v8533_v42 = vcombine.high %v12458_v36, %v12458_v36 }
 0x72b   :  { %11191 = vmatpush1.bf16.msra.mxu0 %v14221_v47  ;;  %v8546_v47 = vrot.slane %v8544_v56, 7  ;;  %v8635_v56 = vrot.slane %v8633_v13, 6 }
 0x72c   :  { %11192 = vmatprep.subr.bf16.mxu0 %v14226_v55  ;;  %v8560_v55 = vrot.slane %v8558_v9, 7  ;;  %v8638_v9 = vrot.slane %v8636_v33, 7 }
 0x72f   :  { %11193 = vmatpush1.bf16.msra.mxu0 %v14224_v28  ;;  %v8589_v28 = vsel %vm15047_vm5, %v8584_v23, %v8588_v12  ;;  %v14281_v23 = vld [vmem:[#allocation12 + $0x7b0] ss:$8 sps:$4 sm:$0xff]   ;;  %v14286_v12 = vld [vmem:[#allocation12 + $0x7c4] ss:$8 sps:$4 sm:$0xff]  }
 0x730   :  { %11194 = vmatprep.subr.bf16.mxu0 %v14229_v62  ;;  %v9024_v62 = vrot.slane %v9016_v21, %v14808_v48  ;;  %v9039_v34 = vcombine.low %v15806_v53, %v8589_v28  ;;  %v8596_v21 = vrot.slane %v8594_v60, 7  ;;  %v14284_v28 = vld [vmem:[#allocation12 + $0x7c0] ss:$8 sps:$4 sm:$0xff]   ;;  %v14301_v60 = vld [vmem:[#allocation12 + $0x814] ss:$8 sps:$4 sm:$0xff]  }
 0x732   :  { %v9032_v19 = vcombine.low %v9024_v62, %v9031_v37 }
 0x733   :  { %11195 = vmatpush1.bf16.msra.mxu0 %v14227_v22  ;;  %v9014_v22 = vcombine.low %v15959_v31, %v15956_v2  ;;  %v15979_v2 = vrot.slane %v9039_v34, %v14808_v48  ;;  %v14254_v31 = vld [vmem:[#allocation12 + $0x720] ss:$8 sps:$4 sm:$0xff]   ;;  %v14287_v34 = vld [vmem:[#allocation12 + $0x7d0] ss:$8 sps:$4 sm:$0xff]  }
 0x734   :  { %11196 = vmatprep.subr.bf16.mxu0 %v14232_v57  ;;  %v14253_v57 = vld [vmem:[#allocation12 + $0x714] ss:$8 sps:$4 sm:$0xff]  }
 0x737   :  { %11197 = vmatpush1.bf16.msra.mxu0 %v14230_v26  ;;  %v8547_v26 = vsel %vm15047_vm5, %v8542_v59, %v8546_v47  ;;  %v8610_v59 = vrot.slane %v8608_v44, 7  ;;  %v8639_v47 = vor.u32 %v8638_v9, %v8635_v56  ;;  %v14299_v9 = vld [vmem:[#allocation12 + $0x810] ss:$8 sps:$4 sm:$0xff]  }
 0x738   :  { %11198 = vmatprep.subr.bf16.mxu0 %v14235_v58  ;;  %v8561_v58 = vsel %vm15047_vm5, %v8556_v54, %v8560_v55  ;;  %v8509_v54 = vcombine.high %v12455_v45, %v12455_v45  ;;  %v8642_v55 = vshll.u32 %v8533_v42, 16 }
 0x739   :  { %v9038_v20 = vcombine.low %v8547_v26, %v8561_v58  ;;  %v8640_v58 = vrot.slane %v8639_v47, 2  ;;  %v14313_v47 = vld [vmem:[#allocation12 + $0x854] ss:$8 sps:$4 sm:$0xff]  }
 0x73b   :  { %11199 = vmatpush1.bf16.msra.mxu0 %v14233_v63  ;;  %v9033_v63 = vcombine.high %v9024_v62, %v9031_v37  ;;  %v15982_v18 = vrot.slane %v9038_v20, %v14808_v48  ;;  %v8517_v37 = vcombine.high %v12456_v6, %v12456_v6  ;;  %v12462_v20 = vld.sshfl [vmem:[#allocation3 + $0x28] sm:$0x5a pattern:$0x76325410] }
 0x73c   :  { %11200 = vmatprep.subr.bf16.mxu0 %v14238_v15  ;;  %v14251_v15 = vld [vmem:[#allocation12 + $0x710] ss:$8 sps:$4 sm:$0xff]  }
 0x73d   :  { %v9055_v53 = vcombine.high %v15982_v18, %v15979_v2  ;;  %v8614_v26 = vshll.u32 %v8517_v37, 16  ;;  %v14308_v37 = vld [vmem:[#allocation12 + $0x840] ss:$8 sps:$4 sm:$0xff]  }
 0x73f   :  { %11201 = vmatpush1.bf16.msra.mxu0 %v14236_v27  ;;  %v14259_v27 = vld [vmem:[#allocation12 + $0x734] ss:$8 sps:$4 sm:$0xff]  }
 0x740   :  { %11202 = vmatprep.subr.bf16.mxu0 %v14241_v51  ;;  %v14257_v51 = vld [vmem:[#allocation12 + $0x730] ss:$8 sps:$4 sm:$0xff]  }
 0x743   :  { %11203 = vmatpush1.bf16.msra.mxu0 %v14239_v24  ;;  %v14269_v24 = vld [vmem:[#allocation12 + $0x770] ss:$8 sps:$4 sm:$0xff]  }
 0x744   :  { %11204 = vmatprep.subr.bf16.mxu0 %v14244_v1  ;;  %v14274_v1 = vld [vmem:[#allocation12 + $0x784] ss:$8 sps:$4 sm:$0xff]  }
 0x747   :  { %11205 = vmatpush1.bf16.msra.mxu0 %v14242_v3  ;;  %v14278_v3 = vld [vmem:[#allocation12 + $0x7a0] ss:$8 sps:$4 sm:$0xff]  }
 0x748   :  { %11206 = vmatprep.subr.bf16.mxu0 %v14247_v4  ;;  %v8591_v4 = vshrl.u32 %v12455_v45, 16 }
 0x74b   :  { %11207 = vmatpush1.bf16.msra.mxu0 %v14245_v41  ;;  %v8593_v41 = vrot.slane %v8591_v4, 6  ;;  %v9054_v4 = vcombine.low %v15982_v18, %v15979_v2  ;;  %v14302_v18 = vld [vmem:[#allocation12 + $0x820] ss:$8 sps:$4 sm:$0xff]  }
 0x74c   :  { %11229 = vmatprep.subr.bf16.mxu0 %v14250_v16  ;;  %v8607_v16 = vrot.slane %v8605_v40, 6 }
 0x74d   :  { %v8597_v62 = vor.u32 %v8596_v21, %v8593_v41 }
 0x74e   :  { %11209 = vmatmul.mubr.bf16.vlgmr.msra.gmra.mrb[24].mxu0 %v9014_v22  ;;  %v8611_v22 = vor.u32 %v8610_v59, %v8607_v16  ;;  %v14307_v16 = vld [vmem:[#allocation12 + $0x834] ss:$8 sps:$4 sm:$0xff]   ;;  %v14305_v59 = vld [vmem:[#allocation12 + $0x830] ss:$8 sps:$4 sm:$0xff]  }
 0x74f   :  { %11218 = vmatprep.mubr.bf16.mxu0 %v9033_v63  ;;  %11230 = vmatpush1.bf16.msra.mxu0 %v14248_v7  ;;  %v14289_v7 = vld [vmem:[#allocation12 + $0x7d4] ss:$8 sps:$4 sm:$0xff]   ;;  %v8644_v63 = vrot.slane %v8642_v55, 7  ;;  %v14311_v55 = vld [vmem:[#allocation12 + $0x850] ss:$8 sps:$4 sm:$0xff]  }
 0x750   :  { %11231 = vmatprep.subr.bf16.mxu0 %v14253_v57  ;;  %v8600_v57 = vshll.u32 %v8509_v54, 16  ;;  %v14310_v54 = vld [vmem:[#allocation12 + $0x844] ss:$8 sps:$4 sm:$0xff]  }
 0x753   :  { %11232 = vmatpush1.bf16.msra.mxu0 %v14251_v15  ;;  %v12459_v15 = vld.sshfl [vmem:[#allocation3 + $0x10] sm:$0x5a pattern:$0x76325410] }
 0x754   :  { %11233 = vmatprep.subr.bf16.mxu0 %v14256_v8  ;;  %v14292_v8 = vld [vmem:[#allocation12 + $0x7e4] ss:$8 sps:$4 sm:$0xff]   ;;  %v12467_v33 = vrot.slane %v12459_v15, 9 }
 0x756   :  { %11219 = vmatmul.mubr.bf16.gmra.mrb[28].mxu0 %v9032_v19  ;;  %v8612_v19 = vrot.slane %v8611_v22, 2  ;;  %v14317_v22 = vld [vmem:[#allocation12 + $0x870] ss:$8 sps:$4 sm:$0xff]  }
 0x757   :  { %11234 = vmatpush1.bf16.msra.mxu0 %v14254_v31  ;;  %11261 = vmatprep.mubr.bf16.mxu0 %v9055_v53  ;;  %v8598_v31 = vrot.slane %v8597_v62, 2  ;;  %v8602_v53 = vrot.slane %v8600_v57, 7  ;;  %v14319_v62 = vld [vmem:[#allocation12 + $0x874] ss:$8 sps:$4 sm:$0xff]   ;;  %v14322_v57 = vld [vmem:[#allocation12 + $0x884] ss:$8 sps:$4 sm:$0xff]  }
 0x758   :  { %11235 = vmatprep.subr.bf16.mxu0 %v14259_v27  ;;  %v12460_v27 = vld.sshfl [vmem:[#allocation3 + $0x18] sm:$0x5a pattern:$0x76325410] }
 0x75b   :  { %11236 = vmatpush1.bf16.msra.mxu0 %v14257_v51  ;;  %v8616_v51 = vrot.slane %v8614_v26, 7  ;;  %v14320_v26 = vld [vmem:[#allocation12 + $0x880] ss:$8 sps:$4 sm:$0xff]  }
 0x75c   :  { %11237 = vmatprep.subr.bf16.mxu0 %v14262_v43  ;;  %v8645_v43 = vsel %vm15047_vm5, %v8640_v58, %v8644_v63  ;;  %v14325_v58 = vld [vmem:[#allocation12 + $0x894] ss:$8 sps:$4 sm:$0xff]   ;;  %v14323_v63 = vld [vmem:[#allocation12 + $0x890] ss:$8 sps:$4 sm:$0xff]  }
 0x75f   :  { %11238 = vmatpush1.bf16.msra.mxu0 %v14260_v52  ;;  %v8693_v52 = vcombine.high %v12462_v20, %v12462_v20 }
 0x760   :  { %11239 = vmatprep.subr.bf16.mxu0 %v14265_v39  ;;  %v14290_v39 = vld [vmem:[#allocation12 + $0x7e0] ss:$8 sps:$4 sm:$0xff]  }
 0x763   :  { %11240 = vmatpush1.bf16.msra.mxu0 %v14263_v11  ;;  %v14295_v11 = vld [vmem:[#allocation12 + $0x7f4] ss:$8 sps:$4 sm:$0xff]  }
 0x764   :  { %11241 = vmatprep.subr.bf16.mxu0 %v14268_v14  ;;  %v8603_v14 = vsel %vm15047_vm5, %v8598_v31, %v8602_v53  ;;  %v12466_v31 = vld.sshfl [vmem:[#allocation3 + $0x58] sm:$0x5a pattern:$0x76325410] }
 0x765   :  { %v12464_v53 = vld.sshfl [vmem:[#allocation3 + $0x48] sm:$0x5a pattern:$0x76325410] }
 0x767   :  { %11242 = vmatpush1.bf16.msra.mxu0 %v14266_v50  ;;  %v8617_v50 = vsel %vm15047_vm5, %v8612_v19, %v8616_v51  ;;  %v14334_v19 = vld [vmem:[#allocation12 + $0x8c4] ss:$8 sps:$4 sm:$0xff]   ;;  %v8725_v51 = vcombine.high %v12466_v31, %v12466_v31 }
 0x768   :  { %11243 = vmatprep.subr.bf16.mxu0 %v14271_v17  ;;  %v8669_v17 = vcombine.high %v12459_v15, %v12459_v15  ;;  %v9056_v36 = vcombine.low %v8603_v14, %v8617_v50  ;;  %v14326_v15 = vld [vmem:[#allocation12 + $0x8a0] ss:$8 sps:$4 sm:$0xff]   ;;  %v12474_v14 = vrot.slane %v12466_v31, 9 }
 0x769   :  { %v8756_v50 = vrot.slane %v8725_v51, 7 }
 0x76a   :  { %v8728_v45 = vrot.slane %v8669_v17, 7  ;;  %v14335_v17 = vld [vmem:[#allocation12 + $0x8d0] ss:$8 sps:$4 sm:$0xff]  }
 0x76b   :  { %11244 = vmatpush1.bf16.msra.mxu0 %v14269_v24  ;;  %v8677_v24 = vcombine.high %v12460_v27, %v12460_v27 }
 0x76c   :  { %11245 = vmatprep.subr.bf16.mxu0 %v14274_v1  ;;  %v9057_v1 = vcombine.low %v15868_v30, %v8645_v43  ;;  %v9064_v30 = vrot.slane %v9056_v36, %v14808_v48  ;;  %v8729_v40 = vsel %vm14910_vm14, %v12467_v33, %v8728_v45  ;;  %v14332_v43 = vld [vmem:[#allocation12 + $0x8c0] ss:$8 sps:$4 sm:$0xff]   ;;  %v8757_v36 = vsel %vm14910_vm14, %v12474_v14, %v8756_v50  ;;  %v14343_v45 = vld [vmem:[#allocation12 + $0x8f4] ss:$8 sps:$4 sm:$0xff]  }
 0x76d   :  { %v8732_v6 = vrot.slane %v8677_v24, 7  ;;  %v14340_v24 = vld [vmem:[#allocation12 + $0x8e4] ss:$8 sps:$4 sm:$0xff]   ;;  %v9097_v33 = vcombine.low %v15859_v10, %v8757_v36  ;;  %v14345_v10 = vld [vmem:[%s16092_s7] sm:$0xff]  }
 0x76e   :  { %v9071_v13 = vrot.slane %v9057_v1, %v14808_v48 }
 0x76f   :  { %11246 = vmatpush1.bf16.msra.mxu0 %v14272_v0  ;;  %v12470_v0 = vrot.slane %v12462_v20, 9  ;;  %v14331_v20 = vld [vmem:[#allocation12 + $0x8b4] ss:$8 sps:$4 sm:$0xff]  }
 0x770   :  { %11247 = vmatprep.subr.bf16.mxu0 %v14277_v38  ;;  %v8740_v38 = vrot.slane %v8693_v52, 7  ;;  %v9073_v42 = vcombine.high %v9064_v30, %v9071_v13  ;;  %v9072_v21 = vcombine.low %v9064_v30, %v9071_v13  ;;  %v14337_v52 = vld [vmem:[#allocation12 + $0x8d4] ss:$8 sps:$4 sm:$0xff]  }
 0x772   :  { %v8741_v32 = vsel %vm14910_vm14, %v12470_v0, %v8740_v38 }
 0x773   :  { %11248 = vmatpush1.bf16.msra.mxu0 %v14275_v35  ;;  %v14293_v35 = vld [vmem:[#allocation12 + $0x7f0] ss:$8 sps:$4 sm:$0xff]   ;;  %v9079_v56 = vcombine.low %v15789_v46, %v8741_v32 }
 0x774   :  { %11249 = vmatprep.subr.bf16.mxu0 %v14280_v49  ;;  %v14298_v49 = vld [vmem:[#allocation12 + $0x804] ss:$8 sps:$4 sm:$0xff]  }
 0x775   :  { %v16005_v2 = vrot.slane %v9079_v56, %v14808_v48  ;;  %v14349_v56 = vld [vmem:[%s16092_s7 + $0x10] sm:$0xff]  }
 0x777   :  { %11250 = vmatpush1.bf16.msra.mxu0 %v14278_v3  ;;  %v12468_v3 = vrot.slane %v12460_v27, 9  ;;  %v12463_v27 = vld.sshfl [vmem:[#allocation3 + $0x40] sm:$0x5a pattern:$0x76325410] }
 0x778   :  { %11251 = vmatprep.subr.bf16.mxu0 %v14283_v5  ;;  %v14296_v5 = vld [vmem:[#allocation12 + $0x800] ss:$8 sps:$4 sm:$0xff]   ;;  %v12471_v38 = vrot.slane %v12463_v27, 9 }
 0x779   :  { %v8733_v44 = vsel %vm14910_vm14, %v12468_v3, %v8732_v6  ;;  %v14341_v3 = vld [vmem:[#allocation12 + $0x8f0] ss:$8 sps:$4 sm:$0xff]  }
 0x77b   :  { %11252 = vmatpush1.bf16.msra.mxu0 %v14281_v23  ;;  %v9078_v23 = vcombine.low %v8729_v40, %v8733_v44  ;;  %v14347_v44 = vld [vmem:[%s16092_s7 + $0x8] sm:$0xff]  }
 0x77c   :  { %11253 = vmatprep.subr.bf16.mxu0 %v14286_v12  ;;  %v14304_v12 = vld [vmem:[#allocation12 + $0x824] ss:$8 sps:$4 sm:$0xff]  }
 0x77d   :  { %v16008_v41 = vrot.slane %v9078_v23, %v14808_v48  ;;  %v14351_v23 = vld [vmem:[%s16092_s7 + $0x18] sm:$0xff]  }
 0x77f   :  { %11254 = vmatpush1.bf16.msra.mxu0 %v14284_v28  ;;  %v9095_v46 = vcombine.high %v16008_v41, %v16005_v2  ;;  %v14316_v28 = vld [vmem:[#allocation12 + $0x864] ss:$8 sps:$4 sm:$0xff]  }
 0x780   :  { %11255 = vmatprep.subr.bf16.mxu0 %v14289_v7  ;;  %v14314_v7 = vld [vmem:[#allocation12 + $0x860] ss:$8 sps:$4 sm:$0xff]  }
 0x783   :  { %11256 = vmatpush1.bf16.msra.mxu0 %v14287_v34  ;;  %v14328_v34 = vld [vmem:[#allocation12 + $0x8a4] ss:$8 sps:$4 sm:$0xff]  }
 0x784   :  { %11257 = vmatprep.subr.bf16.mxu0 %v14292_v8  ;;  %v14329_v8 = vld [vmem:[#allocation12 + $0x8b0] ss:$8 sps:$4 sm:$0xff]  }
 0x787   :  { %11258 = vmatpush1.bf16.msra.mxu0 %v14290_v39  ;;  %v8701_v39 = vcombine.high %v12463_v27, %v12463_v27 }
 0x788   :  { %11259 = vmatprep.subr.bf16.mxu0 %v14295_v11  ;;  %v8709_v11 = vcombine.high %v12464_v53, %v12464_v53 }
 0x789   :  { %v8744_v1 = vrot.slane %v8701_v39, 7 }
 0x78a   :  { %v8748_v0 = vrot.slane %v8709_v11, 7 }
 0x78b   :  { %11260 = vmatpush1.bf16.msra.mxu0 %v14293_v35  ;;  %v12472_v35 = vrot.slane %v12464_v53, 9  ;;  %v8745_v6 = vsel %vm14910_vm14, %v12471_v38, %v8744_v1 }
 0x78c   :  { %11282 = vmatprep.subr.bf16.mxu0 %v14298_v49  ;;  %v14338_v49 = vld [vmem:[#allocation12 + $0x8e0] ss:$8 sps:$4 sm:$0xff]  }
 0x78d   :  { %v8749_v13 = vsel %vm14910_vm14, %v12472_v35, %v8748_v0 }
 0x78e   :  { %11262 = vmatmul.mubr.bf16.vlgmr.msra.gmra.mrb[24].mxu0 %v9054_v4  ;;  %v9096_v32 = vcombine.low %v8745_v6, %v8749_v13  ;;  %v9094_v4 = vcombine.low %v16008_v41, %v16005_v2  ;;  %v14353_v2 = vld [vmem:[%s16092_s7 + $0x20] sm:$0xff]   ;;  %v14355_v41 = vld [vmem:[%s16092_s7 + $0x28] sm:$0xff]  }
 0x78f   :  { %11271 = vmatprep.mubr.bf16.mxu0 %v9073_v42  ;;  %11283 = vmatpush1.bf16.msra.mxu0 %v14296_v5  ;;  %v9111_v5 = vrot.slane %v9097_v33, %v14808_v48  ;;  %v14348_v42 = vld [vmem:[%s16092_s7 + $0x50] sm:$0xff]  }
 0x790   :  { %11284 = vmatprep.subr.bf16.mxu0 %v14301_v60  ;;  %v9104_v30 = vrot.slane %v9096_v32, %v14808_v48  ;;  %v14346_v48 = vld [vmem:[%s16092_s7 + $0x48] sm:$0xff]  }
 0x792   :  { %v9113_v60 = vcombine.high %v9104_v30, %v9111_v5  ;;  %v9112_v40 = vcombine.low %v9104_v30, %v9111_v5 }
 0x793   :  { %11285 = vmatpush1.bf16.msra.mxu0 %v14299_v9  ;;  %v14350_v9 = vld [vmem:[%s16092_s7 + $0x58] sm:$0xff]  }
 0x794   :  { %11286 = vmatprep.subr.bf16.mxu0 %v14304_v12  ;;  %v14352_v12 = vld [vmem:[%s16092_s7 + $0x60] sm:$0xff]  }
 0x796   :  { %11272 = vmatmul.mubr.bf16.gmra.mrb[28].mxu0 %v9072_v21  ;;  %v14356_v21 = vld [vmem:[%s16092_s7 + $0x70] sm:$0xff]  }
 0x797   :  { %11287 = vmatpush1.bf16.msra.mxu0 %v14302_v18  ;;  %11314 = vmatprep.mubr.bf16.mxu0 %v9095_v46  ;;  %v14354_v18 = vld [vmem:[%s16092_s7 + $0x68] sm:$0xff]   ;;  %v14358_v46 = vld [vmem:[%s16092_s7 + $0x78] sm:$0xff]  }
 0x798   :  { %11288 = vmatprep.subr.bf16.mxu0 %v14307_v16  ;;  %v14357_v16 = vld [vmem:[%s16092_s7 + $0x30] sm:$0xff]  }
 0x79b   :  { %11289 = vmatpush1.bf16.msra.mxu0 %v14305_v59  ;;  %v14359_v59 = vld [vmem:[%s16092_s7 + $0x38] sm:$0xff]   ;;  %s14557_s7 = smov [#allocation16]  }
 0x79c   :  { %11290 = vmatprep.subr.bf16.mxu0 %v14310_v54  ;;  %v9406_v54 = vld [vmem:[#allocation13] sm:$0x3]  ;;  %s11579_s19 = sshll.u32 %s14557_s7, 4  ;;  %s11580_s19 = int_to_ptr.vmem [resolvable:$true] %s11579_s19 }
 0x79d   :  { %s14514_s20 = scalar_lea.vmem %s11580_s19, 32  ;;  %p14519_p1 = scmp.lt.s32.totalorder %s11580_s19, %s11580_s19 }
 0x79e   :  { %p14515_p0 = scmp.ne.s32.totalorder %s11580_s19, %s14514_s20  ;;  %p14520_p2 = scmp.lt.s32.totalorder %s14514_s20, %s14514_s20 }
 0x79f   :  { %11291 = vmatpush1.bf16.msra.mxu0 %v14308_v37  ;;  %v9411_v37 = vrot.slane %v9406_v54, %v16171_v29 }
 0x7a0   :  { %11292 = vmatprep.subr.bf16.mxu0 %v14313_v47  ;;  %v9415_v47 = vrot.slane %v9406_v54, %v16172_v25  ;;  %p14521_p3 = por %p14520_p2, %p14519_p1 }
 0x7a2   :  { %p14522_p4 = pnand %p14521_p3, %p14515_p0 }
 0x7a3   :  { %11293 = vmatpush1.bf16.msra.mxu0 %v14311_v55 }
 0x7a4   :  { %11294 = vmatprep.subr.bf16.mxu0 %v14316_v28 }
 0x7a7   :  { %11295 = vmatpush1.bf16.msra.mxu0 %v14314_v7 }
 0x7a8   :  { %11296 = vmatprep.subr.bf16.mxu0 %v14319_v62 }
 0x7ab   :  { %11297 = vmatpush1.bf16.msra.mxu0 %v14317_v22 }
 0x7ac   :  { %11298 = vmatprep.subr.bf16.mxu0 %v14322_v57 }
 0x7af   :  { %11299 = vmatpush1.bf16.msra.mxu0 %v14320_v26 }
 0x7b0   :  { %11300 = vmatprep.subr.bf16.mxu0 %v14325_v58 }
 0x7b3   :  { %11301 = vmatpush1.bf16.msra.mxu0 %v14323_v63 }
 0x7b4   :  { %11302 = vmatprep.subr.bf16.mxu0 %v14328_v34 }
 0x7b7   :  { %11303 = vmatpush1.bf16.msra.mxu0 %v14326_v15 }
 0x7b8   :  { %11304 = vmatprep.subr.bf16.mxu0 %v14331_v20 }
 0x7bb   :  { %11305 = vmatpush1.bf16.msra.mxu0 %v14329_v8 }
 0x7bc   :  { %11306 = vmatprep.subr.bf16.mxu0 %v14334_v19 }
 0x7bf   :  { %11307 = vmatpush1.bf16.msra.mxu0 %v14332_v43 }
 0x7c0   :  { %11308 = vmatprep.subr.bf16.mxu0 %v14337_v52 }
 0x7c3   :  { %11309 = vmatpush1.bf16.msra.mxu0 %v14335_v17 }
 0x7c4   :  { %11310 = vmatprep.subr.bf16.mxu0 %v14340_v24 }
 0x7c7   :  { %11311 = vmatpush1.bf16.msra.mxu0 %v14338_v49 }
 0x7c8   :  { %11312 = vmatprep.subr.bf16.mxu0 %v14343_v45 }
 0x7cb   :  { %11313 = vmatpush1.bf16.msra.mxu0 %v14341_v3 }
 0x7cc   :  { %12792 = vmatprep.subr.bf16.mxu0 %v14344_v61 }
 0x7ce   :  { %11315 = vmatmul.mubr.bf16.vlgmr.msra.gmra.mrb[24].mxu0 %v9094_v4 }
 0x7cf   :  { %11324 = vmatprep.mubr.bf16.mxu0 %v9113_v60  ;;  %12793 = vmatpush3.bf16.msra.mxu0 %v14345_v10 }
 0x7d0   :  { %12794 = vmatprep.subr.bf16.mxu0 %v14346_v48 }
 0x7d3   :  { %12795 = vmatpush3.bf16.msra.mxu0 %v14347_v44 }
 0x7d4   :  { %12796 = vmatprep.subr.bf16.mxu0 %v14348_v42 }
 0x7d6   :  { %11325 = vmatmul.mubr.bf16.gmra.mrb[28].mxu0 %v9112_v40 }
 0x7d7   :  { %12797 = vmatpush3.bf16.msra.mxu0 %v14349_v56 }
 0x7d8   :  { %12798 = vmatprep.subr.bf16.mxu0 %v14350_v9 }
 0x7db   :  { %12799 = vmatpush3.bf16.msra.mxu0 %v14351_v23 }
 0x7dc   :  { %12800 = vmatprep.subr.bf16.mxu0 %v14352_v12 }
 0x7df   :  { %12801 = vmatpush3.bf16.msra.mxu0 %v14353_v2 }
 0x7e0   :  { %12802 = vmatprep.subr.bf16.mxu0 %v14354_v18 }
 0x7e3   :  { %12803 = vmatpush3.bf16.msra.mxu0 %v14355_v41 }
 0x7e4   :  { %12804 = vmatprep.subr.bf16.mxu0 %v14356_v21 }
 0x7e7   :  { %12805 = vmatpush3.bf16.msra.mxu0 %v14357_v16 }
 0x7e8   :  { %12806 = vmatprep.subr.bf16.mxu0 %v14358_v46 }
 0x7eb   :  { %12807 = vmatpush3.bf16.msra.mxu0 %v14359_v59 }
 0x8a1   :  { %v11316_v55 = vpop.f32.mrb[24].mxu0 }
 0x8a2   :  { %v12830_v28 = vadd.f32 %v11316_v55, %v9411_v37  ;;  %v11318_v7 = vpop.f32.mrb[25].mxu0 }
 0x8a3   :  { %v12831_v62 = vadd.f32 %v11318_v7, %v9415_v47  ;;  %v11320_v22 = vpop.f32.mrb[26].mxu0 }
 0x8a4   :  { %v12832_v57 = vadd.f32 %v11320_v22, %v9411_v37  ;;  %v11322_v26 = vpop.f32.mrb[27].mxu0  ;;  %v11335_v63 = vmax.f32 %v12830_v28, 0.0 }
 0x8a5   :  { %v12833_v58 = vadd.f32 %v11322_v26, %v9415_v47  ;;  %v11336_v15 = vmax.f32 %v12831_v62, 0.0 }
 0x8a6   :  { %v11337_v34 = vmax.f32 %v12832_v57, 0.0  ;;  %v12763_v57 = vld [vmem:[#allocation15] ss:$0 sm:$0xff] }
 0x8a7   :  { %v11338_v20 = vmax.f32 %v12833_v58, 0.0 }
 0x8a8   :  { %v11343_v8 = vadd.f32 %v11337_v34, %v11335_v63 }
 0x8a9   :  { %v11350_v31 = vadd.f32 %v11338_v20, %v11336_v15  ;;  %v11326_v19 = vpop.f32.mrb[28].mxu0 }
 0x8aa   :  { %v11344_v27 = vrot.slane %v11343_v8, 4  ;;  %v12834_v53 = vadd.f32 %v11326_v19, %v9411_v37  ;;  %v11328_v29 = vpop.f32.mrb[29].mxu0 }
 0x8ab   :  { %v11351_v51 = vrot.slane %v11350_v31, 4  ;;  %v12835_v25 = vadd.f32 %v11328_v29, %v9415_v47  ;;  %v11330_v43 = vpop.f32.mrb[30].mxu0 }
 0x8ac   :  { %v11345_v52 = vadd.f32 %v11344_v27, %v11343_v8  ;;  %v12836_v39 = vadd.f32 %v11330_v43, %v9411_v37  ;;  %v11332_v11 = vpop.f32.mrb[31].mxu0  ;;  %v11339_v24 = vmax.f32 %v12834_v53, 0.0 }
 0x8ad   :  { %v11352_v14 = vadd.f32 %v11351_v51, %v11350_v31  ;;  %v12837_v50 = vadd.f32 %v11332_v11, %v9415_v47  ;;  %v11340_v38 = vmax.f32 %v12835_v25, 0.0 }
 0x8ae   :  { %v11346_v17 = vrot.slane %v11345_v52, 2  ;;  %v11341_v1 = vmax.f32 %v12836_v39, 0.0 }
 0x8af   :  { %v11353_v0 = vrot.slane %v11352_v14, 2  ;;  %v11342_v35 = vmax.f32 %v12837_v50, 0.0 }
 0x8b0   :  { %v11347_v36 = vadd.f32 %v11346_v17, %v11345_v52  ;;  %v11357_v49 = vadd.f32 %v11341_v1, %v11339_v24 }
 0x8b1   :  { %v11354_v45 = vadd.f32 %v11353_v0, %v11352_v14  ;;  %v11364_v6 = vadd.f32 %v11342_v35, %v11340_v38 }
 0x8b2   :  { %v11348_v13 = vrot.slane %v11347_v36, 1  ;;  %v11358_v33 = vrot.slane %v11357_v49, 4 }
 0x8b3   :  { %v11355_v3 = vrot.slane %v11354_v45, 1  ;;  %v11365_v32 = vrot.slane %v11364_v6, 4 }
 0x8b4   :  { %v11359_v5 = vadd.f32 %v11358_v33, %v11357_v49  ;;  %v11349_v4 = vadd.f32 %v11348_v13, %v11347_v36 }
 0x8b5   :  { %v11366_v30 = vadd.f32 %v11365_v32, %v11364_v6  ;;  %v11356_v40 = vadd.f32 %v11355_v3, %v11354_v45 }
 0x8b6   :  { %v11360_v60 = vrot.slane %v11359_v5, 2  ;;  %v11372_v44 = vmul.f32 0.0625, %v11349_v4 }
 0x8b7   :  { %v11367_v61 = vrot.slane %v11366_v30, 2  ;;  %v11373_v56 = vmul.f32 0.0625, %v11356_v40 }
 0x8b8   :  { %v11361_v10 = vadd.f32 %v11360_v60, %v11359_v5  ;;  %v11376_v2 = vpack.c.bf16 %v11372_v44, %v11372_v44 }
 0x8b9   :  { %v11368_v48 = vadd.f32 %v11367_v61, %v11366_v30  ;;  %v11377_v21 = vpack.c.bf16 %v11373_v56, %v11373_v56 }
 0x8ba   :  { %v11362_v42 = vrot.slane %v11361_v10, 1  ;;  %v11423_v59 = vunpack.c.l.b16 %v11376_v2 }
 0x8bb   :  { %v11369_v9 = vrot.slane %v11368_v48, 1  ;;  %v11424_v37 = vunpack.c.l.b16 %v11377_v21 }
 0x8bc   :  { %v11363_v23 = vadd.f32 %v11362_v42, %v11361_v10 }
 0x8bd   :  { %v11370_v12 = vadd.f32 %v11369_v9, %v11368_v48 }
 0x8be   :  { %v11374_v18 = vmul.f32 0.0625, %v11363_v23 }
 0x8bf   :  { %v11375_v41 = vmul.f32 0.0625, %v11370_v12 }
 0x8c0   :  { %v11378_v16 = vpack.c.bf16 %v11374_v18, %v11374_v18 }
 0x8c1   :  { %v11379_v46 = vpack.c.bf16 %v11375_v41, %v11375_v41 }
 0x8c2   :  { %v11425_v54 = vunpack.c.l.b16 %v11378_v16 }
 0x8c3   :  { %v11426_v47 = vunpack.c.l.b16 %v11379_v46 }
 0x8c4   :  { %v11428_v55 = vsel %vm11427_vm6, %v11425_v54, %v11423_v59 }
 0x8c5   :  { %v11429_v28 = vsel %vm11427_vm6, %v11426_v47, %v11424_v37  ;;  %v11430_v62 = vpack.c.b16 %v11428_v55, %v11428_v55 }
 0x8c6   :  { %v11431_v7 = vpack.c.b16 %v11429_v28, %v11429_v28 }
 0x8c8   :  { %11562 = vmatprep.mubr.bf16.mxu0 %v11431_v7 }
 0x8c9   :  { %11563 = vmatmul.mubr.bf16.vlgmr.msra.gmra.mrb[32].mxu0 %v11430_v62 }
 0x99c   :  { %v12808_v22 = vpop.f32.mrb[32].mxu0 }
 0x99d   :  { %v12809_v26 = vpop.f32.mrb[33].mxu0 }
 0x99e   :  { %v12810_v58 = vadd.f32 %v12809_v26, %v12808_v22  ;;  %v12811_v63 = vpop.f32.mrb[34].mxu0 }
 0x99f   :  { %v12812_v34 = vpop.f32.mrb[35].mxu0 }
 0x9a0   :  { %v11565_v15 = vadd.f32 %v12810_v58, %v12763_v57 }
 0x9a2   :  { %v11570_v20 = vmul.f32 0.01, %v11565_v15 }
 0x9a4   :  { %11572 = vst.msk [vmem:[#allocation16] sm:$0x3] %vm11571_vm7, %v11570_v20 }
 0x9a5   :  { %14525 = shalt.err (!%p14522_p4)
}
 0x9a6   :  { %s14526_s4 = scalar_lea.hbm %s16094_s9, 32 }
 0x9a7   :  { %p14527_p5 = scmp.ne.s32.totalorder %s16094_s9, %s14526_s4  ;;  %p14530_p6 = scmp.lt.u32.totalorder %s14526_s4, %s16094_s9 }
 0x9a9   :  { %p14532_p7 = pnand %p14530_p6, %p14527_p5 }
 0x9ab   :  { %14535 = shalt.err (!%p14532_p7)
}
 0x9ac   :  { %11582 = dma.vmem_to_hbm [thread:$0]  %s11580_s19, 32, %s16094_s9, [#allocation6]  }
 0x9ad   :  { %14544 = dma.done.wait [#allocation6], 32  }
 0x9ae   :  { %14545 = vsyncadd [#allocation6], 4294967264 }
 0x9af   :  { %11586 = vsyncpa [#allocation5], 1 }
 0x9b0   :  { %11587 = vsyncpa [#allocation8], 1 }
 0x9b1   :  { %11588 = vsyncpa [#allocation11], 1 }
 0x9b2   :  { %11589 = vsyncpa [#allocation14], 1 }
 0x9b3   :  { %11590 = vsyncpa [#allocation6], 1 }

</bundles_post_ra>
